<compile_context>
chip_gen: v6e
topology: v6e:2x2x1
jax: 0.10.0
libtpu: 0.0.40
codegen_flags: <defaults>
</compile_context>

<pallas_src>
import functools
import numpy as np
import jax
import jax.numpy as jnp
from jax.experimental import pallas as pl
from jax.experimental.pallas import tpu as pltpu


# --------------------------- in-kernel math helpers ---------------------------

def _layernorm(x, g, b, eps=1e-5):
    mu = jnp.mean(x, axis=-1, keepdims=True)
    var = jnp.mean((x - mu) ** 2, axis=-1, keepdims=True)
    return (x - mu) * jax.lax.rsqrt(var + eps) * g + b


def _mha(q3, k3, v3, wproj, bproj, n_heads):
    """Batched multi-head attention + single output projection.
    q3: (B, Nq, F); k3, v3: (B, Nk, F); wproj: (F, F); bproj: (1, F).
    Heads via static lane slices + batched einsums; head outputs are concatenated
    and projected ONCE with a full-K matmul (per perf review)."""
    B, Nq, F = q3.shape
    dh = F // n_heads
    scale = 1.0 / float(np.sqrt(dh))
    outs = []
    for h in range(n_heads):
        sl = slice(h * dh, (h + 1) * dh)
        s = jnp.einsum('bqd,bkd->bqk', q3[..., sl], k3[..., sl],
                       preferred_element_type=jnp.float32) * scale
        m = jnp.max(s, axis=-1, keepdims=True)
        p = jnp.exp(s - m)
        p = p * pl.reciprocal(jnp.sum(p, axis=-1, keepdims=True), approx=True)
        outs.append(jnp.einsum('bqk,bkd->bqd', p, v3[..., sl],
                               preferred_element_type=jnp.float32))
    attn = jnp.concatenate(outs, axis=-1).reshape(B * Nq, F)
    return jnp.dot(attn, wproj, preferred_element_type=jnp.float32) + bproj


def _mlp(x, w1, b1, w2, b2):
    h = jax.nn.gelu(jnp.dot(x, w1, preferred_element_type=jnp.float32) + b1)
    return jnp.dot(h, w2, preferred_element_type=jnp.float32) + b2


def _self_block_body(x3, p, n_heads):
    """Pre-LN self-attention transformer block on a (B, N, F) value."""
    B, N, F = x3.shape
    x = x3.reshape(B * N, F)
    h = _layernorm(x, p["ln1_g"], p["ln1_b"])
    qkv = jnp.dot(h, p["wqkv"], preferred_element_type=jnp.float32) + p["bqkv"]
    qkv3 = qkv.reshape(B, N, 3 * F)
    x = x + _mha(qkv3[..., :F], qkv3[..., F:2 * F], qkv3[..., 2 * F:],
                 p["wproj"], p["bproj"], n_heads)
    h2 = _layernorm(x, p["ln2_g"], p["ln2_b"])
    x = x + _mlp(h2, p["w1"], p["b1"], p["w2"], p["b2"])
    return x.reshape(B, N, F)


def _cross_block_body(x3, k3, v3, p, n_heads):
    """Pre-LN cross-attention mixing block on a (B, N, F) value (K/V precomputed)."""
    B, N, F = x3.shape
    x = x3.reshape(B * N, F)
    hq = _layernorm(x, p["lnq_g"], p["lnq_b"])
    q = jnp.dot(hq, p["wq"], preferred_element_type=jnp.float32) + p["bq"]
    x = x + _mha(q.reshape(B, N, F), k3, v3, p["wproj"], p["bproj"], n_heads)
    h2 = _layernorm(x, p["ln2_g"], p["ln2_b"])
    x = x + _mlp(h2, p["w1"], p["b1"], p["w2"], p["b2"])
    return x.reshape(B, N, F)


_SELF_KEYS = ("ln1_g", "ln1_b", "wqkv", "bqkv", "wproj", "bproj",
              "ln2_g", "ln2_b", "w1", "b1", "w2", "b2")
_CROSS_KEYS = ("lnq_g", "lnq_b", "wq", "bq", "wproj", "bproj",
               "ln2_g", "ln2_b", "w1", "b1", "w2", "b2")


# ----------------------------- fused kernels -----------------------------

def _encoder_kernel(patches_ref, pw_ref, pb_ref, pos_ref, acc_ref,
                    ln1_g, ln1_b, wqkv, bqkv, wproj, bproj,
                    ln2_g, ln2_b, w1, b1, w2, b2,
                    o_ref, *, n_heads):
    """ViT encoder stack fused in one kernel; grid axis = layer.
    Layer-0 prologue: patch embed + positional embedding.  Token state lives in the
    resident (constant-index) output block.  Last-layer epilogue adds the running
    sum over context encoders (acc_ref)."""
    l = pl.program_id(0)

    @pl.when(l == 0)
    def _():
        B, N, K = patches_ref.shape
        tok = jnp.dot(patches_ref[...].reshape(B * N, K), pw_ref[...],
                      preferred_element_type=jnp.float32) + pb_ref[...]
        o_ref[...] = tok.reshape(B, N, -1) + pos_ref[...]

    refs = (ln1_g, ln1_b, wqkv, bqkv, wproj, bproj, ln2_g, ln2_b, w1, b1, w2, b2)
    p = {k: r[0] for k, r in zip(_SELF_KEYS, refs)}
    x = _self_block_body(o_ref[...], p, n_heads)
    o_ref[...] = x

    @pl.when(l == pl.num_programs(0) - 1)
    def _():
        o_ref[...] = x + acc_ref[...]          # fused sum over context encoders


def _ctx_kv_kernel(f_ref, lnk_g, lnk_b, wkv, bkv, k_ref, v_ref):
    """Per-mixing-block context K/V (one call for all blocks, hoisted out of the
    diffusion loop; each block is independent -> 'parallel' grid axis)."""
    B, Nk, F = f_ref.shape
    h = _layernorm(f_ref[...].reshape(B * Nk, F), lnk_g[0], lnk_b[0])
    kv = jnp.dot(h, wkv[0], preferred_element_type=jnp.float32) + bkv[0]
    kv = kv.reshape(B, Nk, 2 * F)
    k_ref[0] = kv[..., :F]
    v_ref[0] = kv[..., F:]


def _diffusion_kernel(coef_ref, x0_ref, emb_ref, noise_ref, ctx_k_ref, ctx_v_ref,
                      fw1, fb1, fw2, fb2,
                      lnq_g, lnq_b, wq, bq, wproj, bproj,
                      ln2_g, ln2_b, w1, b1, w2, b2,
                      o_ref, h_ref, *, n_heads):
    """Whole reverse-diffusion loop fused into ONE kernel.
    grid = (n_steps-1, n_mixing_blocks), both 'arbitrary' (sequential chain).
    o_ref = diffusion latent x (resident output block); h_ref = working tokens.
    FiLM prologue at j==0 (gamma/beta from the time embedding via a tiny SiLU MLP),
    folded DDIM epilogue at j==last with scalars read from SMEM."""
    s = pl.program_id(0)
    j = pl.program_id(1)
    F = o_ref.shape[-1]

    @pl.when(jnp.logical_and(s == 0, j == 0))
    def _():
        o_ref[...] = x0_ref[...]               # initial Gaussian latent

    @pl.when(j == 0)
    def _():
        e = emb_ref[0]                                                    # (1, F)
        hfe = jnp.dot(e, fw1[...], preferred_element_type=jnp.float32) + fb1[...]
        hfe = hfe * jax.nn.sigmoid(hfe)                                   # SiLU
        gb = jnp.dot(hfe, fw2[...], preferred_element_type=jnp.float32) + fb2[...]
        gamma, beta = gb[:, :F], gb[:, F:]
        h_ref[...] = o_ref[...] * (1.0 + gamma) + beta                    # FiLM

    refs = (lnq_g, lnq_b, wq, bq, wproj, bproj, ln2_g, ln2_b, w1, b1, w2, b2)
    p = {k: r[0] for k, r in zip(_CROSS_KEYS, refs)}
    h_ref[...] = _cross_block_body(h_ref[...], ctx_k_ref[0], ctx_v_ref[0], p, n_heads)

    @pl.when(j == pl.num_programs(1) - 1)
    def _():
        # folded DDIM: x <- c1*x + (c3 - c1*c2)*eps_pred + sigma*noise
        c1 = coef_ref[s, 0]
        ce = coef_ref[s, 1]
        sg = coef_ref[s, 2]
        o_ref[...] = c1 * o_ref[...] + ce * h_ref[...] + sg * noise_ref[0]


def _decoder_kernel(x0_ref, lnf_g, lnf_b, wout, bout,
                    ln1_g, ln1_b, wqkv, bqkv, wproj, bproj,
                    ln2_g, ln2_b, w1, b1, w2, b2,
                    o_ref, xs_ref, *, n_heads):
    """ViT decoder stack fused in one kernel; grid axis = layer.  Token state lives
    in a VMEM scratch; the (B, N, C*p^3) head output (128-lane dense) is written once
    at the last layer."""
    l = pl.program_id(0)

    @pl.when(l == 0)
    def _():
        xs_ref[...] = x0_ref[...]

    refs = (ln1_g, ln1_b, wqkv, bqkv, wproj, bproj, ln2_g, ln2_b, w1, b1, w2, b2)
    p = {k: r[0] for k, r in zip(_SELF_KEYS, refs)}
    x = _self_block_body(xs_ref[...], p, n_heads)
    xs_ref[...] = x

    @pl.when(l == pl.num_programs(0) - 1)
    def _():
        B, N, F = x.shape
        h = _layernorm(x.reshape(B * N, F), lnf_g[...], lnf_b[...])
        out = jnp.dot(h, wout[...], preferred_element_type=jnp.float32) + bout[...]
        o_ref[...] = out.reshape(B, N, -1)


# ----------------------------- pallas wrappers -----------------------------

def _const_block(shape):
    shape = tuple(shape)
    return pl.BlockSpec(shape, lambda *_: (0,) * len(shape))


def _const_spec(a):
    return _const_block(a.shape)


def _stacked_spec(a, index_of):
    """Selects slice grid_idx[index_of] along the leading (stacked) axis of `a`."""
    tail = tuple(a.shape[1:])
    return pl.BlockSpec((1,) + tail,
                        lambda *idx: (idx[index_of],) + (0,) * len(tail))


def encoder_stack(patches, acc, enc_p, n_heads):
    B, N, _ = patches.shape
    F = enc_p["patch_w"].shape[1]
    n_layers = enc_p["blocks"]["wqkv"].shape[0]
    stacked = [enc_p["blocks"][k] for k in _SELF_KEYS]
    operands = [patches, enc_p["patch_w"], enc_p["patch_b"], enc_p["pos"], acc] + stacked
    in_specs = ([_const_spec(patches), _const_spec(enc_p["patch_w"]),
                 _const_spec(enc_p["patch_b"]), _const_spec(enc_p["pos"]),
                 _const_spec(acc)]
                + [_stacked_spec(a, 0) for a in stacked])
    return pl.pallas_call(
        functools.partial(_encoder_kernel, n_heads=n_heads),
        out_shape=jax.ShapeDtypeStruct((B, N, F), jnp.float32),
        grid=(n_layers,),
        in_specs=in_specs,
        out_specs=_const_block((B, N, F)),
        compiler_params=pltpu.CompilerParams(dimension_semantics=("arbitrary",)),
    )(*operands)


def context_kv(feats, mix_p):
    B, Nk, F = feats.shape
    n_mix = mix_p["wkv"].shape[0]
    stacked = [mix_p[k] for k in ("lnk_g", "lnk_b", "wkv", "bkv")]
    kv_spec = pl.BlockSpec((1, B, Nk, F), lambda j: (j, 0, 0, 0))
    return pl.pallas_call(
        _ctx_kv_kernel,
        out_shape=(jax.ShapeDtypeStruct((n_mix, B, Nk, F), jnp.float32),
                   jax.ShapeDtypeStruct((n_mix, B, Nk, F), jnp.float32)),
        grid=(n_mix,),
        in_specs=[_const_spec(feats)] + [_stacked_spec(a, 0) for a in stacked],
        out_specs=(kv_spec, kv_spec),
        compiler_params=pltpu.CompilerParams(dimension_semantics=("parallel",)),
    )(feats, *stacked)


def diffusion_loop(x0, ctx_k, ctx_v, emb_rev, noise_rev, coefs_rev,
                   film_p, mix_p, n_heads):
    B, N, F = x0.shape
    S = noise_rev.shape[0]
    n_mix, _, Nk, _ = ctx_k.shape
    stacked = [mix_p[k] for k in _CROSS_KEYS]
    film = [film_p["w1"], film_p["b1"], film_p["w2"], film_p["b2"]]
    in_specs = ([pl.BlockSpec(memory_space=pltpu.MemorySpace.SMEM),        # DDIM coefs
                 _const_spec(x0),
                 pl.BlockSpec((1, 1, F), lambda s, j: (s, 0, 0)),          # time emb[s]
                 pl.BlockSpec((1, B, N, F), lambda s, j: (s, 0, 0, 0)),    # noise[s]
                 pl.BlockSpec((1, B, Nk, F), lambda s, j: (j, 0, 0, 0)),   # ctx K[j]
                 pl.BlockSpec((1, B, Nk, F), lambda s, j: (j, 0, 0, 0))]   # ctx V[j]
                + [_const_spec(a) for a in film]
                + [_stacked_spec(a, 1) for a in stacked])
    return pl.pallas_call(
        functools.partial(_diffusion_kernel, n_heads=n_heads),
        out_shape=jax.ShapeDtypeStruct((B, N, F), jnp.float32),
        grid=(S, n_mix),
        in_specs=in_specs,
        out_specs=_const_block((B, N, F)),
        scratch_shapes=[pltpu.VMEM((B, N, F), jnp.float32)],
        compiler_params=pltpu.CompilerParams(
            dimension_semantics=("arbitrary", "arbitrary")),
    )(coefs_rev, x0, emb_rev, noise_rev, ctx_k, ctx_v, *film, *stacked)


def decoder_stack(tokens, dec_p, n_heads):
    B, N, F = tokens.shape
    Co = dec_p["out_w"].shape[1]
    n_layers = dec_p["blocks"]["wqkv"].shape[0]
    stacked = [dec_p["blocks"][k] for k in _SELF_KEYS]
    consts = [dec_p["ln_g"], dec_p["ln_b"], dec_p["out_w"], dec_p["out_b"]]
    return pl.pallas_call(
        functools.partial(_decoder_kernel, n_heads=n_heads),
        out_shape=jax.ShapeDtypeStruct((B, N, Co), jnp.float32),
        grid=(n_layers,),
        in_specs=([_const_spec(tokens)] + [_const_spec(a) for a in consts]
                  + [_stacked_spec(a, 0) for a in stacked]),
        out_specs=_const_block((B, N, Co)),
        scratch_shapes=[pltpu.VMEM((B, N, F), jnp.float32)],
        compiler_params=pltpu.CompilerParams(dimension_semantics=("arbitrary",)),
    )(tokens, *consts, *stacked)


# ----------------------------- glue (plain JAX, layout plumbing only) -----------------------------

def patchify(x, p):
    B, C, D, H, W = x.shape
    Pd, Ph, Pw = D // p, H // p, W // p
    x = x.reshape(B, C, Pd, p, Ph, p, Pw, p)
    x = x.transpose(0, 2, 4, 6, 1, 3, 5, 7)
    return x.reshape(B, Pd * Ph * Pw, C * p ** 3)


def unpatchify(h, C, p, grid):
    B, N, _ = h.shape
    Pd, Ph, Pw = grid
    x = h.reshape(B, Pd, Ph, Pw, C, p, p, p)
    x = x.transpose(0, 4, 1, 5, 2, 6, 3, 7)
    return x.reshape(B, C, Pd * p, Ph * p, Pw * p)


def diffvit_forward(params, contexts, key, cfg):
    n_heads = cfg["n_heads"]
    patch = cfg["patch"]
    F = cfg["n_features"]
    n_steps = cfg["n_steps"]

    # --- context encoders: one fused pallas_call each, sum fused into the epilogue
    feats = None
    B = contexts[0].shape[0]
    for enc_p, y in zip(params["context_encoders"], contexts):
        patches = patchify(y, patch)
        _, N, _ = patches.shape
        acc = feats if feats is not None else jnp.zeros((B, N, F), jnp.float32)
        feats = encoder_stack(patches, acc, enc_p, n_heads)
    B, N, _ = feats.shape

    # --- per-mixing-block context K/V: one call, hoisted out of the diffusion loop
    ctx_k, ctx_v = context_kv(feats, params["mixing_blocks"])

    # --- reverse-ordered per-step tables (constants folded at trace time)
    ts = np.arange(n_steps - 1, 0, -1)                       # t = n_steps-1 .. 1
    half = F // 2
    freqs = np.exp(-np.log(10000.0) * np.arange(half, dtype=np.float32) / half)
    ang = ts.astype(np.float32)[:, None] * freqs[None, :]
    emb_rev = jnp.asarray(np.concatenate([np.sin(ang), np.cos(ang)], -1)
                          .astype(np.float32)).reshape(n_steps - 1, 1, F)
    coefs_rev = jnp.asarray(cfg["ddim_coefs"][ts])           # (S, 3) -> SMEM

    key, k0, kn = jax.random.split(key, 3)
    x0 = jax.random.normal(k0, (B, N, F), jnp.float32)
    noise_rev = jax.random.normal(kn, (n_steps - 1, B, N, F), jnp.float32)

    # --- the whole reverse diffusion loop: ONE pallas_call
    lat = diffusion_loop(x0, ctx_k, ctx_v, emb_rev, noise_rev, coefs_rev,
                         params["film"], params["mixing_blocks"], n_heads)

    # --- decoder stack: one pallas_call, then unpatchify
    h = decoder_stack(lat, params["decoder"], n_heads)
    return unpatchify(h, cfg["in_channels"], patch, cfg["grid"])


# ----------------------------- parameter init -----------------------------

class KeyGen:
    def __init__(self, seed):
        self.key = jax.random.PRNGKey(seed)

    def __call__(self):
        self.key, sub = jax.random.split(self.key)
        return sub


def init_linear(kg, k_in, k_out, std=None):
    if std is None:
        std = 1.0 / np.sqrt(k_in)
    return (jax.random.normal(kg(), (k_in, k_out), jnp.float32) * std,
            jnp.zeros((1, k_out), jnp.float32))


def _init_self_block(kg, F):
    wqkv, bqkv = init_linear(kg, F, 3 * F)
    wproj, bproj = init_linear(kg, F, F)
    w1, b1 = init_linear(kg, F, 4 * F)
    w2, b2 = init_linear(kg, 4 * F, F)
    return {"ln1_g": jnp.ones((1, F), jnp.float32), "ln1_b": jnp.zeros((1, F), jnp.float32),
            "wqkv": wqkv, "bqkv": bqkv, "wproj": wproj, "bproj": bproj,
            "ln2_g": jnp.ones((1, F), jnp.float32), "ln2_b": jnp.zeros((1, F), jnp.float32),
            "w1": w1, "b1": b1, "w2": w2, "b2": b2}


def _init_cross_block(kg, F):
    wq, bq = init_linear(kg, F, F)
    wkv, bkv = init_linear(kg, F, 2 * F)
    wproj, bproj = init_linear(kg, F, F)
    w1, b1 = init_linear(kg, F, 4 * F)
    w2, b2 = init_linear(kg, 4 * F, F)
    return {"lnq_g": jnp.ones((1, F), jnp.float32), "lnq_b": jnp.zeros((1, F), jnp.float32),
            "lnk_g": jnp.ones((1, F), jnp.float32), "lnk_b": jnp.zeros((1, F), jnp.float32),
            "wq": wq, "bq": bq, "wkv": wkv, "bkv": bkv,
            "wproj": wproj, "bproj": bproj,
            "ln2_g": jnp.ones((1, F), jnp.float32), "ln2_b": jnp.zeros((1, F), jnp.float32),
            "w1": w1, "b1": b1, "w2": w2, "b2": b2}


def _stack_blocks(blocks):
    return jax.tree_util.tree_map(lambda *xs: jnp.stack(xs, 0), *blocks)


def init_encoder(kg, C, F, patch, N, n_layers):
    fan_in = C * patch ** 3
    std = 0.5 * np.sqrt(2.0 / fan_in)          # kaiming_normal_(fan_in, relu) * 0.5
    return {"patch_w": jax.random.normal(kg(), (fan_in, F), jnp.float32) * std,
            "patch_b": jnp.zeros((1, F), jnp.float32),
            "pos": jax.random.normal(kg(), (1, N, F), jnp.float32) * 0.02,
            "blocks": _stack_blocks([_init_self_block(kg, F) for _ in range(n_layers)])}


def init_decoder(kg, F, C, patch, n_layers):
    out_w, out_b = init_linear(kg, F, C * patch ** 3)
    return {"blocks": _stack_blocks([_init_self_block(kg, F) for _ in range(n_layers)]),
            "ln_g": jnp.ones((1, F), jnp.float32), "ln_b": jnp.zeros((1, F), jnp.float32),
            "out_w": out_w, "out_b": out_b}


def init_diffvit(seed, cfg, patch, N):
    kg = KeyGen(seed)
    F = cfg["n_features"]
    fw1, fb1 = init_linear(kg, F, F)
    fw2, fb2 = init_linear(kg, F, 2 * F)
    return {
        "film": {"w1": fw1, "b1": fb1, "w2": fw2, "b2": fb2},
        "context_encoders": [init_encoder(kg, c, F, patch, N, cfg["n_layers"])
                             for c in cfg["n_cross_channels_list"]],
        "mixing_blocks": _stack_blocks([_init_cross_block(kg, F)
                                        for _ in range(cfg["n_mixing_blocks"])]),
        "decoder": init_decoder(kg, F, cfg["in_channels"], patch, cfg["n_layers"]),
    }


# ----------------------------- main -----------------------------

if __name__ == "__main__":
    cfg = {
        "in_channels": 2,
        "n_cross_channels_list": [3, 2],
        "shape": (8, 8, 8),
        "ratio_shape_patch": 2,       # patch = shape // ratio = 4
        "n_features": 32,
        "n_heads": 4,
        "n_layers": 2,
        "n_mixing_blocks": 2,
        "n_steps": 4,
        "eta": 0.1,
    }
    patch = cfg["shape"][0] // cfg["ratio_shape_patch"]
    grid = tuple(s // patch for s in cfg["shape"])
    N = grid[0] * grid[1] * grid[2]
    cfg["patch"] = patch
    cfg["grid"] = grid

    # diffusion schedule (matches the PyTorch buffer)
    a_max, a_min = 0.9, 0.01
    alpha = (a_min / a_max) ** (1.0 / cfg["n_steps"])
    ac = np.array([a_max * alpha ** i for i in range(cfg["n_steps"])], dtype=np.float32)

    # precomputed + folded DDIM coefficients: x' = c1*x + (c3 - c1*c2)*eps + sigma*noise
    coefs = np.zeros((cfg["n_steps"], 3), np.float32)
    for t in range(1, cfg["n_steps"]):
        a_t, a_t1 = float(ac[t]), float(ac[t - 1])
        sigma = cfg["eta"] * np.sqrt((1.0 - a_t / a_t1) * (1.0 - a_t) / (1.0 - a_t1))
        c1 = np.sqrt(a_t1 / a_t)
        c2 = np.sqrt(1.0 - a_t)
        c3 = np.sqrt(1.0 - a_t1 - sigma ** 2)
        coefs[t] = [c1, c3 - c1 * c2, sigma]
    cfg["ddim_coefs"] = coefs                                   # numpy -> folded at trace

    params = init_diffvit(1234, cfg, patch, N)

    key = jax.random.PRNGKey(0)
    kc0, kc1, kfwd = jax.random.split(key, 3)
    B = 2
    ctx0 = jax.random.normal(kc0, (B, cfg["n_cross_channels_list"][0], *cfg["shape"]),
                             jnp.float32)
    ctx1 = jax.random.normal(kc1, (B, cfg["n_cross_channels_list"][1], *cfg["shape"]),
                             jnp.float32)

    fwd = jax.jit(lambda p, ctxs, k: diffvit_forward(p, ctxs, k, cfg))
    out = fwd(params, (ctx0, ctx1), kfwd)
    jax.block_until_ready(out)
    assert out.shape == (B, cfg["in_channels"], *cfg["shape"]), out.shape
    print("KERNEL_OK")
</pallas_src>

<mosaic_0001>
module attributes {stable_mosaic.version = 11 : i64} {
  func.func @_encoder_kernel(%arg0: i32, %arg1: memref<2x8x192xf32, #tpu.memory_space<vmem>>, %arg2: memref<192x32xf32, #tpu.memory_space<vmem>>, %arg3: memref<1x32xf32, #tpu.memory_space<vmem>>, %arg4: memref<1x8x32xf32, #tpu.memory_space<vmem>>, %arg5: memref<2x8x32xf32, #tpu.memory_space<vmem>>, %arg6: memref<1x1x32xf32, #tpu.memory_space<vmem>>, %arg7: memref<1x1x32xf32, #tpu.memory_space<vmem>>, %arg8: memref<1x32x96xf32, #tpu.memory_space<vmem>>, %arg9: memref<1x1x96xf32, #tpu.memory_space<vmem>>, %arg10: memref<1x32x32xf32, #tpu.memory_space<vmem>>, %arg11: memref<1x1x32xf32, #tpu.memory_space<vmem>>, %arg12: memref<1x1x32xf32, #tpu.memory_space<vmem>>, %arg13: memref<1x1x32xf32, #tpu.memory_space<vmem>>, %arg14: memref<1x32x128xf32, #tpu.memory_space<vmem>>, %arg15: memref<1x1x128xf32, #tpu.memory_space<vmem>>, %arg16: memref<1x128x32xf32, #tpu.memory_space<vmem>>, %arg17: memref<1x1x32xf32, #tpu.memory_space<vmem>>, %arg18: memref<2x8x32xf32, #tpu.memory_space<vmem>>) attributes {dimension_semantics = [#tpu.dimension_semantics<arbitrary>], iteration_bounds = array<i64: 2>, scalar_prefetch = 0 : i64, scratch_operands = 0 : i64, tpu.core_type = #tpu.core_type<tc>, window_params = [{pipeline_mode = #tpu.pipeline_mode<synchronous>, transform_indices = @transform_0, window_bounds = array<i64: 2, 8, 192>}, {pipeline_mode = #tpu.pipeline_mode<synchronous>, transform_indices = @transform_1, window_bounds = array<i64: 192, 32>}, {pipeline_mode = #tpu.pipeline_mode<synchronous>, transform_indices = @transform_2, window_bounds = array<i64: 1, 32>}, {pipeline_mode = #tpu.pipeline_mode<synchronous>, transform_indices = @transform_3, window_bounds = array<i64: 1, 8, 32>}, {pipeline_mode = #tpu.pipeline_mode<synchronous>, transform_indices = @transform_4, window_bounds = array<i64: 2, 8, 32>}, {transform_indices = @transform_5, window_bounds = array<i64: 1, 1, 32>}, {transform_indices = @transform_6, window_bounds = array<i64: 1, 1, 32>}, {transform_indices = @transform_7, window_bounds = array<i64: 1, 32, 96>}, {transform_indices = @transform_8, window_bounds = array<i64: 1, 1, 96>}, {transform_indices = @transform_9, window_bounds = array<i64: 1, 32, 32>}, {transform_indices = @transform_10, window_bounds = array<i64: 1, 1, 32>}, {transform_indices = @transform_11, window_bounds = array<i64: 1, 1, 32>}, {transform_indices = @transform_12, window_bounds = array<i64: 1, 1, 32>}, {transform_indices = @transform_13, window_bounds = array<i64: 1, 32, 128>}, {transform_indices = @transform_14, window_bounds = array<i64: 1, 1, 128>}, {transform_indices = @transform_15, window_bounds = array<i64: 1, 128, 32>}, {transform_indices = @transform_16, window_bounds = array<i64: 1, 1, 32>}, {pipeline_mode = #tpu.pipeline_mode<synchronous>, transform_indices = @transform_17, window_bounds = array<i64: 2, 8, 32>}]} {
    %c0_i32 = arith.constant 0 : i32
    %0 = arith.cmpi eq, %arg0, %c0_i32 : i32
    %1 = arith.extui %0 : i1 to i32
    %c0_i32_0 = arith.constant 0 : i32
    %2 = arith.cmpi ne, %1, %c0_i32_0 : i32
    scf.if %2 {
      %c0_80 = arith.constant 0 : index
      %c0_81 = arith.constant 0 : index
      %c0_82 = arith.constant 0 : index
      %179 = vector.load %arg1[%c0_80, %c0_81, %c0_82] : memref<2x8x192xf32, #tpu.memory_space<vmem>>, vector<2x8x192xf32>
      %180 = vector.shape_cast %179 : vector<2x8x192xf32> to vector<16x192xf32>
      %c0_83 = arith.constant 0 : index
      %c0_84 = arith.constant 0 : index
      %181 = vector.load %arg2[%c0_83, %c0_84] : memref<192x32xf32, #tpu.memory_space<vmem>>, vector<192x32xf32>
      %cst_85 = arith.constant dense<0.000000e+00> : vector<16x32xf32>
      %182 = tpu.matmul %180, %181, %cst_85 {dimension_numbers = #tpu.dot_dimension_numbers<[1], [0], [0], [1], [0, 0, 1, 1], [], []>} : vector<16x192xf32>, vector<192x32xf32>, vector<16x32xf32> -> vector<16x32xf32>
      %c0_86 = arith.constant 0 : index
      %c0_87 = arith.constant 0 : index
      %183 = vector.load %arg3[%c0_86, %c0_87] : memref<1x32xf32, #tpu.memory_space<vmem>>, vector<1x32xf32>
      %184 = vector.broadcast %183 : vector<1x32xf32> to vector<16x32xf32>
      %185 = arith.addf %182, %184 : vector<16x32xf32>
      %186 = vector.shape_cast %185 : vector<16x32xf32> to vector<2x8x32xf32>
      %c0_88 = arith.constant 0 : index
      %c0_89 = arith.constant 0 : index
      %c0_90 = arith.constant 0 : index
      %187 = vector.load %arg4[%c0_88, %c0_89, %c0_90] : memref<1x8x32xf32, #tpu.memory_space<vmem>>, vector<1x8x32xf32>
      %188 = vector.broadcast %187 : vector<1x8x32xf32> to vector<2x8x32xf32>
      %189 = arith.addf %186, %188 : vector<2x8x32xf32>
      %c0_91 = arith.constant 0 : index
      %c0_92 = arith.constant 0 : index
      %c0_93 = arith.constant 0 : index
      %190 = vector.load %arg18[%c0_91, %c0_92, %c0_93] : memref<2x8x32xf32, #tpu.memory_space<vmem>>, vector<2x8x32xf32>
      tpu.vector_store %arg18[%c0_91, %c0_92, %c0_93], %189 {strides = array<i32>} : memref<2x8x32xf32, #tpu.memory_space<vmem>>, vector<2x8x32xf32>,
    } else {
    }
    %c0 = arith.constant 0 : index
    %c0_1 = arith.constant 0 : index
    %c0_2 = arith.constant 0 : index
    %3 = vector.load %arg6[%c0, %c0_1, %c0_2] : memref<1x1x32xf32, #tpu.memory_space<vmem>>, vector<1x1x32xf32>
    %4 = vector.shape_cast %3 : vector<1x1x32xf32> to vector<1x32xf32>
    %c0_3 = arith.constant 0 : index
    %c0_4 = arith.constant 0 : index
    %c0_5 = arith.constant 0 : index
    %5 = vector.load %arg7[%c0_3, %c0_4, %c0_5] : memref<1x1x32xf32, #tpu.memory_space<vmem>>, vector<1x1x32xf32>
    %6 = vector.shape_cast %5 : vector<1x1x32xf32> to vector<1x32xf32>
    %c0_6 = arith.constant 0 : index
    %c0_7 = arith.constant 0 : index
    %c0_8 = arith.constant 0 : index
    %7 = vector.load %arg8[%c0_6, %c0_7, %c0_8] : memref<1x32x96xf32, #tpu.memory_space<vmem>>, vector<1x32x96xf32>
    %8 = vector.shape_cast %7 : vector<1x32x96xf32> to vector<32x96xf32>
    %c0_9 = arith.constant 0 : index
    %c0_10 = arith.constant 0 : index
    %c0_11 = arith.constant 0 : index
    %9 = vector.load %arg9[%c0_9, %c0_10, %c0_11] : memref<1x1x96xf32, #tpu.memory_space<vmem>>, vector<1x1x96xf32>
    %10 = vector.shape_cast %9 : vector<1x1x96xf32> to vector<1x96xf32>
    %c0_12 = arith.constant 0 : index
    %c0_13 = arith.constant 0 : index
    %c0_14 = arith.constant 0 : index
    %11 = vector.load %arg10[%c0_12, %c0_13, %c0_14] : memref<1x32x32xf32, #tpu.memory_space<vmem>>, vector<1x32x32xf32>
    %12 = vector.shape_cast %11 : vector<1x32x32xf32> to vector<32x32xf32>
    %c0_15 = arith.constant 0 : index
    %c0_16 = arith.constant 0 : index
    %c0_17 = arith.constant 0 : index
    %13 = vector.load %arg11[%c0_15, %c0_16, %c0_17] : memref<1x1x32xf32, #tpu.memory_space<vmem>>, vector<1x1x32xf32>
    %14 = vector.shape_cast %13 : vector<1x1x32xf32> to vector<1x32xf32>
    %c0_18 = arith.constant 0 : index
    %c0_19 = arith.constant 0 : index
    %c0_20 = arith.constant 0 : index
    %15 = vector.load %arg12[%c0_18, %c0_19, %c0_20] : memref<1x1x32xf32, #tpu.memory_space<vmem>>, vector<1x1x32xf32>
    %16 = vector.shape_cast %15 : vector<1x1x32xf32> to vector<1x32xf32>
    %c0_21 = arith.constant 0 : index
    %c0_22 = arith.constant 0 : index
    %c0_23 = arith.constant 0 : index
    %17 = vector.load %arg13[%c0_21, %c0_22, %c0_23] : memref<1x1x32xf32, #tpu.memory_space<vmem>>, vector<1x1x32xf32>
    %18 = vector.shape_cast %17 : vector<1x1x32xf32> to vector<1x32xf32>
    %c0_24 = arith.constant 0 : index
    %c0_25 = arith.constant 0 : index
    %c0_26 = arith.constant 0 : index
    %19 = vector.load %arg14[%c0_24, %c0_25, %c0_26] : memref<1x32x128xf32, #tpu.memory_space<vmem>>, vector<1x32x128xf32>
    %20 = vector.shape_cast %19 : vector<1x32x128xf32> to vector<32x128xf32>
    %c0_27 = arith.constant 0 : index
    %c0_28 = arith.constant 0 : index
    %c0_29 = arith.constant 0 : index
    %21 = vector.load %arg15[%c0_27, %c0_28, %c0_29] : memref<1x1x128xf32, #tpu.memory_space<vmem>>, vector<1x1x128xf32>
    %22 = vector.shape_cast %21 : vector<1x1x128xf32> to vector<1x128xf32>
    %c0_30 = arith.constant 0 : index
    %c0_31 = arith.constant 0 : index
    %c0_32 = arith.constant 0 : index
    %23 = vector.load %arg16[%c0_30, %c0_31, %c0_32] : memref<1x128x32xf32, #tpu.memory_space<vmem>>, vector<1x128x32xf32>
    %24 = vector.shape_cast %23 : vector<1x128x32xf32> to vector<128x32xf32>
    %c0_33 = arith.constant 0 : index
    %c0_34 = arith.constant 0 : index
    %c0_35 = arith.constant 0 : index
    %25 = vector.load %arg17[%c0_33, %c0_34, %c0_35] : memref<1x1x32xf32, #tpu.memory_space<vmem>>, vector<1x1x32xf32>
    %26 = vector.shape_cast %25 : vector<1x1x32xf32> to vector<1x32xf32>
    %c0_36 = arith.constant 0 : index
    %c0_37 = arith.constant 0 : index
    %c0_38 = arith.constant 0 : index
    %27 = vector.load %arg18[%c0_36, %c0_37, %c0_38] : memref<2x8x32xf32, #tpu.memory_space<vmem>>, vector<2x8x32xf32>
    %28 = vector.shape_cast %27 : vector<2x8x32xf32> to vector<16x32xf32>
    %cst = arith.constant dense<0.000000e+00> : vector<16xf32>
    %29 = vector.multi_reduction <add>, %28, %cst [1] : vector<16x32xf32> to vector<16xf32>
    %30 = vector.shape_cast %29 : vector<16xf32> to vector<16x1xf32>
    %cst_39 = arith.constant 3.200000e+01 : f32
    %31 = vector.broadcast %cst_39 : f32 to vector<16x1xf32>
    %32 = arith.divf %30, %31 : vector<16x1xf32>
    %33 = vector.broadcast %32 : vector<16x1xf32> to vector<16x32xf32>
    %34 = arith.subf %28, %33 : vector<16x32xf32>
    %35 = arith.mulf %34, %34 : vector<16x32xf32>
    %cst_40 = arith.constant dense<0.000000e+00> : vector<16xf32>
    %36 = vector.multi_reduction <add>, %35, %cst_40 [1] : vector<16x32xf32> to vector<16xf32>
    %37 = vector.shape_cast %36 : vector<16xf32> to vector<16x1xf32>
    %cst_41 = arith.constant 3.200000e+01 : f32
    %38 = vector.broadcast %cst_41 : f32 to vector<16x1xf32>
    %39 = arith.divf %37, %38 : vector<16x1xf32>
    %40 = vector.broadcast %32 : vector<16x1xf32> to vector<16x32xf32>
    %41 = arith.subf %28, %40 : vector<16x32xf32>
    %cst_42 = arith.constant 9.99999974E-6 : f32
    %42 = vector.broadcast %cst_42 : f32 to vector<16x1xf32>
    %43 = arith.addf %39, %42 : vector<16x1xf32>
    %44 = math.rsqrt %43 : vector<16x1xf32>
    %45 = vector.broadcast %44 : vector<16x1xf32> to vector<16x32xf32>
    %46 = arith.mulf %41, %45 : vector<16x32xf32>
    %47 = vector.broadcast %4 : vector<1x32xf32> to vector<16x32xf32>
    %48 = arith.mulf %46, %47 : vector<16x32xf32>
    %49 = vector.broadcast %6 : vector<1x32xf32> to vector<16x32xf32>
    %50 = arith.addf %48, %49 : vector<16x32xf32>
    %cst_43 = arith.constant dense<0.000000e+00> : vector<16x96xf32>
    %51 = tpu.matmul %50, %8, %cst_43 {dimension_numbers = #tpu.dot_dimension_numbers<[1], [0], [0], [1], [0, 0, 1, 1], [], []>} : vector<16x32xf32>, vector<32x96xf32>, vector<16x96xf32> -> vector<16x96xf32>
    %52 = vector.broadcast %10 : vector<1x96xf32> to vector<16x96xf32>
    %53 = arith.addf %51, %52 : vector<16x96xf32>
    %54 = vector.shape_cast %53 : vector<16x96xf32> to vector<2x8x96xf32>
    %55 = vector.extract_strided_slice %54 {offsets = [0, 0, 0], sizes = [2, 8, 32], strides = [1, 1, 1]} : vector<2x8x96xf32> to vector<2x8x32xf32>
    %56 = vector.extract_strided_slice %54 {offsets = [0, 0, 32], sizes = [2, 8, 32], strides = [1, 1, 1]} : vector<2x8x96xf32> to vector<2x8x32xf32>
    %57 = vector.extract_strided_slice %54 {offsets = [0, 0, 64], sizes = [2, 8, 32], strides = [1, 1, 1]} : vector<2x8x96xf32> to vector<2x8x32xf32>
    %58 = vector.extract_strided_slice %55 {offsets = [0, 0, 0], sizes = [2, 8, 8], strides = [1, 1, 1]} : vector<2x8x32xf32> to vector<2x8x8xf32>
    %59 = vector.extract_strided_slice %56 {offsets = [0, 0, 0], sizes = [2, 8, 8], strides = [1, 1, 1]} : vector<2x8x32xf32> to vector<2x8x8xf32>
    "tpu.trace_start"() <{level = 10 : i32, message = "bqd,bkd->bqk"}> : () -> ()
    %cst_44 = arith.constant dense<0.000000e+00> : vector<2x8x8xf32>
    %60 = tpu.matmul %58, %59, %cst_44 {dimension_numbers = #tpu.dot_dimension_numbers<[2], [2], [1], [1], [0, 0, 0, 1, 1, 1], [0], [0]>} : vector<2x8x8xf32>, vector<2x8x8xf32>, vector<2x8x8xf32> -> vector<2x8x8xf32>
    "tpu.trace_stop"() : () -> ()
    %cst_45 = arith.constant 0.353553385 : f32
    %61 = vector.broadcast %cst_45 : f32 to vector<2x8x8xf32>
    %62 = arith.mulf %60, %61 : vector<2x8x8xf32>
    %cst_46 = arith.constant dense<0xFF800000> : vector<2x8xf32>
    %63 = vector.multi_reduction <maximumf>, %62, %cst_46 [2] : vector<2x8x8xf32> to vector<2x8xf32>
    %64 = vector.shape_cast %63 : vector<2x8xf32> to vector<2x8x1xf32>
    %65 = vector.broadcast %64 : vector<2x8x1xf32> to vector<2x8x8xf32>
    %66 = arith.subf %62, %65 : vector<2x8x8xf32>
    %67 = math.exp %66 : vector<2x8x8xf32>
    %cst_47 = arith.constant dense<0.000000e+00> : vector<2x8xf32>
    %68 = vector.multi_reduction <add>, %67, %cst_47 [2] : vector<2x8x8xf32> to vector<2x8xf32>
    %69 = vector.shape_cast %68 : vector<2x8xf32> to vector<2x8x1xf32>
    %70 = tpu.reciprocal %69 {approx = true} : vector<2x8x1xf32> -> vector<2x8x1xf32>
    %71 = vector.broadcast %70 : vector<2x8x1xf32> to vector<2x8x8xf32>
    %72 = arith.mulf %67, %71 : vector<2x8x8xf32>
    %73 = vector.extract_strided_slice %57 {offsets = [0, 0, 0], sizes = [2, 8, 8], strides = [1, 1, 1]} : vector<2x8x32xf32> to vector<2x8x8xf32>
    "tpu.trace_start"() <{level = 10 : i32, message = "bqk,bkd->bqd"}> : () -> ()
    %cst_48 = arith.constant dense<0.000000e+00> : vector<2x8x8xf32>
    %74 = tpu.matmul %72, %73, %cst_48 {dimension_numbers = #tpu.dot_dimension_numbers<[2], [1], [1], [2], [0, 0, 0, 1, 1, 2], [0], [0]>} : vector<2x8x8xf32>, vector<2x8x8xf32>, vector<2x8x8xf32> -> vector<2x8x8xf32>
    "tpu.trace_stop"() : () -> ()
    %75 = vector.extract_strided_slice %55 {offsets = [0, 0, 8], sizes = [2, 8, 8], strides = [1, 1, 1]} : vector<2x8x32xf32> to vector<2x8x8xf32>
    %76 = vector.extract_strided_slice %56 {offsets = [0, 0, 8], sizes = [2, 8, 8], strides = [1, 1, 1]} : vector<2x8x32xf32> to vector<2x8x8xf32>
    "tpu.trace_start"() <{level = 10 : i32, message = "bqd,bkd->bqk"}> : () -> ()
    %cst_49 = arith.constant dense<0.000000e+00> : vector<2x8x8xf32>
    %77 = tpu.matmul %75, %76, %cst_49 {dimension_numbers = #tpu.dot_dimension_numbers<[2], [2], [1], [1], [0, 0, 0, 1, 1, 1], [0], [0]>} : vector<2x8x8xf32>, vector<2x8x8xf32>, vector<2x8x8xf32> -> vector<2x8x8xf32>
    "tpu.trace_stop"() : () -> ()
    %cst_50 = arith.constant 0.353553385 : f32
    %78 = vector.broadcast %cst_50 : f32 to vector<2x8x8xf32>
    %79 = arith.mulf %77, %78 : vector<2x8x8xf32>
    %cst_51 = arith.constant dense<0xFF800000> : vector<2x8xf32>
    %80 = vector.multi_reduction <maximumf>, %79, %cst_51 [2] : vector<2x8x8xf32> to vector<2x8xf32>
    %81 = vector.shape_cast %80 : vector<2x8xf32> to vector<2x8x1xf32>
    %82 = vector.broadcast %81 : vector<2x8x1xf32> to vector<2x8x8xf32>
    %83 = arith.subf %79, %82 : vector<2x8x8xf32>
    %84 = math.exp %83 : vector<2x8x8xf32>
    %cst_52 = arith.constant dense<0.000000e+00> : vector<2x8xf32>
    %85 = vector.multi_reduction <add>, %84, %cst_52 [2] : vector<2x8x8xf32> to vector<2x8xf32>
    %86 = vector.shape_cast %85 : vector<2x8xf32> to vector<2x8x1xf32>
    %87 = tpu.reciprocal %86 {approx = true} : vector<2x8x1xf32> -> vector<2x8x1xf32>
    %88 = vector.broadcast %87 : vector<2x8x1xf32> to vector<2x8x8xf32>
    %89 = arith.mulf %84, %88 : vector<2x8x8xf32>
    %90 = vector.extract_strided_slice %57 {offsets = [0, 0, 8], sizes = [2, 8, 8], strides = [1, 1, 1]} : vector<2x8x32xf32> to vector<2x8x8xf32>
    "tpu.trace_start"() <{level = 10 : i32, message = "bqk,bkd->bqd"}> : () -> ()
    %cst_53 = arith.constant dense<0.000000e+00> : vector<2x8x8xf32>
    %91 = tpu.matmul %89, %90, %cst_53 {dimension_numbers = #tpu.dot_dimension_numbers<[2], [1], [1], [2], [0, 0, 0, 1, 1, 2], [0], [0]>} : vector<2x8x8xf32>, vector<2x8x8xf32>, vector<2x8x8xf32> -> vector<2x8x8xf32>
    "tpu.trace_stop"() : () -> ()
    %92 = vector.extract_strided_slice %55 {offsets = [0, 0, 16], sizes = [2, 8, 8], strides = [1, 1, 1]} : vector<2x8x32xf32> to vector<2x8x8xf32>
    %93 = vector.extract_strided_slice %56 {offsets = [0, 0, 16], sizes = [2, 8, 8], strides = [1, 1, 1]} : vector<2x8x32xf32> to vector<2x8x8xf32>
    "tpu.trace_start"() <{level = 10 : i32, message = "bqd,bkd->bqk"}> : () -> ()
    %cst_54 = arith.constant dense<0.000000e+00> : vector<2x8x8xf32>
    %94 = tpu.matmul %92, %93, %cst_54 {dimension_numbers = #tpu.dot_dimension_numbers<[2], [2], [1], [1], [0, 0, 0, 1, 1, 1], [0], [0]>} : vector<2x8x8xf32>, vector<2x8x8xf32>, vector<2x8x8xf32> -> vector<2x8x8xf32>
    "tpu.trace_stop"() : () -> ()
    %cst_55 = arith.constant 0.353553385 : f32
    %95 = vector.broadcast %cst_55 : f32 to vector<2x8x8xf32>
    %96 = arith.mulf %94, %95 : vector<2x8x8xf32>
    %cst_56 = arith.constant dense<0xFF800000> : vector<2x8xf32>
    %97 = vector.multi_reduction <maximumf>, %96, %cst_56 [2] : vector<2x8x8xf32> to vector<2x8xf32>
    %98 = vector.shape_cast %97 : vector<2x8xf32> to vector<2x8x1xf32>
    %99 = vector.broadcast %98 : vector<2x8x1xf32> to vector<2x8x8xf32>
    %100 = arith.subf %96, %99 : vector<2x8x8xf32>
    %101 = math.exp %100 : vector<2x8x8xf32>
    %cst_57 = arith.constant dense<0.000000e+00> : vector<2x8xf32>
    %102 = vector.multi_reduction <add>, %101, %cst_57 [2] : vector<2x8x8xf32> to vector<2x8xf32>
    %103 = vector.shape_cast %102 : vector<2x8xf32> to vector<2x8x1xf32>
    %104 = tpu.reciprocal %103 {approx = true} : vector<2x8x1xf32> -> vector<2x8x1xf32>
    %105 = vector.broadcast %104 : vector<2x8x1xf32> to vector<2x8x8xf32>
    %106 = arith.mulf %101, %105 : vector<2x8x8xf32>
    %107 = vector.extract_strided_slice %57 {offsets = [0, 0, 16], sizes = [2, 8, 8], strides = [1, 1, 1]} : vector<2x8x32xf32> to vector<2x8x8xf32>
    "tpu.trace_start"() <{level = 10 : i32, message = "bqk,bkd->bqd"}> : () -> ()
    %cst_58 = arith.constant dense<0.000000e+00> : vector<2x8x8xf32>
    %108 = tpu.matmul %106, %107, %cst_58 {dimension_numbers = #tpu.dot_dimension_numbers<[2], [1], [1], [2], [0, 0, 0, 1, 1, 2], [0], [0]>} : vector<2x8x8xf32>, vector<2x8x8xf32>, vector<2x8x8xf32> -> vector<2x8x8xf32>
    "tpu.trace_stop"() : () -> ()
    %109 = vector.extract_strided_slice %55 {offsets = [0, 0, 24], sizes = [2, 8, 8], strides = [1, 1, 1]} : vector<2x8x32xf32> to vector<2x8x8xf32>
    %110 = vector.extract_strided_slice %56 {offsets = [0, 0, 24], sizes = [2, 8, 8], strides = [1, 1, 1]} : vector<2x8x32xf32> to vector<2x8x8xf32>
    "tpu.trace_start"() <{level = 10 : i32, message = "bqd,bkd->bqk"}> : () -> ()
    %cst_59 = arith.constant dense<0.000000e+00> : vector<2x8x8xf32>
    %111 = tpu.matmul %109, %110, %cst_59 {dimension_numbers = #tpu.dot_dimension_numbers<[2], [2], [1], [1], [0, 0, 0, 1, 1, 1], [0], [0]>} : vector<2x8x8xf32>, vector<2x8x8xf32>, vector<2x8x8xf32> -> vector<2x8x8xf32>
    "tpu.trace_stop"() : () -> ()
    %cst_60 = arith.constant 0.353553385 : f32
    %112 = vector.broadcast %cst_60 : f32 to vector<2x8x8xf32>
    %113 = arith.mulf %111, %112 : vector<2x8x8xf32>
    %cst_61 = arith.constant dense<0xFF800000> : vector<2x8xf32>
    %114 = vector.multi_reduction <maximumf>, %113, %cst_61 [2] : vector<2x8x8xf32> to vector<2x8xf32>
    %115 = vector.shape_cast %114 : vector<2x8xf32> to vector<2x8x1xf32>
    %116 = vector.broadcast %115 : vector<2x8x1xf32> to vector<2x8x8xf32>
    %117 = arith.subf %113, %116 : vector<2x8x8xf32>
    %118 = math.exp %117 : vector<2x8x8xf32>
    %cst_62 = arith.constant dense<0.000000e+00> : vector<2x8xf32>
    %119 = vector.multi_reduction <add>, %118, %cst_62 [2] : vector<2x8x8xf32> to vector<2x8xf32>
    %120 = vector.shape_cast %119 : vector<2x8xf32> to vector<2x8x1xf32>
    %121 = tpu.reciprocal %120 {approx = true} : vector<2x8x1xf32> -> vector<2x8x1xf32>
    %122 = vector.broadcast %121 : vector<2x8x1xf32> to vector<2x8x8xf32>
    %123 = arith.mulf %118, %122 : vector<2x8x8xf32>
    %124 = vector.extract_strided_slice %57 {offsets = [0, 0, 24], sizes = [2, 8, 8], strides = [1, 1, 1]} : vector<2x8x32xf32> to vector<2x8x8xf32>
    "tpu.trace_start"() <{level = 10 : i32, message = "bqk,bkd->bqd"}> : () -> ()
    %cst_63 = arith.constant dense<0.000000e+00> : vector<2x8x8xf32>
    %125 = tpu.matmul %123, %124, %cst_63 {dimension_numbers = #tpu.dot_dimension_numbers<[2], [1], [1], [2], [0, 0, 0, 1, 1, 2], [0], [0]>} : vector<2x8x8xf32>, vector<2x8x8xf32>, vector<2x8x8xf32> -> vector<2x8x8xf32>
    "tpu.trace_stop"() : () -> ()
    %126 = tpu.concatenate %74, %91, %108, %125 in 2 : vector<2x8x8xf32>, vector<2x8x8xf32>, vector<2x8x8xf32>, vector<2x8x8xf32> -> vector<2x8x32xf32>
    %127 = vector.shape_cast %126 : vector<2x8x32xf32> to vector<16x32xf32>
    %cst_64 = arith.constant dense<0.000000e+00> : vector<16x32xf32>
    %128 = tpu.matmul %127, %12, %cst_64 {dimension_numbers = #tpu.dot_dimension_numbers<[1], [0], [0], [1], [0, 0, 1, 1], [], []>} : vector<16x32xf32>, vector<32x32xf32>, vector<16x32xf32> -> vector<16x32xf32>
    %129 = vector.broadcast %14 : vector<1x32xf32> to vector<16x32xf32>
    %130 = arith.addf %128, %129 : vector<16x32xf32>
    %131 = arith.addf %28, %130 : vector<16x32xf32>
    %cst_65 = arith.constant dense<0.000000e+00> : vector<16xf32>
    %132 = vector.multi_reduction <add>, %131, %cst_65 [1] : vector<16x32xf32> to vector<16xf32>
    %133 = vector.shape_cast %132 : vector<16xf32> to vector<16x1xf32>
    %cst_66 = arith.constant 3.200000e+01 : f32
    %134 = vector.broadcast %cst_66 : f32 to vector<16x1xf32>
    %135 = arith.divf %133, %134 : vector<16x1xf32>
    %136 = vector.broadcast %135 : vector<16x1xf32> to vector<16x32xf32>
    %137 = arith.subf %131, %136 : vector<16x32xf32>
    %138 = arith.mulf %137, %137 : vector<16x32xf32>
    %cst_67 = arith.constant dense<0.000000e+00> : vector<16xf32>
    %139 = vector.multi_reduction <add>, %138, %cst_67 [1] : vector<16x32xf32> to vector<16xf32>
    %140 = vector.shape_cast %139 : vector<16xf32> to vector<16x1xf32>
    %cst_68 = arith.constant 3.200000e+01 : f32
    %141 = vector.broadcast %cst_68 : f32 to vector<16x1xf32>
    %142 = arith.divf %140, %141 : vector<16x1xf32>
    %143 = vector.broadcast %135 : vector<16x1xf32> to vector<16x32xf32>
    %144 = arith.subf %131, %143 : vector<16x32xf32>
    %cst_69 = arith.constant 9.99999974E-6 : f32
    %145 = vector.broadcast %cst_69 : f32 to vector<16x1xf32>
    %146 = arith.addf %142, %145 : vector<16x1xf32>
    %147 = math.rsqrt %146 : vector<16x1xf32>
    %148 = vector.broadcast %147 : vector<16x1xf32> to vector<16x32xf32>
    %149 = arith.mulf %144, %148 : vector<16x32xf32>
    %150 = vector.broadcast %16 : vector<1x32xf32> to vector<16x32xf32>
    %151 = arith.mulf %149, %150 : vector<16x32xf32>
    %152 = vector.broadcast %18 : vector<1x32xf32> to vector<16x32xf32>
    %153 = arith.addf %151, %152 : vector<16x32xf32>
    %cst_70 = arith.constant dense<0.000000e+00> : vector<16x128xf32>
    %154 = tpu.matmul %153, %20, %cst_70 {dimension_numbers = #tpu.dot_dimension_numbers<[1], [0], [0], [1], [0, 0, 1, 1], [], []>} : vector<16x32xf32>, vector<32x128xf32>, vector<16x128xf32> -> vector<16x128xf32>
    %155 = vector.broadcast %22 : vector<1x128xf32> to vector<16x128xf32>
    %156 = arith.addf %154, %155 : vector<16x128xf32>
    %157 = arith.mulf %156, %156 : vector<16x128xf32>
    %158 = arith.mulf %156, %157 : vector<16x128xf32>
    %cst_71 = arith.constant 4.471500e-02 : f32
    %159 = vector.broadcast %cst_71 : f32 to vector<16x128xf32>
    %160 = arith.mulf %159, %158 : vector<16x128xf32>
    %161 = arith.addf %156, %160 : vector<16x128xf32>
    %cst_72 = arith.constant 0.797884583 : f32
    %162 = vector.broadcast %cst_72 : f32 to vector<16x128xf32>
    %163 = arith.mulf %162, %161 : vector<16x128xf32>
    %164 = math.tanh %163 : vector<16x128xf32>
    %cst_73 = arith.constant 1.000000e+00 : f32
    %165 = vector.broadcast %cst_73 : f32 to vector<16x128xf32>
    %166 = arith.addf %165, %164 : vector<16x128xf32>
    %cst_74 = arith.constant 5.000000e-01 : f32
    %167 = vector.broadcast %cst_74 : f32 to vector<16x128xf32>
    %168 = arith.mulf %167, %166 : vector<16x128xf32>
    %169 = arith.mulf %156, %168 : vector<16x128xf32>
    %cst_75 = arith.constant dense<0.000000e+00> : vector<16x32xf32>
    %170 = tpu.matmul %169, %24, %cst_75 {dimension_numbers = #tpu.dot_dimension_numbers<[1], [0], [0], [1], [0, 0, 1, 1], [], []>} : vector<16x128xf32>, vector<128x32xf32>, vector<16x32xf32> -> vector<16x32xf32>
    %171 = vector.broadcast %26 : vector<1x32xf32> to vector<16x32xf32>
    %172 = arith.addf %170, %171 : vector<16x32xf32>
    %173 = arith.addf %131, %172 : vector<16x32xf32>
    %174 = vector.shape_cast %173 : vector<16x32xf32> to vector<2x8x32xf32>
    %c0_76 = arith.constant 0 : index
    %c0_77 = arith.constant 0 : index
    %c0_78 = arith.constant 0 : index
    %175 = vector.load %arg18[%c0_76, %c0_77, %c0_78] : memref<2x8x32xf32, #tpu.memory_space<vmem>>, vector<2x8x32xf32>
    tpu.vector_store %arg18[%c0_76, %c0_77, %c0_78], %174 {strides = array<i32>} : memref<2x8x32xf32, #tpu.memory_space<vmem>>, vector<2x8x32xf32>,
    %c1_i32 = arith.constant 1 : i32
    %176 = arith.cmpi eq, %arg0, %c1_i32 : i32
    %177 = arith.extui %176 : i1 to i32
    %c0_i32_79 = arith.constant 0 : i32
    %178 = arith.cmpi ne, %177, %c0_i32_79 : i32
    scf.if %178 {
      %c0_80 = arith.constant 0 : index
      %c0_81 = arith.constant 0 : index
      %c0_82 = arith.constant 0 : index
      %179 = vector.load %arg5[%c0_80, %c0_81, %c0_82] : memref<2x8x32xf32, #tpu.memory_space<vmem>>, vector<2x8x32xf32>
      %180 = arith.addf %174, %179 : vector<2x8x32xf32>
      %c0_83 = arith.constant 0 : index
      %c0_84 = arith.constant 0 : index
      %c0_85 = arith.constant 0 : index
      %181 = vector.load %arg18[%c0_83, %c0_84, %c0_85] : memref<2x8x32xf32, #tpu.memory_space<vmem>>, vector<2x8x32xf32>
      tpu.vector_store %arg18[%c0_83, %c0_84, %c0_85], %180 {strides = array<i32>} : memref<2x8x32xf32, #tpu.memory_space<vmem>>, vector<2x8x32xf32>,
    } else {
    }
    return
  }
  func.func @transform_0(%arg0: i32) -> (i32, i32, i32) {
    %c0_i32 = arith.constant 0 : i32
    %c0_i32_0 = arith.constant 0 : i32
    %c0_i32_1 = arith.constant 0 : i32
    %c0_i32_2 = arith.constant 0 : i32
    return %c0_i32, %c0_i32_0, %c0_i32_1 : i32, i32, i32
  }
  func.func @transform_1(%arg0: i32) -> (i32, i32) {
    %c0_i32 = arith.constant 0 : i32
    %c0_i32_0 = arith.constant 0 : i32
    %c0_i32_1 = arith.constant 0 : i32
    return %c0_i32, %c0_i32_0 : i32, i32
  }
  func.func @transform_2(%arg0: i32) -> (i32, i32) {
    %c0_i32 = arith.constant 0 : i32
    %c0_i32_0 = arith.constant 0 : i32
    %c0_i32_1 = arith.constant 0 : i32
    return %c0_i32, %c0_i32_0 : i32, i32
  }
  func.func @transform_3(%arg0: i32) -> (i32, i32, i32) {
    %c0_i32 = arith.constant 0 : i32
    %c0_i32_0 = arith.constant 0 : i32
    %c0_i32_1 = arith.constant 0 : i32
    %c0_i32_2 = arith.constant 0 : i32
    return %c0_i32, %c0_i32_0, %c0_i32_1 : i32, i32, i32
  }
  func.func @transform_4(%arg0: i32) -> (i32, i32, i32) {
    %c0_i32 = arith.constant 0 : i32
    %c0_i32_0 = arith.constant 0 : i32
    %c0_i32_1 = arith.constant 0 : i32
    %c0_i32_2 = arith.constant 0 : i32
    return %c0_i32, %c0_i32_0, %c0_i32_1 : i32, i32, i32
  }
  func.func @transform_5(%arg0: i32) -> (i32, i32, i32) {
    %c0_i32 = arith.constant 0 : i32
    %c0_i32_0 = arith.constant 0 : i32
    %c0_i32_1 = arith.constant 0 : i32
    return %arg0, %c0_i32, %c0_i32_0 : i32, i32, i32
  }
  func.func @transform_6(%arg0: i32) -> (i32, i32, i32) {
    %c0_i32 = arith.constant 0 : i32
    %c0_i32_0 = arith.constant 0 : i32
    %c0_i32_1 = arith.constant 0 : i32
    return %arg0, %c0_i32, %c0_i32_0 : i32, i32, i32
  }
  func.func @transform_7(%arg0: i32) -> (i32, i32, i32) {
    %c0_i32 = arith.constant 0 : i32
    %c0_i32_0 = arith.constant 0 : i32
    %c0_i32_1 = arith.constant 0 : i32
    return %arg0, %c0_i32, %c0_i32_0 : i32, i32, i32
  }
  func.func @transform_8(%arg0: i32) -> (i32, i32, i32) {
    %c0_i32 = arith.constant 0 : i32
    %c0_i32_0 = arith.constant 0 : i32
    %c0_i32_1 = arith.constant 0 : i32
    return %arg0, %c0_i32, %c0_i32_0 : i32, i32, i32
  }
  func.func @transform_9(%arg0: i32) -> (i32, i32, i32) {
    %c0_i32 = arith.constant 0 : i32
    %c0_i32_0 = arith.constant 0 : i32
    %c0_i32_1 = arith.constant 0 : i32
    return %arg0, %c0_i32, %c0_i32_0 : i32, i32, i32
  }
  func.func @transform_10(%arg0: i32) -> (i32, i32, i32) {
    %c0_i32 = arith.constant 0 : i32
    %c0_i32_0 = arith.constant 0 : i32
    %c0_i32_1 = arith.constant 0 : i32
    return %arg0, %c0_i32, %c0_i32_0 : i32, i32, i32
  }
  func.func @transform_11(%arg0: i32) -> (i32, i32, i32) {
    %c0_i32 = arith.constant 0 : i32
    %c0_i32_0 = arith.constant 0 : i32
    %c0_i32_1 = arith.constant 0 : i32
    return %arg0, %c0_i32, %c0_i32_0 : i32, i32, i32
  }
  func.func @transform_12(%arg0: i32) -> (i32, i32, i32) {
    %c0_i32 = arith.constant 0 : i32
    %c0_i32_0 = arith.constant 0 : i32
    %c0_i32_1 = arith.constant 0 : i32
    return %arg0, %c0_i32, %c0_i32_0 : i32, i32, i32
  }
  func.func @transform_13(%arg0: i32) -> (i32, i32, i32) {
    %c0_i32 = arith.constant 0 : i32
    %c0_i32_0 = arith.constant 0 : i32
    %c0_i32_1 = arith.constant 0 : i32
    return %arg0, %c0_i32, %c0_i32_0 : i32, i32, i32
  }
  func.func @transform_14(%arg0: i32) -> (i32, i32, i32) {
    %c0_i32 = arith.constant 0 : i32
    %c0_i32_0 = arith.constant 0 : i32
    %c0_i32_1 = arith.constant 0 : i32
    return %arg0, %c0_i32, %c0_i32_0 : i32, i32, i32
  }
  func.func @transform_15(%arg0: i32) -> (i32, i32, i32) {
    %c0_i32 = arith.constant 0 : i32
    %c0_i32_0 = arith.constant 0 : i32
    %c0_i32_1 = arith.constant 0 : i32
    return %arg0, %c0_i32, %c0_i32_0 : i32, i32, i32
  }
  func.func @transform_16(%arg0: i32) -> (i32, i32, i32) {
    %c0_i32 = arith.constant 0 : i32
    %c0_i32_0 = arith.constant 0 : i32
    %c0_i32_1 = arith.constant 0 : i32
    return %arg0, %c0_i32, %c0_i32_0 : i32, i32, i32
  }
  func.func @transform_17(%arg0: i32) -> (i32, i32, i32) {
    %c0_i32 = arith.constant 0 : i32
    %c0_i32_0 = arith.constant 0 : i32
    %c0_i32_1 = arith.constant 0 : i32
    %c0_i32_2 = arith.constant 0 : i32
    return %c0_i32, %c0_i32_0, %c0_i32_1 : i32, i32, i32
  }
}

module attributes {stable_mosaic.version = 11 : i64} {
  func.func @_encoder_kernel(%arg0: i32, %arg1: memref<2x8x128xf32, #tpu.memory_space<vmem>>, %arg2: memref<128x32xf32, #tpu.memory_space<vmem>>, %arg3: memref<1x32xf32, #tpu.memory_space<vmem>>, %arg4: memref<1x8x32xf32, #tpu.memory_space<vmem>>, %arg5: memref<2x8x32xf32, #tpu.memory_space<vmem>>, %arg6: memref<1x1x32xf32, #tpu.memory_space<vmem>>, %arg7: memref<1x1x32xf32, #tpu.memory_space<vmem>>, %arg8: memref<1x32x96xf32, #tpu.memory_space<vmem>>, %arg9: memref<1x1x96xf32, #tpu.memory_space<vmem>>, %arg10: memref<1x32x32xf32, #tpu.memory_space<vmem>>, %arg11: memref<1x1x32xf32, #tpu.memory_space<vmem>>, %arg12: memref<1x1x32xf32, #tpu.memory_space<vmem>>, %arg13: memref<1x1x32xf32, #tpu.memory_space<vmem>>, %arg14: memref<1x32x128xf32, #tpu.memory_space<vmem>>, %arg15: memref<1x1x128xf32, #tpu.memory_space<vmem>>, %arg16: memref<1x128x32xf32, #tpu.memory_space<vmem>>, %arg17: memref<1x1x32xf32, #tpu.memory_space<vmem>>, %arg18: memref<2x8x32xf32, #tpu.memory_space<vmem>>) attributes {dimension_semantics = [#tpu.dimension_semantics<arbitrary>], iteration_bounds = array<i64: 2>, scalar_prefetch = 0 : i64, scratch_operands = 0 : i64, tpu.core_type = #tpu.core_type<tc>, window_params = [{pipeline_mode = #tpu.pipeline_mode<synchronous>, transform_indices = @transform_0, window_bounds = array<i64: 2, 8, 128>}, {pipeline_mode = #tpu.pipeline_mode<synchronous>, transform_indices = @transform_1, window_bounds = array<i64: 128, 32>}, {pipeline_mode = #tpu.pipeline_mode<synchronous>, transform_indices = @transform_2, window_bounds = array<i64: 1, 32>}, {pipeline_mode = #tpu.pipeline_mode<synchronous>, transform_indices = @transform_3, window_bounds = array<i64: 1, 8, 32>}, {pipeline_mode = #tpu.pipeline_mode<synchronous>, transform_indices = @transform_4, window_bounds = array<i64: 2, 8, 32>}, {transform_indices = @transform_5, window_bounds = array<i64: 1, 1, 32>}, {transform_indices = @transform_6, window_bounds = array<i64: 1, 1, 32>}, {transform_indices = @transform_7, window_bounds = array<i64: 1, 32, 96>}, {transform_indices = @transform_8, window_bounds = array<i64: 1, 1, 96>}, {transform_indices = @transform_9, window_bounds = array<i64: 1, 32, 32>}, {transform_indices = @transform_10, window_bounds = array<i64: 1, 1, 32>}, {transform_indices = @transform_11, window_bounds = array<i64: 1, 1, 32>}, {transform_indices = @transform_12, window_bounds = array<i64: 1, 1, 32>}, {transform_indices = @transform_13, window_bounds = array<i64: 1, 32, 128>}, {transform_indices = @transform_14, window_bounds = array<i64: 1, 1, 128>}, {transform_indices = @transform_15, window_bounds = array<i64: 1, 128, 32>}, {transform_indices = @transform_16, window_bounds = array<i64: 1, 1, 32>}, {pipeline_mode = #tpu.pipeline_mode<synchronous>, transform_indices = @transform_17, window_bounds = array<i64: 2, 8, 32>}]} {
    %c0_i32 = arith.constant 0 : i32
    %0 = arith.cmpi eq, %arg0, %c0_i32 : i32
    %1 = arith.extui %0 : i1 to i32
    %c0_i32_0 = arith.constant 0 : i32
    %2 = arith.cmpi ne, %1, %c0_i32_0 : i32
    scf.if %2 {
      %c0_80 = arith.constant 0 : index
      %c0_81 = arith.constant 0 : index
      %c0_82 = arith.constant 0 : index
      %179 = vector.load %arg1[%c0_80, %c0_81, %c0_82] : memref<2x8x128xf32, #tpu.memory_space<vmem>>, vector<2x8x128xf32>
      %180 = vector.shape_cast %179 : vector<2x8x128xf32> to vector<16x128xf32>
      %c0_83 = arith.constant 0 : index
      %c0_84 = arith.constant 0 : index
      %181 = vector.load %arg2[%c0_83, %c0_84] : memref<128x32xf32, #tpu.memory_space<vmem>>, vector<128x32xf32>
      %cst_85 = arith.constant dense<0.000000e+00> : vector<16x32xf32>
      %182 = tpu.matmul %180, %181, %cst_85 {dimension_numbers = #tpu.dot_dimension_numbers<[1], [0], [0], [1], [0, 0, 1, 1], [], []>} : vector<16x128xf32>, vector<128x32xf32>, vector<16x32xf32> -> vector<16x32xf32>
      %c0_86 = arith.constant 0 : index
      %c0_87 = arith.constant 0 : index
      %183 = vector.load %arg3[%c0_86, %c0_87] : memref<1x32xf32, #tpu.memory_space<vmem>>, vector<1x32xf32>
      %184 = vector.broadcast %183 : vector<1x32xf32> to vector<16x32xf32>
      %185 = arith.addf %182, %184 : vector<16x32xf32>
      %186 = vector.shape_cast %185 : vector<16x32xf32> to vector<2x8x32xf32>
      %c0_88 = arith.constant 0 : index
      %c0_89 = arith.constant 0 : index
      %c0_90 = arith.constant 0 : index
      %187 = vector.load %arg4[%c0_88, %c0_89, %c0_90] : memref<1x8x32xf32, #tpu.memory_space<vmem>>, vector<1x8x32xf32>
      %188 = vector.broadcast %187 : vector<1x8x32xf32> to vector<2x8x32xf32>
      %189 = arith.addf %186, %188 : vector<2x8x32xf32>
      %c0_91 = arith.constant 0 : index
      %c0_92 = arith.constant 0 : index
      %c0_93 = arith.constant 0 : index
      %190 = vector.load %arg18[%c0_91, %c0_92, %c0_93] : memref<2x8x32xf32, #tpu.memory_space<vmem>>, vector<2x8x32xf32>
      tpu.vector_store %arg18[%c0_91, %c0_92, %c0_93], %189 {strides = array<i32>} : memref<2x8x32xf32, #tpu.memory_space<vmem>>, vector<2x8x32xf32>,
    } else {
    }
    %c0 = arith.constant 0 : index
    %c0_1 = arith.constant 0 : index
    %c0_2 = arith.constant 0 : index
    %3 = vector.load %arg6[%c0, %c0_1, %c0_2] : memref<1x1x32xf32, #tpu.memory_space<vmem>>, vector<1x1x32xf32>
    %4 = vector.shape_cast %3 : vector<1x1x32xf32> to vector<1x32xf32>
    %c0_3 = arith.constant 0 : index
    %c0_4 = arith.constant 0 : index
    %c0_5 = arith.constant 0 : index
    %5 = vector.load %arg7[%c0_3, %c0_4, %c0_5] : memref<1x1x32xf32, #tpu.memory_space<vmem>>, vector<1x1x32xf32>
    %6 = vector.shape_cast %5 : vector<1x1x32xf32> to vector<1x32xf32>
    %c0_6 = arith.constant 0 : index
    %c0_7 = arith.constant 0 : index
    %c0_8 = arith.constant 0 : index
    %7 = vector.load %arg8[%c0_6, %c0_7, %c0_8] : memref<1x32x96xf32, #tpu.memory_space<vmem>>, vector<1x32x96xf32>
    %8 = vector.shape_cast %7 : vector<1x32x96xf32> to vector<32x96xf32>
    %c0_9 = arith.constant 0 : index
    %c0_10 = arith.constant 0 : index
    %c0_11 = arith.constant 0 : index
    %9 = vector.load %arg9[%c0_9, %c0_10, %c0_11] : memref<1x1x96xf32, #tpu.memory_space<vmem>>, vector<1x1x96xf32>
    %10 = vector.shape_cast %9 : vector<1x1x96xf32> to vector<1x96xf32>
    %c0_12 = arith.constant 0 : index
    %c0_13 = arith.constant 0 : index
    %c0_14 = arith.constant 0 : index
    %11 = vector.load %arg10[%c0_12, %c0_13, %c0_14] : memref<1x32x32xf32, #tpu.memory_space<vmem>>, vector<1x32x32xf32>
    %12 = vector.shape_cast %11 : vector<1x32x32xf32> to vector<32x32xf32>
    %c0_15 = arith.constant 0 : index
    %c0_16 = arith.constant 0 : index
    %c0_17 = arith.constant 0 : index
    %13 = vector.load %arg11[%c0_15, %c0_16, %c0_17] : memref<1x1x32xf32, #tpu.memory_space<vmem>>, vector<1x1x32xf32>
    %14 = vector.shape_cast %13 : vector<1x1x32xf32> to vector<1x32xf32>
    %c0_18 = arith.constant 0 : index
    %c0_19 = arith.constant 0 : index
    %c0_20 = arith.constant 0 : index
    %15 = vector.load %arg12[%c0_18, %c0_19, %c0_20] : memref<1x1x32xf32, #tpu.memory_space<vmem>>, vector<1x1x32xf32>
    %16 = vector.shape_cast %15 : vector<1x1x32xf32> to vector<1x32xf32>
    %c0_21 = arith.constant 0 : index
    %c0_22 = arith.constant 0 : index
    %c0_23 = arith.constant 0 : index
    %17 = vector.load %arg13[%c0_21, %c0_22, %c0_23] : memref<1x1x32xf32, #tpu.memory_space<vmem>>, vector<1x1x32xf32>
    %18 = vector.shape_cast %17 : vector<1x1x32xf32> to vector<1x32xf32>
    %c0_24 = arith.constant 0 : index
    %c0_25 = arith.constant 0 : index
    %c0_26 = arith.constant 0 : index
    %19 = vector.load %arg14[%c0_24, %c0_25, %c0_26] : memref<1x32x128xf32, #tpu.memory_space<vmem>>, vector<1x32x128xf32>
    %20 = vector.shape_cast %19 : vector<1x32x128xf32> to vector<32x128xf32>
    %c0_27 = arith.constant 0 : index
    %c0_28 = arith.constant 0 : index
    %c0_29 = arith.constant 0 : index
    %21 = vector.load %arg15[%c0_27, %c0_28, %c0_29] : memref<1x1x128xf32, #tpu.memory_space<vmem>>, vector<1x1x128xf32>
    %22 = vector.shape_cast %21 : vector<1x1x128xf32> to vector<1x128xf32>
    %c0_30 = arith.constant 0 : index
    %c0_31 = arith.constant 0 : index
    %c0_32 = arith.constant 0 : index
    %23 = vector.load %arg16[%c0_30, %c0_31, %c0_32] : memref<1x128x32xf32, #tpu.memory_space<vmem>>, vector<1x128x32xf32>
    %24 = vector.shape_cast %23 : vector<1x128x32xf32> to vector<128x32xf32>
    %c0_33 = arith.constant 0 : index
    %c0_34 = arith.constant 0 : index
    %c0_35 = arith.constant 0 : index
    %25 = vector.load %arg17[%c0_33, %c0_34, %c0_35] : memref<1x1x32xf32, #tpu.memory_space<vmem>>, vector<1x1x32xf32>
    %26 = vector.shape_cast %25 : vector<1x1x32xf32> to vector<1x32xf32>
    %c0_36 = arith.constant 0 : index
    %c0_37 = arith.constant 0 : index
    %c0_38 = arith.constant 0 : index
    %27 = vector.load %arg18[%c0_36, %c0_37, %c0_38] : memref<2x8x32xf32, #tpu.memory_space<vmem>>, vector<2x8x32xf32>
    %28 = vector.shape_cast %27 : vector<2x8x32xf32> to vector<16x32xf32>
    %cst = arith.constant dense<0.000000e+00> : vector<16xf32>
    %29 = vector.multi_reduction <add>, %28, %cst [1] : vector<16x32xf32> to vector<16xf32>
    %30 = vector.shape_cast %29 : vector<16xf32> to vector<16x1xf32>
    %cst_39 = arith.constant 3.200000e+01 : f32
    %31 = vector.broadcast %cst_39 : f32 to vector<16x1xf32>
    %32 = arith.divf %30, %31 : vector<16x1xf32>
    %33 = vector.broadcast %32 : vector<16x1xf32> to vector<16x32xf32>
    %34 = arith.subf %28, %33 : vector<16x32xf32>
    %35 = arith.mulf %34, %34 : vector<16x32xf32>
    %cst_40 = arith.constant dense<0.000000e+00> : vector<16xf32>
    %36 = vector.multi_reduction <add>, %35, %cst_40 [1] : vector<16x32xf32> to vector<16xf32>
    %37 = vector.shape_cast %36 : vector<16xf32> to vector<16x1xf32>
    %cst_41 = arith.constant 3.200000e+01 : f32
    %38 = vector.broadcast %cst_41 : f32 to vector<16x1xf32>
    %39 = arith.divf %37, %38 : vector<16x1xf32>
    %40 = vector.broadcast %32 : vector<16x1xf32> to vector<16x32xf32>
    %41 = arith.subf %28, %40 : vector<16x32xf32>
    %cst_42 = arith.constant 9.99999974E-6 : f32
    %42 = vector.broadcast %cst_42 : f32 to vector<16x1xf32>
    %43 = arith.addf %39, %42 : vector<16x1xf32>
    %44 = math.rsqrt %43 : vector<16x1xf32>
    %45 = vector.broadcast %44 : vector<16x1xf32> to vector<16x32xf32>
    %46 = arith.mulf %41, %45 : vector<16x32xf32>
    %47 = vector.broadcast %4 : vector<1x32xf32> to vector<16x32xf32>
    %48 = arith.mulf %46, %47 : vector<16x32xf32>
    %49 = vector.broadcast %6 : vector<1x32xf32> to vector<16x32xf32>
    %50 = arith.addf %48, %49 : vector<16x32xf32>
    %cst_43 = arith.constant dense<0.000000e+00> : vector<16x96xf32>
    %51 = tpu.matmul %50, %8, %cst_43 {dimension_numbers = #tpu.dot_dimension_numbers<[1], [0], [0], [1], [0, 0, 1, 1], [], []>} : vector<16x32xf32>, vector<32x96xf32>, vector<16x96xf32> -> vector<16x96xf32>
    %52 = vector.broadcast %10 : vector<1x96xf32> to vector<16x96xf32>
    %53 = arith.addf %51, %52 : vector<16x96xf32>
    %54 = vector.shape_cast %53 : vector<16x96xf32> to vector<2x8x96xf32>
    %55 = vector.extract_strided_slice %54 {offsets = [0, 0, 0], sizes = [2, 8, 32], strides = [1, 1, 1]} : vector<2x8x96xf32> to vector<2x8x32xf32>
    %56 = vector.extract_strided_slice %54 {offsets = [0, 0, 32], sizes = [2, 8, 32], strides = [1, 1, 1]} : vector<2x8x96xf32> to vector<2x8x32xf32>
    %57 = vector.extract_strided_slice %54 {offsets = [0, 0, 64], sizes = [2, 8, 32], strides = [1, 1, 1]} : vector<2x8x96xf32> to vector<2x8x32xf32>
    %58 = vector.extract_strided_slice %55 {offsets = [0, 0, 0], sizes = [2, 8, 8], strides = [1, 1, 1]} : vector<2x8x32xf32> to vector<2x8x8xf32>
    %59 = vector.extract_strided_slice %56 {offsets = [0, 0, 0], sizes = [2, 8, 8], strides = [1, 1, 1]} : vector<2x8x32xf32> to vector<2x8x8xf32>
    "tpu.trace_start"() <{level = 10 : i32, message = "bqd,bkd->bqk"}> : () -> ()
    %cst_44 = arith.constant dense<0.000000e+00> : vector<2x8x8xf32>
    %60 = tpu.matmul %58, %59, %cst_44 {dimension_numbers = #tpu.dot_dimension_numbers<[2], [2], [1], [1], [0, 0, 0, 1, 1, 1], [0], [0]>} : vector<2x8x8xf32>, vector<2x8x8xf32>, vector<2x8x8xf32> -> vector<2x8x8xf32>
    "tpu.trace_stop"() : () -> ()
    %cst_45 = arith.constant 0.353553385 : f32
    %61 = vector.broadcast %cst_45 : f32 to vector<2x8x8xf32>
    %62 = arith.mulf %60, %61 : vector<2x8x8xf32>
    %cst_46 = arith.constant dense<0xFF800000> : vector<2x8xf32>
    %63 = vector.multi_reduction <maximumf>, %62, %cst_46 [2] : vector<2x8x8xf32> to vector<2x8xf32>
    %64 = vector.shape_cast %63 : vector<2x8xf32> to vector<2x8x1xf32>
    %65 = vector.broadcast %64 : vector<2x8x1xf32> to vector<2x8x8xf32>
    %66 = arith.subf %62, %65 : vector<2x8x8xf32>
    %67 = math.exp %66 : vector<2x8x8xf32>
    %cst_47 = arith.constant dense<0.000000e+00> : vector<2x8xf32>
    %68 = vector.multi_reduction <add>, %67, %cst_47 [2] : vector<2x8x8xf32> to vector<2x8xf32>
    %69 = vector.shape_cast %68 : vector<2x8xf32> to vector<2x8x1xf32>
    %70 = tpu.reciprocal %69 {approx = true} : vector<2x8x1xf32> -> vector<2x8x1xf32>
    %71 = vector.broadcast %70 : vector<2x8x1xf32> to vector<2x8x8xf32>
    %72 = arith.mulf %67, %71 : vector<2x8x8xf32>
    %73 = vector.extract_strided_slice %57 {offsets = [0, 0, 0], sizes = [2, 8, 8], strides = [1, 1, 1]} : vector<2x8x32xf32> to vector<2x8x8xf32>
    "tpu.trace_start"() <{level = 10 : i32, message = "bqk,bkd->bqd"}> : () -> ()
    %cst_48 = arith.constant dense<0.000000e+00> : vector<2x8x8xf32>
    %74 = tpu.matmul %72, %73, %cst_48 {dimension_numbers = #tpu.dot_dimension_numbers<[2], [1], [1], [2], [0, 0, 0, 1, 1, 2], [0], [0]>} : vector<2x8x8xf32>, vector<2x8x8xf32>, vector<2x8x8xf32> -> vector<2x8x8xf32>
    "tpu.trace_stop"() : () -> ()
    %75 = vector.extract_strided_slice %55 {offsets = [0, 0, 8], sizes = [2, 8, 8], strides = [1, 1, 1]} : vector<2x8x32xf32> to vector<2x8x8xf32>
    %76 = vector.extract_strided_slice %56 {offsets = [0, 0, 8], sizes = [2, 8, 8], strides = [1, 1, 1]} : vector<2x8x32xf32> to vector<2x8x8xf32>
    "tpu.trace_start"() <{level = 10 : i32, message = "bqd,bkd->bqk"}> : () -> ()
    %cst_49 = arith.constant dense<0.000000e+00> : vector<2x8x8xf32>
    %77 = tpu.matmul %75, %76, %cst_49 {dimension_numbers = #tpu.dot_dimension_numbers<[2], [2], [1], [1], [0, 0, 0, 1, 1, 1], [0], [0]>} : vector<2x8x8xf32>, vector<2x8x8xf32>, vector<2x8x8xf32> -> vector<2x8x8xf32>
    "tpu.trace_stop"() : () -> ()
    %cst_50 = arith.constant 0.353553385 : f32
    %78 = vector.broadcast %cst_50 : f32 to vector<2x8x8xf32>
    %79 = arith.mulf %77, %78 : vector<2x8x8xf32>
    %cst_51 = arith.constant dense<0xFF800000> : vector<2x8xf32>
    %80 = vector.multi_reduction <maximumf>, %79, %cst_51 [2] : vector<2x8x8xf32> to vector<2x8xf32>
    %81 = vector.shape_cast %80 : vector<2x8xf32> to vector<2x8x1xf32>
    %82 = vector.broadcast %81 : vector<2x8x1xf32> to vector<2x8x8xf32>
    %83 = arith.subf %79, %82 : vector<2x8x8xf32>
    %84 = math.exp %83 : vector<2x8x8xf32>
    %cst_52 = arith.constant dense<0.000000e+00> : vector<2x8xf32>
    %85 = vector.multi_reduction <add>, %84, %cst_52 [2] : vector<2x8x8xf32> to vector<2x8xf32>
    %86 = vector.shape_cast %85 : vector<2x8xf32> to vector<2x8x1xf32>
    %87 = tpu.reciprocal %86 {approx = true} : vector<2x8x1xf32> -> vector<2x8x1xf32>
    %88 = vector.broadcast %87 : vector<2x8x1xf32> to vector<2x8x8xf32>
    %89 = arith.mulf %84, %88 : vector<2x8x8xf32>
    %90 = vector.extract_strided_slice %57 {offsets = [0, 0, 8], sizes = [2, 8, 8], strides = [1, 1, 1]} : vector<2x8x32xf32> to vector<2x8x8xf32>
    "tpu.trace_start"() <{level = 10 : i32, message = "bqk,bkd->bqd"}> : () -> ()
    %cst_53 = arith.constant dense<0.000000e+00> : vector<2x8x8xf32>
    %91 = tpu.matmul %89, %90, %cst_53 {dimension_numbers = #tpu.dot_dimension_numbers<[2], [1], [1], [2], [0, 0, 0, 1, 1, 2], [0], [0]>} : vector<2x8x8xf32>, vector<2x8x8xf32>, vector<2x8x8xf32> -> vector<2x8x8xf32>
    "tpu.trace_stop"() : () -> ()
    %92 = vector.extract_strided_slice %55 {offsets = [0, 0, 16], sizes = [2, 8, 8], strides = [1, 1, 1]} : vector<2x8x32xf32> to vector<2x8x8xf32>
    %93 = vector.extract_strided_slice %56 {offsets = [0, 0, 16], sizes = [2, 8, 8], strides = [1, 1, 1]} : vector<2x8x32xf32> to vector<2x8x8xf32>
    "tpu.trace_start"() <{level = 10 : i32, message = "bqd,bkd->bqk"}> : () -> ()
    %cst_54 = arith.constant dense<0.000000e+00> : vector<2x8x8xf32>
    %94 = tpu.matmul %92, %93, %cst_54 {dimension_numbers = #tpu.dot_dimension_numbers<[2], [2], [1], [1], [0, 0, 0, 1, 1, 1], [0], [0]>} : vector<2x8x8xf32>, vector<2x8x8xf32>, vector<2x8x8xf32> -> vector<2x8x8xf32>
    "tpu.trace_stop"() : () -> ()
    %cst_55 = arith.constant 0.353553385 : f32
    %95 = vector.broadcast %cst_55 : f32 to vector<2x8x8xf32>
    %96 = arith.mulf %94, %95 : vector<2x8x8xf32>
    %cst_56 = arith.constant dense<0xFF800000> : vector<2x8xf32>
    %97 = vector.multi_reduction <maximumf>, %96, %cst_56 [2] : vector<2x8x8xf32> to vector<2x8xf32>
    %98 = vector.shape_cast %97 : vector<2x8xf32> to vector<2x8x1xf32>
    %99 = vector.broadcast %98 : vector<2x8x1xf32> to vector<2x8x8xf32>
    %100 = arith.subf %96, %99 : vector<2x8x8xf32>
    %101 = math.exp %100 : vector<2x8x8xf32>
    %cst_57 = arith.constant dense<0.000000e+00> : vector<2x8xf32>
    %102 = vector.multi_reduction <add>, %101, %cst_57 [2] : vector<2x8x8xf32> to vector<2x8xf32>
    %103 = vector.shape_cast %102 : vector<2x8xf32> to vector<2x8x1xf32>
    %104 = tpu.reciprocal %103 {approx = true} : vector<2x8x1xf32> -> vector<2x8x1xf32>
    %105 = vector.broadcast %104 : vector<2x8x1xf32> to vector<2x8x8xf32>
    %106 = arith.mulf %101, %105 : vector<2x8x8xf32>
    %107 = vector.extract_strided_slice %57 {offsets = [0, 0, 16], sizes = [2, 8, 8], strides = [1, 1, 1]} : vector<2x8x32xf32> to vector<2x8x8xf32>
    "tpu.trace_start"() <{level = 10 : i32, message = "bqk,bkd->bqd"}> : () -> ()
    %cst_58 = arith.constant dense<0.000000e+00> : vector<2x8x8xf32>
    %108 = tpu.matmul %106, %107, %cst_58 {dimension_numbers = #tpu.dot_dimension_numbers<[2], [1], [1], [2], [0, 0, 0, 1, 1, 2], [0], [0]>} : vector<2x8x8xf32>, vector<2x8x8xf32>, vector<2x8x8xf32> -> vector<2x8x8xf32>
    "tpu.trace_stop"() : () -> ()
    %109 = vector.extract_strided_slice %55 {offsets = [0, 0, 24], sizes = [2, 8, 8], strides = [1, 1, 1]} : vector<2x8x32xf32> to vector<2x8x8xf32>
    %110 = vector.extract_strided_slice %56 {offsets = [0, 0, 24], sizes = [2, 8, 8], strides = [1, 1, 1]} : vector<2x8x32xf32> to vector<2x8x8xf32>
    "tpu.trace_start"() <{level = 10 : i32, message = "bqd,bkd->bqk"}> : () -> ()
    %cst_59 = arith.constant dense<0.000000e+00> : vector<2x8x8xf32>
    %111 = tpu.matmul %109, %110, %cst_59 {dimension_numbers = #tpu.dot_dimension_numbers<[2], [2], [1], [1], [0, 0, 0, 1, 1, 1], [0], [0]>} : vector<2x8x8xf32>, vector<2x8x8xf32>, vector<2x8x8xf32> -> vector<2x8x8xf32>
    "tpu.trace_stop"() : () -> ()
    %cst_60 = arith.constant 0.353553385 : f32
    %112 = vector.broadcast %cst_60 : f32 to vector<2x8x8xf32>
    %113 = arith.mulf %111, %112 : vector<2x8x8xf32>
    %cst_61 = arith.constant dense<0xFF800000> : vector<2x8xf32>
    %114 = vector.multi_reduction <maximumf>, %113, %cst_61 [2] : vector<2x8x8xf32> to vector<2x8xf32>
    %115 = vector.shape_cast %114 : vector<2x8xf32> to vector<2x8x1xf32>
    %116 = vector.broadcast %115 : vector<2x8x1xf32> to vector<2x8x8xf32>
    %117 = arith.subf %113, %116 : vector<2x8x8xf32>
    %118 = math.exp %117 : vector<2x8x8xf32>
    %cst_62 = arith.constant dense<0.000000e+00> : vector<2x8xf32>
    %119 = vector.multi_reduction <add>, %118, %cst_62 [2] : vector<2x8x8xf32> to vector<2x8xf32>
    %120 = vector.shape_cast %119 : vector<2x8xf32> to vector<2x8x1xf32>
    %121 = tpu.reciprocal %120 {approx = true} : vector<2x8x1xf32> -> vector<2x8x1xf32>
    %122 = vector.broadcast %121 : vector<2x8x1xf32> to vector<2x8x8xf32>
    %123 = arith.mulf %118, %122 : vector<2x8x8xf32>
    %124 = vector.extract_strided_slice %57 {offsets = [0, 0, 24], sizes = [2, 8, 8], strides = [1, 1, 1]} : vector<2x8x32xf32> to vector<2x8x8xf32>
    "tpu.trace_start"() <{level = 10 : i32, message = "bqk,bkd->bqd"}> : () -> ()
    %cst_63 = arith.constant dense<0.000000e+00> : vector<2x8x8xf32>
    %125 = tpu.matmul %123, %124, %cst_63 {dimension_numbers = #tpu.dot_dimension_numbers<[2], [1], [1], [2], [0, 0, 0, 1, 1, 2], [0], [0]>} : vector<2x8x8xf32>, vector<2x8x8xf32>, vector<2x8x8xf32> -> vector<2x8x8xf32>
    "tpu.trace_stop"() : () -> ()
    %126 = tpu.concatenate %74, %91, %108, %125 in 2 : vector<2x8x8xf32>, vector<2x8x8xf32>, vector<2x8x8xf32>, vector<2x8x8xf32> -> vector<2x8x32xf32>
    %127 = vector.shape_cast %126 : vector<2x8x32xf32> to vector<16x32xf32>
    %cst_64 = arith.constant dense<0.000000e+00> : vector<16x32xf32>
    %128 = tpu.matmul %127, %12, %cst_64 {dimension_numbers = #tpu.dot_dimension_numbers<[1], [0], [0], [1], [0, 0, 1, 1], [], []>} : vector<16x32xf32>, vector<32x32xf32>, vector<16x32xf32> -> vector<16x32xf32>
    %129 = vector.broadcast %14 : vector<1x32xf32> to vector<16x32xf32>
    %130 = arith.addf %128, %129 : vector<16x32xf32>
    %131 = arith.addf %28, %130 : vector<16x32xf32>
    %cst_65 = arith.constant dense<0.000000e+00> : vector<16xf32>
    %132 = vector.multi_reduction <add>, %131, %cst_65 [1] : vector<16x32xf32> to vector<16xf32>
    %133 = vector.shape_cast %132 : vector<16xf32> to vector<16x1xf32>
    %cst_66 = arith.constant 3.200000e+01 : f32
    %134 = vector.broadcast %cst_66 : f32 to vector<16x1xf32>
    %135 = arith.divf %133, %134 : vector<16x1xf32>
    %136 = vector.broadcast %135 : vector<16x1xf32> to vector<16x32xf32>
    %137 = arith.subf %131, %136 : vector<16x32xf32>
    %138 = arith.mulf %137, %137 : vector<16x32xf32>
    %cst_67 = arith.constant dense<0.000000e+00> : vector<16xf32>
    %139 = vector.multi_reduction <add>, %138, %cst_67 [1] : vector<16x32xf32> to vector<16xf32>
    %140 = vector.shape_cast %139 : vector<16xf32> to vector<16x1xf32>
    %cst_68 = arith.constant 3.200000e+01 : f32
    %141 = vector.broadcast %cst_68 : f32 to vector<16x1xf32>
    %142 = arith.divf %140, %141 : vector<16x1xf32>
    %143 = vector.broadcast %135 : vector<16x1xf32> to vector<16x32xf32>
    %144 = arith.subf %131, %143 : vector<16x32xf32>
    %cst_69 = arith.constant 9.99999974E-6 : f32
    %145 = vector.broadcast %cst_69 : f32 to vector<16x1xf32>
    %146 = arith.addf %142, %145 : vector<16x1xf32>
    %147 = math.rsqrt %146 : vector<16x1xf32>
    %148 = vector.broadcast %147 : vector<16x1xf32> to vector<16x32xf32>
    %149 = arith.mulf %144, %148 : vector<16x32xf32>
    %150 = vector.broadcast %16 : vector<1x32xf32> to vector<16x32xf32>
    %151 = arith.mulf %149, %150 : vector<16x32xf32>
    %152 = vector.broadcast %18 : vector<1x32xf32> to vector<16x32xf32>
    %153 = arith.addf %151, %152 : vector<16x32xf32>
    %cst_70 = arith.constant dense<0.000000e+00> : vector<16x128xf32>
    %154 = tpu.matmul %153, %20, %cst_70 {dimension_numbers = #tpu.dot_dimension_numbers<[1], [0], [0], [1], [0, 0, 1, 1], [], []>} : vector<16x32xf32>, vector<32x128xf32>, vector<16x128xf32> -> vector<16x128xf32>
    %155 = vector.broadcast %22 : vector<1x128xf32> to vector<16x128xf32>
    %156 = arith.addf %154, %155 : vector<16x128xf32>
    %157 = arith.mulf %156, %156 : vector<16x128xf32>
    %158 = arith.mulf %156, %157 : vector<16x128xf32>
    %cst_71 = arith.constant 4.471500e-02 : f32
    %159 = vector.broadcast %cst_71 : f32 to vector<16x128xf32>
    %160 = arith.mulf %159, %158 : vector<16x128xf32>
    %161 = arith.addf %156, %160 : vector<16x128xf32>
    %cst_72 = arith.constant 0.797884583 : f32
    %162 = vector.broadcast %cst_72 : f32 to vector<16x128xf32>
    %163 = arith.mulf %162, %161 : vector<16x128xf32>
    %164 = math.tanh %163 : vector<16x128xf32>
    %cst_73 = arith.constant 1.000000e+00 : f32
    %165 = vector.broadcast %cst_73 : f32 to vector<16x128xf32>
    %166 = arith.addf %165, %164 : vector<16x128xf32>
    %cst_74 = arith.constant 5.000000e-01 : f32
    %167 = vector.broadcast %cst_74 : f32 to vector<16x128xf32>
    %168 = arith.mulf %167, %166 : vector<16x128xf32>
    %169 = arith.mulf %156, %168 : vector<16x128xf32>
    %cst_75 = arith.constant dense<0.000000e+00> : vector<16x32xf32>
    %170 = tpu.matmul %169, %24, %cst_75 {dimension_numbers = #tpu.dot_dimension_numbers<[1], [0], [0], [1], [0, 0, 1, 1], [], []>} : vector<16x128xf32>, vector<128x32xf32>, vector<16x32xf32> -> vector<16x32xf32>
    %171 = vector.broadcast %26 : vector<1x32xf32> to vector<16x32xf32>
    %172 = arith.addf %170, %171 : vector<16x32xf32>
    %173 = arith.addf %131, %172 : vector<16x32xf32>
    %174 = vector.shape_cast %173 : vector<16x32xf32> to vector<2x8x32xf32>
    %c0_76 = arith.constant 0 : index
    %c0_77 = arith.constant 0 : index
    %c0_78 = arith.constant 0 : index
    %175 = vector.load %arg18[%c0_76, %c0_77, %c0_78] : memref<2x8x32xf32, #tpu.memory_space<vmem>>, vector<2x8x32xf32>
    tpu.vector_store %arg18[%c0_76, %c0_77, %c0_78], %174 {strides = array<i32>} : memref<2x8x32xf32, #tpu.memory_space<vmem>>, vector<2x8x32xf32>,
    %c1_i32 = arith.constant 1 : i32
    %176 = arith.cmpi eq, %arg0, %c1_i32 : i32
    %177 = arith.extui %176 : i1 to i32
    %c0_i32_79 = arith.constant 0 : i32
    %178 = arith.cmpi ne, %177, %c0_i32_79 : i32
    scf.if %178 {
      %c0_80 = arith.constant 0 : index
      %c0_81 = arith.constant 0 : index
      %c0_82 = arith.constant 0 : index
      %179 = vector.load %arg5[%c0_80, %c0_81, %c0_82] : memref<2x8x32xf32, #tpu.memory_space<vmem>>, vector<2x8x32xf32>
      %180 = arith.addf %174, %179 : vector<2x8x32xf32>
      %c0_83 = arith.constant 0 : index
      %c0_84 = arith.constant 0 : index
      %c0_85 = arith.constant 0 : index
      %181 = vector.load %arg18[%c0_83, %c0_84, %c0_85] : memref<2x8x32xf32, #tpu.memory_space<vmem>>, vector<2x8x32xf32>
      tpu.vector_store %arg18[%c0_83, %c0_84, %c0_85], %180 {strides = array<i32>} : memref<2x8x32xf32, #tpu.memory_space<vmem>>, vector<2x8x32xf32>,
    } else {
    }
    return
  }
  func.func @transform_0(%arg0: i32) -> (i32, i32, i32) {
    %c0_i32 = arith.constant 0 : i32
    %c0_i32_0 = arith.constant 0 : i32
    %c0_i32_1 = arith.constant 0 : i32
    %c0_i32_2 = arith.constant 0 : i32
    return %c0_i32, %c0_i32_0, %c0_i32_1 : i32, i32, i32
  }
  func.func @transform_1(%arg0: i32) -> (i32, i32) {
    %c0_i32 = arith.constant 0 : i32
    %c0_i32_0 = arith.constant 0 : i32
    %c0_i32_1 = arith.constant 0 : i32
    return %c0_i32, %c0_i32_0 : i32, i32
  }
  func.func @transform_2(%arg0: i32) -> (i32, i32) {
    %c0_i32 = arith.constant 0 : i32
    %c0_i32_0 = arith.constant 0 : i32
    %c0_i32_1 = arith.constant 0 : i32
    return %c0_i32, %c0_i32_0 : i32, i32
  }
  func.func @transform_3(%arg0: i32) -> (i32, i32, i32) {
    %c0_i32 = arith.constant 0 : i32
    %c0_i32_0 = arith.constant 0 : i32
    %c0_i32_1 = arith.constant 0 : i32
    %c0_i32_2 = arith.constant 0 : i32
    return %c0_i32, %c0_i32_0, %c0_i32_1 : i32, i32, i32
  }
  func.func @transform_4(%arg0: i32) -> (i32, i32, i32) {
    %c0_i32 = arith.constant 0 : i32
    %c0_i32_0 = arith.constant 0 : i32
    %c0_i32_1 = arith.constant 0 : i32
    %c0_i32_2 = arith.constant 0 : i32
    return %c0_i32, %c0_i32_0, %c0_i32_1 : i32, i32, i32
  }
  func.func @transform_5(%arg0: i32) -> (i32, i32, i32) {
    %c0_i32 = arith.constant 0 : i32
    %c0_i32_0 = arith.constant 0 : i32
    %c0_i32_1 = arith.constant 0 : i32
    return %arg0, %c0_i32, %c0_i32_0 : i32, i32, i32
  }
  func.func @transform_6(%arg0: i32) -> (i32, i32, i32) {
    %c0_i32 = arith.constant 0 : i32
    %c0_i32_0 = arith.constant 0 : i32
    %c0_i32_1 = arith.constant 0 : i32
    return %arg0, %c0_i32, %c0_i32_0 : i32, i32, i32
  }
  func.func @transform_7(%arg0: i32) -> (i32, i32, i32) {
    %c0_i32 = arith.constant 0 : i32
    %c0_i32_0 = arith.constant 0 : i32
    %c0_i32_1 = arith.constant 0 : i32
    return %arg0, %c0_i32, %c0_i32_0 : i32, i32, i32
  }
  func.func @transform_8(%arg0: i32) -> (i32, i32, i32) {
    %c0_i32 = arith.constant 0 : i32
    %c0_i32_0 = arith.constant 0 : i32
    %c0_i32_1 = arith.constant 0 : i32
    return %arg0, %c0_i32, %c0_i32_0 : i32, i32, i32
  }
  func.func @transform_9(%arg0: i32) -> (i32, i32, i32) {
    %c0_i32 = arith.constant 0 : i32
    %c0_i32_0 = arith.constant 0 : i32
    %c0_i32_1 = arith.constant 0 : i32
    return %arg0, %c0_i32, %c0_i32_0 : i32, i32, i32
  }
  func.func @transform_10(%arg0: i32) -> (i32, i32, i32) {
    %c0_i32 = arith.constant 0 : i32
    %c0_i32_0 = arith.constant 0 : i32
    %c0_i32_1 = arith.constant 0 : i32
    return %arg0, %c0_i32, %c0_i32_0 : i32, i32, i32
  }
  func.func @transform_11(%arg0: i32) -> (i32, i32, i32) {
    %c0_i32 = arith.constant 0 : i32
    %c0_i32_0 = arith.constant 0 : i32
    %c0_i32_1 = arith.constant 0 : i32
    return %arg0, %c0_i32, %c0_i32_0 : i32, i32, i32
  }
  func.func @transform_12(%arg0: i32) -> (i32, i32, i32) {
    %c0_i32 = arith.constant 0 : i32
    %c0_i32_0 = arith.constant 0 : i32
    %c0_i32_1 = arith.constant 0 : i32
    return %arg0, %c0_i32, %c0_i32_0 : i32, i32, i32
  }
  func.func @transform_13(%arg0: i32) -> (i32, i32, i32) {
    %c0_i32 = arith.constant 0 : i32
    %c0_i32_0 = arith.constant 0 : i32
    %c0_i32_1 = arith.constant 0 : i32
    return %arg0, %c0_i32, %c0_i32_0 : i32, i32, i32
  }
  func.func @transform_14(%arg0: i32) -> (i32, i32, i32) {
    %c0_i32 = arith.constant 0 : i32
    %c0_i32_0 = arith.constant 0 : i32
    %c0_i32_1 = arith.constant 0 : i32
    return %arg0, %c0_i32, %c0_i32_0 : i32, i32, i32
  }
  func.func @transform_15(%arg0: i32) -> (i32, i32, i32) {
    %c0_i32 = arith.constant 0 : i32
    %c0_i32_0 = arith.constant 0 : i32
    %c0_i32_1 = arith.constant 0 : i32
    return %arg0, %c0_i32, %c0_i32_0 : i32, i32, i32
  }
  func.func @transform_16(%arg0: i32) -> (i32, i32, i32) {
    %c0_i32 = arith.constant 0 : i32
    %c0_i32_0 = arith.constant 0 : i32
    %c0_i32_1 = arith.constant 0 : i32
    return %arg0, %c0_i32, %c0_i32_0 : i32, i32, i32
  }
  func.func @transform_17(%arg0: i32) -> (i32, i32, i32) {
    %c0_i32 = arith.constant 0 : i32
    %c0_i32_0 = arith.constant 0 : i32
    %c0_i32_1 = arith.constant 0 : i32
    %c0_i32_2 = arith.constant 0 : i32
    return %c0_i32, %c0_i32_0, %c0_i32_1 : i32, i32, i32
  }
}

module attributes {stable_mosaic.version = 11 : i64} {
  func.func @_ctx_kv_kernel(%arg0: i32, %arg1: memref<2x8x32xf32, #tpu.memory_space<vmem>>, %arg2: memref<1x1x32xf32, #tpu.memory_space<vmem>>, %arg3: memref<1x1x32xf32, #tpu.memory_space<vmem>>, %arg4: memref<1x32x64xf32, #tpu.memory_space<vmem>>, %arg5: memref<1x1x64xf32, #tpu.memory_space<vmem>>, %arg6: memref<1x2x8x32xf32, #tpu.memory_space<vmem>>, %arg7: memref<1x2x8x32xf32, #tpu.memory_space<vmem>>) attributes {dimension_semantics = [#tpu.dimension_semantics<parallel>], iteration_bounds = array<i64: 2>, scalar_prefetch = 0 : i64, scratch_operands = 0 : i64, tpu.core_type = #tpu.core_type<tc>, window_params = [{pipeline_mode = #tpu.pipeline_mode<synchronous>, transform_indices = @transform_0, window_bounds = array<i64: 2, 8, 32>}, {transform_indices = @transform_1, window_bounds = array<i64: 1, 1, 32>}, {transform_indices = @transform_2, window_bounds = array<i64: 1, 1, 32>}, {transform_indices = @transform_3, window_bounds = array<i64: 1, 32, 64>}, {transform_indices = @transform_4, window_bounds = array<i64: 1, 1, 64>}, {transform_indices = @transform_5, window_bounds = array<i64: 1, 2, 8, 32>}, {transform_indices = @transform_6, window_bounds = array<i64: 1, 2, 8, 32>}]} {
    %c0 = arith.constant 0 : index
    %c0_0 = arith.constant 0 : index
    %c0_1 = arith.constant 0 : index
    %0 = vector.load %arg1[%c0, %c0_0, %c0_1] : memref<2x8x32xf32, #tpu.memory_space<vmem>>, vector<2x8x32xf32>
    %1 = vector.shape_cast %0 : vector<2x8x32xf32> to vector<16x32xf32>
    %c0_2 = arith.constant 0 : index
    %c0_3 = arith.constant 0 : index
    %c0_4 = arith.constant 0 : index
    %2 = vector.load %arg2[%c0_2, %c0_3, %c0_4] : memref<1x1x32xf32, #tpu.memory_space<vmem>>, vector<1x1x32xf32>
    %3 = vector.shape_cast %2 : vector<1x1x32xf32> to vector<1x32xf32>
    %c0_5 = arith.constant 0 : index
    %c0_6 = arith.constant 0 : index
    %c0_7 = arith.constant 0 : index
    %4 = vector.load %arg3[%c0_5, %c0_6, %c0_7] : memref<1x1x32xf32, #tpu.memory_space<vmem>>, vector<1x1x32xf32>
    %5 = vector.shape_cast %4 : vector<1x1x32xf32> to vector<1x32xf32>
    %cst = arith.constant dense<0.000000e+00> : vector<16xf32>
    %6 = vector.multi_reduction <add>, %1, %cst [1] : vector<16x32xf32> to vector<16xf32>
    %7 = vector.shape_cast %6 : vector<16xf32> to vector<16x1xf32>
    %cst_8 = arith.constant 3.200000e+01 : f32
    %8 = vector.broadcast %cst_8 : f32 to vector<16x1xf32>
    %9 = arith.divf %7, %8 : vector<16x1xf32>
    %10 = vector.broadcast %9 : vector<16x1xf32> to vector<16x32xf32>
    %11 = arith.subf %1, %10 : vector<16x32xf32>
    %12 = arith.mulf %11, %11 : vector<16x32xf32>
    %cst_9 = arith.constant dense<0.000000e+00> : vector<16xf32>
    %13 = vector.multi_reduction <add>, %12, %cst_9 [1] : vector<16x32xf32> to vector<16xf32>
    %14 = vector.shape_cast %13 : vector<16xf32> to vector<16x1xf32>
    %cst_10 = arith.constant 3.200000e+01 : f32
    %15 = vector.broadcast %cst_10 : f32 to vector<16x1xf32>
    %16 = arith.divf %14, %15 : vector<16x1xf32>
    %17 = vector.broadcast %9 : vector<16x1xf32> to vector<16x32xf32>
    %18 = arith.subf %1, %17 : vector<16x32xf32>
    %cst_11 = arith.constant 9.99999974E-6 : f32
    %19 = vector.broadcast %cst_11 : f32 to vector<16x1xf32>
    %20 = arith.addf %16, %19 : vector<16x1xf32>
    %21 = math.rsqrt %20 : vector<16x1xf32>
    %22 = vector.broadcast %21 : vector<16x1xf32> to vector<16x32xf32>
    %23 = arith.mulf %18, %22 : vector<16x32xf32>
    %24 = vector.broadcast %3 : vector<1x32xf32> to vector<16x32xf32>
    %25 = arith.mulf %23, %24 : vector<16x32xf32>
    %26 = vector.broadcast %5 : vector<1x32xf32> to vector<16x32xf32>
    %27 = arith.addf %25, %26 : vector<16x32xf32>
    %c0_12 = arith.constant 0 : index
    %c0_13 = arith.constant 0 : index
    %c0_14 = arith.constant 0 : index
    %28 = vector.load %arg4[%c0_12, %c0_13, %c0_14] : memref<1x32x64xf32, #tpu.memory_space<vmem>>, vector<1x32x64xf32>
    %29 = vector.shape_cast %28 : vector<1x32x64xf32> to vector<32x64xf32>
    %cst_15 = arith.constant dense<0.000000e+00> : vector<16x64xf32>
    %30 = tpu.matmul %27, %29, %cst_15 {dimension_numbers = #tpu.dot_dimension_numbers<[1], [0], [0], [1], [0, 0, 1, 1], [], []>} : vector<16x32xf32>, vector<32x64xf32>, vector<16x64xf32> -> vector<16x64xf32>
    %c0_16 = arith.constant 0 : index
    %c0_17 = arith.constant 0 : index
    %c0_18 = arith.constant 0 : index
    %31 = vector.load %arg5[%c0_16, %c0_17, %c0_18] : memref<1x1x64xf32, #tpu.memory_space<vmem>>, vector<1x1x64xf32>
    %32 = vector.shape_cast %31 : vector<1x1x64xf32> to vector<1x64xf32>
    %33 = vector.broadcast %32 : vector<1x64xf32> to vector<16x64xf32>
    %34 = arith.addf %30, %33 : vector<16x64xf32>
    %35 = vector.shape_cast %34 : vector<16x64xf32> to vector<2x8x64xf32>
    %36 = vector.extract_strided_slice %35 {offsets = [0, 0, 0], sizes = [2, 8, 32], strides = [1, 1, 1]} : vector<2x8x64xf32> to vector<2x8x32xf32>
    %c0_19 = arith.constant 0 : index
    %c0_20 = arith.constant 0 : index
    %c0_21 = arith.constant 0 : index
    %c0_22 = arith.constant 0 : index
    %37 = vector.load %arg6[%c0_19, %c0_20, %c0_21, %c0_22] : memref<1x2x8x32xf32, #tpu.memory_space<vmem>>, vector<1x2x8x32xf32>
    %38 = vector.shape_cast %37 : vector<1x2x8x32xf32> to vector<2x8x32xf32>
    %39 = vector.shape_cast %36 : vector<2x8x32xf32> to vector<1x2x8x32xf32>
    tpu.vector_store %arg6[%c0_19, %c0_20, %c0_21, %c0_22], %39 {strides = array<i32>} : memref<1x2x8x32xf32, #tpu.memory_space<vmem>>, vector<1x2x8x32xf32>,
    %40 = vector.extract_strided_slice %35 {offsets = [0, 0, 32], sizes = [2, 8, 32], strides = [1, 1, 1]} : vector<2x8x64xf32> to vector<2x8x32xf32>
    %c0_23 = arith.constant 0 : index
    %c0_24 = arith.constant 0 : index
    %c0_25 = arith.constant 0 : index
    %c0_26 = arith.constant 0 : index
    %41 = vector.load %arg7[%c0_23, %c0_24, %c0_25, %c0_26] : memref<1x2x8x32xf32, #tpu.memory_space<vmem>>, vector<1x2x8x32xf32>
    %42 = vector.shape_cast %41 : vector<1x2x8x32xf32> to vector<2x8x32xf32>
    %43 = vector.shape_cast %40 : vector<2x8x32xf32> to vector<1x2x8x32xf32>
    tpu.vector_store %arg7[%c0_23, %c0_24, %c0_25, %c0_26], %43 {strides = array<i32>} : memref<1x2x8x32xf32, #tpu.memory_space<vmem>>, vector<1x2x8x32xf32>,
    return
  }
  func.func @transform_0(%arg0: i32) -> (i32, i32, i32) {
    %c0_i32 = arith.constant 0 : i32
    %c0_i32_0 = arith.constant 0 : i32
    %c0_i32_1 = arith.constant 0 : i32
    %c0_i32_2 = arith.constant 0 : i32
    return %c0_i32, %c0_i32_0, %c0_i32_1 : i32, i32, i32
  }
  func.func @transform_1(%arg0: i32) -> (i32, i32, i32) {
    %c0_i32 = arith.constant 0 : i32
    %c0_i32_0 = arith.constant 0 : i32
    %c0_i32_1 = arith.constant 0 : i32
    return %arg0, %c0_i32, %c0_i32_0 : i32, i32, i32
  }
  func.func @transform_2(%arg0: i32) -> (i32, i32, i32) {
    %c0_i32 = arith.constant 0 : i32
    %c0_i32_0 = arith.constant 0 : i32
    %c0_i32_1 = arith.constant 0 : i32
    return %arg0, %c0_i32, %c0_i32_0 : i32, i32, i32
  }
  func.func @transform_3(%arg0: i32) -> (i32, i32, i32) {
    %c0_i32 = arith.constant 0 : i32
    %c0_i32_0 = arith.constant 0 : i32
    %c0_i32_1 = arith.constant 0 : i32
    return %arg0, %c0_i32, %c0_i32_0 : i32, i32, i32
  }
  func.func @transform_4(%arg0: i32) -> (i32, i32, i32) {
    %c0_i32 = arith.constant 0 : i32
    %c0_i32_0 = arith.constant 0 : i32
    %c0_i32_1 = arith.constant 0 : i32
    return %arg0, %c0_i32, %c0_i32_0 : i32, i32, i32
  }
  func.func @transform_5(%arg0: i32) -> (i32, i32, i32, i32) {
    %c0_i32 = arith.constant 0 : i32
    %c0_i32_0 = arith.constant 0 : i32
    %c0_i32_1 = arith.constant 0 : i32
    %c0_i32_2 = arith.constant 0 : i32
    return %arg0, %c0_i32, %c0_i32_0, %c0_i32_1 : i32, i32, i32, i32
  }
  func.func @transform_6(%arg0: i32) -> (i32, i32, i32, i32) {
    %c0_i32 = arith.constant 0 : i32
    %c0_i32_0 = arith.constant 0 : i32
    %c0_i32_1 = arith.constant 0 : i32
    %c0_i32_2 = arith.constant 0 : i32
    return %arg0, %c0_i32, %c0_i32_0, %c0_i32_1 : i32, i32, i32, i32
  }
}

module attributes {stable_mosaic.version = 11 : i64} {
  func.func @_diffusion_kernel(%arg0: i32, %arg1: i32, %arg2: memref<3x3xf32, #tpu.memory_space<smem>>, %arg3: memref<2x8x32xf32, #tpu.memory_space<vmem>>, %arg4: memref<1x1x32xf32, #tpu.memory_space<vmem>>, %arg5: memref<1x2x8x32xf32, #tpu.memory_space<vmem>>, %arg6: memref<1x2x8x32xf32, #tpu.memory_space<vmem>>, %arg7: memref<1x2x8x32xf32, #tpu.memory_space<vmem>>, %arg8: memref<32x32xf32, #tpu.memory_space<vmem>>, %arg9: memref<1x32xf32, #tpu.memory_space<vmem>>, %arg10: memref<32x64xf32, #tpu.memory_space<vmem>>, %arg11: memref<1x64xf32, #tpu.memory_space<vmem>>, %arg12: memref<1x1x32xf32, #tpu.memory_space<vmem>>, %arg13: memref<1x1x32xf32, #tpu.memory_space<vmem>>, %arg14: memref<1x32x32xf32, #tpu.memory_space<vmem>>, %arg15: memref<1x1x32xf32, #tpu.memory_space<vmem>>, %arg16: memref<1x32x32xf32, #tpu.memory_space<vmem>>, %arg17: memref<1x1x32xf32, #tpu.memory_space<vmem>>, %arg18: memref<1x1x32xf32, #tpu.memory_space<vmem>>, %arg19: memref<1x1x32xf32, #tpu.memory_space<vmem>>, %arg20: memref<1x32x128xf32, #tpu.memory_space<vmem>>, %arg21: memref<1x1x128xf32, #tpu.memory_space<vmem>>, %arg22: memref<1x128x32xf32, #tpu.memory_space<vmem>>, %arg23: memref<1x1x32xf32, #tpu.memory_space<vmem>>, %arg24: memref<2x8x32xf32, #tpu.memory_space<vmem>>, %arg25: memref<2x8x32xf32, #tpu.memory_space<vmem>>) attributes {dimension_semantics = [#tpu.dimension_semantics<arbitrary>, #tpu.dimension_semantics<arbitrary>], iteration_bounds = array<i64: 3, 2>, scalar_prefetch = 0 : i64, scratch_operands = 1 : i64, tpu.core_type = #tpu.core_type<tc>, window_params = [{transform_indices = @transform_0, window_bounds = array<i64: 3, 3>}, {pipeline_mode = #tpu.pipeline_mode<synchronous>, transform_indices = @transform_1, window_bounds = array<i64: 2, 8, 32>}, {transform_indices = @transform_2, window_bounds = array<i64: 1, 1, 32>}, {transform_indices = @transform_3, window_bounds = array<i64: 1, 2, 8, 32>}, {transform_indices = @transform_4, window_bounds = array<i64: 1, 2, 8, 32>}, {transform_indices = @transform_5, window_bounds = array<i64: 1, 2, 8, 32>}, {pipeline_mode = #tpu.pipeline_mode<synchronous>, transform_indices = @transform_6, window_bounds = array<i64: 32, 32>}, {pipeline_mode = #tpu.pipeline_mode<synchronous>, transform_indices = @transform_7, window_bounds = array<i64: 1, 32>}, {pipeline_mode = #tpu.pipeline_mode<synchronous>, transform_indices = @transform_8, window_bounds = array<i64: 32, 64>}, {pipeline_mode = #tpu.pipeline_mode<synchronous>, transform_indices = @transform_9, window_bounds = array<i64: 1, 64>}, {transform_indices = @transform_10, window_bounds = array<i64: 1, 1, 32>}, {transform_indices = @transform_11, window_bounds = array<i64: 1, 1, 32>}, {transform_indices = @transform_12, window_bounds = array<i64: 1, 32, 32>}, {transform_indices = @transform_13, window_bounds = array<i64: 1, 1, 32>}, {transform_indices = @transform_14, window_bounds = array<i64: 1, 32, 32>}, {transform_indices = @transform_15, window_bounds = array<i64: 1, 1, 32>}, {transform_indices = @transform_16, window_bounds = array<i64: 1, 1, 32>}, {transform_indices = @transform_17, window_bounds = array<i64: 1, 1, 32>}, {transform_indices = @transform_18, window_bounds = array<i64: 1, 32, 128>}, {transform_indices = @transform_19, window_bounds = array<i64: 1, 1, 128>}, {transform_indices = @transform_20, window_bounds = array<i64: 1, 128, 32>}, {transform_indices = @transform_21, window_bounds = array<i64: 1, 1, 32>}, {pipeline_mode = #tpu.pipeline_mode<synchronous>, transform_indices = @transform_22, window_bounds = array<i64: 2, 8, 32>}]} {
    %c0_i32 = arith.constant 0 : i32
    %0 = arith.cmpi eq, %arg0, %c0_i32 : i32
    %c0_i32_0 = arith.constant 0 : i32
    %1 = arith.cmpi eq, %arg1, %c0_i32_0 : i32
    %2 = arith.andi %0, %1 : i1
    %3 = arith.extui %2 : i1 to i32
    %c0_i32_1 = arith.constant 0 : i32
    %4 = arith.cmpi ne, %3, %c0_i32_1 : i32
    scf.if %4 {
      %c0_91 = arith.constant 0 : index
      %c0_92 = arith.constant 0 : index
      %c0_93 = arith.constant 0 : index
      %185 = vector.load %arg3[%c0_91, %c0_92, %c0_93] : memref<2x8x32xf32, #tpu.memory_space<vmem>>, vector<2x8x32xf32>
      %c0_94 = arith.constant 0 : index
      %c0_95 = arith.constant 0 : index
      %c0_96 = arith.constant 0 : index
      %186 = vector.load %arg24[%c0_94, %c0_95, %c0_96] : memref<2x8x32xf32, #tpu.memory_space<vmem>>, vector<2x8x32xf32>
      tpu.vector_store %arg24[%c0_94, %c0_95, %c0_96], %185 {strides = array<i32>} : memref<2x8x32xf32, #tpu.memory_space<vmem>>, vector<2x8x32xf32>,
    } else {
    }
    %c0_i32_2 = arith.constant 0 : i32
    %5 = arith.cmpi eq, %arg1, %c0_i32_2 : i32
    %6 = arith.extui %5 : i1 to i32
    %c0_i32_3 = arith.constant 0 : i32
    %7 = arith.cmpi ne, %6, %c0_i32_3 : i32
    scf.if %7 {
      %c0_91 = arith.constant 0 : index
      %c0_92 = arith.constant 0 : index
      %c0_93 = arith.constant 0 : index
      %185 = vector.load %arg4[%c0_91, %c0_92, %c0_93] : memref<1x1x32xf32, #tpu.memory_space<vmem>>, vector<1x1x32xf32>
      %186 = vector.shape_cast %185 : vector<1x1x32xf32> to vector<1x32xf32>
      %c0_94 = arith.constant 0 : index
      %c0_95 = arith.constant 0 : index
      %187 = vector.load %arg8[%c0_94, %c0_95] : memref<32x32xf32, #tpu.memory_space<vmem>>, vector<32x32xf32>
      %cst_96 = arith.constant dense<0.000000e+00> : vector<1x32xf32>
      %188 = tpu.matmul %186, %187, %cst_96 {dimension_numbers = #tpu.dot_dimension_numbers<[1], [0], [0], [1], [0, 0, 1, 1], [], []>} : vector<1x32xf32>, vector<32x32xf32>, vector<1x32xf32> -> vector<1x32xf32>
      %c0_97 = arith.constant 0 : index
      %c0_98 = arith.constant 0 : index
      %189 = vector.load %arg9[%c0_97, %c0_98] : memref<1x32xf32, #tpu.memory_space<vmem>>, vector<1x32xf32>
      %190 = arith.addf %188, %189 : vector<1x32xf32>
      %191 = arith.negf %190 : vector<1x32xf32>
      %192 = math.exp %191 : vector<1x32xf32>
      %cst_99 = arith.constant 1.000000e+00 : f32
      %193 = vector.broadcast %cst_99 : f32 to vector<1x32xf32>
      %194 = arith.addf %193, %192 : vector<1x32xf32>
      %195 = arith.divf %193, %194 : vector<1x32xf32>
      %196 = arith.mulf %190, %195 : vector<1x32xf32>
      %c0_100 = arith.constant 0 : index
      %c0_101 = arith.constant 0 : index
      %197 = vector.load %arg10[%c0_100, %c0_101] : memref<32x64xf32, #tpu.memory_space<vmem>>, vector<32x64xf32>
      %cst_102 = arith.constant dense<0.000000e+00> : vector<1x64xf32>
      %198 = tpu.matmul %196, %197, %cst_102 {dimension_numbers = #tpu.dot_dimension_numbers<[1], [0], [0], [1], [0, 0, 1, 1], [], []>} : vector<1x32xf32>, vector<32x64xf32>, vector<1x64xf32> -> vector<1x64xf32>
      %c0_103 = arith.constant 0 : index
      %c0_104 = arith.constant 0 : index
      %199 = vector.load %arg11[%c0_103, %c0_104] : memref<1x64xf32, #tpu.memory_space<vmem>>, vector<1x64xf32>
      %200 = arith.addf %198, %199 : vector<1x64xf32>
      %201 = vector.extract_strided_slice %200 {offsets = [0, 0], sizes = [1, 32], strides = [1, 1]} : vector<1x64xf32> to vector<1x32xf32>
      %202 = vector.extract_strided_slice %200 {offsets = [0, 32], sizes = [1, 32], strides = [1, 1]} : vector<1x64xf32> to vector<1x32xf32>
      %c0_105 = arith.constant 0 : index
      %c0_106 = arith.constant 0 : index
      %c0_107 = arith.constant 0 : index
      %203 = vector.load %arg24[%c0_105, %c0_106, %c0_107] : memref<2x8x32xf32, #tpu.memory_space<vmem>>, vector<2x8x32xf32>
      %cst_108 = arith.constant 1.000000e+00 : f32
      %204 = vector.broadcast %cst_108 : f32 to vector<1x32xf32>
      %205 = arith.addf %204, %201 : vector<1x32xf32>
      %206 = vector.shape_cast %205 : vector<1x32xf32> to vector<1x1x32xf32>
      %207 = vector.broadcast %206 : vector<1x1x32xf32> to vector<2x8x32xf32>
      %208 = arith.mulf %203, %207 : vector<2x8x32xf32>
      %209 = vector.shape_cast %202 : vector<1x32xf32> to vector<1x1x32xf32>
      %210 = vector.broadcast %209 : vector<1x1x32xf32> to vector<2x8x32xf32>
      %211 = arith.addf %208, %210 : vector<2x8x32xf32>
      %c0_109 = arith.constant 0 : index
      %c0_110 = arith.constant 0 : index
      %c0_111 = arith.constant 0 : index
      %212 = vector.load %arg25[%c0_109, %c0_110, %c0_111] : memref<2x8x32xf32, #tpu.memory_space<vmem>>, vector<2x8x32xf32>
      tpu.vector_store %arg25[%c0_109, %c0_110, %c0_111], %211 {strides = array<i32>} : memref<2x8x32xf32, #tpu.memory_space<vmem>>, vector<2x8x32xf32>,
    } else {
    }
    %c0 = arith.constant 0 : index
    %c0_4 = arith.constant 0 : index
    %c0_5 = arith.constant 0 : index
    %8 = vector.load %arg12[%c0, %c0_4, %c0_5] : memref<1x1x32xf32, #tpu.memory_space<vmem>>, vector<1x1x32xf32>
    %9 = vector.shape_cast %8 : vector<1x1x32xf32> to vector<1x32xf32>
    %c0_6 = arith.constant 0 : index
    %c0_7 = arith.constant 0 : index
    %c0_8 = arith.constant 0 : index
    %10 = vector.load %arg13[%c0_6, %c0_7, %c0_8] : memref<1x1x32xf32, #tpu.memory_space<vmem>>, vector<1x1x32xf32>
    %11 = vector.shape_cast %10 : vector<1x1x32xf32> to vector<1x32xf32>
    %c0_9 = arith.constant 0 : index
    %c0_10 = arith.constant 0 : index
    %c0_11 = arith.constant 0 : index
    %12 = vector.load %arg14[%c0_9, %c0_10, %c0_11] : memref<1x32x32xf32, #tpu.memory_space<vmem>>, vector<1x32x32xf32>
    %13 = vector.shape_cast %12 : vector<1x32x32xf32> to vector<32x32xf32>
    %c0_12 = arith.constant 0 : index
    %c0_13 = arith.constant 0 : index
    %c0_14 = arith.constant 0 : index
    %14 = vector.load %arg15[%c0_12, %c0_13, %c0_14] : memref<1x1x32xf32, #tpu.memory_space<vmem>>, vector<1x1x32xf32>
    %15 = vector.shape_cast %14 : vector<1x1x32xf32> to vector<1x32xf32>
    %c0_15 = arith.constant 0 : index
    %c0_16 = arith.constant 0 : index
    %c0_17 = arith.constant 0 : index
    %16 = vector.load %arg16[%c0_15, %c0_16, %c0_17] : memref<1x32x32xf32, #tpu.memory_space<vmem>>, vector<1x32x32xf32>
    %17 = vector.shape_cast %16 : vector<1x32x32xf32> to vector<32x32xf32>
    %c0_18 = arith.constant 0 : index
    %c0_19 = arith.constant 0 : index
    %c0_20 = arith.constant 0 : index
    %18 = vector.load %arg17[%c0_18, %c0_19, %c0_20] : memref<1x1x32xf32, #tpu.memory_space<vmem>>, vector<1x1x32xf32>
    %19 = vector.shape_cast %18 : vector<1x1x32xf32> to vector<1x32xf32>
    %c0_21 = arith.constant 0 : index
    %c0_22 = arith.constant 0 : index
    %c0_23 = arith.constant 0 : index
    %20 = vector.load %arg18[%c0_21, %c0_22, %c0_23] : memref<1x1x32xf32, #tpu.memory_space<vmem>>, vector<1x1x32xf32>
    %21 = vector.shape_cast %20 : vector<1x1x32xf32> to vector<1x32xf32>
    %c0_24 = arith.constant 0 : index
    %c0_25 = arith.constant 0 : index
    %c0_26 = arith.constant 0 : index
    %22 = vector.load %arg19[%c0_24, %c0_25, %c0_26] : memref<1x1x32xf32, #tpu.memory_space<vmem>>, vector<1x1x32xf32>
    %23 = vector.shape_cast %22 : vector<1x1x32xf32> to vector<1x32xf32>
    %c0_27 = arith.constant 0 : index
    %c0_28 = arith.constant 0 : index
    %c0_29 = arith.constant 0 : index
    %24 = vector.load %arg20[%c0_27, %c0_28, %c0_29] : memref<1x32x128xf32, #tpu.memory_space<vmem>>, vector<1x32x128xf32>
    %25 = vector.shape_cast %24 : vector<1x32x128xf32> to vector<32x128xf32>
    %c0_30 = arith.constant 0 : index
    %c0_31 = arith.constant 0 : index
    %c0_32 = arith.constant 0 : index
    %26 = vector.load %arg21[%c0_30, %c0_31, %c0_32] : memref<1x1x128xf32, #tpu.memory_space<vmem>>, vector<1x1x128xf32>
    %27 = vector.shape_cast %26 : vector<1x1x128xf32> to vector<1x128xf32>
    %c0_33 = arith.constant 0 : index
    %c0_34 = arith.constant 0 : index
    %c0_35 = arith.constant 0 : index
    %28 = vector.load %arg22[%c0_33, %c0_34, %c0_35] : memref<1x128x32xf32, #tpu.memory_space<vmem>>, vector<1x128x32xf32>
    %29 = vector.shape_cast %28 : vector<1x128x32xf32> to vector<128x32xf32>
    %c0_36 = arith.constant 0 : index
    %c0_37 = arith.constant 0 : index
    %c0_38 = arith.constant 0 : index
    %30 = vector.load %arg23[%c0_36, %c0_37, %c0_38] : memref<1x1x32xf32, #tpu.memory_space<vmem>>, vector<1x1x32xf32>
    %31 = vector.shape_cast %30 : vector<1x1x32xf32> to vector<1x32xf32>
    %c0_39 = arith.constant 0 : index
    %c0_40 = arith.constant 0 : index
    %c0_41 = arith.constant 0 : index
    %32 = vector.load %arg25[%c0_39, %c0_40, %c0_41] : memref<2x8x32xf32, #tpu.memory_space<vmem>>, vector<2x8x32xf32>
    %c0_42 = arith.constant 0 : index
    %c0_43 = arith.constant 0 : index
    %c0_44 = arith.constant 0 : index
    %c0_45 = arith.constant 0 : index
    %33 = vector.load %arg6[%c0_42, %c0_43, %c0_44, %c0_45] : memref<1x2x8x32xf32, #tpu.memory_space<vmem>>, vector<1x2x8x32xf32>
    %34 = vector.shape_cast %33 : vector<1x2x8x32xf32> to vector<2x8x32xf32>
    %c0_46 = arith.constant 0 : index
    %c0_47 = arith.constant 0 : index
    %c0_48 = arith.constant 0 : index
    %c0_49 = arith.constant 0 : index
    %35 = vector.load %arg7[%c0_46, %c0_47, %c0_48, %c0_49] : memref<1x2x8x32xf32, #tpu.memory_space<vmem>>, vector<1x2x8x32xf32>
    %36 = vector.shape_cast %35 : vector<1x2x8x32xf32> to vector<2x8x32xf32>
    %37 = vector.shape_cast %32 : vector<2x8x32xf32> to vector<16x32xf32>
    %cst = arith.constant dense<0.000000e+00> : vector<16xf32>
    %38 = vector.multi_reduction <add>, %37, %cst [1] : vector<16x32xf32> to vector<16xf32>
    %39 = vector.shape_cast %38 : vector<16xf32> to vector<16x1xf32>
    %cst_50 = arith.constant 3.200000e+01 : f32
    %40 = vector.broadcast %cst_50 : f32 to vector<16x1xf32>
    %41 = arith.divf %39, %40 : vector<16x1xf32>
    %42 = vector.broadcast %41 : vector<16x1xf32> to vector<16x32xf32>
    %43 = arith.subf %37, %42 : vector<16x32xf32>
    %44 = arith.mulf %43, %43 : vector<16x32xf32>
    %cst_51 = arith.constant dense<0.000000e+00> : vector<16xf32>
    %45 = vector.multi_reduction <add>, %44, %cst_51 [1] : vector<16x32xf32> to vector<16xf32>
    %46 = vector.shape_cast %45 : vector<16xf32> to vector<16x1xf32>
    %cst_52 = arith.constant 3.200000e+01 : f32
    %47 = vector.broadcast %cst_52 : f32 to vector<16x1xf32>
    %48 = arith.divf %46, %47 : vector<16x1xf32>
    %49 = vector.broadcast %41 : vector<16x1xf32> to vector<16x32xf32>
    %50 = arith.subf %37, %49 : vector<16x32xf32>
    %cst_53 = arith.constant 9.99999974E-6 : f32
    %51 = vector.broadcast %cst_53 : f32 to vector<16x1xf32>
    %52 = arith.addf %48, %51 : vector<16x1xf32>
    %53 = math.rsqrt %52 : vector<16x1xf32>
    %54 = vector.broadcast %53 : vector<16x1xf32> to vector<16x32xf32>
    %55 = arith.mulf %50, %54 : vector<16x32xf32>
    %56 = vector.broadcast %9 : vector<1x32xf32> to vector<16x32xf32>
    %57 = arith.mulf %55, %56 : vector<16x32xf32>
    %58 = vector.broadcast %11 : vector<1x32xf32> to vector<16x32xf32>
    %59 = arith.addf %57, %58 : vector<16x32xf32>
    %cst_54 = arith.constant dense<0.000000e+00> : vector<16x32xf32>
    %60 = tpu.matmul %59, %13, %cst_54 {dimension_numbers = #tpu.dot_dimension_numbers<[1], [0], [0], [1], [0, 0, 1, 1], [], []>} : vector<16x32xf32>, vector<32x32xf32>, vector<16x32xf32> -> vector<16x32xf32>
    %61 = vector.broadcast %15 : vector<1x32xf32> to vector<16x32xf32>
    %62 = arith.addf %60, %61 : vector<16x32xf32>
    %63 = vector.shape_cast %62 : vector<16x32xf32> to vector<2x8x32xf32>
    %64 = vector.extract_strided_slice %63 {offsets = [0, 0, 0], sizes = [2, 8, 8], strides = [1, 1, 1]} : vector<2x8x32xf32> to vector<2x8x8xf32>
    %65 = vector.extract_strided_slice %34 {offsets = [0, 0, 0], sizes = [2, 8, 8], strides = [1, 1, 1]} : vector<2x8x32xf32> to vector<2x8x8xf32>
    "tpu.trace_start"() <{level = 10 : i32, message = "bqd,bkd->bqk"}> : () -> ()
    %cst_55 = arith.constant dense<0.000000e+00> : vector<2x8x8xf32>
    %66 = tpu.matmul %64, %65, %cst_55 {dimension_numbers = #tpu.dot_dimension_numbers<[2], [2], [1], [1], [0, 0, 0, 1, 1, 1], [0], [0]>} : vector<2x8x8xf32>, vector<2x8x8xf32>, vector<2x8x8xf32> -> vector<2x8x8xf32>
    "tpu.trace_stop"() : () -> ()
    %cst_56 = arith.constant 0.353553385 : f32
    %67 = vector.broadcast %cst_56 : f32 to vector<2x8x8xf32>
    %68 = arith.mulf %66, %67 : vector<2x8x8xf32>
    %cst_57 = arith.constant dense<0xFF800000> : vector<2x8xf32>
    %69 = vector.multi_reduction <maximumf>, %68, %cst_57 [2] : vector<2x8x8xf32> to vector<2x8xf32>
    %70 = vector.shape_cast %69 : vector<2x8xf32> to vector<2x8x1xf32>
    %71 = vector.broadcast %70 : vector<2x8x1xf32> to vector<2x8x8xf32>
    %72 = arith.subf %68, %71 : vector<2x8x8xf32>
    %73 = math.exp %72 : vector<2x8x8xf32>
    %cst_58 = arith.constant dense<0.000000e+00> : vector<2x8xf32>
    %74 = vector.multi_reduction <add>, %73, %cst_58 [2] : vector<2x8x8xf32> to vector<2x8xf32>
    %75 = vector.shape_cast %74 : vector<2x8xf32> to vector<2x8x1xf32>
    %76 = tpu.reciprocal %75 {approx = true} : vector<2x8x1xf32> -> vector<2x8x1xf32>
    %77 = vector.broadcast %76 : vector<2x8x1xf32> to vector<2x8x8xf32>
    %78 = arith.mulf %73, %77 : vector<2x8x8xf32>
    %79 = vector.extract_strided_slice %36 {offsets = [0, 0, 0], sizes = [2, 8, 8], strides = [1, 1, 1]} : vector<2x8x32xf32> to vector<2x8x8xf32>
    "tpu.trace_start"() <{level = 10 : i32, message = "bqk,bkd->bqd"}> : () -> ()
    %cst_59 = arith.constant dense<0.000000e+00> : vector<2x8x8xf32>
    %80 = tpu.matmul %78, %79, %cst_59 {dimension_numbers = #tpu.dot_dimension_numbers<[2], [1], [1], [2], [0, 0, 0, 1, 1, 2], [0], [0]>} : vector<2x8x8xf32>, vector<2x8x8xf32>, vector<2x8x8xf32> -> vector<2x8x8xf32>
    "tpu.trace_stop"() : () -> ()
    %81 = vector.extract_strided_slice %63 {offsets = [0, 0, 8], sizes = [2, 8, 8], strides = [1, 1, 1]} : vector<2x8x32xf32> to vector<2x8x8xf32>
    %82 = vector.extract_strided_slice %34 {offsets = [0, 0, 8], sizes = [2, 8, 8], strides = [1, 1, 1]} : vector<2x8x32xf32> to vector<2x8x8xf32>
    "tpu.trace_start"() <{level = 10 : i32, message = "bqd,bkd->bqk"}> : () -> ()
    %cst_60 = arith.constant dense<0.000000e+00> : vector<2x8x8xf32>
    %83 = tpu.matmul %81, %82, %cst_60 {dimension_numbers = #tpu.dot_dimension_numbers<[2], [2], [1], [1], [0, 0, 0, 1, 1, 1], [0], [0]>} : vector<2x8x8xf32>, vector<2x8x8xf32>, vector<2x8x8xf32> -> vector<2x8x8xf32>
    "tpu.trace_stop"() : () -> ()
    %cst_61 = arith.constant 0.353553385 : f32
    %84 = vector.broadcast %cst_61 : f32 to vector<2x8x8xf32>
    %85 = arith.mulf %83, %84 : vector<2x8x8xf32>
    %cst_62 = arith.constant dense<0xFF800000> : vector<2x8xf32>
    %86 = vector.multi_reduction <maximumf>, %85, %cst_62 [2] : vector<2x8x8xf32> to vector<2x8xf32>
    %87 = vector.shape_cast %86 : vector<2x8xf32> to vector<2x8x1xf32>
    %88 = vector.broadcast %87 : vector<2x8x1xf32> to vector<2x8x8xf32>
    %89 = arith.subf %85, %88 : vector<2x8x8xf32>
    %90 = math.exp %89 : vector<2x8x8xf32>
    %cst_63 = arith.constant dense<0.000000e+00> : vector<2x8xf32>
    %91 = vector.multi_reduction <add>, %90, %cst_63 [2] : vector<2x8x8xf32> to vector<2x8xf32>
    %92 = vector.shape_cast %91 : vector<2x8xf32> to vector<2x8x1xf32>
    %93 = tpu.reciprocal %92 {approx = true} : vector<2x8x1xf32> -> vector<2x8x1xf32>
    %94 = vector.broadcast %93 : vector<2x8x1xf32> to vector<2x8x8xf32>
    %95 = arith.mulf %90, %94 : vector<2x8x8xf32>
    %96 = vector.extract_strided_slice %36 {offsets = [0, 0, 8], sizes = [2, 8, 8], strides = [1, 1, 1]} : vector<2x8x32xf32> to vector<2x8x8xf32>
    "tpu.trace_start"() <{level = 10 : i32, message = "bqk,bkd->bqd"}> : () -> ()
    %cst_64 = arith.constant dense<0.000000e+00> : vector<2x8x8xf32>
    %97 = tpu.matmul %95, %96, %cst_64 {dimension_numbers = #tpu.dot_dimension_numbers<[2], [1], [1], [2], [0, 0, 0, 1, 1, 2], [0], [0]>} : vector<2x8x8xf32>, vector<2x8x8xf32>, vector<2x8x8xf32> -> vector<2x8x8xf32>
    "tpu.trace_stop"() : () -> ()
    %98 = vector.extract_strided_slice %63 {offsets = [0, 0, 16], sizes = [2, 8, 8], strides = [1, 1, 1]} : vector<2x8x32xf32> to vector<2x8x8xf32>
    %99 = vector.extract_strided_slice %34 {offsets = [0, 0, 16], sizes = [2, 8, 8], strides = [1, 1, 1]} : vector<2x8x32xf32> to vector<2x8x8xf32>
    "tpu.trace_start"() <{level = 10 : i32, message = "bqd,bkd->bqk"}> : () -> ()
    %cst_65 = arith.constant dense<0.000000e+00> : vector<2x8x8xf32>
    %100 = tpu.matmul %98, %99, %cst_65 {dimension_numbers = #tpu.dot_dimension_numbers<[2], [2], [1], [1], [0, 0, 0, 1, 1, 1], [0], [0]>} : vector<2x8x8xf32>, vector<2x8x8xf32>, vector<2x8x8xf32> -> vector<2x8x8xf32>
    "tpu.trace_stop"() : () -> ()
    %cst_66 = arith.constant 0.353553385 : f32
    %101 = vector.broadcast %cst_66 : f32 to vector<2x8x8xf32>
    %102 = arith.mulf %100, %101 : vector<2x8x8xf32>
    %cst_67 = arith.constant dense<0xFF800000> : vector<2x8xf32>
    %103 = vector.multi_reduction <maximumf>, %102, %cst_67 [2] : vector<2x8x8xf32> to vector<2x8xf32>
    %104 = vector.shape_cast %103 : vector<2x8xf32> to vector<2x8x1xf32>
    %105 = vector.broadcast %104 : vector<2x8x1xf32> to vector<2x8x8xf32>
    %106 = arith.subf %102, %105 : vector<2x8x8xf32>
    %107 = math.exp %106 : vector<2x8x8xf32>
    %cst_68 = arith.constant dense<0.000000e+00> : vector<2x8xf32>
    %108 = vector.multi_reduction <add>, %107, %cst_68 [2] : vector<2x8x8xf32> to vector<2x8xf32>
    %109 = vector.shape_cast %108 : vector<2x8xf32> to vector<2x8x1xf32>
    %110 = tpu.reciprocal %109 {approx = true} : vector<2x8x1xf32> -> vector<2x8x1xf32>
    %111 = vector.broadcast %110 : vector<2x8x1xf32> to vector<2x8x8xf32>
    %112 = arith.mulf %107, %111 : vector<2x8x8xf32>
    %113 = vector.extract_strided_slice %36 {offsets = [0, 0, 16], sizes = [2, 8, 8], strides = [1, 1, 1]} : vector<2x8x32xf32> to vector<2x8x8xf32>
    "tpu.trace_start"() <{level = 10 : i32, message = "bqk,bkd->bqd"}> : () -> ()
    %cst_69 = arith.constant dense<0.000000e+00> : vector<2x8x8xf32>
    %114 = tpu.matmul %112, %113, %cst_69 {dimension_numbers = #tpu.dot_dimension_numbers<[2], [1], [1], [2], [0, 0, 0, 1, 1, 2], [0], [0]>} : vector<2x8x8xf32>, vector<2x8x8xf32>, vector<2x8x8xf32> -> vector<2x8x8xf32>
    "tpu.trace_stop"() : () -> ()
    %115 = vector.extract_strided_slice %63 {offsets = [0, 0, 24], sizes = [2, 8, 8], strides = [1, 1, 1]} : vector<2x8x32xf32> to vector<2x8x8xf32>
    %116 = vector.extract_strided_slice %34 {offsets = [0, 0, 24], sizes = [2, 8, 8], strides = [1, 1, 1]} : vector<2x8x32xf32> to vector<2x8x8xf32>
    "tpu.trace_start"() <{level = 10 : i32, message = "bqd,bkd->bqk"}> : () -> ()
    %cst_70 = arith.constant dense<0.000000e+00> : vector<2x8x8xf32>
    %117 = tpu.matmul %115, %116, %cst_70 {dimension_numbers = #tpu.dot_dimension_numbers<[2], [2], [1], [1], [0, 0, 0, 1, 1, 1], [0], [0]>} : vector<2x8x8xf32>, vector<2x8x8xf32>, vector<2x8x8xf32> -> vector<2x8x8xf32>
    "tpu.trace_stop"() : () -> ()
    %cst_71 = arith.constant 0.353553385 : f32
    %118 = vector.broadcast %cst_71 : f32 to vector<2x8x8xf32>
    %119 = arith.mulf %117, %118 : vector<2x8x8xf32>
    %cst_72 = arith.constant dense<0xFF800000> : vector<2x8xf32>
    %120 = vector.multi_reduction <maximumf>, %119, %cst_72 [2] : vector<2x8x8xf32> to vector<2x8xf32>
    %121 = vector.shape_cast %120 : vector<2x8xf32> to vector<2x8x1xf32>
    %122 = vector.broadcast %121 : vector<2x8x1xf32> to vector<2x8x8xf32>
    %123 = arith.subf %119, %122 : vector<2x8x8xf32>
    %124 = math.exp %123 : vector<2x8x8xf32>
    %cst_73 = arith.constant dense<0.000000e+00> : vector<2x8xf32>
    %125 = vector.multi_reduction <add>, %124, %cst_73 [2] : vector<2x8x8xf32> to vector<2x8xf32>
    %126 = vector.shape_cast %125 : vector<2x8xf32> to vector<2x8x1xf32>
    %127 = tpu.reciprocal %126 {approx = true} : vector<2x8x1xf32> -> vector<2x8x1xf32>
    %128 = vector.broadcast %127 : vector<2x8x1xf32> to vector<2x8x8xf32>
    %129 = arith.mulf %124, %128 : vector<2x8x8xf32>
    %130 = vector.extract_strided_slice %36 {offsets = [0, 0, 24], sizes = [2, 8, 8], strides = [1, 1, 1]} : vector<2x8x32xf32> to vector<2x8x8xf32>
    "tpu.trace_start"() <{level = 10 : i32, message = "bqk,bkd->bqd"}> : () -> ()
    %cst_74 = arith.constant dense<0.000000e+00> : vector<2x8x8xf32>
    %131 = tpu.matmul %129, %130, %cst_74 {dimension_numbers = #tpu.dot_dimension_numbers<[2], [1], [1], [2], [0, 0, 0, 1, 1, 2], [0], [0]>} : vector<2x8x8xf32>, vector<2x8x8xf32>, vector<2x8x8xf32> -> vector<2x8x8xf32>
    "tpu.trace_stop"() : () -> ()
    %132 = tpu.concatenate %80, %97, %114, %131 in 2 : vector<2x8x8xf32>, vector<2x8x8xf32>, vector<2x8x8xf32>, vector<2x8x8xf32> -> vector<2x8x32xf32>
    %133 = vector.shape_cast %132 : vector<2x8x32xf32> to vector<16x32xf32>
    %cst_75 = arith.constant dense<0.000000e+00> : vector<16x32xf32>
    %134 = tpu.matmul %133, %17, %cst_75 {dimension_numbers = #tpu.dot_dimension_numbers<[1], [0], [0], [1], [0, 0, 1, 1], [], []>} : vector<16x32xf32>, vector<32x32xf32>, vector<16x32xf32> -> vector<16x32xf32>
    %135 = vector.broadcast %19 : vector<1x32xf32> to vector<16x32xf32>
    %136 = arith.addf %134, %135 : vector<16x32xf32>
    %137 = arith.addf %37, %136 : vector<16x32xf32>
    %cst_76 = arith.constant dense<0.000000e+00> : vector<16xf32>
    %138 = vector.multi_reduction <add>, %137, %cst_76 [1] : vector<16x32xf32> to vector<16xf32>
    %139 = vector.shape_cast %138 : vector<16xf32> to vector<16x1xf32>
    %cst_77 = arith.constant 3.200000e+01 : f32
    %140 = vector.broadcast %cst_77 : f32 to vector<16x1xf32>
    %141 = arith.divf %139, %140 : vector<16x1xf32>
    %142 = vector.broadcast %141 : vector<16x1xf32> to vector<16x32xf32>
    %143 = arith.subf %137, %142 : vector<16x32xf32>
    %144 = arith.mulf %143, %143 : vector<16x32xf32>
    %cst_78 = arith.constant dense<0.000000e+00> : vector<16xf32>
    %145 = vector.multi_reduction <add>, %144, %cst_78 [1] : vector<16x32xf32> to vector<16xf32>
    %146 = vector.shape_cast %145 : vector<16xf32> to vector<16x1xf32>
    %cst_79 = arith.constant 3.200000e+01 : f32
    %147 = vector.broadcast %cst_79 : f32 to vector<16x1xf32>
    %148 = arith.divf %146, %147 : vector<16x1xf32>
    %149 = vector.broadcast %141 : vector<16x1xf32> to vector<16x32xf32>
    %150 = arith.subf %137, %149 : vector<16x32xf32>
    %cst_80 = arith.constant 9.99999974E-6 : f32
    %151 = vector.broadcast %cst_80 : f32 to vector<16x1xf32>
    %152 = arith.addf %148, %151 : vector<16x1xf32>
    %153 = math.rsqrt %152 : vector<16x1xf32>
    %154 = vector.broadcast %153 : vector<16x1xf32> to vector<16x32xf32>
    %155 = arith.mulf %150, %154 : vector<16x32xf32>
    %156 = vector.broadcast %21 : vector<1x32xf32> to vector<16x32xf32>
    %157 = arith.mulf %155, %156 : vector<16x32xf32>
    %158 = vector.broadcast %23 : vector<1x32xf32> to vector<16x32xf32>
    %159 = arith.addf %157, %158 : vector<16x32xf32>
    %cst_81 = arith.constant dense<0.000000e+00> : vector<16x128xf32>
    %160 = tpu.matmul %159, %25, %cst_81 {dimension_numbers = #tpu.dot_dimension_numbers<[1], [0], [0], [1], [0, 0, 1, 1], [], []>} : vector<16x32xf32>, vector<32x128xf32>, vector<16x128xf32> -> vector<16x128xf32>
    %161 = vector.broadcast %27 : vector<1x128xf32> to vector<16x128xf32>
    %162 = arith.addf %160, %161 : vector<16x128xf32>
    %163 = arith.mulf %162, %162 : vector<16x128xf32>
    %164 = arith.mulf %162, %163 : vector<16x128xf32>
    %cst_82 = arith.constant 4.471500e-02 : f32
    %165 = vector.broadcast %cst_82 : f32 to vector<16x128xf32>
    %166 = arith.mulf %165, %164 : vector<16x128xf32>
    %167 = arith.addf %162, %166 : vector<16x128xf32>
    %cst_83 = arith.constant 0.797884583 : f32
    %168 = vector.broadcast %cst_83 : f32 to vector<16x128xf32>
    %169 = arith.mulf %168, %167 : vector<16x128xf32>
    %170 = math.tanh %169 : vector<16x128xf32>
    %cst_84 = arith.constant 1.000000e+00 : f32
    %171 = vector.broadcast %cst_84 : f32 to vector<16x128xf32>
    %172 = arith.addf %171, %170 : vector<16x128xf32>
    %cst_85 = arith.constant 5.000000e-01 : f32
    %173 = vector.broadcast %cst_85 : f32 to vector<16x128xf32>
    %174 = arith.mulf %173, %172 : vector<16x128xf32>
    %175 = arith.mulf %162, %174 : vector<16x128xf32>
    %cst_86 = arith.constant dense<0.000000e+00> : vector<16x32xf32>
    %176 = tpu.matmul %175, %29, %cst_86 {dimension_numbers = #tpu.dot_dimension_numbers<[1], [0], [0], [1], [0, 0, 1, 1], [], []>} : vector<16x128xf32>, vector<128x32xf32>, vector<16x32xf32> -> vector<16x32xf32>
    %177 = vector.broadcast %31 : vector<1x32xf32> to vector<16x32xf32>
    %178 = arith.addf %176, %177 : vector<16x32xf32>
    %179 = arith.addf %137, %178 : vector<16x32xf32>
    %180 = vector.shape_cast %179 : vector<16x32xf32> to vector<2x8x32xf32>
    %c0_87 = arith.constant 0 : index
    %c0_88 = arith.constant 0 : index
    %c0_89 = arith.constant 0 : index
    %181 = vector.load %arg25[%c0_87, %c0_88, %c0_89] : memref<2x8x32xf32, #tpu.memory_space<vmem>>, vector<2x8x32xf32>
    tpu.vector_store %arg25[%c0_87, %c0_88, %c0_89], %180 {strides = array<i32>} : memref<2x8x32xf32, #tpu.memory_space<vmem>>, vector<2x8x32xf32>,
    %c1_i32 = arith.constant 1 : i32
    %182 = arith.cmpi eq, %arg1, %c1_i32 : i32
    %183 = arith.extui %182 : i1 to i32
    %c0_i32_90 = arith.constant 0 : i32
    %184 = arith.cmpi ne, %183, %c0_i32_90 : i32
    scf.if %184 {
      %185 = arith.index_cast %arg0 : i32 to index
      %c0_91 = arith.constant 0 : index
      %186 = memref.load %arg2[%185, %c0_91] : memref<3x3xf32, #tpu.memory_space<smem>>
      %187 = arith.index_cast %arg0 : i32 to index
      %c1 = arith.constant 1 : index
      %188 = memref.load %arg2[%187, %c1] : memref<3x3xf32, #tpu.memory_space<smem>>
      %189 = arith.index_cast %arg0 : i32 to index
      %c2 = arith.constant 2 : index
      %190 = memref.load %arg2[%189, %c2] : memref<3x3xf32, #tpu.memory_space<smem>>
      %c0_92 = arith.constant 0 : index
      %c0_93 = arith.constant 0 : index
      %c0_94 = arith.constant 0 : index
      %191 = vector.load %arg24[%c0_92, %c0_93, %c0_94] : memref<2x8x32xf32, #tpu.memory_space<vmem>>, vector<2x8x32xf32>
      %192 = vector.broadcast %186 : f32 to vector<2x8x32xf32>
      %193 = arith.mulf %192, %191 : vector<2x8x32xf32>
      %c0_95 = arith.constant 0 : index
      %c0_96 = arith.constant 0 : index
      %c0_97 = arith.constant 0 : index
      %194 = vector.load %arg25[%c0_95, %c0_96, %c0_97] : memref<2x8x32xf32, #tpu.memory_space<vmem>>, vector<2x8x32xf32>
      %195 = vector.broadcast %188 : f32 to vector<2x8x32xf32>
      %196 = arith.mulf %195, %194 : vector<2x8x32xf32>
      %197 = arith.addf %193, %196 : vector<2x8x32xf32>
      %c0_98 = arith.constant 0 : index
      %c0_99 = arith.constant 0 : index
      %c0_100 = arith.constant 0 : index
      %c0_101 = arith.constant 0 : index
      %198 = vector.load %arg5[%c0_98, %c0_99, %c0_100, %c0_101] : memref<1x2x8x32xf32, #tpu.memory_space<vmem>>, vector<1x2x8x32xf32>
      %199 = vector.shape_cast %198 : vector<1x2x8x32xf32> to vector<2x8x32xf32>
      %200 = vector.broadcast %190 : f32 to vector<2x8x32xf32>
      %201 = arith.mulf %200, %199 : vector<2x8x32xf32>
      %202 = arith.addf %197, %201 : vector<2x8x32xf32>
      %c0_102 = arith.constant 0 : index
      %c0_103 = arith.constant 0 : index
      %c0_104 = arith.constant 0 : index
      %203 = vector.load %arg24[%c0_102, %c0_103, %c0_104] : memref<2x8x32xf32, #tpu.memory_space<vmem>>, vector<2x8x32xf32>
      tpu.vector_store %arg24[%c0_102, %c0_103, %c0_104], %202 {strides = array<i32>} : memref<2x8x32xf32, #tpu.memory_space<vmem>>, vector<2x8x32xf32>,
    } else {
    }
    return
  }
  func.func @transform_0(%arg0: i32, %arg1: i32) -> (i32, i32) {
    %c0_i32 = arith.constant 0 : i32
    %c0_i32_0 = arith.constant 0 : i32
    %c0_i32_1 = arith.constant 0 : i32
    return %c0_i32, %c0_i32_0 : i32, i32
  }
  func.func @transform_1(%arg0: i32, %arg1: i32) -> (i32, i32, i32) {
    %c0_i32 = arith.constant 0 : i32
    %c0_i32_0 = arith.constant 0 : i32
    %c0_i32_1 = arith.constant 0 : i32
    %c0_i32_2 = arith.constant 0 : i32
    return %c0_i32, %c0_i32_0, %c0_i32_1 : i32, i32, i32
  }
  func.func @transform_2(%arg0: i32, %arg1: i32) -> (i32, i32, i32) {
    %c0_i32 = arith.constant 0 : i32
    %c0_i32_0 = arith.constant 0 : i32
    %c0_i32_1 = arith.constant 0 : i32
    return %arg0, %c0_i32, %c0_i32_0 : i32, i32, i32
  }
  func.func @transform_3(%arg0: i32, %arg1: i32) -> (i32, i32, i32, i32) {
    %c0_i32 = arith.constant 0 : i32
    %c0_i32_0 = arith.constant 0 : i32
    %c0_i32_1 = arith.constant 0 : i32
    %c0_i32_2 = arith.constant 0 : i32
    return %arg0, %c0_i32, %c0_i32_0, %c0_i32_1 : i32, i32, i32, i32
  }
  func.func @transform_4(%arg0: i32, %arg1: i32) -> (i32, i32, i32, i32) {
    %c0_i32 = arith.constant 0 : i32
    %c0_i32_0 = arith.constant 0 : i32
    %c0_i32_1 = arith.constant 0 : i32
    %c0_i32_2 = arith.constant 0 : i32
    return %arg1, %c0_i32, %c0_i32_0, %c0_i32_1 : i32, i32, i32, i32
  }
  func.func @transform_5(%arg0: i32, %arg1: i32) -> (i32, i32, i32, i32) {
    %c0_i32 = arith.constant 0 : i32
    %c0_i32_0 = arith.constant 0 : i32
    %c0_i32_1 = arith.constant 0 : i32
    %c0_i32_2 = arith.constant 0 : i32
    return %arg1, %c0_i32, %c0_i32_0, %c0_i32_1 : i32, i32, i32, i32
  }
  func.func @transform_6(%arg0: i32, %arg1: i32) -> (i32, i32) {
    %c0_i32 = arith.constant 0 : i32
    %c0_i32_0 = arith.constant 0 : i32
    %c0_i32_1 = arith.constant 0 : i32
    return %c0_i32, %c0_i32_0 : i32, i32
  }
  func.func @transform_7(%arg0: i32, %arg1: i32) -> (i32, i32) {
    %c0_i32 = arith.constant 0 : i32
    %c0_i32_0 = arith.constant 0 : i32
    %c0_i32_1 = arith.constant 0 : i32
    return %c0_i32, %c0_i32_0 : i32, i32
  }
  func.func @transform_8(%arg0: i32, %arg1: i32) -> (i32, i32) {
    %c0_i32 = arith.constant 0 : i32
    %c0_i32_0 = arith.constant 0 : i32
    %c0_i32_1 = arith.constant 0 : i32
    return %c0_i32, %c0_i32_0 : i32, i32
  }
  func.func @transform_9(%arg0: i32, %arg1: i32) -> (i32, i32) {
    %c0_i32 = arith.constant 0 : i32
    %c0_i32_0 = arith.constant 0 : i32
    %c0_i32_1 = arith.constant 0 : i32
    return %c0_i32, %c0_i32_0 : i32, i32
  }
  func.func @transform_10(%arg0: i32, %arg1: i32) -> (i32, i32, i32) {
    %c0_i32 = arith.constant 0 : i32
    %c0_i32_0 = arith.constant 0 : i32
    %c0_i32_1 = arith.constant 0 : i32
    return %arg1, %c0_i32, %c0_i32_0 : i32, i32, i32
  }
  func.func @transform_11(%arg0: i32, %arg1: i32) -> (i32, i32, i32) {
    %c0_i32 = arith.constant 0 : i32
    %c0_i32_0 = arith.constant 0 : i32
    %c0_i32_1 = arith.constant 0 : i32
    return %arg1, %c0_i32, %c0_i32_0 : i32, i32, i32
  }
  func.func @transform_12(%arg0: i32, %arg1: i32) -> (i32, i32, i32) {
    %c0_i32 = arith.constant 0 : i32
    %c0_i32_0 = arith.constant 0 : i32
    %c0_i32_1 = arith.constant 0 : i32
    return %arg1, %c0_i32, %c0_i32_0 : i32, i32, i32
  }
  func.func @transform_13(%arg0: i32, %arg1: i32) -> (i32, i32, i32) {
    %c0_i32 = arith.constant 0 : i32
    %c0_i32_0 = arith.constant 0 : i32
    %c0_i32_1 = arith.constant 0 : i32
    return %arg1, %c0_i32, %c0_i32_0 : i32, i32, i32
  }
  func.func @transform_14(%arg0: i32, %arg1: i32) -> (i32, i32, i32) {
    %c0_i32 = arith.constant 0 : i32
    %c0_i32_0 = arith.constant 0 : i32
    %c0_i32_1 = arith.constant 0 : i32
    return %arg1, %c0_i32, %c0_i32_0 : i32, i32, i32
  }
  func.func @transform_15(%arg0: i32, %arg1: i32) -> (i32, i32, i32) {
    %c0_i32 = arith.constant 0 : i32
    %c0_i32_0 = arith.constant 0 : i32
    %c0_i32_1 = arith.constant 0 : i32
    return %arg1, %c0_i32, %c0_i32_0 : i32, i32, i32
  }
  func.func @transform_16(%arg0: i32, %arg1: i32) -> (i32, i32, i32) {
    %c0_i32 = arith.constant 0 : i32
    %c0_i32_0 = arith.constant 0 : i32
    %c0_i32_1 = arith.constant 0 : i32
    return %arg1, %c0_i32, %c0_i32_0 : i32, i32, i32
  }
  func.func @transform_17(%arg0: i32, %arg1: i32) -> (i32, i32, i32) {
    %c0_i32 = arith.constant 0 : i32
    %c0_i32_0 = arith.constant 0 : i32
    %c0_i32_1 = arith.constant 0 : i32
    return %arg1, %c0_i32, %c0_i32_0 : i32, i32, i32
  }
  func.func @transform_18(%arg0: i32, %arg1: i32) -> (i32, i32, i32) {
    %c0_i32 = arith.constant 0 : i32
    %c0_i32_0 = arith.constant 0 : i32
    %c0_i32_1 = arith.constant 0 : i32
    return %arg1, %c0_i32, %c0_i32_0 : i32, i32, i32
  }
  func.func @transform_19(%arg0: i32, %arg1: i32) -> (i32, i32, i32) {
    %c0_i32 = arith.constant 0 : i32
    %c0_i32_0 = arith.constant 0 : i32
    %c0_i32_1 = arith.constant 0 : i32
    return %arg1, %c0_i32, %c0_i32_0 : i32, i32, i32
  }
  func.func @transform_20(%arg0: i32, %arg1: i32) -> (i32, i32, i32) {
    %c0_i32 = arith.constant 0 : i32
    %c0_i32_0 = arith.constant 0 : i32
    %c0_i32_1 = arith.constant 0 : i32
    return %arg1, %c0_i32, %c0_i32_0 : i32, i32, i32
  }
  func.func @transform_21(%arg0: i32, %arg1: i32) -> (i32, i32, i32) {
    %c0_i32 = arith.constant 0 : i32
    %c0_i32_0 = arith.constant 0 : i32
    %c0_i32_1 = arith.constant 0 : i32
    return %arg1, %c0_i32, %c0_i32_0 : i32, i32, i32
  }
  func.func @transform_22(%arg0: i32, %arg1: i32) -> (i32, i32, i32) {
    %c0_i32 = arith.constant 0 : i32
    %c0_i32_0 = arith.constant 0 : i32
    %c0_i32_1 = arith.constant 0 : i32
    %c0_i32_2 = arith.constant 0 : i32
    return %c0_i32, %c0_i32_0, %c0_i32_1 : i32, i32, i32
  }
}

module attributes {stable_mosaic.version = 11 : i64} {
  func.func @_decoder_kernel(%arg0: i32, %arg1: memref<2x8x32xf32, #tpu.memory_space<vmem>>, %arg2: memref<1x32xf32, #tpu.memory_space<vmem>>, %arg3: memref<1x32xf32, #tpu.memory_space<vmem>>, %arg4: memref<32x128xf32, #tpu.memory_space<vmem>>, %arg5: memref<1x128xf32, #tpu.memory_space<vmem>>, %arg6: memref<1x1x32xf32, #tpu.memory_space<vmem>>, %arg7: memref<1x1x32xf32, #tpu.memory_space<vmem>>, %arg8: memref<1x32x96xf32, #tpu.memory_space<vmem>>, %arg9: memref<1x1x96xf32, #tpu.memory_space<vmem>>, %arg10: memref<1x32x32xf32, #tpu.memory_space<vmem>>, %arg11: memref<1x1x32xf32, #tpu.memory_space<vmem>>, %arg12: memref<1x1x32xf32, #tpu.memory_space<vmem>>, %arg13: memref<1x1x32xf32, #tpu.memory_space<vmem>>, %arg14: memref<1x32x128xf32, #tpu.memory_space<vmem>>, %arg15: memref<1x1x128xf32, #tpu.memory_space<vmem>>, %arg16: memref<1x128x32xf32, #tpu.memory_space<vmem>>, %arg17: memref<1x1x32xf32, #tpu.memory_space<vmem>>, %arg18: memref<2x8x128xf32, #tpu.memory_space<vmem>>, %arg19: memref<2x8x32xf32, #tpu.memory_space<vmem>>) attributes {dimension_semantics = [#tpu.dimension_semantics<arbitrary>], iteration_bounds = array<i64: 2>, scalar_prefetch = 0 : i64, scratch_operands = 1 : i64, tpu.core_type = #tpu.core_type<tc>, window_params = [{pipeline_mode = #tpu.pipeline_mode<synchronous>, transform_indices = @transform_0, window_bounds = array<i64: 2, 8, 32>}, {pipeline_mode = #tpu.pipeline_mode<synchronous>, transform_indices = @transform_1, window_bounds = array<i64: 1, 32>}, {pipeline_mode = #tpu.pipeline_mode<synchronous>, transform_indices = @transform_2, window_bounds = array<i64: 1, 32>}, {pipeline_mode = #tpu.pipeline_mode<synchronous>, transform_indices = @transform_3, window_bounds = array<i64: 32, 128>}, {pipeline_mode = #tpu.pipeline_mode<synchronous>, transform_indices = @transform_4, window_bounds = array<i64: 1, 128>}, {transform_indices = @transform_5, window_bounds = array<i64: 1, 1, 32>}, {transform_indices = @transform_6, window_bounds = array<i64: 1, 1, 32>}, {transform_indices = @transform_7, window_bounds = array<i64: 1, 32, 96>}, {transform_indices = @transform_8, window_bounds = array<i64: 1, 1, 96>}, {transform_indices = @transform_9, window_bounds = array<i64: 1, 32, 32>}, {transform_indices = @transform_10, window_bounds = array<i64: 1, 1, 32>}, {transform_indices = @transform_11, window_bounds = array<i64: 1, 1, 32>}, {transform_indices = @transform_12, window_bounds = array<i64: 1, 1, 32>}, {transform_indices = @transform_13, window_bounds = array<i64: 1, 32, 128>}, {transform_indices = @transform_14, window_bounds = array<i64: 1, 1, 128>}, {transform_indices = @transform_15, window_bounds = array<i64: 1, 128, 32>}, {transform_indices = @transform_16, window_bounds = array<i64: 1, 1, 32>}, {pipeline_mode = #tpu.pipeline_mode<synchronous>, transform_indices = @transform_17, window_bounds = array<i64: 2, 8, 128>}]} {
    %c0_i32 = arith.constant 0 : i32
    %0 = arith.cmpi eq, %arg0, %c0_i32 : i32
    %1 = arith.extui %0 : i1 to i32
    %c0_i32_0 = arith.constant 0 : i32
    %2 = arith.cmpi ne, %1, %c0_i32_0 : i32
    scf.if %2 {
      %c0_80 = arith.constant 0 : index
      %c0_81 = arith.constant 0 : index
      %c0_82 = arith.constant 0 : index
      %179 = vector.load %arg1[%c0_80, %c0_81, %c0_82] : memref<2x8x32xf32, #tpu.memory_space<vmem>>, vector<2x8x32xf32>
      %c0_83 = arith.constant 0 : index
      %c0_84 = arith.constant 0 : index
      %c0_85 = arith.constant 0 : index
      %180 = vector.load %arg19[%c0_83, %c0_84, %c0_85] : memref<2x8x32xf32, #tpu.memory_space<vmem>>, vector<2x8x32xf32>
      tpu.vector_store %arg19[%c0_83, %c0_84, %c0_85], %179 {strides = array<i32>} : memref<2x8x32xf32, #tpu.memory_space<vmem>>, vector<2x8x32xf32>,
    } else {
    }
    %c0 = arith.constant 0 : index
    %c0_1 = arith.constant 0 : index
    %c0_2 = arith.constant 0 : index
    %3 = vector.load %arg6[%c0, %c0_1, %c0_2] : memref<1x1x32xf32, #tpu.memory_space<vmem>>, vector<1x1x32xf32>
    %4 = vector.shape_cast %3 : vector<1x1x32xf32> to vector<1x32xf32>
    %c0_3 = arith.constant 0 : index
    %c0_4 = arith.constant 0 : index
    %c0_5 = arith.constant 0 : index
    %5 = vector.load %arg7[%c0_3, %c0_4, %c0_5] : memref<1x1x32xf32, #tpu.memory_space<vmem>>, vector<1x1x32xf32>
    %6 = vector.shape_cast %5 : vector<1x1x32xf32> to vector<1x32xf32>
    %c0_6 = arith.constant 0 : index
    %c0_7 = arith.constant 0 : index
    %c0_8 = arith.constant 0 : index
    %7 = vector.load %arg8[%c0_6, %c0_7, %c0_8] : memref<1x32x96xf32, #tpu.memory_space<vmem>>, vector<1x32x96xf32>
    %8 = vector.shape_cast %7 : vector<1x32x96xf32> to vector<32x96xf32>
    %c0_9 = arith.constant 0 : index
    %c0_10 = arith.constant 0 : index
    %c0_11 = arith.constant 0 : index
    %9 = vector.load %arg9[%c0_9, %c0_10, %c0_11] : memref<1x1x96xf32, #tpu.memory_space<vmem>>, vector<1x1x96xf32>
    %10 = vector.shape_cast %9 : vector<1x1x96xf32> to vector<1x96xf32>
    %c0_12 = arith.constant 0 : index
    %c0_13 = arith.constant 0 : index
    %c0_14 = arith.constant 0 : index
    %11 = vector.load %arg10[%c0_12, %c0_13, %c0_14] : memref<1x32x32xf32, #tpu.memory_space<vmem>>, vector<1x32x32xf32>
    %12 = vector.shape_cast %11 : vector<1x32x32xf32> to vector<32x32xf32>
    %c0_15 = arith.constant 0 : index
    %c0_16 = arith.constant 0 : index
    %c0_17 = arith.constant 0 : index
    %13 = vector.load %arg11[%c0_15, %c0_16, %c0_17] : memref<1x1x32xf32, #tpu.memory_space<vmem>>, vector<1x1x32xf32>
    %14 = vector.shape_cast %13 : vector<1x1x32xf32> to vector<1x32xf32>
    %c0_18 = arith.constant 0 : index
    %c0_19 = arith.constant 0 : index
    %c0_20 = arith.constant 0 : index
    %15 = vector.load %arg12[%c0_18, %c0_19, %c0_20] : memref<1x1x32xf32, #tpu.memory_space<vmem>>, vector<1x1x32xf32>
    %16 = vector.shape_cast %15 : vector<1x1x32xf32> to vector<1x32xf32>
    %c0_21 = arith.constant 0 : index
    %c0_22 = arith.constant 0 : index
    %c0_23 = arith.constant 0 : index
    %17 = vector.load %arg13[%c0_21, %c0_22, %c0_23] : memref<1x1x32xf32, #tpu.memory_space<vmem>>, vector<1x1x32xf32>
    %18 = vector.shape_cast %17 : vector<1x1x32xf32> to vector<1x32xf32>
    %c0_24 = arith.constant 0 : index
    %c0_25 = arith.constant 0 : index
    %c0_26 = arith.constant 0 : index
    %19 = vector.load %arg14[%c0_24, %c0_25, %c0_26] : memref<1x32x128xf32, #tpu.memory_space<vmem>>, vector<1x32x128xf32>
    %20 = vector.shape_cast %19 : vector<1x32x128xf32> to vector<32x128xf32>
    %c0_27 = arith.constant 0 : index
    %c0_28 = arith.constant 0 : index
    %c0_29 = arith.constant 0 : index
    %21 = vector.load %arg15[%c0_27, %c0_28, %c0_29] : memref<1x1x128xf32, #tpu.memory_space<vmem>>, vector<1x1x128xf32>
    %22 = vector.shape_cast %21 : vector<1x1x128xf32> to vector<1x128xf32>
    %c0_30 = arith.constant 0 : index
    %c0_31 = arith.constant 0 : index
    %c0_32 = arith.constant 0 : index
    %23 = vector.load %arg16[%c0_30, %c0_31, %c0_32] : memref<1x128x32xf32, #tpu.memory_space<vmem>>, vector<1x128x32xf32>
    %24 = vector.shape_cast %23 : vector<1x128x32xf32> to vector<128x32xf32>
    %c0_33 = arith.constant 0 : index
    %c0_34 = arith.constant 0 : index
    %c0_35 = arith.constant 0 : index
    %25 = vector.load %arg17[%c0_33, %c0_34, %c0_35] : memref<1x1x32xf32, #tpu.memory_space<vmem>>, vector<1x1x32xf32>
    %26 = vector.shape_cast %25 : vector<1x1x32xf32> to vector<1x32xf32>
    %c0_36 = arith.constant 0 : index
    %c0_37 = arith.constant 0 : index
    %c0_38 = arith.constant 0 : index
    %27 = vector.load %arg19[%c0_36, %c0_37, %c0_38] : memref<2x8x32xf32, #tpu.memory_space<vmem>>, vector<2x8x32xf32>
    %28 = vector.shape_cast %27 : vector<2x8x32xf32> to vector<16x32xf32>
    %cst = arith.constant dense<0.000000e+00> : vector<16xf32>
    %29 = vector.multi_reduction <add>, %28, %cst [1] : vector<16x32xf32> to vector<16xf32>
    %30 = vector.shape_cast %29 : vector<16xf32> to vector<16x1xf32>
    %cst_39 = arith.constant 3.200000e+01 : f32
    %31 = vector.broadcast %cst_39 : f32 to vector<16x1xf32>
    %32 = arith.divf %30, %31 : vector<16x1xf32>
    %33 = vector.broadcast %32 : vector<16x1xf32> to vector<16x32xf32>
    %34 = arith.subf %28, %33 : vector<16x32xf32>
    %35 = arith.mulf %34, %34 : vector<16x32xf32>
    %cst_40 = arith.constant dense<0.000000e+00> : vector<16xf32>
    %36 = vector.multi_reduction <add>, %35, %cst_40 [1] : vector<16x32xf32> to vector<16xf32>
    %37 = vector.shape_cast %36 : vector<16xf32> to vector<16x1xf32>
    %cst_41 = arith.constant 3.200000e+01 : f32
    %38 = vector.broadcast %cst_41 : f32 to vector<16x1xf32>
    %39 = arith.divf %37, %38 : vector<16x1xf32>
    %40 = vector.broadcast %32 : vector<16x1xf32> to vector<16x32xf32>
    %41 = arith.subf %28, %40 : vector<16x32xf32>
    %cst_42 = arith.constant 9.99999974E-6 : f32
    %42 = vector.broadcast %cst_42 : f32 to vector<16x1xf32>
    %43 = arith.addf %39, %42 : vector<16x1xf32>
    %44 = math.rsqrt %43 : vector<16x1xf32>
    %45 = vector.broadcast %44 : vector<16x1xf32> to vector<16x32xf32>
    %46 = arith.mulf %41, %45 : vector<16x32xf32>
    %47 = vector.broadcast %4 : vector<1x32xf32> to vector<16x32xf32>
    %48 = arith.mulf %46, %47 : vector<16x32xf32>
    %49 = vector.broadcast %6 : vector<1x32xf32> to vector<16x32xf32>
    %50 = arith.addf %48, %49 : vector<16x32xf32>
    %cst_43 = arith.constant dense<0.000000e+00> : vector<16x96xf32>
    %51 = tpu.matmul %50, %8, %cst_43 {dimension_numbers = #tpu.dot_dimension_numbers<[1], [0], [0], [1], [0, 0, 1, 1], [], []>} : vector<16x32xf32>, vector<32x96xf32>, vector<16x96xf32> -> vector<16x96xf32>
    %52 = vector.broadcast %10 : vector<1x96xf32> to vector<16x96xf32>
    %53 = arith.addf %51, %52 : vector<16x96xf32>
    %54 = vector.shape_cast %53 : vector<16x96xf32> to vector<2x8x96xf32>
    %55 = vector.extract_strided_slice %54 {offsets = [0, 0, 0], sizes = [2, 8, 32], strides = [1, 1, 1]} : vector<2x8x96xf32> to vector<2x8x32xf32>
    %56 = vector.extract_strided_slice %54 {offsets = [0, 0, 32], sizes = [2, 8, 32], strides = [1, 1, 1]} : vector<2x8x96xf32> to vector<2x8x32xf32>
    %57 = vector.extract_strided_slice %54 {offsets = [0, 0, 64], sizes = [2, 8, 32], strides = [1, 1, 1]} : vector<2x8x96xf32> to vector<2x8x32xf32>
    %58 = vector.extract_strided_slice %55 {offsets = [0, 0, 0], sizes = [2, 8, 8], strides = [1, 1, 1]} : vector<2x8x32xf32> to vector<2x8x8xf32>
    %59 = vector.extract_strided_slice %56 {offsets = [0, 0, 0], sizes = [2, 8, 8], strides = [1, 1, 1]} : vector<2x8x32xf32> to vector<2x8x8xf32>
    "tpu.trace_start"() <{level = 10 : i32, message = "bqd,bkd->bqk"}> : () -> ()
    %cst_44 = arith.constant dense<0.000000e+00> : vector<2x8x8xf32>
    %60 = tpu.matmul %58, %59, %cst_44 {dimension_numbers = #tpu.dot_dimension_numbers<[2], [2], [1], [1], [0, 0, 0, 1, 1, 1], [0], [0]>} : vector<2x8x8xf32>, vector<2x8x8xf32>, vector<2x8x8xf32> -> vector<2x8x8xf32>
    "tpu.trace_stop"() : () -> ()
    %cst_45 = arith.constant 0.353553385 : f32
    %61 = vector.broadcast %cst_45 : f32 to vector<2x8x8xf32>
    %62 = arith.mulf %60, %61 : vector<2x8x8xf32>
    %cst_46 = arith.constant dense<0xFF800000> : vector<2x8xf32>
    %63 = vector.multi_reduction <maximumf>, %62, %cst_46 [2] : vector<2x8x8xf32> to vector<2x8xf32>
    %64 = vector.shape_cast %63 : vector<2x8xf32> to vector<2x8x1xf32>
    %65 = vector.broadcast %64 : vector<2x8x1xf32> to vector<2x8x8xf32>
    %66 = arith.subf %62, %65 : vector<2x8x8xf32>
    %67 = math.exp %66 : vector<2x8x8xf32>
    %cst_47 = arith.constant dense<0.000000e+00> : vector<2x8xf32>
    %68 = vector.multi_reduction <add>, %67, %cst_47 [2] : vector<2x8x8xf32> to vector<2x8xf32>
    %69 = vector.shape_cast %68 : vector<2x8xf32> to vector<2x8x1xf32>
    %70 = tpu.reciprocal %69 {approx = true} : vector<2x8x1xf32> -> vector<2x8x1xf32>
    %71 = vector.broadcast %70 : vector<2x8x1xf32> to vector<2x8x8xf32>
    %72 = arith.mulf %67, %71 : vector<2x8x8xf32>
    %73 = vector.extract_strided_slice %57 {offsets = [0, 0, 0], sizes = [2, 8, 8], strides = [1, 1, 1]} : vector<2x8x32xf32> to vector<2x8x8xf32>
    "tpu.trace_start"() <{level = 10 : i32, message = "bqk,bkd->bqd"}> : () -> ()
    %cst_48 = arith.constant dense<0.000000e+00> : vector<2x8x8xf32>
    %74 = tpu.matmul %72, %73, %cst_48 {dimension_numbers = #tpu.dot_dimension_numbers<[2], [1], [1], [2], [0, 0, 0, 1, 1, 2], [0], [0]>} : vector<2x8x8xf32>, vector<2x8x8xf32>, vector<2x8x8xf32> -> vector<2x8x8xf32>
    "tpu.trace_stop"() : () -> ()
    %75 = vector.extract_strided_slice %55 {offsets = [0, 0, 8], sizes = [2, 8, 8], strides = [1, 1, 1]} : vector<2x8x32xf32> to vector<2x8x8xf32>
    %76 = vector.extract_strided_slice %56 {offsets = [0, 0, 8], sizes = [2, 8, 8], strides = [1, 1, 1]} : vector<2x8x32xf32> to vector<2x8x8xf32>
    "tpu.trace_start"() <{level = 10 : i32, message = "bqd,bkd->bqk"}> : () -> ()
    %cst_49 = arith.constant dense<0.000000e+00> : vector<2x8x8xf32>
    %77 = tpu.matmul %75, %76, %cst_49 {dimension_numbers = #tpu.dot_dimension_numbers<[2], [2], [1], [1], [0, 0, 0, 1, 1, 1], [0], [0]>} : vector<2x8x8xf32>, vector<2x8x8xf32>, vector<2x8x8xf32> -> vector<2x8x8xf32>
    "tpu.trace_stop"() : () -> ()
    %cst_50 = arith.constant 0.353553385 : f32
    %78 = vector.broadcast %cst_50 : f32 to vector<2x8x8xf32>
    %79 = arith.mulf %77, %78 : vector<2x8x8xf32>
    %cst_51 = arith.constant dense<0xFF800000> : vector<2x8xf32>
    %80 = vector.multi_reduction <maximumf>, %79, %cst_51 [2] : vector<2x8x8xf32> to vector<2x8xf32>
    %81 = vector.shape_cast %80 : vector<2x8xf32> to vector<2x8x1xf32>
    %82 = vector.broadcast %81 : vector<2x8x1xf32> to vector<2x8x8xf32>
    %83 = arith.subf %79, %82 : vector<2x8x8xf32>
    %84 = math.exp %83 : vector<2x8x8xf32>
    %cst_52 = arith.constant dense<0.000000e+00> : vector<2x8xf32>
    %85 = vector.multi_reduction <add>, %84, %cst_52 [2] : vector<2x8x8xf32> to vector<2x8xf32>
    %86 = vector.shape_cast %85 : vector<2x8xf32> to vector<2x8x1xf32>
    %87 = tpu.reciprocal %86 {approx = true} : vector<2x8x1xf32> -> vector<2x8x1xf32>
    %88 = vector.broadcast %87 : vector<2x8x1xf32> to vector<2x8x8xf32>
    %89 = arith.mulf %84, %88 : vector<2x8x8xf32>
    %90 = vector.extract_strided_slice %57 {offsets = [0, 0, 8], sizes = [2, 8, 8], strides = [1, 1, 1]} : vector<2x8x32xf32> to vector<2x8x8xf32>
    "tpu.trace_start"() <{level = 10 : i32, message = "bqk,bkd->bqd"}> : () -> ()
    %cst_53 = arith.constant dense<0.000000e+00> : vector<2x8x8xf32>
    %91 = tpu.matmul %89, %90, %cst_53 {dimension_numbers = #tpu.dot_dimension_numbers<[2], [1], [1], [2], [0, 0, 0, 1, 1, 2], [0], [0]>} : vector<2x8x8xf32>, vector<2x8x8xf32>, vector<2x8x8xf32> -> vector<2x8x8xf32>
    "tpu.trace_stop"() : () -> ()
    %92 = vector.extract_strided_slice %55 {offsets = [0, 0, 16], sizes = [2, 8, 8], strides = [1, 1, 1]} : vector<2x8x32xf32> to vector<2x8x8xf32>
    %93 = vector.extract_strided_slice %56 {offsets = [0, 0, 16], sizes = [2, 8, 8], strides = [1, 1, 1]} : vector<2x8x32xf32> to vector<2x8x8xf32>
    "tpu.trace_start"() <{level = 10 : i32, message = "bqd,bkd->bqk"}> : () -> ()
    %cst_54 = arith.constant dense<0.000000e+00> : vector<2x8x8xf32>
    %94 = tpu.matmul %92, %93, %cst_54 {dimension_numbers = #tpu.dot_dimension_numbers<[2], [2], [1], [1], [0, 0, 0, 1, 1, 1], [0], [0]>} : vector<2x8x8xf32>, vector<2x8x8xf32>, vector<2x8x8xf32> -> vector<2x8x8xf32>
    "tpu.trace_stop"() : () -> ()
    %cst_55 = arith.constant 0.353553385 : f32
    %95 = vector.broadcast %cst_55 : f32 to vector<2x8x8xf32>
    %96 = arith.mulf %94, %95 : vector<2x8x8xf32>
    %cst_56 = arith.constant dense<0xFF800000> : vector<2x8xf32>
    %97 = vector.multi_reduction <maximumf>, %96, %cst_56 [2] : vector<2x8x8xf32> to vector<2x8xf32>
    %98 = vector.shape_cast %97 : vector<2x8xf32> to vector<2x8x1xf32>
    %99 = vector.broadcast %98 : vector<2x8x1xf32> to vector<2x8x8xf32>
    %100 = arith.subf %96, %99 : vector<2x8x8xf32>
    %101 = math.exp %100 : vector<2x8x8xf32>
    %cst_57 = arith.constant dense<0.000000e+00> : vector<2x8xf32>
    %102 = vector.multi_reduction <add>, %101, %cst_57 [2] : vector<2x8x8xf32> to vector<2x8xf32>
    %103 = vector.shape_cast %102 : vector<2x8xf32> to vector<2x8x1xf32>
    %104 = tpu.reciprocal %103 {approx = true} : vector<2x8x1xf32> -> vector<2x8x1xf32>
    %105 = vector.broadcast %104 : vector<2x8x1xf32> to vector<2x8x8xf32>
    %106 = arith.mulf %101, %105 : vector<2x8x8xf32>
    %107 = vector.extract_strided_slice %57 {offsets = [0, 0, 16], sizes = [2, 8, 8], strides = [1, 1, 1]} : vector<2x8x32xf32> to vector<2x8x8xf32>
    "tpu.trace_start"() <{level = 10 : i32, message = "bqk,bkd->bqd"}> : () -> ()
    %cst_58 = arith.constant dense<0.000000e+00> : vector<2x8x8xf32>
    %108 = tpu.matmul %106, %107, %cst_58 {dimension_numbers = #tpu.dot_dimension_numbers<[2], [1], [1], [2], [0, 0, 0, 1, 1, 2], [0], [0]>} : vector<2x8x8xf32>, vector<2x8x8xf32>, vector<2x8x8xf32> -> vector<2x8x8xf32>
    "tpu.trace_stop"() : () -> ()
    %109 = vector.extract_strided_slice %55 {offsets = [0, 0, 24], sizes = [2, 8, 8], strides = [1, 1, 1]} : vector<2x8x32xf32> to vector<2x8x8xf32>
    %110 = vector.extract_strided_slice %56 {offsets = [0, 0, 24], sizes = [2, 8, 8], strides = [1, 1, 1]} : vector<2x8x32xf32> to vector<2x8x8xf32>
    "tpu.trace_start"() <{level = 10 : i32, message = "bqd,bkd->bqk"}> : () -> ()
    %cst_59 = arith.constant dense<0.000000e+00> : vector<2x8x8xf32>
    %111 = tpu.matmul %109, %110, %cst_59 {dimension_numbers = #tpu.dot_dimension_numbers<[2], [2], [1], [1], [0, 0, 0, 1, 1, 1], [0], [0]>} : vector<2x8x8xf32>, vector<2x8x8xf32>, vector<2x8x8xf32> -> vector<2x8x8xf32>
    "tpu.trace_stop"() : () -> ()
    %cst_60 = arith.constant 0.353553385 : f32
    %112 = vector.broadcast %cst_60 : f32 to vector<2x8x8xf32>
    %113 = arith.mulf %111, %112 : vector<2x8x8xf32>
    %cst_61 = arith.constant dense<0xFF800000> : vector<2x8xf32>
    %114 = vector.multi_reduction <maximumf>, %113, %cst_61 [2] : vector<2x8x8xf32> to vector<2x8xf32>
    %115 = vector.shape_cast %114 : vector<2x8xf32> to vector<2x8x1xf32>
    %116 = vector.broadcast %115 : vector<2x8x1xf32> to vector<2x8x8xf32>
    %117 = arith.subf %113, %116 : vector<2x8x8xf32>
    %118 = math.exp %117 : vector<2x8x8xf32>
    %cst_62 = arith.constant dense<0.000000e+00> : vector<2x8xf32>
    %119 = vector.multi_reduction <add>, %118, %cst_62 [2] : vector<2x8x8xf32> to vector<2x8xf32>
    %120 = vector.shape_cast %119 : vector<2x8xf32> to vector<2x8x1xf32>
    %121 = tpu.reciprocal %120 {approx = true} : vector<2x8x1xf32> -> vector<2x8x1xf32>
    %122 = vector.broadcast %121 : vector<2x8x1xf32> to vector<2x8x8xf32>
    %123 = arith.mulf %118, %122 : vector<2x8x8xf32>
    %124 = vector.extract_strided_slice %57 {offsets = [0, 0, 24], sizes = [2, 8, 8], strides = [1, 1, 1]} : vector<2x8x32xf32> to vector<2x8x8xf32>
    "tpu.trace_start"() <{level = 10 : i32, message = "bqk,bkd->bqd"}> : () -> ()
    %cst_63 = arith.constant dense<0.000000e+00> : vector<2x8x8xf32>
    %125 = tpu.matmul %123, %124, %cst_63 {dimension_numbers = #tpu.dot_dimension_numbers<[2], [1], [1], [2], [0, 0, 0, 1, 1, 2], [0], [0]>} : vector<2x8x8xf32>, vector<2x8x8xf32>, vector<2x8x8xf32> -> vector<2x8x8xf32>
    "tpu.trace_stop"() : () -> ()
    %126 = tpu.concatenate %74, %91, %108, %125 in 2 : vector<2x8x8xf32>, vector<2x8x8xf32>, vector<2x8x8xf32>, vector<2x8x8xf32> -> vector<2x8x32xf32>
    %127 = vector.shape_cast %126 : vector<2x8x32xf32> to vector<16x32xf32>
    %cst_64 = arith.constant dense<0.000000e+00> : vector<16x32xf32>
    %128 = tpu.matmul %127, %12, %cst_64 {dimension_numbers = #tpu.dot_dimension_numbers<[1], [0], [0], [1], [0, 0, 1, 1], [], []>} : vector<16x32xf32>, vector<32x32xf32>, vector<16x32xf32> -> vector<16x32xf32>
    %129 = vector.broadcast %14 : vector<1x32xf32> to vector<16x32xf32>
    %130 = arith.addf %128, %129 : vector<16x32xf32>
    %131 = arith.addf %28, %130 : vector<16x32xf32>
    %cst_65 = arith.constant dense<0.000000e+00> : vector<16xf32>
    %132 = vector.multi_reduction <add>, %131, %cst_65 [1] : vector<16x32xf32> to vector<16xf32>
    %133 = vector.shape_cast %132 : vector<16xf32> to vector<16x1xf32>
    %cst_66 = arith.constant 3.200000e+01 : f32
    %134 = vector.broadcast %cst_66 : f32 to vector<16x1xf32>
    %135 = arith.divf %133, %134 : vector<16x1xf32>
    %136 = vector.broadcast %135 : vector<16x1xf32> to vector<16x32xf32>
    %137 = arith.subf %131, %136 : vector<16x32xf32>
    %138 = arith.mulf %137, %137 : vector<16x32xf32>
    %cst_67 = arith.constant dense<0.000000e+00> : vector<16xf32>
    %139 = vector.multi_reduction <add>, %138, %cst_67 [1] : vector<16x32xf32> to vector<16xf32>
    %140 = vector.shape_cast %139 : vector<16xf32> to vector<16x1xf32>
    %cst_68 = arith.constant 3.200000e+01 : f32
    %141 = vector.broadcast %cst_68 : f32 to vector<16x1xf32>
    %142 = arith.divf %140, %141 : vector<16x1xf32>
    %143 = vector.broadcast %135 : vector<16x1xf32> to vector<16x32xf32>
    %144 = arith.subf %131, %143 : vector<16x32xf32>
    %cst_69 = arith.constant 9.99999974E-6 : f32
    %145 = vector.broadcast %cst_69 : f32 to vector<16x1xf32>
    %146 = arith.addf %142, %145 : vector<16x1xf32>
    %147 = math.rsqrt %146 : vector<16x1xf32>
    %148 = vector.broadcast %147 : vector<16x1xf32> to vector<16x32xf32>
    %149 = arith.mulf %144, %148 : vector<16x32xf32>
    %150 = vector.broadcast %16 : vector<1x32xf32> to vector<16x32xf32>
    %151 = arith.mulf %149, %150 : vector<16x32xf32>
    %152 = vector.broadcast %18 : vector<1x32xf32> to vector<16x32xf32>
    %153 = arith.addf %151, %152 : vector<16x32xf32>
    %cst_70 = arith.constant dense<0.000000e+00> : vector<16x128xf32>
    %154 = tpu.matmul %153, %20, %cst_70 {dimension_numbers = #tpu.dot_dimension_numbers<[1], [0], [0], [1], [0, 0, 1, 1], [], []>} : vector<16x32xf32>, vector<32x128xf32>, vector<16x128xf32> -> vector<16x128xf32>
    %155 = vector.broadcast %22 : vector<1x128xf32> to vector<16x128xf32>
    %156 = arith.addf %154, %155 : vector<16x128xf32>
    %157 = arith.mulf %156, %156 : vector<16x128xf32>
    %158 = arith.mulf %156, %157 : vector<16x128xf32>
    %cst_71 = arith.constant 4.471500e-02 : f32
    %159 = vector.broadcast %cst_71 : f32 to vector<16x128xf32>
    %160 = arith.mulf %159, %158 : vector<16x128xf32>
    %161 = arith.addf %156, %160 : vector<16x128xf32>
    %cst_72 = arith.constant 0.797884583 : f32
    %162 = vector.broadcast %cst_72 : f32 to vector<16x128xf32>
    %163 = arith.mulf %162, %161 : vector<16x128xf32>
    %164 = math.tanh %163 : vector<16x128xf32>
    %cst_73 = arith.constant 1.000000e+00 : f32
    %165 = vector.broadcast %cst_73 : f32 to vector<16x128xf32>
    %166 = arith.addf %165, %164 : vector<16x128xf32>
    %cst_74 = arith.constant 5.000000e-01 : f32
    %167 = vector.broadcast %cst_74 : f32 to vector<16x128xf32>
    %168 = arith.mulf %167, %166 : vector<16x128xf32>
    %169 = arith.mulf %156, %168 : vector<16x128xf32>
    %cst_75 = arith.constant dense<0.000000e+00> : vector<16x32xf32>
    %170 = tpu.matmul %169, %24, %cst_75 {dimension_numbers = #tpu.dot_dimension_numbers<[1], [0], [0], [1], [0, 0, 1, 1], [], []>} : vector<16x128xf32>, vector<128x32xf32>, vector<16x32xf32> -> vector<16x32xf32>
    %171 = vector.broadcast %26 : vector<1x32xf32> to vector<16x32xf32>
    %172 = arith.addf %170, %171 : vector<16x32xf32>
    %173 = arith.addf %131, %172 : vector<16x32xf32>
    %174 = vector.shape_cast %173 : vector<16x32xf32> to vector<2x8x32xf32>
    %c0_76 = arith.constant 0 : index
    %c0_77 = arith.constant 0 : index
    %c0_78 = arith.constant 0 : index
    %175 = vector.load %arg19[%c0_76, %c0_77, %c0_78] : memref<2x8x32xf32, #tpu.memory_space<vmem>>, vector<2x8x32xf32>
    tpu.vector_store %arg19[%c0_76, %c0_77, %c0_78], %174 {strides = array<i32>} : memref<2x8x32xf32, #tpu.memory_space<vmem>>, vector<2x8x32xf32>,
    %c1_i32 = arith.constant 1 : i32
    %176 = arith.cmpi eq, %arg0, %c1_i32 : i32
    %177 = arith.extui %176 : i1 to i32
    %c0_i32_79 = arith.constant 0 : i32
    %178 = arith.cmpi ne, %177, %c0_i32_79 : i32
    scf.if %178 {
      %179 = vector.shape_cast %174 : vector<2x8x32xf32> to vector<16x32xf32>
      %c0_80 = arith.constant 0 : index
      %c0_81 = arith.constant 0 : index
      %180 = vector.load %arg2[%c0_80, %c0_81] : memref<1x32xf32, #tpu.memory_space<vmem>>, vector<1x32xf32>
      %c0_82 = arith.constant 0 : index
      %c0_83 = arith.constant 0 : index
      %181 = vector.load %arg3[%c0_82, %c0_83] : memref<1x32xf32, #tpu.memory_space<vmem>>, vector<1x32xf32>
      %cst_84 = arith.constant dense<0.000000e+00> : vector<16xf32>
      %182 = vector.multi_reduction <add>, %179, %cst_84 [1] : vector<16x32xf32> to vector<16xf32>
      %183 = vector.shape_cast %182 : vector<16xf32> to vector<16x1xf32>
      %cst_85 = arith.constant 3.200000e+01 : f32
      %184 = vector.broadcast %cst_85 : f32 to vector<16x1xf32>
      %185 = arith.divf %183, %184 : vector<16x1xf32>
      %186 = vector.broadcast %185 : vector<16x1xf32> to vector<16x32xf32>
      %187 = arith.subf %179, %186 : vector<16x32xf32>
      %188 = arith.mulf %187, %187 : vector<16x32xf32>
      %cst_86 = arith.constant dense<0.000000e+00> : vector<16xf32>
      %189 = vector.multi_reduction <add>, %188, %cst_86 [1] : vector<16x32xf32> to vector<16xf32>
      %190 = vector.shape_cast %189 : vector<16xf32> to vector<16x1xf32>
      %cst_87 = arith.constant 3.200000e+01 : f32
      %191 = vector.broadcast %cst_87 : f32 to vector<16x1xf32>
      %192 = arith.divf %190, %191 : vector<16x1xf32>
      %193 = vector.broadcast %185 : vector<16x1xf32> to vector<16x32xf32>
      %194 = arith.subf %179, %193 : vector<16x32xf32>
      %cst_88 = arith.constant 9.99999974E-6 : f32
      %195 = vector.broadcast %cst_88 : f32 to vector<16x1xf32>
      %196 = arith.addf %192, %195 : vector<16x1xf32>
      %197 = math.rsqrt %196 : vector<16x1xf32>
      %198 = vector.broadcast %197 : vector<16x1xf32> to vector<16x32xf32>
      %199 = arith.mulf %194, %198 : vector<16x32xf32>
      %200 = vector.broadcast %180 : vector<1x32xf32> to vector<16x32xf32>
      %201 = arith.mulf %199, %200 : vector<16x32xf32>
      %202 = vector.broadcast %181 : vector<1x32xf32> to vector<16x32xf32>
      %203 = arith.addf %201, %202 : vector<16x32xf32>
      %c0_89 = arith.constant 0 : index
      %c0_90 = arith.constant 0 : index
      %204 = vector.load %arg4[%c0_89, %c0_90] : memref<32x128xf32, #tpu.memory_space<vmem>>, vector<32x128xf32>
      %cst_91 = arith.constant dense<0.000000e+00> : vector<16x128xf32>
      %205 = tpu.matmul %203, %204, %cst_91 {dimension_numbers = #tpu.dot_dimension_numbers<[1], [0], [0], [1], [0, 0, 1, 1], [], []>} : vector<16x32xf32>, vector<32x128xf32>, vector<16x128xf32> -> vector<16x128xf32>
      %c0_92 = arith.constant 0 : index
      %c0_93 = arith.constant 0 : index
      %206 = vector.load %arg5[%c0_92, %c0_93] : memref<1x128xf32, #tpu.memory_space<vmem>>, vector<1x128xf32>
      %207 = vector.broadcast %206 : vector<1x128xf32> to vector<16x128xf32>
      %208 = arith.addf %205, %207 : vector<16x128xf32>
      %209 = vector.shape_cast %208 : vector<16x128xf32> to vector<2x8x128xf32>
      %c0_94 = arith.constant 0 : index
      %c0_95 = arith.constant 0 : index
      %c0_96 = arith.constant 0 : index
      %210 = vector.load %arg18[%c0_94, %c0_95, %c0_96] : memref<2x8x128xf32, #tpu.memory_space<vmem>>, vector<2x8x128xf32>
      tpu.vector_store %arg18[%c0_94, %c0_95, %c0_96], %209 {strides = array<i32>} : memref<2x8x128xf32, #tpu.memory_space<vmem>>, vector<2x8x128xf32>,
    } else {
    }
    return
  }
  func.func @transform_0(%arg0: i32) -> (i32, i32, i32) {
    %c0_i32 = arith.constant 0 : i32
    %c0_i32_0 = arith.constant 0 : i32
    %c0_i32_1 = arith.constant 0 : i32
    %c0_i32_2 = arith.constant 0 : i32
    return %c0_i32, %c0_i32_0, %c0_i32_1 : i32, i32, i32
  }
  func.func @transform_1(%arg0: i32) -> (i32, i32) {
    %c0_i32 = arith.constant 0 : i32
    %c0_i32_0 = arith.constant 0 : i32
    %c0_i32_1 = arith.constant 0 : i32
    return %c0_i32, %c0_i32_0 : i32, i32
  }
  func.func @transform_2(%arg0: i32) -> (i32, i32) {
    %c0_i32 = arith.constant 0 : i32
    %c0_i32_0 = arith.constant 0 : i32
    %c0_i32_1 = arith.constant 0 : i32
    return %c0_i32, %c0_i32_0 : i32, i32
  }
  func.func @transform_3(%arg0: i32) -> (i32, i32) {
    %c0_i32 = arith.constant 0 : i32
    %c0_i32_0 = arith.constant 0 : i32
    %c0_i32_1 = arith.constant 0 : i32
    return %c0_i32, %c0_i32_0 : i32, i32
  }
  func.func @transform_4(%arg0: i32) -> (i32, i32) {
    %c0_i32 = arith.constant 0 : i32
    %c0_i32_0 = arith.constant 0 : i32
    %c0_i32_1 = arith.constant 0 : i32
    return %c0_i32, %c0_i32_0 : i32, i32
  }
  func.func @transform_5(%arg0: i32) -> (i32, i32, i32) {
    %c0_i32 = arith.constant 0 : i32
    %c0_i32_0 = arith.constant 0 : i32
    %c0_i32_1 = arith.constant 0 : i32
    return %arg0, %c0_i32, %c0_i32_0 : i32, i32, i32
  }
  func.func @transform_6(%arg0: i32) -> (i32, i32, i32) {
    %c0_i32 = arith.constant 0 : i32
    %c0_i32_0 = arith.constant 0 : i32
    %c0_i32_1 = arith.constant 0 : i32
    return %arg0, %c0_i32, %c0_i32_0 : i32, i32, i32
  }
  func.func @transform_7(%arg0: i32) -> (i32, i32, i32) {
    %c0_i32 = arith.constant 0 : i32
    %c0_i32_0 = arith.constant 0 : i32
    %c0_i32_1 = arith.constant 0 : i32
    return %arg0, %c0_i32, %c0_i32_0 : i32, i32, i32
  }
  func.func @transform_8(%arg0: i32) -> (i32, i32, i32) {
    %c0_i32 = arith.constant 0 : i32
    %c0_i32_0 = arith.constant 0 : i32
    %c0_i32_1 = arith.constant 0 : i32
    return %arg0, %c0_i32, %c0_i32_0 : i32, i32, i32
  }
  func.func @transform_9(%arg0: i32) -> (i32, i32, i32) {
    %c0_i32 = arith.constant 0 : i32
    %c0_i32_0 = arith.constant 0 : i32
    %c0_i32_1 = arith.constant 0 : i32
    return %arg0, %c0_i32, %c0_i32_0 : i32, i32, i32
  }
  func.func @transform_10(%arg0: i32) -> (i32, i32, i32) {
    %c0_i32 = arith.constant 0 : i32
    %c0_i32_0 = arith.constant 0 : i32
    %c0_i32_1 = arith.constant 0 : i32
    return %arg0, %c0_i32, %c0_i32_0 : i32, i32, i32
  }
  func.func @transform_11(%arg0: i32) -> (i32, i32, i32) {
    %c0_i32 = arith.constant 0 : i32
    %c0_i32_0 = arith.constant 0 : i32
    %c0_i32_1 = arith.constant 0 : i32
    return %arg0, %c0_i32, %c0_i32_0 : i32, i32, i32
  }
  func.func @transform_12(%arg0: i32) -> (i32, i32, i32) {
    %c0_i32 = arith.constant 0 : i32
    %c0_i32_0 = arith.constant 0 : i32
    %c0_i32_1 = arith.constant 0 : i32
    return %arg0, %c0_i32, %c0_i32_0 : i32, i32, i32
  }
  func.func @transform_13(%arg0: i32) -> (i32, i32, i32) {
    %c0_i32 = arith.constant 0 : i32
    %c0_i32_0 = arith.constant 0 : i32
    %c0_i32_1 = arith.constant 0 : i32
    return %arg0, %c0_i32, %c0_i32_0 : i32, i32, i32
  }
  func.func @transform_14(%arg0: i32) -> (i32, i32, i32) {
    %c0_i32 = arith.constant 0 : i32
    %c0_i32_0 = arith.constant 0 : i32
    %c0_i32_1 = arith.constant 0 : i32
    return %arg0, %c0_i32, %c0_i32_0 : i32, i32, i32
  }
  func.func @transform_15(%arg0: i32) -> (i32, i32, i32) {
    %c0_i32 = arith.constant 0 : i32
    %c0_i32_0 = arith.constant 0 : i32
    %c0_i32_1 = arith.constant 0 : i32
    return %arg0, %c0_i32, %c0_i32_0 : i32, i32, i32
  }
  func.func @transform_16(%arg0: i32) -> (i32, i32, i32) {
    %c0_i32 = arith.constant 0 : i32
    %c0_i32_0 = arith.constant 0 : i32
    %c0_i32_1 = arith.constant 0 : i32
    return %arg0, %c0_i32, %c0_i32_0 : i32, i32, i32
  }
  func.func @transform_17(%arg0: i32) -> (i32, i32, i32) {
    %c0_i32 = arith.constant 0 : i32
    %c0_i32_0 = arith.constant 0 : i32
    %c0_i32_1 = arith.constant 0 : i32
    %c0_i32_2 = arith.constant 0 : i32
    return %c0_i32, %c0_i32_0, %c0_i32_1 : i32, i32, i32
  }
}

</mosaic_0001>

<bundles_post_ra>
// kernel: _lambda_.5
= control target key start
LH: loop header
LB: loop body
LE: loop exit
PB: predicated region body
PF: predicated region fallthrough
CT: control target
= control target key end

     0   :  { %s3337_s24 = smov 0   ;;  %s3814_s0 = inlined_call_operand.vmem [shape: f32[2,8,192], index: 0, kind: input, shape index: {}]   ;;  %s3815_s1 = inlined_call_operand.vmem [shape: f32[192,32], index: 1, kind: input, shape index: {}]   ;;  %s3816_s2 = inlined_call_operand.vmem [shape: f32[1,32], index: 2, kind: input, shape index: {}]   ;;  %s3817_s3 = inlined_call_operand.vmem [shape: f32[1,8,32], index: 3, kind: input, shape index: {}]   ;;  %s3818_s4 = inlined_call_operand.vmem [shape: f32[2,8,32], index: 4, kind: input, shape index: {}]   ;;  %s3819_s5 = inlined_call_operand.vmem [shape: f32[2,1,32], index: 5, kind: input, shape index: {}]   ;;  %s3820_s6 = inlined_call_operand.vmem [shape: f32[2,1,32], index: 6, kind: input, shape index: {}]   ;;  %s3821_s7 = inlined_call_operand.vmem [shape: f32[2,32,96], index: 7, kind: input, shape index: {}]   ;;  %s3822_s8 = inlined_call_operand.vmem [shape: f32[2,1,96], index: 8, kind: input, shape index: {}]   ;;  %s3823_s9 = inlined_call_operand.vmem [shape: f32[2,32,32], index: 9, kind: input, shape index: {}]   ;;  %s3824_s10 = inlined_call_operand.vmem [shape: f32[2,1,32], index: 10, kind: input, shape index: {}]   ;;  %s3825_s11 = inlined_call_operand.vmem [shape: f32[2,1,32], index: 11, kind: input, shape index: {}]   ;;  %s3826_s12 = inlined_call_operand.vmem [shape: f32[2,1,32], index: 12, kind: input, shape index: {}]   ;;  %s3827_s13 = inlined_call_operand.vmem [shape: f32[2,32,128], index: 13, kind: input, shape index: {}]   ;;  %s3828_s14 = inlined_call_operand.vmem [shape: f32[2,1,128], index: 14, kind: input, shape index: {}]   ;;  %s3829_s15 = inlined_call_operand.vmem [shape: f32[2,128,32], index: 15, kind: input, shape index: {}]   ;;  %s3830_s16 = inlined_call_operand.vmem [shape: f32[2,1,32], index: 16, kind: input, shape index: {}]   ;;  %s3831_s17 = inlined_call_operand.vmem [shape: f32[2,8,32], index: 17, kind: output, shape index: {}]  }
   0x1   :  { %3837 = sst [smem:[#allocation4_spill]] %s3814_s0 }
   0x2   :  { %3838 = sst [smem:[#allocation5_spill]] %s3815_s1 }
   0x3   :  { %3839 = sst [smem:[#allocation6_spill]] %s3818_s4 }
   0x4   :  { %3840 = sst [smem:[#allocation7_spill]] %s3819_s5 }
   0x5   :  { %3841 = sst [smem:[#allocation8_spill]] %s3820_s6 }
   0x6   :  { %3842 = sst [smem:[#allocation9_spill]] %s3821_s7 }
   0x7   :  { %3843 = sst [smem:[#allocation10_spill]] %s3823_s9 }
   0x8 LB: > { %3844 = sst [smem:[#allocation2_spill]] %s3228_s24  ;;  %s3343_s25 = sadd.s32 4294967295, %s3228_s24   ;;  %s3228_s24 = sphi %s3337_s24, %s27_s24  }
   0x9   : > { %p2831_p0 = scmp.ge.s32.totalorder %s3228_s24, 1  ;;  %p576_p1 = scmp.lt.s32.totalorder %s3228_s24, 3 }
   0xb   : > { %p577_p2 = pnand %p2831_p0, %p576_p1 }
   0xd   : > { %580 = sbr.rel (%p577_p2) target bundleno = 4210 (0x1072), region = 88 }
  0x12   : > { %p662_p3 = scmp.lt.s32.totalorder %s3343_s25, 1  ;;  %s3847_s7 = sld [smem:[#allocation9_spill]] }
  0x13   : > { %s3848_s9 = sld [smem:[#allocation10_spill]]  ;;  %p2840_p4 = scmp.ne.s32.totalorder %s3343_s25, 0 }
  0x14   : > { %s3349_s26 = scalar_select %p662_p3, %s3343_s25, 1 }
  0x15   : > { %s3850_s22 = sld [smem:[#allocation5_spill]] (!%p2840_p4) }
  0x16   : > { %s2885_s19 = sshll.u32 %s3349_s26, 5  ;;  %s686_s6 = scalar_lea.vmem %s3825_s11, %s3349_s26 }
  0x17   : > { %s689_s21 = scalar_lea.vmem %s3826_s12, %s3349_s26  ;;  %s705_s1 = scalar_lea.vmem %s3830_s16, %s3349_s26 }
  0x18   : > { %s3367_s27 = scalar_lea.vmem %s3847_s7, %s2885_s19  ;;  %s3389_s7 = scalar_lea.vmem %s3827_s13, %s2885_s19 }
  0x19   : > { %s3372_s4 = scalar_lea.vmem %s3848_s9, %s2885_s19  ;;  %s697_s9 = scalar_lea.vmem %s3828_s14, %s3349_s26 }
  0x1a   : > { %3849 = sst [smem:[#allocation3_spill]] %s3372_s4  ;;  %s2888_s4 = sshll.u32 %s3349_s26, 7 }
  0x1b   : > { %s3399_s0 = scalar_lea.vmem %s3829_s15, %s2888_s4  ;;  %709 = sbr.rel (%p2840_p4) target bundleno = 280 (0x118), region = 92 }
  0x1c   : > { %s3851_s20 = sld [smem:[#allocation4_spill]] (!%p2840_p4) }
  0x20   : > { %v729_v0 = vld [vmem:[%s3850_s22 + $0x78] sm:$0xff]  ;;  %v3230_v1 = vmov 0.0   ;;  %v728_v2 = vld [vmem:[%s3850_s22 + $0x70] sm:$0xff]  ;;  %v727_v3 = vld [vmem:[%s3850_s22 + $0x68] sm:$0xff]  ;;  %vm745_vm0 = vcmask 523264   ;;  %vm830_vm1 = vcmask 261120  }
  0x21   : > { %752 = vmatprep.subr.mxu0 %v3230_v1  ;;  %3105 = vmatprep.subr.mxu1 %v3230_v1  ;;  %v726_v4 = vld [vmem:[%s3850_s22 + $0x60] sm:$0xff]  ;;  %v725_v5 = vld [vmem:[%s3850_s22 + $0x58] sm:$0xff]  ;;  %v724_v6 = vld [vmem:[%s3850_s22 + $0x50] sm:$0xff] }
  0x22   : > { %753 = vmatpush1.msra.mxu0 %v729_v0  ;;  %3129 = vmatpush1.msra.mxu1 %v729_v0  ;;  %v723_v7 = vld [vmem:[%s3850_s22 + $0x48] sm:$0xff]  ;;  %v722_v8 = vld [vmem:[%s3850_s22 + $0x40] sm:$0xff]  ;;  %v721_v9 = vld [vmem:[%s3850_s22 + $0x38] sm:$0xff] }
  0x23   : > { %754 = vmatprep.subr.mxu0 %v3230_v1  ;;  %3106 = vmatprep.subr.mxu1 %v3230_v1  ;;  %v720_v10 = vld [vmem:[%s3850_s22 + $0x30] sm:$0xff]  ;;  %v719_v11 = vld [vmem:[%s3850_s22 + $0x28] sm:$0xff]  ;;  %v718_v12 = vld [vmem:[%s3850_s22 + $0x20] sm:$0xff] }
  0x24   : > { %755 = vmatpush1.msra.mxu0 %v728_v2  ;;  %3130 = vmatpush1.msra.mxu1 %v728_v2  ;;  %v717_v13 = vld [vmem:[%s3850_s22 + $0x18] sm:$0xff]  ;;  %v716_v14 = vld [vmem:[%s3850_s22 + $0x10] sm:$0xff]  ;;  %v715_v15 = vld [vmem:[%s3850_s22 + $0x8] sm:$0xff] }
  0x25   : > { %756 = vmatprep.subr.mxu0 %v3230_v1  ;;  %3107 = vmatprep.subr.mxu1 %v3230_v1  ;;  %v714_v16 = vld [vmem:[%s3850_s22] sm:$0xff]  ;;  %v737_v17 = vld [vmem:[%s3850_s22 + $0xb8] sm:$0xff]  ;;  %v736_v18 = vld [vmem:[%s3850_s22 + $0xb0] sm:$0xff] }
  0x26   : > { %757 = vmatpush1.msra.mxu0 %v727_v3  ;;  %3131 = vmatpush1.msra.mxu1 %v727_v3  ;;  %v735_v19 = vld [vmem:[%s3850_s22 + $0xa8] sm:$0xff]  ;;  %v734_v20 = vld [vmem:[%s3850_s22 + $0xa0] sm:$0xff]  ;;  %v733_v21 = vld [vmem:[%s3850_s22 + $0x98] sm:$0xff] }
  0x27   : > { %758 = vmatprep.subr.mxu0 %v3230_v1  ;;  %3108 = vmatprep.subr.mxu1 %v3230_v1  ;;  %v732_v22 = vld [vmem:[%s3850_s22 + $0x90] sm:$0xff]  ;;  %v731_v23 = vld [vmem:[%s3850_s22 + $0x88] sm:$0xff]  ;;  %v730_v24 = vld [vmem:[%s3850_s22 + $0x80] sm:$0xff] }
  0x28   : > { %759 = vmatpush1.msra.mxu0 %v726_v4  ;;  %3132 = vmatpush1.msra.mxu1 %v726_v4  ;;  %v711_v25 = vld [vmem:[%s3851_s20 + $0x8] sm:$0xff]  ;;  %v713_v26 = vld [vmem:[%s3851_s20 + $0x18] sm:$0xff]  ;;  %v710_v27 = vld [vmem:[%s3851_s20] sm:$0xff] }
  0x29   : > { %760 = vmatprep.subr.mxu0 %v3230_v1  ;;  %3109 = vmatprep.subr.mxu1 %v3230_v1  ;;  %v712_v28 = vld [vmem:[%s3851_s20 + $0x10] sm:$0xff]  ;;  %v2841_v29 = vld [vmem:[%s3816_s2] ss:$0 sm:$0xff] }
  0x2a   : > { %761 = vmatpush1.msra.mxu0 %v725_v5  ;;  %3133 = vmatpush1.msra.mxu1 %v725_v5  ;;  %v827_v31 = vld [vmem:[%s3817_s3] sm:$0xff] }
  0x2b   : > { %762 = vmatprep.subr.mxu0 %v3230_v1  ;;  %3110 = vmatprep.subr.mxu1 %v3230_v1 }
  0x2c   : > { %763 = vmatpush1.msra.mxu0 %v724_v6  ;;  %3134 = vmatpush1.msra.mxu1 %v724_v6 }
  0x2d   : > { %764 = vmatprep.subr.mxu0 %v3230_v1  ;;  %3111 = vmatprep.subr.mxu1 %v3230_v1 }
  0x2e   : > { %765 = vmatpush1.msra.mxu0 %v723_v7  ;;  %3135 = vmatpush1.msra.mxu1 %v723_v7 }
  0x2f   : > { %766 = vmatprep.subr.mxu0 %v3230_v1  ;;  %3112 = vmatprep.subr.mxu1 %v3230_v1 }
  0x30   : > { %767 = vmatpush1.msra.mxu0 %v722_v8  ;;  %3136 = vmatpush1.msra.mxu1 %v722_v8 }
  0x31   : > { %768 = vmatprep.subr.mxu0 %v3230_v1  ;;  %3113 = vmatprep.subr.mxu1 %v3230_v1 }
  0x32   : > { %769 = vmatpush1.msra.mxu0 %v721_v9  ;;  %3137 = vmatpush1.msra.mxu1 %v721_v9 }
  0x33   : > { %770 = vmatprep.subr.mxu0 %v3230_v1  ;;  %3114 = vmatprep.subr.mxu1 %v3230_v1 }
  0x34   : > { %771 = vmatpush1.msra.mxu0 %v720_v10  ;;  %3138 = vmatpush1.msra.mxu1 %v720_v10 }
  0x35   : > { %772 = vmatprep.subr.mxu0 %v3230_v1  ;;  %3115 = vmatprep.subr.mxu1 %v3230_v1 }
  0x36   : > { %773 = vmatpush1.msra.mxu0 %v719_v11  ;;  %3139 = vmatpush1.msra.mxu1 %v719_v11 }
  0x37   : > { %774 = vmatprep.subr.mxu0 %v3230_v1  ;;  %3116 = vmatprep.subr.mxu1 %v3230_v1 }
  0x38   : > { %775 = vmatpush1.msra.mxu0 %v718_v12  ;;  %3140 = vmatpush1.msra.mxu1 %v718_v12 }
  0x39   : > { %776 = vmatprep.subr.mxu0 %v3230_v1  ;;  %3117 = vmatprep.subr.mxu1 %v3230_v1 }
  0x3a   : > { %777 = vmatpush1.msra.mxu0 %v717_v13  ;;  %3141 = vmatpush1.msra.mxu1 %v717_v13 }
  0x3b   : > { %778 = vmatprep.subr.mxu0 %v3230_v1  ;;  %3118 = vmatprep.subr.mxu1 %v3230_v1 }
  0x3c   : > { %779 = vmatpush1.msra.mxu0 %v716_v14  ;;  %3142 = vmatpush1.msra.mxu1 %v716_v14 }
  0x3d   : > { %780 = vmatprep.subr.mxu0 %v3230_v1  ;;  %3119 = vmatprep.subr.mxu1 %v3230_v1 }
  0x3e   : > { %781 = vmatpush1.msra.mxu0 %v715_v15  ;;  %3143 = vmatpush1.msra.mxu1 %v715_v15 }
  0x3f   : > { %782 = vmatprep.subr.mxu0 %v3230_v1  ;;  %3120 = vmatprep.subr.mxu1 %v3230_v1 }
  0x40   : > { %783 = vmatpush1.msra.mxu0 %v714_v16  ;;  %3144 = vmatpush1.msra.mxu1 %v714_v16 }
  0x41   : > { %800 = vmatprep.subr.mxu0 %v3230_v1  ;;  %3121 = vmatprep.subr.mxu1 %v3230_v1 }
  0x42   : > { %801 = vmatpush2.msra.mxu0 %v737_v17  ;;  %3145 = vmatpush2.msra.mxu1 %v737_v17 }
  0x43   : > { %802 = vmatprep.subr.mxu0 %v3230_v1  ;;  %3122 = vmatprep.subr.mxu1 %v3230_v1 }
  0x44   : > { %803 = vmatpush2.msra.mxu0 %v736_v18  ;;  %3146 = vmatpush2.msra.mxu1 %v736_v18 }
  0x45   : > { %804 = vmatprep.subr.mxu0 %v3230_v1  ;;  %3123 = vmatprep.subr.mxu1 %v3230_v1 }
  0x46   : > { %805 = vmatpush2.msra.mxu0 %v735_v19  ;;  %3147 = vmatpush2.msra.mxu1 %v735_v19 }
  0x47   : > { %806 = vmatprep.subr.mxu0 %v3230_v1  ;;  %3124 = vmatprep.subr.mxu1 %v3230_v1 }
  0x48   : > { %807 = vmatpush2.msra.mxu0 %v734_v20  ;;  %3148 = vmatpush2.msra.mxu1 %v734_v20 }
  0x49   : > { %808 = vmatprep.subr.mxu0 %v3230_v1  ;;  %3125 = vmatprep.subr.mxu1 %v3230_v1 }
  0x4a   : > { %809 = vmatpush2.msra.mxu0 %v733_v21  ;;  %3149 = vmatpush2.msra.mxu1 %v733_v21 }
  0x4b   : > { %810 = vmatprep.subr.mxu0 %v3230_v1  ;;  %3126 = vmatprep.subr.mxu1 %v3230_v1 }
  0x4c   : > { %811 = vmatpush2.msra.mxu0 %v732_v22  ;;  %3150 = vmatpush2.msra.mxu1 %v732_v22 }
  0x4d   : > { %812 = vmatprep.subr.mxu0 %v3230_v1  ;;  %3127 = vmatprep.subr.mxu1 %v3230_v1 }
  0x4e   : > { %813 = vmatpush2.msra.mxu0 %v731_v23  ;;  %3151 = vmatpush2.msra.mxu1 %v731_v23 }
  0x4f   : > { %814 = vmatprep.subr.mxu0 %v3230_v1  ;;  %3128 = vmatprep.subr.mxu1 %v3230_v1 }
  0x50   : > { %815 = vmatpush2.msra.mxu0 %v730_v24  ;;  %3152 = vmatpush2.msra.mxu1 %v730_v24 }
  0x51   : > { %2842 = vmatprep.mubr.msk.f32.mxu0 %vm745_vm0, %v711_v25  ;;  %2843 = vmatprep.mubr.msk.f32.mxu1 %vm745_vm0, %v713_v26 }
  0x52   : > { %817 = vmatmul.mubr.f32.vlgmr.msra.gmra.mxu0 %v710_v27  ;;  %822 = vmatmul.mubr.f32.vlgmr.msra.gmra.mxu1 %v712_v28 }
 0x112   : > { %v818_v30 = vpop.f32.mrf.mxu0  ;;  %v823_v32 = vpop.f32.mrf.mxu1 }
 0x113   : > { %v819_v33 = vadd.f32 %v2841_v29, %v818_v30  ;;  %v824_v34 = vadd.f32 %v2841_v29, %v823_v32 }
 0x114   : > { %v820_v35 = vpop.f32.mrf.mxu0  ;;  %v825_v36 = vpop.f32.mrf.mxu1 }
 0x115   : > { %v828_v37 = vadd.f32 %v827_v31, %v819_v33  ;;  %v829_v38 = vadd.f32 %v827_v31, %v824_v34 }
 0x117   : > { %831 = vst.msk [vmem:[%s3831_s17] sm:$0xff] %vm830_vm1, %v828_v37  ;;  %832 = vst.msk [vmem:[%s3831_s17 + $0x8] sm:$0xff] %vm830_vm1, %v829_v38 }
 0x118 PF: > { %vm871_vm2 = vcmask 261120   ;;  %v838_v53 = vld [vmem:[%s3367_s27 + $0x18] sm:$0xff]  ;;  %v837_v54 = vld [vmem:[%s3367_s27 + $0x10] sm:$0xff]  ;;  %v836_v55 = vld [vmem:[%s3367_s27 + $0x8] sm:$0xff]  ;;  %s3852_s24 = sld [smem:[#allocation7_spill]]  ;;  %v3231_v9 = vmov 0.0   ;;  %s3856_s19 = scalar_lea.vmem %s3822_s8, %s3349_s26 }
 0x119   : > { %2957 = vmatprep.subr.mxu1 %v838_v53  ;;  %v835_v56 = vld [vmem:[%s3367_s27] sm:$0xff]  ;;  %s3854_s27 = sld [smem:[#allocation8_spill]]  ;;  %2978 = vmatprep.subr.mxu0 %v3231_v9  ;;  %vm3232_vm3 = vmmov 0   ;;  %s3233_s23 = smov 96   ;;  %vm1005_vm4 = vcmask 64512   ;;  %vm2358_vm5 = vcmask 195584  }
 0x11a   : > { %2958 = vmatpush3.msra.mxu1 %v838_v53  ;;  %2980 = vmatprep.mubr.msk.f32.mxu0 %vm3232_vm3, %v3231_v9  ;;  %v2846_v10 = vld [vmem:[%s3856_s19] ss:$0 sm:$0xff]  ;;  %s3236_s28 = smov 120   ;;  %s3237_s5 = smov 56   ;;  %vm2355_vm6 = vcmask 130048  }
 0x11b   : > { %2959 = vmatprep.subr.mxu1 %v837_v54  ;;  %s3240_s18 = smov 48   ;;  %s3241_s30 = smov 72  }
 0x11c   : > { %2960 = vmatpush3.msra.mxu1 %v837_v54  ;;  %s3242_s19 = smov 104   ;;  %p2882_p5 = scmp.ne.s32.totalorder %s3343_s25, 1 }
 0x11d   : > { %2961 = vmatprep.subr.mxu1 %v836_v55 }
 0x11e   : > { %v3553_v39 = vld [vmem:[%s3831_s17] sm:$0xff]  ;;  %v3558_v40 = vld [vmem:[%s3831_s17 + $0x8] sm:$0xff]  ;;  %2962 = vmatpush3.msra.mxu1 %v836_v55  ;;  %s3853_s4 = scalar_lea.vmem %s3852_s24, %s3349_s26  ;;  %s3234_s24 = smov 64  }
 0x11f   : > { %v872_v41 = vsel %vm871_vm2, %v3553_v39, 0.0  ;;  %v875_v42 = vsel %vm871_vm2, %v3558_v40, 0.0  ;;  %2963 = vmatprep.subr.mxu1 %v835_v56  ;;  %v2844_v0 = vld [vmem:[%s3853_s4] ss:$0 sm:$0xff]  ;;  %s3855_s29 = scalar_lea.vmem %s3854_s27, %s3349_s26  ;;  %s3235_s4 = smov 88  }
 0x120   : > { %873 = vadd.xlane.f32.xlu0 %v872_v41  ;;  %2964 = vmatpush3.msra.mxu1 %v835_v56  ;;  %v2845_v2 = vld [vmem:[%s3855_s29] ss:$0 sm:$0xff]  ;;  %s3238_s27 = smov 80   ;;  %s3239_s29 = smov 112  }
 0x121   : > { %2968 = vmatprep.subr.mxu1 %v3231_v9 }
 0x124   : > { %876 = vadd.xlane.f32.xlu0 %v875_v42 }
 0x1a9   : > { %v874_v43 = vpop.xlane.xlu0 %873 }
 0x1aa   : > { %v879_v44 = vmul.f32 0.03125, %v874_v43 }
 0x1ac   : > { %v881_v45 = vsub.f32 %v3553_v39, %v879_v44 }
 0x1ad   : > { %v877_v46 = vpop.xlane.xlu0 %876 }
 0x1ae   : > { %v880_v47 = vmul.f32 0.03125, %v877_v46  ;;  %v883_v48 = vmul.f32 %v881_v45, %v881_v45 }
 0x1b0   : > { %v882_v49 = vsub.f32 %v3558_v40, %v880_v47  ;;  %v885_v50 = vsel %vm871_vm2, %v883_v48, 0.0 }
 0x1b1   : > { %886 = vadd.xlane.f32.xlu1 %v885_v50 }
 0x1b2   : > { %v884_v51 = vmul.f32 %v882_v49, %v882_v49 }
 0x1b4   : > { %v888_v52 = vsel %vm871_vm2, %v884_v51, 0.0 }
 0x1b5   : > { %889 = vadd.xlane.f32.xlu1 %v888_v52 }
 0x23a   : > { %v887_v57 = vpop.xlane.xlu1 %886 }
 0x23b   : > { %v891_v58 = vmul.f32 0.03125, %v887_v57 }
 0x23d   : > { %v893_v59 = vadd.f32 1e-05, %v891_v58 }
 0x23e   : > { %v890_v60 = vpop.xlane.xlu1 %889 }
 0x23f   : > { %3178 = vrsqrt.f32 %v893_v59  ;;  %v892_v61 = vmul.f32 0.03125, %v890_v60 }
 0x241   : > { %v894_v62 = vadd.f32 1e-05, %v892_v61 }
 0x243   : > { %3180 = vrsqrt.f32 %v894_v62 }
 0x24c   : > { %v3179_v63 = vpop.eup %3178 }
 0x24d   : > { %v897_v1 = vmul.f32 %v3179_v63, %v881_v45 }
 0x24f   : > { %v905_v3 = vmul.f32 %v2844_v0, %v897_v1 }
 0x250   : > { %v3181_v4 = vpop.eup %3180 }
 0x251   : > { %v898_v5 = vmul.f32 %v3181_v4, %v882_v49  ;;  %v913_v6 = vadd.f32 %v2845_v2, %v905_v3 }
 0x253   : > { %v906_v7 = vmul.f32 %v2844_v0, %v898_v5  ;;  %2965 = vmatprep.mubr.msk.f32.mxu1 %vm871_vm2, %v913_v6 }
 0x255   : > { %v914_v8 = vadd.f32 %v2845_v2, %v906_v7 }
 0x257   : > { %2966 = vmatmul.mubr.msk.f32.vlgmr.msra.gmra.mxu1 %vm871_vm2, %v914_v8 }
 0x258   : > { %2970 = vmatprep.mubr.msk.f32.mxu1 %vm3232_vm3, %v3231_v9 }
 0x317   : > { %v2967_v11 = vpop.f32.mrf.mxu1 }
 0x318   : > { %v3595_v12 = vadd.f32 %v2967_v11, %v2846_v10 }
 0x319   : > { %v993_v13 = vpop.f32.mrf.mxu1 }
 0x31a   : > { %v3597_v14 = vadd.f32 %v2846_v10, %v993_v13  ;;  %1081 = vrot.lane.b32.xlu1 %v3595_v12, %s3233_s23 }
 0x31c   : > { %1003 = vrot.lane.b32.xlu0 %v3597_v14, %s3233_s23  ;;  %s3243_s23 = smov 40  }
 0x38c   : > { %v1082_v16 = vpop.permute.xlu1 %1081 }
 0x38e   : > { %v1004_v15 = vpop.permute.xlu0 %1003 }
 0x38f   : > { %2969 = vmatpush3.xpose.msk.msra.mxu1 %vm1005_vm4, %v1004_v15 }
 0x390   : > { %2973 = vmatprep.subr.mxu1 %v3231_v9 }
 0x392   : > { %2971 = vmatmul.mubr.msk.f32.vlgmr.msra.gmra.mxu1 %vm1005_vm4, %v3597_v14 }
 0x393   : > { %2974 = vmatpush3.xpose.msk.msra.mxu1 %vm1005_vm4, %v1082_v16  ;;  %2975 = vmatprep.mubr.msk.f32.mxu1 %vm3232_vm3, %v3231_v9 }
 0x394   : > { %2983 = vmatprep.subr.mxu1 %v3231_v9 }
 0x396   : > { %2976 = vmatmul.mubr.msk.f32.vlgmr.msra.gmra.mxu1 %vm1005_vm4, %v3595_v12 }
 0x397   : > { %2985 = vmatprep.mubr.msk.f32.mxu1 %vm3232_vm3, %v3231_v9 }
 0x452   : > { %v1076_v17 = vpop.f32.mrf.mxu1 }
 0x453   : > { %v1157_v18 = vmul.f32 0.35355338, %v1076_v17 }
 0x454   : > { %v2972_v19 = vpop.f32.mrf.mxu1 }
 0x455   : > { %v1159_v20 = vsel %vm1005_vm4, %v1157_v18, -inf }
 0x456   : > { %1160 = vmax.xlane.f32.xlu1 %v1159_v20  ;;  %v1153_v21 = vpop.f32.mrf.mxu1 }
 0x457   : > { %v1158_v22 = vmul.f32 0.35355338, %v1153_v21 }
 0x458   : > { %v2977_v23 = vpop.f32.mrf.mxu1 }
 0x459   : > { %v1162_v24 = vsel %vm1005_vm4, %v1158_v22, -inf }
 0x45a   : > { %1163 = vmax.xlane.f32.xlu0 %v1162_v24 }
 0x467   : > { %1257 = vrot.lane.b32.xlu1 %v3595_v12, %s3234_s24 }
 0x46b   : > { %1335 = vrot.lane.b32.xlu1 %v3597_v14, %s3235_s4 }
 0x46f   : > { %1413 = vrot.lane.b32.xlu1 %v3595_v12, %s3235_s4  ;;  %s3245_s4 = smov 16  }
 0x4df   : > { %v1161_v25 = vpop.xlane.xlu1 %1160 }
 0x4e0   : > { %v1165_v26 = vsub.f32 %v1157_v18, %v1161_v25 }
 0x4e2   : > { %v1167_v27 = vmul.f32 1.442695, %v1165_v26 }
 0x4e3   : > { %v1258_v28 = vpop.permute.xlu1 %1257  ;;  %v1164_v29 = vpop.xlane.xlu0 %1163 }
 0x4e4   : > { %3182 = vpow2.f32 %v1167_v27  ;;  %v1166_v30 = vsub.f32 %v1158_v22, %v1164_v29  ;;  %2984 = vmatpush3.msra.mxu1 %v1258_v28 }
 0x4e5   : > { %2993 = vmatprep.subr.mxu1 %v3231_v9 }
 0x4e6   : > { %v1169_v31 = vmul.f32 1.442695, %v1166_v30 }
 0x4e7   : > { %v1336_v36 = vpop.permute.xlu1 %1335 }
 0x4e8   : > { %3184 = vpow2.f32 %v1169_v31 }
 0x4eb   : > { %v1414_v37 = vpop.permute.xlu1 %1413 }
 0x4f1   : > { %v3183_v32 = vpop.eup %3182 }
 0x4f2   : > { %v1171_v33 = vsel %vm1005_vm4, %v3183_v32, 0.0 }
 0x4f3   : > { %1172 = vadd.xlane.f32.xlu0 %v1171_v33 }
 0x4f5   : > { %v3185_v34 = vpop.eup %3184 }
 0x4f6   : > { %v1174_v35 = vsel %vm1005_vm4, %v3185_v34, 0.0 }
 0x4f7   : > { %1175 = vadd.xlane.f32.xlu1 %v1174_v35 }
 0x508   : > { %1411 = vrot.lane.b32.xlu1 %v3595_v12, %s3236_s28 }
 0x509   : > { %1181 = vrot.lane.b32.xlu0 %v3597_v14, %s3234_s24  ;;  %s3244_s24 = smov 8  }
 0x50d   : > { %1333 = vrot.lane.b32.xlu0 %v3597_v14, %s3236_s28  ;;  %s3857_s28 = sld [smem:[#allocation3_spill]] }
 0x57c   : > { %v1173_v38 = vpop.xlane.xlu0 %1172 }
 0x57d   : > { %3186 = vrcp.f32 %v1173_v38 }
 0x580   : > { %v1176_v41 = vpop.xlane.xlu1 %1175  ;;  %v1182_v42 = vpop.permute.xlu0 %1181 }
 0x581   : > { %3188 = vrcp.f32 %v1176_v41  ;;  %2979 = vmatpush3.msra.mxu0 %v1182_v42 }
 0x582   : > { %2988 = vmatprep.subr.mxu0 %v3231_v9 }
 0x584   : > { %v1334_v47 = vpop.permute.xlu0 %1333  ;;  %v1412_v48 = vpop.permute.xlu1 %1411 }
 0x58a   : > { %v3187_v43 = vpop.eup %3186 }
 0x58b   : > { %v1179_v44 = vmul.f32 %v3187_v43, %v3183_v32 }
 0x58d   : > { %2981 = vmatmul.mubr.msk.f32.vlgmr.msra.gmra.mxu0 %vm1005_vm4, %v1179_v44 }
 0x58e   : > { %v3189_v45 = vpop.eup %3188  ;;  %2989 = vmatpush3.xpose.msk.msra.mxu0 %vm1005_vm4, %v1336_v36  ;;  %2990 = vmatprep.mubr.msk.f32.mxu0 %vm3232_vm3, %v3231_v9 }
 0x58f   : > { %v1180_v46 = vmul.f32 %v3189_v45, %v3185_v34  ;;  %2998 = vmatprep.subr.mxu0 %v3231_v9 }
 0x591   : > { %2986 = vmatmul.mubr.msk.f32.vlgmr.msra.gmra.mxu1 %vm1005_vm4, %v1180_v46  ;;  %2991 = vmatmul.mubr.msk.f32.vlgmr.msra.gmra.mxu0 %vm1005_vm4, %v1334_v47 }
 0x592   : > { %2994 = vmatpush3.xpose.msk.msra.mxu1 %vm1005_vm4, %v1414_v37  ;;  %2995 = vmatprep.mubr.msk.f32.mxu1 %vm3232_vm3, %v3231_v9 }
 0x593   : > { %3003 = vmatprep.subr.mxu1 %v3231_v9  ;;  %3000 = vmatprep.mubr.msk.f32.mxu0 %vm3232_vm3, %v3231_v9 }
 0x595   : > { %2996 = vmatmul.mubr.msk.f32.vlgmr.msra.gmra.mxu1 %vm1005_vm4, %v1412_v48 }
 0x596   : > { %3005 = vmatprep.mubr.msk.f32.mxu1 %vm3232_vm3, %v3231_v9 }
 0x64d   : > { %v3641_v49 = vpop.f32.mrf.mxu0 }
 0x64f   : > { %v2982_v50 = vpop.f32.mrf.mxu0 }
 0x651   : > { %v3643_v51 = vpop.f32.mrf.mxu1  ;;  %v1407_v52 = vpop.f32.mrf.mxu0 }
 0x652   : > { %v1489_v53 = vmul.f32 0.35355338, %v1407_v52 }
 0x653   : > { %v2987_v54 = vpop.f32.mrf.mxu1  ;;  %v2992_v55 = vpop.f32.mrf.mxu0 }
 0x654   : > { %v1491_v56 = vsel %vm1005_vm4, %v1489_v53, -inf }
 0x655   : > { %1492 = vmax.xlane.f32.xlu0 %v1491_v56  ;;  %v1485_v57 = vpop.f32.mrf.mxu1 }
 0x656   : > { %v1490_v58 = vmul.f32 0.35355338, %v1485_v57 }
 0x657   : > { %v2997_v59 = vpop.f32.mrf.mxu1 }
 0x658   : > { %v1494_v60 = vsel %vm1005_vm4, %v1490_v58, -inf }
 0x659   : > { %1495 = vmax.xlane.f32.xlu1 %v1494_v60 }
 0x66a   : > { %1589 = vrot.lane.b32.xlu1 %v3595_v12, %s3237_s5 }
 0x66b   : > { %1513 = vrot.lane.b32.xlu0 %v3597_v14, %s3237_s5  ;;  %s3246_s5 = smov 24  }
 0x66e   : > { %1667 = vrot.lane.b32.xlu1 %v3597_v14, %s3238_s27 }
 0x672   : > { %1745 = vrot.lane.b32.xlu1 %v3595_v12, %s3238_s27  ;;  %s3859_s27 = sld [smem:[#allocation6_spill]] (!%p2882_p5) }
 0x676   : > { %1743 = vrot.lane.b32.xlu1 %v3595_v12, %s3239_s29 }
 0x6de   : > { %v1493_v61 = vpop.xlane.xlu0 %1492 }
 0x6df   : > { %v1497_v62 = vsub.f32 %v1489_v53, %v1493_v61 }
 0x6e1   : > { %v1499_v63 = vmul.f32 1.442695, %v1497_v62 }
 0x6e2   : > { %v1514_v0 = vpop.permute.xlu0 %1513  ;;  %v1496_v1 = vpop.xlane.xlu1 %1495 }
 0x6e3   : > { %3190 = vpow2.f32 %v1499_v63  ;;  %v1498_v2 = vsub.f32 %v1490_v58, %v1496_v1  ;;  %2999 = vmatpush3.msra.mxu0 %v1514_v0 }
 0x6e4   : > { %3008 = vmatprep.subr.mxu0 %v3231_v9 }
 0x6e5   : > { %v1501_v3 = vmul.f32 1.442695, %v1498_v2 }
 0x6e6   : > { %v1590_v4 = vpop.permute.xlu1 %1589 }
 0x6e7   : > { %3192 = vpow2.f32 %v1501_v3  ;;  %3004 = vmatpush3.msra.mxu1 %v1590_v4 }
 0x6e8   : > { %3013 = vmatprep.subr.mxu1 %v3231_v9 }
 0x6ea   : > { %v1668_v13 = vpop.permute.xlu1 %1667 }
 0x6ee   : > { %v1746_v18 = vpop.permute.xlu1 %1745 }
 0x6f0   : > { %v3191_v5 = vpop.eup %3190 }
 0x6f1   : > { %v1503_v6 = vsel %vm1005_vm4, %v3191_v5, 0.0 }
 0x6f2   : > { %1504 = vadd.xlane.f32.xlu0 %v1503_v6  ;;  %v1744_v21 = vpop.permute.xlu1 %1743 }
 0x6f4   : > { %v3193_v7 = vpop.eup %3192 }
 0x6f5   : > { %v1506_v8 = vsel %vm1005_vm4, %v3193_v7, 0.0 }
 0x6f6   : > { %1507 = vadd.xlane.f32.xlu0 %v1506_v8 }
 0x70c   : > { %1665 = vrot.lane.b32.xlu0 %v3597_v14, %s3239_s29 }
 0x77b   : > { %v1505_v10 = vpop.xlane.xlu0 %1504 }
 0x77c   : > { %3194 = vrcp.f32 %v1505_v10 }
 0x77f   : > { %v1508_v11 = vpop.xlane.xlu0 %1507 }
 0x780   : > { %3196 = vrcp.f32 %v1508_v11 }
 0x783   : > { %v1666_v20 = vpop.permute.xlu0 %1665 }
 0x789   : > { %v3195_v15 = vpop.eup %3194 }
 0x78a   : > { %v1511_v16 = vmul.f32 %v3195_v15, %v3191_v5 }
 0x78c   : > { %3001 = vmatmul.mubr.msk.f32.vlgmr.msra.gmra.mxu0 %vm1005_vm4, %v1511_v16 }
 0x78d   : > { %v3197_v17 = vpop.eup %3196  ;;  %3009 = vmatpush3.xpose.msk.msra.mxu0 %vm1005_vm4, %v1668_v13  ;;  %3010 = vmatprep.mubr.msk.f32.mxu0 %vm3232_vm3, %v3231_v9 }
 0x78e   : > { %v1512_v19 = vmul.f32 %v3197_v17, %v3193_v7  ;;  %3018 = vmatprep.subr.mxu0 %v3231_v9 }
 0x790   : > { %3006 = vmatmul.mubr.msk.f32.vlgmr.msra.gmra.mxu1 %vm1005_vm4, %v1512_v19  ;;  %3011 = vmatmul.mubr.msk.f32.vlgmr.msra.gmra.mxu0 %vm1005_vm4, %v1666_v20 }
 0x791   : > { %3014 = vmatpush3.xpose.msk.msra.mxu1 %vm1005_vm4, %v1746_v18  ;;  %3015 = vmatprep.mubr.msk.f32.mxu1 %vm3232_vm3, %v3231_v9 }
 0x792   : > { %3023 = vmatprep.subr.mxu1 %v3231_v9  ;;  %3020 = vmatprep.mubr.msk.f32.mxu0 %vm3232_vm3, %v3231_v9 }
 0x794   : > { %3016 = vmatmul.mubr.msk.f32.vlgmr.msra.gmra.mxu1 %vm1005_vm4, %v1744_v21 }
 0x795   : > { %3025 = vmatprep.mubr.msk.f32.mxu1 %vm3232_vm3, %v3231_v9 }
 0x84c   : > { %v3673_v22 = vpop.f32.mrf.mxu0 }
 0x84e   : > { %v3002_v23 = vpop.f32.mrf.mxu0 }
 0x850   : > { %v3675_v24 = vpop.f32.mrf.mxu1  ;;  %v1739_v25 = vpop.f32.mrf.mxu0 }
 0x851   : > { %v1821_v26 = vmul.f32 0.35355338, %v1739_v25 }
 0x852   : > { %v3007_v27 = vpop.f32.mrf.mxu1  ;;  %v3012_v28 = vpop.f32.mrf.mxu0 }
 0x853   : > { %v1823_v29 = vsel %vm1005_vm4, %v1821_v26, -inf  ;;  %v843_v27 = vld [vmem:[%s3857_s28 + $0x18] sm:$0xff]  ;;  %v841_v28 = vld [vmem:[%s3857_s28 + $0x8] sm:$0xff] }
 0x854   : > { %1824 = vmax.xlane.f32.xlu0 %v1823_v29  ;;  %v1817_v30 = vpop.f32.mrf.mxu1  ;;  %v840_v29 = vld [vmem:[%s3857_s28] sm:$0xff] }
 0x855   : > { %v1822_v31 = vmul.f32 0.35355338, %v1817_v30 }
 0x856   : > { %v3017_v32 = vpop.f32.mrf.mxu1 }
 0x857   : > { %v1826_v33 = vsel %vm1005_vm4, %v1822_v31, -inf }
 0x858   : > { %1827 = vmax.xlane.f32.xlu1 %v1826_v33 }
 0x869   : > { %1921 = vrot.lane.b32.xlu1 %v3595_v12, %s3240_s18 }
 0x86a   : > { %1845 = vrot.lane.b32.xlu0 %v3597_v14, %s3240_s18  ;;  %s3858_s18 = scalar_lea.vmem %s3824_s10, %s3349_s26 }
 0x86d   : > { %1999 = vrot.lane.b32.xlu1 %v3597_v14, %s3241_s30 }
 0x871   : > { %2077 = vrot.lane.b32.xlu1 %v3595_v12, %s3241_s30 }
 0x875   : > { %2075 = vrot.lane.b32.xlu1 %v3595_v12, %s3242_s19 }
 0x8dd   : > { %v1825_v34 = vpop.xlane.xlu0 %1824 }
 0x8de   : > { %v1829_v35 = vsub.f32 %v1821_v26, %v1825_v34 }
 0x8e0   : > { %v1831_v36 = vmul.f32 1.442695, %v1829_v35 }
 0x8e1   : > { %v1846_v37 = vpop.permute.xlu0 %1845  ;;  %v1828_v38 = vpop.xlane.xlu1 %1827 }
 0x8e2   : > { %3198 = vpow2.f32 %v1831_v36  ;;  %v1830_v41 = vsub.f32 %v1822_v31, %v1828_v38  ;;  %3019 = vmatpush3.msra.mxu0 %v1846_v37 }
 0x8e3   : > { %3028 = vmatprep.subr.mxu0 %v3231_v9 }
 0x8e4   : > { %v1833_v42 = vmul.f32 1.442695, %v1830_v41 }
 0x8e5   : > { %v1922_v43 = vpop.permute.xlu1 %1921 }
 0x8e6   : > { %3200 = vpow2.f32 %v1833_v42  ;;  %3024 = vmatpush3.msra.mxu1 %v1922_v43 }
 0x8e7   : > { %3033 = vmatprep.subr.mxu1 %v3231_v9 }
 0x8e9   : > { %v2000_v52 = vpop.permute.xlu1 %1999 }
 0x8ed   : > { %v2078_v56 = vpop.permute.xlu1 %2077 }
 0x8ef   : > { %v3199_v44 = vpop.eup %3198 }
 0x8f0   : > { %v1835_v45 = vsel %vm1005_vm4, %v3199_v44, 0.0 }
 0x8f1   : > { %1836 = vadd.xlane.f32.xlu0 %v1835_v45  ;;  %v2076_v59 = vpop.permute.xlu1 %2075 }
 0x8f3   : > { %v3201_v46 = vpop.eup %3200 }
 0x8f4   : > { %v1838_v47 = vsel %vm1005_vm4, %v3201_v46, 0.0 }
 0x8f5   : > { %1839 = vadd.xlane.f32.xlu0 %v1838_v47 }
 0x90b   : > { %1997 = vrot.lane.b32.xlu0 %v3597_v14, %s3242_s19 }
 0x97a   : > { %v1837_v48 = vpop.xlane.xlu0 %1836 }
 0x97b   : > { %3202 = vrcp.f32 %v1837_v48 }
 0x97e   : > { %v1840_v50 = vpop.xlane.xlu0 %1839 }
 0x97f   : > { %3204 = vrcp.f32 %v1840_v50 }
 0x982   : > { %v1998_v58 = vpop.permute.xlu0 %1997 }
 0x988   : > { %v3203_v53 = vpop.eup %3202 }
 0x989   : > { %v1843_v54 = vmul.f32 %v3203_v53, %v3199_v44 }
 0x98b   : > { %3021 = vmatmul.mubr.msk.f32.vlgmr.msra.gmra.mxu0 %vm1005_vm4, %v1843_v54 }
 0x98c   : > { %v3205_v55 = vpop.eup %3204  ;;  %3029 = vmatpush3.xpose.msk.msra.mxu0 %vm1005_vm4, %v2000_v52  ;;  %3030 = vmatprep.mubr.msk.f32.mxu0 %vm3232_vm3, %v3231_v9 }
 0x98d   : > { %v1844_v57 = vmul.f32 %v3205_v55, %v3201_v46  ;;  %3038 = vmatprep.subr.mxu0 %v3231_v9 }
 0x98f   : > { %3026 = vmatmul.mubr.msk.f32.vlgmr.msra.gmra.mxu1 %vm1005_vm4, %v1844_v57  ;;  %3031 = vmatmul.mubr.msk.f32.vlgmr.msra.gmra.mxu0 %vm1005_vm4, %v1998_v58 }
 0x990   : > { %3034 = vmatpush3.xpose.msk.msra.mxu1 %vm1005_vm4, %v2078_v56  ;;  %3035 = vmatprep.mubr.msk.f32.mxu1 %vm3232_vm3, %v3231_v9 }
 0x991   : > { %3043 = vmatprep.subr.mxu1 %v3231_v9  ;;  %3040 = vmatprep.mubr.msk.f32.mxu0 %vm3232_vm3, %v3231_v9 }
 0x993   : > { %3036 = vmatmul.mubr.msk.f32.vlgmr.msra.gmra.mxu1 %vm1005_vm4, %v2076_v59 }
 0x994   : > { %3045 = vmatprep.mubr.msk.f32.mxu1 %vm3232_vm3, %v3231_v9 }
 0xa4b   : > { %v1917_v60 = vpop.f32.mrf.mxu0 }
 0xa4d   : > { %v3022_v61 = vpop.f32.mrf.mxu0 }
 0xa4f   : > { %v1993_v62 = vpop.f32.mrf.mxu1  ;;  %v2071_v63 = vpop.f32.mrf.mxu0 }
 0xa50   : > { %v2153_v0 = vmul.f32 0.35355338, %v2071_v63 }
 0xa51   : > { %v3027_v1 = vpop.f32.mrf.mxu1  ;;  %v3032_v2 = vpop.f32.mrf.mxu0 }
 0xa52   : > { %v2155_v3 = vsel %vm1005_vm4, %v2153_v0, -inf  ;;  %v850_v1 = vld [vmem:[%s3389_s7 + $0x18] sm:$0xff]  ;;  %v849_v2 = vld [vmem:[%s3389_s7 + $0x10] sm:$0xff] }
 0xa53   : > { %2156 = vmax.xlane.f32.xlu0 %v2155_v3  ;;  %v2149_v4 = vpop.f32.mrf.mxu1  ;;  %v848_v3 = vld [vmem:[%s3389_s7 + $0x8] sm:$0xff] }
 0xa54   : > { %v2154_v5 = vmul.f32 0.35355338, %v2149_v4  ;;  %v847_v4 = vld [vmem:[%s3389_s7] sm:$0xff] }
 0xa55   : > { %v3037_v6 = vpop.f32.mrf.mxu1 }
 0xa56   : > { %v2158_v7 = vsel %vm1005_vm4, %v2154_v5, -inf }
 0xa57   : > { %2159 = vmax.xlane.f32.xlu1 %v2158_v7 }
 0xa68   : > { %2253 = vrot.lane.b32.xlu1 %v3595_v12, %s3243_s23 }
 0xa6c   : > { %2331 = vrot.lane.b32.xlu1 %v3673_v22, %s3244_s24 }
 0xa70   : > { %2333 = vrot.lane.b32.xlu1 %v3675_v24, %s3244_s24 }
 0xa74   : > { %2341 = vrot.lane.b32.xlu1 %v1993_v62, %s3245_s4 }
 0xadc   : > { %v2157_v9 = vpop.xlane.xlu0 %2156 }
 0xadd   : > { %v2161_v8 = vsub.f32 %v2153_v0, %v2157_v9 }
 0xadf   : > { %v2163_v10 = vmul.f32 1.442695, %v2161_v8 }
 0xae0   : > { %v2160_v11 = vpop.xlane.xlu1 %2159 }
 0xae1   : > { %3206 = vpow2.f32 %v2163_v10  ;;  %v2162_v13 = vsub.f32 %v2154_v5, %v2160_v11 }
 0xae3   : > { %v2165_v15 = vmul.f32 1.442695, %v2162_v13  ;;  %v2876_v13 = vld [vmem:[%s686_s6] ss:$0 sm:$0xff] }
 0xae4   : > { %v2254_v16 = vpop.permute.xlu1 %2253 }
 0xae5   : > { %3208 = vpow2.f32 %v2165_v15  ;;  %3044 = vmatpush3.msra.mxu1 %v2254_v16  ;;  %v2877_v16 = vld [vmem:[%s689_s21] ss:$0 sm:$0xff] }
 0xae6   : > { %3048 = vmatprep.subr.mxu1 %v843_v27 }
 0xae8   : > { %v2332_v34 = vpop.permute.xlu1 %2331 }
 0xae9   : > { %v2353_v37 = vsel %vm1005_vm4, %v3641_v49, %v2332_v34  ;;  %v2873_v49 = vld [vmem:[%s3858_s18] ss:$0 sm:$0xff]  ;;  %v854_v34 = vld [vmem:[%s3399_s0 + $0x10] sm:$0xff] }
 0xaec   : > { %v2334_v35 = vpop.permute.xlu1 %2333 }
 0xaed   : > { %v2354_v44 = vsel %vm1005_vm4, %v3643_v51, %v2334_v35  ;;  %v853_v35 = vld [vmem:[%s3399_s0 + $0x8] sm:$0xff] }
 0xaee   : > { %v3207_v17 = vpop.eup %3206 }
 0xaef   : > { %v2167_v12 = vsel %vm1005_vm4, %v3207_v17, 0.0 }
 0xaf0   : > { %2168 = vadd.xlane.f32.xlu0 %v2167_v12  ;;  %v2342_v38 = vpop.permute.xlu1 %2341 }
 0xaf1   : > { %v2357_v45 = vsel %vm2355_vm6, %v2354_v44, %v2342_v38 }
 0xaf2   : > { %v3209_v18 = vpop.eup %3208 }
 0xaf3   : > { %v2170_v19 = vsel %vm1005_vm4, %v3209_v18, 0.0 }
 0xaf4   : > { %2171 = vadd.xlane.f32.xlu0 %v2170_v19 }
 0xb0a   : > { %2177 = vrot.lane.b32.xlu0 %v3597_v14, %s3243_s23  ;;  %v842_v14 = vld [vmem:[%s3857_s28 + $0x10] sm:$0xff] }
 0xb0e   : > { %2339 = vrot.lane.b32.xlu0 %v1917_v60, %s3245_s4 }
 0xb79   : > { %v2169_v20 = vpop.xlane.xlu0 %2168 }
 0xb7a   : > { %3210 = vrcp.f32 %v2169_v20 }
 0xb7d   : > { %v2172_v21 = vpop.xlane.xlu0 %2171 }
 0xb7e   : > { %3212 = vrcp.f32 %v2172_v21 }
 0xb81   : > { %v2178_v22 = vpop.permute.xlu0 %2177 }
 0xb82   : > { %3039 = vmatpush3.msra.mxu0 %v2178_v22  ;;  %v867_v22 = vld [vmem:[%s3399_s0 + $0x78] sm:$0xff] }
 0xb83   : > { %3070 = vmatprep.subr.mxu0 %v867_v22 }
 0xb85   : > { %v2340_v36 = vpop.permute.xlu0 %2339 }
 0xb86   : > { %v2356_v41 = vsel %vm2355_vm6, %v2353_v37, %v2340_v36  ;;  %v852_v36 = vld [vmem:[%s3399_s0] sm:$0xff] }
 0xb87   : > { %v3211_v23 = vpop.eup %3210  ;;  %v2878_v37 = vld [vmem:[%s697_s9] ss:$0 sm:$0xff] }
 0xb88   : > { %v2175_v24 = vmul.f32 %v3211_v23, %v3207_v17  ;;  %v866_v23 = vld [vmem:[%s3399_s0 + $0x70] sm:$0xff] }
 0xb8a   : > { %3041 = vmatmul.mubr.msk.f32.vlgmr.msra.gmra.mxu0 %vm1005_vm4, %v2175_v24  ;;  %v865_v24 = vld [vmem:[%s3399_s0 + $0x68] sm:$0xff] }
 0xb8b   : > { %v3213_v25 = vpop.eup %3212  ;;  %3071 = vmatpush3.msra.mxu0 %v867_v22 }
 0xb8c   : > { %v2176_v26 = vmul.f32 %v3213_v25, %v3209_v18  ;;  %3072 = vmatprep.subr.mxu0 %v866_v23  ;;  %v864_v25 = vld [vmem:[%s3399_s0 + $0x60] sm:$0xff] }
 0xb8d   : > { %3073 = vmatpush3.msra.mxu0 %v866_v23 }
 0xb8e   : > { %3046 = vmatmul.mubr.msk.f32.vlgmr.msra.gmra.mxu1 %vm1005_vm4, %v2176_v26  ;;  %3074 = vmatprep.subr.mxu0 %v865_v24  ;;  %v863_v26 = vld [vmem:[%s3399_s0 + $0x58] sm:$0xff] }
 0xb8f   : > { %3049 = vmatpush3.msra.mxu1 %v843_v27  ;;  %3075 = vmatpush3.msra.mxu0 %v865_v24  ;;  %v862_v27 = vld [vmem:[%s3399_s0 + $0x50] sm:$0xff] }
 0xb90   : > { %3050 = vmatprep.subr.mxu1 %v842_v14  ;;  %3076 = vmatprep.subr.mxu0 %v864_v25 }
 0xb91   : > { %3051 = vmatpush3.msra.mxu1 %v842_v14  ;;  %3077 = vmatpush3.msra.mxu0 %v864_v25  ;;  %v861_v14 = vld [vmem:[%s3399_s0 + $0x48] sm:$0xff] }
 0xb92   : > { %3052 = vmatprep.subr.mxu1 %v841_v28  ;;  %3078 = vmatprep.subr.mxu0 %v863_v26 }
 0xb93   : > { %3053 = vmatpush3.msra.mxu1 %v841_v28  ;;  %3079 = vmatpush3.msra.mxu0 %v863_v26  ;;  %v860_v28 = vld [vmem:[%s3399_s0 + $0x40] sm:$0xff] }
 0xb94   : > { %3054 = vmatprep.subr.mxu1 %v840_v29  ;;  %3080 = vmatprep.subr.mxu0 %v862_v27 }
 0xb95   : > { %3055 = vmatpush3.msra.mxu1 %v840_v29  ;;  %3081 = vmatpush3.msra.mxu0 %v862_v27  ;;  %v859_v29 = vld [vmem:[%s3399_s0 + $0x38] sm:$0xff] }
 0xb96   : > { %3059 = vmatprep.subr.mxu1 %v850_v1  ;;  %3082 = vmatprep.subr.mxu0 %v861_v14 }
 0xb97   : > { %3083 = vmatpush3.msra.mxu0 %v861_v14 }
 0xb98   : > { %3084 = vmatprep.subr.mxu0 %v860_v28 }
 0xb99   : > { %3085 = vmatpush3.msra.mxu0 %v860_v28 }
 0xb9a   : > { %3086 = vmatprep.subr.mxu0 %v859_v29 }
 0xb9b   : > { %3087 = vmatpush3.msra.mxu0 %v859_v29 }
 0xc4a   : > { %v2249_v30 = vpop.f32.mrf.mxu0 }
 0xc4b   : > { %2347 = vrot.lane.b32.xlu0 %v2249_v30, %s3246_s5  ;;  %v858_v30 = vld [vmem:[%s3399_s0 + $0x30] sm:$0xff] }
 0xc4c   : > { %v3042_v31 = vpop.f32.mrf.mxu0  ;;  %3088 = vmatprep.subr.mxu0 %v858_v30 }
 0xc4d   : > { %v857_v31 = vld [vmem:[%s3399_s0 + $0x28] sm:$0xff]  ;;  %3089 = vmatpush3.msra.mxu0 %v858_v30 }
 0xc4e   : > { %v2325_v32 = vpop.f32.mrf.mxu1  ;;  %3090 = vmatprep.subr.mxu0 %v857_v31 }
 0xc4f   : > { %2349 = vrot.lane.b32.xlu1 %v2325_v32, %s3246_s5  ;;  %v856_v32 = vld [vmem:[%s3399_s0 + $0x20] sm:$0xff]  ;;  %3091 = vmatpush3.msra.mxu0 %v857_v31 }
 0xc50   : > { %v3047_v33 = vpop.f32.mrf.mxu1  ;;  %3092 = vmatprep.subr.mxu0 %v856_v32 }
 0xc51   : > { %v855_v33 = vld [vmem:[%s3399_s0 + $0x18] sm:$0xff]  ;;  %3093 = vmatpush3.msra.mxu0 %v856_v32 }
 0xc52   : > { %3094 = vmatprep.subr.mxu0 %v855_v33 }
 0xc53   : > { %3095 = vmatpush3.msra.mxu0 %v855_v33 }
 0xc54   : > { %3096 = vmatprep.subr.mxu0 %v854_v34 }
 0xc55   : > { %3097 = vmatpush3.msra.mxu0 %v854_v34 }
 0xc56   : > { %3098 = vmatprep.subr.mxu0 %v853_v35 }
 0xc57   : > { %3099 = vmatpush3.msra.mxu0 %v853_v35 }
 0xc58   : > { %3100 = vmatprep.subr.mxu0 %v852_v36 }
 0xc59   : > { %3101 = vmatpush3.msra.mxu0 %v852_v36 }
 0xcbd   : > { %v2348_v42 = vpop.permute.xlu0 %2347 }
 0xcbe   : > { %v2359_v43 = vsel %vm2358_vm5, %v2356_v41, %v2348_v42 }
 0xcbf   : > { %3056 = vmatprep.mubr.msk.f32.mxu1 %vm871_vm2, %v2359_v43 }
 0xcc1   : > { %v2350_v46 = vpop.permute.xlu1 %2349 }
 0xcc2   : > { %v2360_v47 = vsel %vm2358_vm5, %v2357_v45, %v2350_v46 }
 0xcc3   : > { %3057 = vmatmul.mubr.msk.f32.vlgmr.msra.gmra.mxu1 %vm871_vm2, %v2360_v47 }
 0xcc4   : > { %3060 = vmatpush3.msra.mxu1 %v850_v1 }
 0xcc5   : > { %3061 = vmatprep.subr.mxu1 %v849_v2 }
 0xcc6   : > { %3062 = vmatpush3.msra.mxu1 %v849_v2 }
 0xcc7   : > { %3063 = vmatprep.subr.mxu1 %v848_v3 }
 0xcc8   : > { %3064 = vmatpush3.msra.mxu1 %v848_v3 }
 0xcc9   : > { %3065 = vmatprep.subr.mxu1 %v847_v4 }
 0xcca   : > { %3066 = vmatpush3.msra.mxu1 %v847_v4 }
 0xd83   : > { %v3058_v48 = vpop.f32.mrf.mxu1 }
 0xd84   : > { %v2445_v50 = vadd.f32 %v3058_v48, %v2873_v49 }
 0xd85   : > { %v2439_v52 = vpop.f32.mrf.mxu1 }
 0xd86   : > { %v3731_v53 = vadd.f32 %v2445_v50, %v3558_v40  ;;  %v2440_v54 = vadd.f32 %v2873_v49, %v2439_v52 }
 0xd88   : > { %v3734_v55 = vadd.f32 %v2440_v54, %v3553_v39  ;;  %v2453_v51 = vsel %vm871_vm2, %v3731_v53, 0.0 }
 0xd89   : > { %2454 = vadd.xlane.f32.xlu1 %v2453_v51 }
 0xd8a   : > { %v2450_v56 = vsel %vm871_vm2, %v3734_v55, 0.0 }
 0xd8b   : > { %2451 = vadd.xlane.f32.xlu0 %v2450_v56 }
 0xe12   : > { %v2455_v57 = vpop.xlane.xlu1 %2454 }
 0xe13   : > { %v2457_v58 = vmul.f32 0.03125, %v2455_v57 }
 0xe14   : > { %v2452_v59 = vpop.xlane.xlu0 %2451 }
 0xe15   : > { %v2456_v40 = vmul.f32 0.03125, %v2452_v59  ;;  %v2459_v60 = vsub.f32 %v3731_v53, %v2457_v58 }
 0xe17   : > { %v2458_v39 = vsub.f32 %v3734_v55, %v2456_v40  ;;  %v2461_v63 = vmul.f32 %v2459_v60, %v2459_v60 }
 0xe19   : > { %v2460_v61 = vmul.f32 %v2458_v39, %v2458_v39  ;;  %v2465_v0 = vsel %vm871_vm2, %v2461_v63, 0.0 }
 0xe1b   : > { %v2462_v62 = vsel %vm871_vm2, %v2460_v61, 0.0 }
 0xe1c   : > { %2463 = vadd.xlane.f32.xlu0 %v2462_v62  ;;  %v2881_v62 = vld [vmem:[%s705_s1] ss:$0 sm:$0xff] }
 0xe20   : > { %2466 = vadd.xlane.f32.xlu0 %v2465_v0 }
 0xea5   : > { %v2464_v5 = vpop.xlane.xlu0 %2463 }
 0xea6   : > { %v2468_v6 = vmul.f32 0.03125, %v2464_v5 }
 0xea8   : > { %v2470_v7 = vadd.f32 1e-05, %v2468_v6 }
 0xea9   : > { %v2467_v9 = vpop.xlane.xlu0 %2466 }
 0xeaa   : > { %3214 = vrsqrt.f32 %v2470_v7  ;;  %v2469_v8 = vmul.f32 0.03125, %v2467_v9 }
 0xeac   : > { %v2471_v10 = vadd.f32 1e-05, %v2469_v8 }
 0xeae   : > { %3216 = vrsqrt.f32 %v2471_v10 }
 0xeb7   : > { %v3215_v11 = vpop.eup %3214 }
 0xeb8   : > { %v2474_v15 = vmul.f32 %v3215_v11, %v2458_v39 }
 0xeba   : > { %v2482_v17 = vmul.f32 %v2876_v13, %v2474_v15 }
 0xebb   : > { %v3217_v12 = vpop.eup %3216 }
 0xebc   : > { %v2475_v18 = vmul.f32 %v3217_v12, %v2459_v60  ;;  %v2490_v19 = vadd.f32 %v2877_v16, %v2482_v17 }
 0xebe   : > { %v2483_v20 = vmul.f32 %v2876_v13, %v2475_v18  ;;  %3067 = vmatprep.mubr.msk.f32.mxu1 %vm871_vm2, %v2490_v19 }
 0xec0   : > { %v2491_v21 = vadd.f32 %v2877_v16, %v2483_v20 }
 0xec2   : > { %3068 = vmatmul.mubr.msk.f32.vlgmr.msra.gmra.mxu1 %vm871_vm2, %v2491_v21 }
 0xf82   : > { %v3069_v38 = vpop.f32.mrf.mxu1 }
 0xf83   : > { %v2576_v41 = vadd.f32 %v3069_v38, %v2878_v37 }
 0xf84   : > { %v2570_v42 = vpop.f32.mrf.mxu1 }
 0xf85   : > { %v2580_v43 = vmul.f32 %v2576_v41, %v2576_v41  ;;  %v2571_v44 = vadd.f32 %v2878_v37, %v2570_v42 }
 0xf87   : > { %v2582_v45 = vmul.f32 %v2580_v43, %v2576_v41  ;;  %v2579_v46 = vmul.f32 %v2571_v44, %v2571_v44 }
 0xf89   : > { %v2584_v47 = vmul.f32 0.044715, %v2582_v45  ;;  %v2581_v49 = vmul.f32 %v2579_v46, %v2571_v44 }
 0xf8b   : > { %v2586_v48 = vadd.f32 %v2584_v47, %v2576_v41  ;;  %v2583_v50 = vmul.f32 0.044715, %v2581_v49 }
 0xf8d   : > { %v2588_v52 = vmul.f32 0.7978846, %v2586_v48  ;;  %v2585_v54 = vadd.f32 %v2583_v50, %v2571_v44 }
 0xf8f   : > { %3218 = vtanh.f32 %v2588_v52  ;;  %v2587_v51 = vmul.f32 0.7978846, %v2585_v54 }
 0xf91   : > { %3220 = vtanh.f32 %v2587_v51 }
 0xf9c   : > { %v3219_v56 = vpop.eup %3218 }
 0xf9d   : > { %v2592_v57 = vadd.f32 1.0, %v3219_v56 }
 0xf9e   : > { %v3221_v58 = vpop.eup %3220 }
 0xf9f   : > { %v2591_v59 = vadd.f32 1.0, %v3221_v58  ;;  %v2594_v40 = vmul.f32 0.5, %v2592_v57 }
 0xfa1   : > { %v2593_v60 = vmul.f32 0.5, %v2591_v59  ;;  %v2596_v61 = vmul.f32 %v2594_v40, %v2576_v41 }
 0xfa3   : > { %v2595_v39 = vmul.f32 %v2593_v60, %v2571_v44 }
 0xfa5   : > { %3102 = vmatprep.mubr.f32.mxu0 %v2595_v39 }
 0xfa6   : > { %3103 = vmatmul.mubr.f32.vlgmr.msra.gmra.mxu0 %v2596_v61 }
0x1066   : > { %v3104_v63 = vpop.f32.mrf.mxu0 }
0x1067   : > { %v2675_v0 = vadd.f32 %v3104_v63, %v2881_v62 }
0x1068   : > { %v2669_v1 = vpop.f32.mrf.mxu0 }
0x1069   : > { %v2679_v2 = vadd.f32 %v2675_v0, %v3731_v53  ;;  %v2670_v3 = vadd.f32 %v2881_v62, %v2669_v1  ;;  %2685 = sbr.rel (%p2882_p5) target bundleno = 4210 (0x1072), region = 96 }
0x106b   : > { %2681 = vst.msk [vmem:[%s3831_s17 + $0x8] sm:$0xff] %vm871_vm2, %v2679_v2  ;;  %v2678_v4 = vadd.f32 %v2670_v3, %v3734_v55 }
0x106d   : > { %2680 = vst.msk [vmem:[%s3831_s17] sm:$0xff] %vm871_vm2, %v2678_v4 }
0x106e   : > { %v2686_v53 = vld [vmem:[%s3859_s27] sm:$0xff]  ;;  %v2687_v5 = vld [vmem:[%s3859_s27 + $0x8] sm:$0xff] }
0x106f   : > { %v2688_v6 = vadd.f32 %v2686_v53, %v2678_v4  ;;  %v2689_v7 = vadd.f32 %v2687_v5, %v2679_v2 }
0x1071   : > { %2690 = vst.msk [vmem:[%s3831_s17] sm:$0xff] %vm871_vm2, %v2688_v6  ;;  %2691 = vst.msk [vmem:[%s3831_s17 + $0x8] sm:$0xff] %vm871_vm2, %v2689_v7 }
0x1072 PF: > { %s3860_s25 = sld [smem:[#allocation2_spill]] }
0x1078   : > { %s27_s24 = sadd.s32 1, %s3860_s25  }
0x1079   : > { %p24_p6 = scmp.ge.s32.totalorder %s27_s24, 4  }
0x107b   :  { %26 = sbr.rel (!%p24_p6) target bundleno = 8 (0x8), region = 155 }

// kernel: _lambda_.7
= control target key start
LH: loop header
LB: loop body
LE: loop exit
PB: predicated region body
PF: predicated region fallthrough
CT: control target
= control target key end

     0   :  { %s669_s21 = smov 0   ;;  %s721_s0 = inlined_call_operand.vmem [shape: f32[2,8,32], index: 0, kind: input, shape index: {}]   ;;  %s722_s1 = inlined_call_operand.vmem [shape: f32[2,1,32], index: 1, kind: input, shape index: {}]   ;;  %s723_s2 = inlined_call_operand.vmem [shape: f32[2,1,32], index: 2, kind: input, shape index: {}]   ;;  %s724_s3 = inlined_call_operand.vmem [shape: f32[2,32,64], index: 3, kind: input, shape index: {}]   ;;  %s725_s4 = inlined_call_operand.vmem [shape: f32[2,1,64], index: 4, kind: input, shape index: {}]   ;;  %s726_s5 = inlined_call_operand.vmem [shape: f32[2,2,8,32], index: 5, kind: output, shape index: {0}]   ;;  %s727_s6 = inlined_call_operand.vmem [shape: f32[2,2,8,32], index: 6, kind: output, shape index: {1}]  }
   0x1 LB: > { %s574_s22 = sadd.s32 4294967295, %s631_s21   ;;  %p578_p0 = scmp.ge.s32.totalorder %s631_s21, 1  ;;  %s631_s21 = sphi %s669_s21, %s17_s21  }
   0x2   : > { %p239_p1 = scmp.lt.s32.totalorder %s631_s21, 3 }
   0x4   : > { %p240_p2 = pnand %p578_p0, %p239_p1 }
   0x5   : > { %p283_p3 = scmp.lt.s32.totalorder (!%p240_p2), %s574_s22, 1  ;;  %s633_s20 = smov (!%p240_p2), 96  }
   0x6   : > { %243 = sbr.rel (%p240_p2) target bundleno = 637 (0x27d), region = 40 }
   0xb   : > { %v307_v0 = vld [vmem:[%s721_s0] sm:$0xff]  ;;  %vm311_vm0 = vcmask 261120   ;;  %v308_v1 = vld [vmem:[%s721_s0 + $0x8] sm:$0xff]  ;;  %s729_s22 = smov (!%p283_p3, %s574_s22), 1 }
   0xc   : > { %v312_v2 = vsel %vm311_vm0, %v307_v0, 0.0  ;;  %v315_v3 = vsel %vm311_vm0, %v308_v1, 0.0  ;;  %s592_s27 = sshll.u32 %s729_s22, 5  ;;  %s285_s9 = scalar_lea.vmem %s722_s1, %s729_s22 }
   0xd   : > { %313 = vadd.xlane.f32.xlu0 %v312_v2  ;;  %s293_s30 = scalar_lea.vmem %s724_s3, %s592_s27  ;;  %s288_s12 = scalar_lea.vmem %s723_s2, %s729_s22  ;;  %v585_v25 = vld [vmem:[%s285_s9] ss:$0 sm:$0xff] }
   0xe   : > { %v358_v14 = vld [vmem:[%s293_s30 + $0x18] sm:$0xff]  ;;  %v357_v15 = vld [vmem:[%s293_s30 + $0x10] sm:$0xff]  ;;  %v356_v16 = vld [vmem:[%s293_s30 + $0x8] sm:$0xff]  ;;  %s296_s15 = scalar_lea.vmem %s725_s4, %s729_s22  ;;  %s593_s16 = sshll.u32 %s729_s22, 4 }
   0xf   : > { %601 = vmatprep.subr.mxu0 %v358_v14  ;;  %v355_v17 = vld [vmem:[%s293_s30] sm:$0xff]  ;;  %s301_s19 = scalar_lea.vmem %s726_s5, %s593_s16  ;;  %s306_s22 = scalar_lea.vmem %s727_s6, %s593_s16 }
  0x10   : > { %602 = vmatpush3.msra.mxu0 %v358_v14  ;;  %v586_v27 = vld [vmem:[%s288_s12] ss:$0 sm:$0xff] }
  0x11   : > { %316 = vadd.xlane.f32.xlu0 %v315_v3  ;;  %603 = vmatprep.subr.mxu0 %v357_v15  ;;  %v587_v34 = vld [vmem:[%s296_s15] ss:$0 sm:$0xff] }
  0x12   : > { %604 = vmatpush3.msra.mxu0 %v357_v15 }
  0x13   : > { %605 = vmatprep.subr.mxu0 %v356_v16 }
  0x14   : > { %606 = vmatpush3.msra.mxu0 %v356_v16 }
  0x15   : > { %607 = vmatprep.subr.mxu0 %v355_v17 }
  0x16   : > { %608 = vmatpush3.msra.mxu0 %v355_v17 }
  0x96   : > { %v314_v4 = vpop.xlane.xlu0 %313 }
  0x97   : > { %v319_v5 = vmul.f32 0.03125, %v314_v4 }
  0x99   : > { %v321_v6 = vsub.f32 %v307_v0, %v319_v5 }
  0x9a   : > { %v317_v7 = vpop.xlane.xlu0 %316 }
  0x9b   : > { %v320_v8 = vmul.f32 0.03125, %v317_v7  ;;  %v323_v9 = vmul.f32 %v321_v6, %v321_v6 }
  0x9d   : > { %v322_v10 = vsub.f32 %v308_v1, %v320_v8  ;;  %v325_v11 = vsel %vm311_vm0, %v323_v9, 0.0 }
  0x9e   : > { %326 = vadd.xlane.f32.xlu1 %v325_v11 }
  0x9f   : > { %v324_v12 = vmul.f32 %v322_v10, %v322_v10 }
  0xa1   : > { %v328_v13 = vsel %vm311_vm0, %v324_v12, 0.0 }
  0xa2   : > { %329 = vadd.xlane.f32.xlu1 %v328_v13 }
 0x127   : > { %v327_v18 = vpop.xlane.xlu1 %326 }
 0x128   : > { %v331_v19 = vmul.f32 0.03125, %v327_v18 }
 0x12a   : > { %v333_v20 = vadd.f32 1e-05, %v331_v19 }
 0x12b   : > { %v330_v21 = vpop.xlane.xlu1 %329 }
 0x12c   : > { %621 = vrsqrt.f32 %v333_v20  ;;  %v332_v22 = vmul.f32 0.03125, %v330_v21 }
 0x12e   : > { %v334_v23 = vadd.f32 1e-05, %v332_v22 }
 0x130   : > { %623 = vrsqrt.f32 %v334_v23 }
 0x139   : > { %v622_v24 = vpop.eup %621 }
 0x13a   : > { %v337_v26 = vmul.f32 %v622_v24, %v321_v6 }
 0x13c   : > { %v345_v28 = vmul.f32 %v585_v25, %v337_v26 }
 0x13d   : > { %v624_v29 = vpop.eup %623 }
 0x13e   : > { %v338_v30 = vmul.f32 %v624_v29, %v322_v10  ;;  %v353_v31 = vadd.f32 %v586_v27, %v345_v28 }
 0x140   : > { %v346_v32 = vmul.f32 %v585_v25, %v338_v30  ;;  %609 = vmatprep.mubr.msk.f32.mxu0 %vm311_vm0, %v353_v31 }
 0x142   : > { %v354_v33 = vadd.f32 %v586_v27, %v346_v32 }
 0x144   : > { %610 = vmatmul.mubr.msk.f32.vlgmr.msra.gmra.mxu0 %vm311_vm0, %v354_v33 }
 0x204   : > { %v611_v35 = vpop.f32.mrf.mxu0 }
 0x205   : > { %v444_v36 = vadd.f32 %v611_v35, %v587_v34 }
 0x206   : > { %v438_v37 = vpop.f32.mrf.mxu0 }
 0x207   : > { %448 = vst.msk [vmem:[%s301_s19 + $0x8] sm:$0xff] %vm311_vm0, %v444_v36  ;;  %v439_v38 = vadd.f32 %v587_v34, %v438_v37  ;;  %453 = vrot.lane.b32.xlu1 %v444_v36, %s633_s20 }
 0x209   : > { %447 = vst.msk [vmem:[%s301_s19] sm:$0xff] %vm311_vm0, %v439_v38  ;;  %451 = vrot.lane.b32.xlu0 %v439_v38, %s633_s20 }
 0x279   : > { %v454_v39 = vpop.permute.xlu1 %453 }
 0x27a   : > { %458 = vst.msk [vmem:[%s306_s22 + $0x8] sm:$0xff] %vm311_vm0, %v454_v39 }
 0x27b   : > { %v452_v40 = vpop.permute.xlu0 %451 }
 0x27c   : > { %457 = vst.msk [vmem:[%s306_s22] sm:$0xff] %vm311_vm0, %v452_v40 }
 0x27d PF: > { %s17_s21 = sadd.s32 1, %s631_s21  }
 0x27e   : > { %p14_p4 = scmp.ge.s32.totalorder %s17_s21, 4  }
 0x280   :  { %16 = sbr.rel (!%p14_p4) target bundleno = 1 (0x1), region = 91 }

// kernel: _lambda_.6
= control target key start
LH: loop header
LB: loop body
LE: loop exit
PB: predicated region body
PF: predicated region fallthrough
CT: control target
= control target key end

     0   :  { %s3321_s24 = smov 0   ;;  %s3720_s0 = inlined_call_operand.vmem [shape: f32[2,8,128], index: 0, kind: input, shape index: {}]   ;;  %s3721_s1 = inlined_call_operand.vmem [shape: f32[128,32], index: 1, kind: input, shape index: {}]   ;;  %s3722_s2 = inlined_call_operand.vmem [shape: f32[1,32], index: 2, kind: input, shape index: {}]   ;;  %s3723_s3 = inlined_call_operand.vmem [shape: f32[1,8,32], index: 3, kind: input, shape index: {}]   ;;  %s3724_s4 = inlined_call_operand.vmem [shape: f32[2,8,32], index: 4, kind: input, shape index: {}]   ;;  %s3725_s5 = inlined_call_operand.vmem [shape: f32[2,1,32], index: 5, kind: input, shape index: {}]   ;;  %s3726_s6 = inlined_call_operand.vmem [shape: f32[2,1,32], index: 6, kind: input, shape index: {}]   ;;  %s3727_s7 = inlined_call_operand.vmem [shape: f32[2,32,96], index: 7, kind: input, shape index: {}]   ;;  %s3728_s8 = inlined_call_operand.vmem [shape: f32[2,1,96], index: 8, kind: input, shape index: {}]   ;;  %s3729_s9 = inlined_call_operand.vmem [shape: f32[2,32,32], index: 9, kind: input, shape index: {}]   ;;  %s3730_s10 = inlined_call_operand.vmem [shape: f32[2,1,32], index: 10, kind: input, shape index: {}]   ;;  %s3731_s11 = inlined_call_operand.vmem [shape: f32[2,1,32], index: 11, kind: input, shape index: {}]   ;;  %s3732_s12 = inlined_call_operand.vmem [shape: f32[2,1,32], index: 12, kind: input, shape index: {}]   ;;  %s3733_s13 = inlined_call_operand.vmem [shape: f32[2,32,128], index: 13, kind: input, shape index: {}]   ;;  %s3734_s14 = inlined_call_operand.vmem [shape: f32[2,1,128], index: 14, kind: input, shape index: {}]   ;;  %s3735_s15 = inlined_call_operand.vmem [shape: f32[2,128,32], index: 15, kind: input, shape index: {}]   ;;  %s3736_s16 = inlined_call_operand.vmem [shape: f32[2,1,32], index: 16, kind: input, shape index: {}]   ;;  %s3737_s17 = inlined_call_operand.vmem [shape: f32[2,8,32], index: 17, kind: output, shape index: {}]  }
   0x1   :  { %3743 = sst [smem:[#allocation4_spill]] %s3720_s0 }
   0x2   :  { %3744 = sst [smem:[#allocation5_spill]] %s3721_s1 }
   0x3   :  { %3745 = sst [smem:[#allocation6_spill]] %s3724_s4 }
   0x4   :  { %3746 = sst [smem:[#allocation7_spill]] %s3725_s5 }
   0x5   :  { %3747 = sst [smem:[#allocation8_spill]] %s3726_s6 }
   0x6   :  { %3748 = sst [smem:[#allocation9_spill]] %s3727_s7 }
   0x7   :  { %3749 = sst [smem:[#allocation10_spill]] %s3729_s9 }
   0x8 LB: > { %3750 = sst [smem:[#allocation2_spill]] %s3213_s24  ;;  %s3327_s25 = sadd.s32 4294967295, %s3213_s24   ;;  %s3213_s24 = sphi %s3321_s24, %s27_s24  }
   0x9   : > { %p2814_p0 = scmp.ge.s32.totalorder %s3213_s24, 1  ;;  %p576_p1 = scmp.lt.s32.totalorder %s3213_s24, 3 }
   0xb   : > { %p577_p2 = pnand %p2814_p0, %p576_p1 }
   0xd   : > { %580 = sbr.rel (%p577_p2) target bundleno = 4195 (0x1063), region = 88 }
  0x12   : > { %p662_p3 = scmp.lt.s32.totalorder %s3327_s25, 1  ;;  %s3753_s7 = sld [smem:[#allocation9_spill]] }
  0x13   : > { %s3754_s9 = sld [smem:[#allocation10_spill]]  ;;  %p2823_p4 = scmp.ne.s32.totalorder %s3327_s25, 0 }
  0x14   : > { %s3333_s26 = scalar_select %p662_p3, %s3327_s25, 1 }
  0x15   : > { %s3756_s22 = sld [smem:[#allocation5_spill]] (!%p2823_p4) }
  0x16   : > { %s2866_s19 = sshll.u32 %s3333_s26, 5  ;;  %s686_s6 = scalar_lea.vmem %s3731_s11, %s3333_s26 }
  0x17   : > { %s689_s21 = scalar_lea.vmem %s3732_s12, %s3333_s26  ;;  %s705_s1 = scalar_lea.vmem %s3736_s16, %s3333_s26 }
  0x18   : > { %s3351_s27 = scalar_lea.vmem %s3753_s7, %s2866_s19  ;;  %s3373_s7 = scalar_lea.vmem %s3733_s13, %s2866_s19 }
  0x19   : > { %s3356_s4 = scalar_lea.vmem %s3754_s9, %s2866_s19  ;;  %s697_s9 = scalar_lea.vmem %s3734_s14, %s3333_s26 }
  0x1a   : > { %3755 = sst [smem:[#allocation3_spill]] %s3356_s4  ;;  %s2869_s4 = sshll.u32 %s3333_s26, 7 }
  0x1b   : > { %s3383_s0 = scalar_lea.vmem %s3735_s15, %s2869_s4  ;;  %709 = sbr.rel (%p2823_p4) target bundleno = 265 (0x109), region = 92 }
  0x1c   : > { %s3757_s20 = sld [smem:[#allocation4_spill]] (!%p2823_p4) }
  0x20   : > { %v727_v0 = vld [vmem:[%s3756_s22 + $0x78] sm:$0xff]  ;;  %v726_v1 = vld [vmem:[%s3756_s22 + $0x70] sm:$0xff]  ;;  %v725_v2 = vld [vmem:[%s3756_s22 + $0x68] sm:$0xff]  ;;  %vm813_vm0 = vcmask 261120  }
  0x21   : > { %2956 = vmatprep.subr.mxu0 %v727_v0  ;;  %v724_v3 = vld [vmem:[%s3756_s22 + $0x60] sm:$0xff]  ;;  %v723_v5 = vld [vmem:[%s3756_s22 + $0x58] sm:$0xff]  ;;  %v722_v6 = vld [vmem:[%s3756_s22 + $0x50] sm:$0xff] }
  0x22   : > { %2957 = vmatpush3.msra.mxu0 %v727_v0  ;;  %v710_v4 = vld [vmem:[%s3757_s20] sm:$0xff]  ;;  %v721_v7 = vld [vmem:[%s3756_s22 + $0x48] sm:$0xff]  ;;  %v719_v9 = vld [vmem:[%s3756_s22 + $0x38] sm:$0xff] }
  0x23   : > { %2958 = vmatprep.subr.mxu0 %v726_v1  ;;  %2988 = vmatprep.mubr.f32.mxu0 %v710_v4  ;;  %v720_v8 = vld [vmem:[%s3756_s22 + $0x40] sm:$0xff]  ;;  %v718_v10 = vld [vmem:[%s3756_s22 + $0x30] sm:$0xff]  ;;  %v717_v11 = vld [vmem:[%s3756_s22 + $0x28] sm:$0xff] }
  0x24   : > { %2959 = vmatpush3.msra.mxu0 %v726_v1  ;;  %v716_v12 = vld [vmem:[%s3756_s22 + $0x20] sm:$0xff]  ;;  %v715_v13 = vld [vmem:[%s3756_s22 + $0x18] sm:$0xff]  ;;  %v714_v14 = vld [vmem:[%s3756_s22 + $0x10] sm:$0xff] }
  0x25   : > { %2960 = vmatprep.subr.mxu0 %v725_v2  ;;  %v713_v15 = vld [vmem:[%s3756_s22 + $0x8] sm:$0xff]  ;;  %v712_v16 = vld [vmem:[%s3756_s22] sm:$0xff] }
  0x26   : > { %2961 = vmatpush3.msra.mxu0 %v725_v2  ;;  %v711_v17 = vld [vmem:[%s3757_s20 + $0x8] sm:$0xff]  ;;  %v2824_v18 = vld [vmem:[%s3722_s2] ss:$0 sm:$0xff] }
  0x27   : > { %2962 = vmatprep.subr.mxu0 %v724_v3  ;;  %v810_v20 = vld [vmem:[%s3723_s3] sm:$0xff] }
  0x28   : > { %2963 = vmatpush3.msra.mxu0 %v724_v3 }
  0x29   : > { %2964 = vmatprep.subr.mxu0 %v723_v5 }
  0x2a   : > { %2965 = vmatpush3.msra.mxu0 %v723_v5 }
  0x2b   : > { %2966 = vmatprep.subr.mxu0 %v722_v6 }
  0x2c   : > { %2967 = vmatpush3.msra.mxu0 %v722_v6 }
  0x2d   : > { %2968 = vmatprep.subr.mxu0 %v721_v7 }
  0x2e   : > { %2969 = vmatpush3.msra.mxu0 %v721_v7 }
  0x2f   : > { %2970 = vmatprep.subr.mxu0 %v720_v8 }
  0x30   : > { %2971 = vmatpush3.msra.mxu0 %v720_v8 }
  0x31   : > { %2972 = vmatprep.subr.mxu0 %v719_v9 }
  0x32   : > { %2973 = vmatpush3.msra.mxu0 %v719_v9 }
  0x33   : > { %2974 = vmatprep.subr.mxu0 %v718_v10 }
  0x34   : > { %2975 = vmatpush3.msra.mxu0 %v718_v10 }
  0x35   : > { %2976 = vmatprep.subr.mxu0 %v717_v11 }
  0x36   : > { %2977 = vmatpush3.msra.mxu0 %v717_v11 }
  0x37   : > { %2978 = vmatprep.subr.mxu0 %v716_v12 }
  0x38   : > { %2979 = vmatpush3.msra.mxu0 %v716_v12 }
  0x39   : > { %2980 = vmatprep.subr.mxu0 %v715_v13 }
  0x3a   : > { %2981 = vmatpush3.msra.mxu0 %v715_v13 }
  0x3b   : > { %2982 = vmatprep.subr.mxu0 %v714_v14 }
  0x3c   : > { %2983 = vmatpush3.msra.mxu0 %v714_v14 }
  0x3d   : > { %2984 = vmatprep.subr.mxu0 %v713_v15 }
  0x3e   : > { %2985 = vmatpush3.msra.mxu0 %v713_v15 }
  0x3f   : > { %2986 = vmatprep.subr.mxu0 %v712_v16 }
  0x40   : > { %2987 = vmatpush3.msra.mxu0 %v712_v16 }
  0x41   : > { %2989 = vmatmul.mubr.f32.vlgmr.msra.gmra.mxu0 %v711_v17 }
 0x101   : > { %v2990_v19 = vpop.f32.mrf.mxu0 }
 0x102   : > { %v807_v21 = vadd.f32 %v2990_v19, %v2824_v18 }
 0x103   : > { %v801_v22 = vpop.f32.mrf.mxu0 }
 0x104   : > { %v812_v23 = vadd.f32 %v810_v20, %v807_v21  ;;  %v802_v24 = vadd.f32 %v2824_v18, %v801_v22 }
 0x106   : > { %815 = vst.msk [vmem:[%s3737_s17 + $0x8] sm:$0xff] %vm813_vm0, %v812_v23  ;;  %v811_v25 = vadd.f32 %v810_v20, %v802_v24 }
 0x108   : > { %814 = vst.msk [vmem:[%s3737_s17] sm:$0xff] %vm813_vm0, %v811_v25 }
 0x109 PF: > { %vm854_vm1 = vcmask 261120   ;;  %v821_v40 = vld [vmem:[%s3351_s27 + $0x18] sm:$0xff]  ;;  %v820_v41 = vld [vmem:[%s3351_s27 + $0x10] sm:$0xff]  ;;  %v819_v42 = vld [vmem:[%s3351_s27 + $0x8] sm:$0xff]  ;;  %s3758_s4 = sld [smem:[#allocation7_spill]]  ;;  %v3215_v60 = vmov 0.0   ;;  %s3762_s24 = scalar_lea.vmem %s3728_s8, %s3333_s26 }
 0x10a   : > { %2991 = vmatprep.subr.mxu1 %v821_v40  ;;  %v818_v43 = vld [vmem:[%s3351_s27] sm:$0xff]  ;;  %s3760_s27 = sld [smem:[#allocation8_spill]]  ;;  %3012 = vmatprep.subr.mxu0 %v3215_v60  ;;  %vm3216_vm2 = vmmov 0   ;;  %s3217_s28 = smov 96   ;;  %vm988_vm3 = vcmask 64512   ;;  %vm2341_vm4 = vcmask 195584  }
 0x10b   : > { %2992 = vmatpush3.msra.mxu1 %v821_v40  ;;  %3014 = vmatprep.mubr.msk.f32.mxu0 %vm3216_vm2, %v3215_v60  ;;  %v2827_v61 = vld [vmem:[%s3762_s24] ss:$0 sm:$0xff]  ;;  %s3220_s29 = smov 120   ;;  %s3221_s18 = smov 56   ;;  %vm2338_vm5 = vcmask 130048  }
 0x10c   : > { %2993 = vmatprep.subr.mxu1 %v820_v41  ;;  %s3224_s19 = smov 48   ;;  %s3225_s23 = smov 72  }
 0x10d   : > { %v3464_v27 = vld [vmem:[%s3737_s17 + $0x8] sm:$0xff]  ;;  %2994 = vmatpush3.msra.mxu1 %v820_v41  ;;  %s3226_s24 = smov 104   ;;  %p2863_p5 = scmp.ne.s32.totalorder %s3327_s25, 1 }
 0x10e   : > { %v858_v29 = vsel %vm854_vm1, %v3464_v27, 0.0  ;;  %2995 = vmatprep.subr.mxu1 %v819_v42 }
 0x10f   : > { %v3459_v26 = vld [vmem:[%s3737_s17] sm:$0xff]  ;;  %2996 = vmatpush3.msra.mxu1 %v819_v42  ;;  %s3759_s5 = scalar_lea.vmem %s3758_s4, %s3333_s26  ;;  %s3218_s4 = smov 64  }
 0x110   : > { %v855_v28 = vsel %vm854_vm1, %v3459_v26, 0.0  ;;  %2997 = vmatprep.subr.mxu1 %v818_v43  ;;  %v2825_v51 = vld [vmem:[%s3759_s5] ss:$0 sm:$0xff]  ;;  %s3761_s30 = scalar_lea.vmem %s3760_s27, %s3333_s26  ;;  %s3219_s5 = smov 88  }
 0x111   : > { %856 = vadd.xlane.f32.xlu0 %v855_v28  ;;  %2998 = vmatpush3.msra.mxu1 %v818_v43  ;;  %v2826_v53 = vld [vmem:[%s3761_s30] ss:$0 sm:$0xff]  ;;  %s3222_s27 = smov 80   ;;  %s3223_s30 = smov 112  }
 0x112   : > { %3002 = vmatprep.subr.mxu1 %v3215_v60 }
 0x115   : > { %859 = vadd.xlane.f32.xlu0 %v858_v29 }
 0x19a   : > { %v857_v30 = vpop.xlane.xlu0 %856 }
 0x19b   : > { %v862_v31 = vmul.f32 0.03125, %v857_v30 }
 0x19d   : > { %v864_v32 = vsub.f32 %v3459_v26, %v862_v31 }
 0x19e   : > { %v860_v33 = vpop.xlane.xlu0 %859 }
 0x19f   : > { %v863_v34 = vmul.f32 0.03125, %v860_v33  ;;  %v866_v35 = vmul.f32 %v864_v32, %v864_v32 }
 0x1a1   : > { %v865_v36 = vsub.f32 %v3464_v27, %v863_v34  ;;  %v868_v37 = vsel %vm854_vm1, %v866_v35, 0.0 }
 0x1a2   : > { %869 = vadd.xlane.f32.xlu1 %v868_v37 }
 0x1a3   : > { %v867_v38 = vmul.f32 %v865_v36, %v865_v36 }
 0x1a5   : > { %v871_v39 = vsel %vm854_vm1, %v867_v38, 0.0 }
 0x1a6   : > { %872 = vadd.xlane.f32.xlu1 %v871_v39 }
 0x22b   : > { %v870_v44 = vpop.xlane.xlu1 %869 }
 0x22c   : > { %v874_v45 = vmul.f32 0.03125, %v870_v44 }
 0x22e   : > { %v876_v46 = vadd.f32 1e-05, %v874_v45 }
 0x22f   : > { %v873_v47 = vpop.xlane.xlu1 %872 }
 0x230   : > { %3163 = vrsqrt.f32 %v876_v46  ;;  %v875_v48 = vmul.f32 0.03125, %v873_v47 }
 0x232   : > { %v877_v49 = vadd.f32 1e-05, %v875_v48 }
 0x234   : > { %3165 = vrsqrt.f32 %v877_v49 }
 0x23d   : > { %v3164_v50 = vpop.eup %3163 }
 0x23e   : > { %v880_v52 = vmul.f32 %v3164_v50, %v864_v32 }
 0x240   : > { %v888_v54 = vmul.f32 %v2825_v51, %v880_v52 }
 0x241   : > { %v3166_v55 = vpop.eup %3165 }
 0x242   : > { %v881_v56 = vmul.f32 %v3166_v55, %v865_v36  ;;  %v896_v57 = vadd.f32 %v2826_v53, %v888_v54 }
 0x244   : > { %v889_v58 = vmul.f32 %v2825_v51, %v881_v56  ;;  %2999 = vmatprep.mubr.msk.f32.mxu1 %vm854_vm1, %v896_v57 }
 0x246   : > { %v897_v59 = vadd.f32 %v2826_v53, %v889_v58 }
 0x248   : > { %3000 = vmatmul.mubr.msk.f32.vlgmr.msra.gmra.mxu1 %vm854_vm1, %v897_v59 }
 0x249   : > { %3004 = vmatprep.mubr.msk.f32.mxu1 %vm3216_vm2, %v3215_v60 }
 0x308   : > { %v3001_v62 = vpop.f32.mrf.mxu1 }
 0x309   : > { %v3501_v63 = vadd.f32 %v3001_v62, %v2827_v61 }
 0x30a   : > { %v976_v0 = vpop.f32.mrf.mxu1 }
 0x30b   : > { %v3503_v1 = vadd.f32 %v2827_v61, %v976_v0  ;;  %1064 = vrot.lane.b32.xlu1 %v3501_v63, %s3217_s28 }
 0x30d   : > { %986 = vrot.lane.b32.xlu0 %v3503_v1, %s3217_s28  ;;  %s3227_s28 = smov 40  }
 0x37d   : > { %v1065_v3 = vpop.permute.xlu1 %1064 }
 0x37f   : > { %v987_v2 = vpop.permute.xlu0 %986 }
 0x380   : > { %3003 = vmatpush3.xpose.msk.msra.mxu1 %vm988_vm3, %v987_v2 }
 0x381   : > { %3007 = vmatprep.subr.mxu1 %v3215_v60 }
 0x383   : > { %3005 = vmatmul.mubr.msk.f32.vlgmr.msra.gmra.mxu1 %vm988_vm3, %v3503_v1 }
 0x384   : > { %3008 = vmatpush3.xpose.msk.msra.mxu1 %vm988_vm3, %v1065_v3  ;;  %3009 = vmatprep.mubr.msk.f32.mxu1 %vm3216_vm2, %v3215_v60 }
 0x385   : > { %3017 = vmatprep.subr.mxu1 %v3215_v60 }
 0x387   : > { %3010 = vmatmul.mubr.msk.f32.vlgmr.msra.gmra.mxu1 %vm988_vm3, %v3501_v63 }
 0x388   : > { %3019 = vmatprep.mubr.msk.f32.mxu1 %vm3216_vm2, %v3215_v60 }
 0x443   : > { %v1059_v4 = vpop.f32.mrf.mxu1 }
 0x444   : > { %v1140_v5 = vmul.f32 0.35355338, %v1059_v4 }
 0x445   : > { %v3006_v6 = vpop.f32.mrf.mxu1 }
 0x446   : > { %v1142_v7 = vsel %vm988_vm3, %v1140_v5, -inf }
 0x447   : > { %1143 = vmax.xlane.f32.xlu1 %v1142_v7  ;;  %v1136_v8 = vpop.f32.mrf.mxu1 }
 0x448   : > { %v1141_v9 = vmul.f32 0.35355338, %v1136_v8 }
 0x449   : > { %v3011_v10 = vpop.f32.mrf.mxu1 }
 0x44a   : > { %v1145_v11 = vsel %vm988_vm3, %v1141_v9, -inf }
 0x44b   : > { %1146 = vmax.xlane.f32.xlu0 %v1145_v11 }
 0x458   : > { %1240 = vrot.lane.b32.xlu1 %v3501_v63, %s3218_s4 }
 0x45c   : > { %1318 = vrot.lane.b32.xlu1 %v3503_v1, %s3219_s5 }
 0x460   : > { %1396 = vrot.lane.b32.xlu1 %v3501_v63, %s3219_s5  ;;  %s3229_s5 = smov 16  }
 0x4d0   : > { %v1144_v12 = vpop.xlane.xlu1 %1143 }
 0x4d1   : > { %v1148_v13 = vsub.f32 %v1140_v5, %v1144_v12 }
 0x4d3   : > { %v1150_v14 = vmul.f32 1.442695, %v1148_v13 }
 0x4d4   : > { %v1241_v15 = vpop.permute.xlu1 %1240  ;;  %v1147_v16 = vpop.xlane.xlu0 %1146 }
 0x4d5   : > { %3167 = vpow2.f32 %v1150_v14  ;;  %v1149_v17 = vsub.f32 %v1141_v9, %v1147_v16  ;;  %3018 = vmatpush3.msra.mxu1 %v1241_v15 }
 0x4d6   : > { %3027 = vmatprep.subr.mxu1 %v3215_v60 }
 0x4d7   : > { %v1152_v18 = vmul.f32 1.442695, %v1149_v17 }
 0x4d8   : > { %v1319_v23 = vpop.permute.xlu1 %1318 }
 0x4d9   : > { %3169 = vpow2.f32 %v1152_v18 }
 0x4dc   : > { %v1397_v24 = vpop.permute.xlu1 %1396 }
 0x4e2   : > { %v3168_v19 = vpop.eup %3167 }
 0x4e3   : > { %v1154_v20 = vsel %vm988_vm3, %v3168_v19, 0.0 }
 0x4e4   : > { %1155 = vadd.xlane.f32.xlu0 %v1154_v20 }
 0x4e6   : > { %v3170_v21 = vpop.eup %3169 }
 0x4e7   : > { %v1157_v22 = vsel %vm988_vm3, %v3170_v21, 0.0 }
 0x4e8   : > { %1158 = vadd.xlane.f32.xlu1 %v1157_v22 }
 0x4f9   : > { %1394 = vrot.lane.b32.xlu1 %v3501_v63, %s3220_s29 }
 0x4fa   : > { %1164 = vrot.lane.b32.xlu0 %v3503_v1, %s3218_s4  ;;  %s3228_s4 = smov 8  }
 0x4fe   : > { %1316 = vrot.lane.b32.xlu0 %v3503_v1, %s3220_s29  ;;  %s3763_s29 = sld [smem:[#allocation3_spill]] }
 0x56d   : > { %v1156_v25 = vpop.xlane.xlu0 %1155 }
 0x56e   : > { %3171 = vrcp.f32 %v1156_v25 }
 0x571   : > { %v1159_v28 = vpop.xlane.xlu1 %1158  ;;  %v1165_v29 = vpop.permute.xlu0 %1164 }
 0x572   : > { %3173 = vrcp.f32 %v1159_v28  ;;  %3013 = vmatpush3.msra.mxu0 %v1165_v29 }
 0x573   : > { %3022 = vmatprep.subr.mxu0 %v3215_v60 }
 0x575   : > { %v1317_v34 = vpop.permute.xlu0 %1316  ;;  %v1395_v35 = vpop.permute.xlu1 %1394 }
 0x57b   : > { %v3172_v30 = vpop.eup %3171 }
 0x57c   : > { %v1162_v31 = vmul.f32 %v3172_v30, %v3168_v19 }
 0x57e   : > { %3015 = vmatmul.mubr.msk.f32.vlgmr.msra.gmra.mxu0 %vm988_vm3, %v1162_v31 }
 0x57f   : > { %v3174_v32 = vpop.eup %3173  ;;  %3023 = vmatpush3.xpose.msk.msra.mxu0 %vm988_vm3, %v1319_v23  ;;  %3024 = vmatprep.mubr.msk.f32.mxu0 %vm3216_vm2, %v3215_v60 }
 0x580   : > { %v1163_v33 = vmul.f32 %v3174_v32, %v3170_v21  ;;  %3032 = vmatprep.subr.mxu0 %v3215_v60 }
 0x582   : > { %3020 = vmatmul.mubr.msk.f32.vlgmr.msra.gmra.mxu1 %vm988_vm3, %v1163_v33  ;;  %3025 = vmatmul.mubr.msk.f32.vlgmr.msra.gmra.mxu0 %vm988_vm3, %v1317_v34 }
 0x583   : > { %3028 = vmatpush3.xpose.msk.msra.mxu1 %vm988_vm3, %v1397_v24  ;;  %3029 = vmatprep.mubr.msk.f32.mxu1 %vm3216_vm2, %v3215_v60 }
 0x584   : > { %3037 = vmatprep.subr.mxu1 %v3215_v60  ;;  %3034 = vmatprep.mubr.msk.f32.mxu0 %vm3216_vm2, %v3215_v60 }
 0x586   : > { %3030 = vmatmul.mubr.msk.f32.vlgmr.msra.gmra.mxu1 %vm988_vm3, %v1395_v35 }
 0x587   : > { %3039 = vmatprep.mubr.msk.f32.mxu1 %vm3216_vm2, %v3215_v60 }
 0x63e   : > { %v3547_v36 = vpop.f32.mrf.mxu0 }
 0x640   : > { %v3016_v37 = vpop.f32.mrf.mxu0 }
 0x642   : > { %v3549_v38 = vpop.f32.mrf.mxu1  ;;  %v1390_v39 = vpop.f32.mrf.mxu0 }
 0x643   : > { %v1472_v40 = vmul.f32 0.35355338, %v1390_v39 }
 0x644   : > { %v3021_v41 = vpop.f32.mrf.mxu1  ;;  %v3026_v42 = vpop.f32.mrf.mxu0 }
 0x645   : > { %v1474_v43 = vsel %vm988_vm3, %v1472_v40, -inf }
 0x646   : > { %1475 = vmax.xlane.f32.xlu0 %v1474_v43  ;;  %v1468_v44 = vpop.f32.mrf.mxu1 }
 0x647   : > { %v1473_v45 = vmul.f32 0.35355338, %v1468_v44 }
 0x648   : > { %v3031_v46 = vpop.f32.mrf.mxu1 }
 0x649   : > { %v1477_v47 = vsel %vm988_vm3, %v1473_v45, -inf }
 0x64a   : > { %1478 = vmax.xlane.f32.xlu1 %v1477_v47 }
 0x65b   : > { %1572 = vrot.lane.b32.xlu1 %v3501_v63, %s3221_s18 }
 0x65c   : > { %1496 = vrot.lane.b32.xlu0 %v3503_v1, %s3221_s18  ;;  %s3230_s18 = smov 24  }
 0x65f   : > { %1650 = vrot.lane.b32.xlu1 %v3503_v1, %s3222_s27 }
 0x663   : > { %1728 = vrot.lane.b32.xlu1 %v3501_v63, %s3222_s27  ;;  %s3765_s27 = sld [smem:[#allocation6_spill]] (!%p2863_p5) }
 0x667   : > { %1726 = vrot.lane.b32.xlu1 %v3501_v63, %s3223_s30 }
 0x6cf   : > { %v1476_v48 = vpop.xlane.xlu0 %1475 }
 0x6d0   : > { %v1480_v49 = vsub.f32 %v1472_v40, %v1476_v48 }
 0x6d2   : > { %v1482_v50 = vmul.f32 1.442695, %v1480_v49 }
 0x6d3   : > { %v1497_v51 = vpop.permute.xlu0 %1496  ;;  %v1479_v52 = vpop.xlane.xlu1 %1478 }
 0x6d4   : > { %3175 = vpow2.f32 %v1482_v50  ;;  %v1481_v53 = vsub.f32 %v1473_v45, %v1479_v52  ;;  %3033 = vmatpush3.msra.mxu0 %v1497_v51 }
 0x6d5   : > { %3042 = vmatprep.subr.mxu0 %v3215_v60 }
 0x6d6   : > { %v1484_v54 = vmul.f32 1.442695, %v1481_v53 }
 0x6d7   : > { %v1573_v55 = vpop.permute.xlu1 %1572 }
 0x6d8   : > { %3177 = vpow2.f32 %v1484_v54  ;;  %3038 = vmatpush3.msra.mxu1 %v1573_v55 }
 0x6d9   : > { %3047 = vmatprep.subr.mxu1 %v3215_v60 }
 0x6db   : > { %v1651_v0 = vpop.permute.xlu1 %1650 }
 0x6df   : > { %v1729_v5 = vpop.permute.xlu1 %1728 }
 0x6e1   : > { %v3176_v56 = vpop.eup %3175 }
 0x6e2   : > { %v1486_v57 = vsel %vm988_vm3, %v3176_v56, 0.0 }
 0x6e3   : > { %1487 = vadd.xlane.f32.xlu0 %v1486_v57  ;;  %v1727_v8 = vpop.permute.xlu1 %1726 }
 0x6e5   : > { %v3178_v58 = vpop.eup %3177 }
 0x6e6   : > { %v1489_v59 = vsel %vm988_vm3, %v3178_v58, 0.0 }
 0x6e7   : > { %1490 = vadd.xlane.f32.xlu0 %v1489_v59 }
 0x6fd   : > { %1648 = vrot.lane.b32.xlu0 %v3503_v1, %s3223_s30 }
 0x76c   : > { %v1488_v61 = vpop.xlane.xlu0 %1487 }
 0x76d   : > { %3179 = vrcp.f32 %v1488_v61 }
 0x770   : > { %v1491_v62 = vpop.xlane.xlu0 %1490 }
 0x771   : > { %3181 = vrcp.f32 %v1491_v62 }
 0x774   : > { %v1649_v7 = vpop.permute.xlu0 %1648 }
 0x77a   : > { %v3180_v2 = vpop.eup %3179 }
 0x77b   : > { %v1494_v3 = vmul.f32 %v3180_v2, %v3176_v56 }
 0x77d   : > { %3035 = vmatmul.mubr.msk.f32.vlgmr.msra.gmra.mxu0 %vm988_vm3, %v1494_v3 }
 0x77e   : > { %v3182_v4 = vpop.eup %3181  ;;  %3043 = vmatpush3.xpose.msk.msra.mxu0 %vm988_vm3, %v1651_v0  ;;  %3044 = vmatprep.mubr.msk.f32.mxu0 %vm3216_vm2, %v3215_v60 }
 0x77f   : > { %v1495_v6 = vmul.f32 %v3182_v4, %v3178_v58  ;;  %3052 = vmatprep.subr.mxu0 %v3215_v60 }
 0x781   : > { %3040 = vmatmul.mubr.msk.f32.vlgmr.msra.gmra.mxu1 %vm988_vm3, %v1495_v6  ;;  %3045 = vmatmul.mubr.msk.f32.vlgmr.msra.gmra.mxu0 %vm988_vm3, %v1649_v7 }
 0x782   : > { %3048 = vmatpush3.xpose.msk.msra.mxu1 %vm988_vm3, %v1729_v5  ;;  %3049 = vmatprep.mubr.msk.f32.mxu1 %vm3216_vm2, %v3215_v60 }
 0x783   : > { %3057 = vmatprep.subr.mxu1 %v3215_v60  ;;  %3054 = vmatprep.mubr.msk.f32.mxu0 %vm3216_vm2, %v3215_v60 }
 0x785   : > { %3050 = vmatmul.mubr.msk.f32.vlgmr.msra.gmra.mxu1 %vm988_vm3, %v1727_v8 }
 0x786   : > { %3059 = vmatprep.mubr.msk.f32.mxu1 %vm3216_vm2, %v3215_v60 }
 0x83d   : > { %v3579_v9 = vpop.f32.mrf.mxu0 }
 0x83f   : > { %v3036_v10 = vpop.f32.mrf.mxu0 }
 0x841   : > { %v3581_v11 = vpop.f32.mrf.mxu1  ;;  %v1722_v12 = vpop.f32.mrf.mxu0 }
 0x842   : > { %v1804_v13 = vmul.f32 0.35355338, %v1722_v12 }
 0x843   : > { %v3041_v14 = vpop.f32.mrf.mxu1  ;;  %v3046_v15 = vpop.f32.mrf.mxu0 }
 0x844   : > { %v1806_v16 = vsel %vm988_vm3, %v1804_v13, -inf  ;;  %v826_v14 = vld [vmem:[%s3763_s29 + $0x18] sm:$0xff]  ;;  %v824_v15 = vld [vmem:[%s3763_s29 + $0x8] sm:$0xff] }
 0x845   : > { %1807 = vmax.xlane.f32.xlu0 %v1806_v16  ;;  %v1800_v17 = vpop.f32.mrf.mxu1  ;;  %v823_v16 = vld [vmem:[%s3763_s29] sm:$0xff] }
 0x846   : > { %v1805_v18 = vmul.f32 0.35355338, %v1800_v17 }
 0x847   : > { %v3051_v19 = vpop.f32.mrf.mxu1 }
 0x848   : > { %v1809_v20 = vsel %vm988_vm3, %v1805_v18, -inf }
 0x849   : > { %1810 = vmax.xlane.f32.xlu1 %v1809_v20 }
 0x85a   : > { %1904 = vrot.lane.b32.xlu1 %v3501_v63, %s3224_s19 }
 0x85b   : > { %1828 = vrot.lane.b32.xlu0 %v3503_v1, %s3224_s19  ;;  %s3764_s19 = scalar_lea.vmem %s3730_s10, %s3333_s26 }
 0x85e   : > { %1982 = vrot.lane.b32.xlu1 %v3503_v1, %s3225_s23 }
 0x862   : > { %2060 = vrot.lane.b32.xlu1 %v3501_v63, %s3225_s23 }
 0x866   : > { %2058 = vrot.lane.b32.xlu1 %v3501_v63, %s3226_s24 }
 0x8ce   : > { %v1808_v21 = vpop.xlane.xlu0 %1807 }
 0x8cf   : > { %v1812_v22 = vsub.f32 %v1804_v13, %v1808_v21 }
 0x8d1   : > { %v1814_v23 = vmul.f32 1.442695, %v1812_v22 }
 0x8d2   : > { %v1829_v24 = vpop.permute.xlu0 %1828  ;;  %v1811_v25 = vpop.xlane.xlu1 %1810 }
 0x8d3   : > { %3183 = vpow2.f32 %v1814_v23  ;;  %v1813_v28 = vsub.f32 %v1805_v18, %v1811_v25  ;;  %3053 = vmatpush3.msra.mxu0 %v1829_v24 }
 0x8d4   : > { %3062 = vmatprep.subr.mxu0 %v3215_v60 }
 0x8d5   : > { %v1816_v29 = vmul.f32 1.442695, %v1813_v28 }
 0x8d6   : > { %v1905_v30 = vpop.permute.xlu1 %1904 }
 0x8d7   : > { %3185 = vpow2.f32 %v1816_v29  ;;  %3058 = vmatpush3.msra.mxu1 %v1905_v30 }
 0x8d8   : > { %3067 = vmatprep.subr.mxu1 %v3215_v60 }
 0x8da   : > { %v1983_v39 = vpop.permute.xlu1 %1982 }
 0x8de   : > { %v2061_v43 = vpop.permute.xlu1 %2060 }
 0x8e0   : > { %v3184_v31 = vpop.eup %3183 }
 0x8e1   : > { %v1818_v32 = vsel %vm988_vm3, %v3184_v31, 0.0 }
 0x8e2   : > { %1819 = vadd.xlane.f32.xlu0 %v1818_v32  ;;  %v2059_v46 = vpop.permute.xlu1 %2058 }
 0x8e4   : > { %v3186_v33 = vpop.eup %3185 }
 0x8e5   : > { %v1821_v34 = vsel %vm988_vm3, %v3186_v33, 0.0 }
 0x8e6   : > { %1822 = vadd.xlane.f32.xlu0 %v1821_v34 }
 0x8fc   : > { %1980 = vrot.lane.b32.xlu0 %v3503_v1, %s3226_s24 }
 0x96b   : > { %v1820_v35 = vpop.xlane.xlu0 %1819 }
 0x96c   : > { %3187 = vrcp.f32 %v1820_v35 }
 0x96f   : > { %v1823_v37 = vpop.xlane.xlu0 %1822 }
 0x970   : > { %3189 = vrcp.f32 %v1823_v37 }
 0x973   : > { %v1981_v45 = vpop.permute.xlu0 %1980 }
 0x979   : > { %v3188_v40 = vpop.eup %3187 }
 0x97a   : > { %v1826_v41 = vmul.f32 %v3188_v40, %v3184_v31 }
 0x97c   : > { %3055 = vmatmul.mubr.msk.f32.vlgmr.msra.gmra.mxu0 %vm988_vm3, %v1826_v41 }
 0x97d   : > { %v3190_v42 = vpop.eup %3189  ;;  %3063 = vmatpush3.xpose.msk.msra.mxu0 %vm988_vm3, %v1983_v39  ;;  %3064 = vmatprep.mubr.msk.f32.mxu0 %vm3216_vm2, %v3215_v60 }
 0x97e   : > { %v1827_v44 = vmul.f32 %v3190_v42, %v3186_v33  ;;  %3072 = vmatprep.subr.mxu0 %v3215_v60 }
 0x980   : > { %3060 = vmatmul.mubr.msk.f32.vlgmr.msra.gmra.mxu1 %vm988_vm3, %v1827_v44  ;;  %3065 = vmatmul.mubr.msk.f32.vlgmr.msra.gmra.mxu0 %vm988_vm3, %v1981_v45 }
 0x981   : > { %3068 = vmatpush3.xpose.msk.msra.mxu1 %vm988_vm3, %v2061_v43  ;;  %3069 = vmatprep.mubr.msk.f32.mxu1 %vm3216_vm2, %v3215_v60 }
 0x982   : > { %3077 = vmatprep.subr.mxu1 %v3215_v60  ;;  %3074 = vmatprep.mubr.msk.f32.mxu0 %vm3216_vm2, %v3215_v60 }
 0x984   : > { %3070 = vmatmul.mubr.msk.f32.vlgmr.msra.gmra.mxu1 %vm988_vm3, %v2059_v46 }
 0x985   : > { %3079 = vmatprep.mubr.msk.f32.mxu1 %vm3216_vm2, %v3215_v60 }
 0xa3c   : > { %v1900_v47 = vpop.f32.mrf.mxu0 }
 0xa3e   : > { %v3056_v48 = vpop.f32.mrf.mxu0 }
 0xa40   : > { %v1976_v49 = vpop.f32.mrf.mxu1  ;;  %v2054_v50 = vpop.f32.mrf.mxu0 }
 0xa41   : > { %v2136_v51 = vmul.f32 0.35355338, %v2054_v50 }
 0xa42   : > { %v3061_v52 = vpop.f32.mrf.mxu1  ;;  %v3066_v53 = vpop.f32.mrf.mxu0 }
 0xa43   : > { %v2138_v54 = vsel %vm988_vm3, %v2136_v51, -inf  ;;  %v833_v52 = vld [vmem:[%s3373_s7 + $0x18] sm:$0xff]  ;;  %v832_v53 = vld [vmem:[%s3373_s7 + $0x10] sm:$0xff] }
 0xa44   : > { %2139 = vmax.xlane.f32.xlu0 %v2138_v54  ;;  %v2132_v55 = vpop.f32.mrf.mxu1  ;;  %v831_v54 = vld [vmem:[%s3373_s7 + $0x8] sm:$0xff] }
 0xa45   : > { %v2137_v56 = vmul.f32 0.35355338, %v2132_v55  ;;  %v830_v55 = vld [vmem:[%s3373_s7] sm:$0xff] }
 0xa46   : > { %v3071_v57 = vpop.f32.mrf.mxu1 }
 0xa47   : > { %v2141_v58 = vsel %vm988_vm3, %v2137_v56, -inf }
 0xa48   : > { %2142 = vmax.xlane.f32.xlu1 %v2141_v58 }
 0xa59   : > { %2236 = vrot.lane.b32.xlu1 %v3501_v63, %s3227_s28 }
 0xa5d   : > { %2314 = vrot.lane.b32.xlu1 %v3579_v9, %s3228_s4 }
 0xa61   : > { %2316 = vrot.lane.b32.xlu1 %v3581_v11, %s3228_s4 }
 0xa65   : > { %2324 = vrot.lane.b32.xlu1 %v1976_v49, %s3229_s5 }
 0xacd   : > { %v2140_v60 = vpop.xlane.xlu0 %2139 }
 0xace   : > { %v2144_v59 = vsub.f32 %v2136_v51, %v2140_v60 }
 0xad0   : > { %v2146_v61 = vmul.f32 1.442695, %v2144_v59 }
 0xad1   : > { %v2143_v62 = vpop.xlane.xlu1 %2142 }
 0xad2   : > { %3191 = vpow2.f32 %v2146_v61  ;;  %v2145_v0 = vsub.f32 %v2137_v56, %v2143_v62 }
 0xad4   : > { %v2148_v2 = vmul.f32 1.442695, %v2145_v0  ;;  %v2857_v0 = vld [vmem:[%s686_s6] ss:$0 sm:$0xff] }
 0xad5   : > { %v2237_v3 = vpop.permute.xlu1 %2236 }
 0xad6   : > { %3193 = vpow2.f32 %v2148_v2  ;;  %3078 = vmatpush3.msra.mxu1 %v2237_v3  ;;  %v2858_v3 = vld [vmem:[%s689_s21] ss:$0 sm:$0xff] }
 0xad7   : > { %3082 = vmatprep.subr.mxu1 %v826_v14 }
 0xad9   : > { %v2315_v21 = vpop.permute.xlu1 %2314 }
 0xada   : > { %v2336_v24 = vsel %vm988_vm3, %v3547_v36, %v2315_v21  ;;  %v2854_v36 = vld [vmem:[%s3764_s19] ss:$0 sm:$0xff]  ;;  %v837_v21 = vld [vmem:[%s3383_s0 + $0x10] sm:$0xff] }
 0xadd   : > { %v2317_v22 = vpop.permute.xlu1 %2316 }
 0xade   : > { %v2337_v31 = vsel %vm988_vm3, %v3549_v38, %v2317_v22  ;;  %v836_v22 = vld [vmem:[%s3383_s0 + $0x8] sm:$0xff] }
 0xadf   : > { %v3192_v4 = vpop.eup %3191 }
 0xae0   : > { %v2150_v63 = vsel %vm988_vm3, %v3192_v4, 0.0 }
 0xae1   : > { %2151 = vadd.xlane.f32.xlu0 %v2150_v63  ;;  %v2325_v25 = vpop.permute.xlu1 %2324 }
 0xae2   : > { %v2340_v32 = vsel %vm2338_vm5, %v2337_v31, %v2325_v25 }
 0xae3   : > { %v3194_v5 = vpop.eup %3193 }
 0xae4   : > { %v2153_v6 = vsel %vm988_vm3, %v3194_v5, 0.0 }
 0xae5   : > { %2154 = vadd.xlane.f32.xlu0 %v2153_v6 }
 0xafb   : > { %2160 = vrot.lane.b32.xlu0 %v3503_v1, %s3227_s28  ;;  %v825_v1 = vld [vmem:[%s3763_s29 + $0x10] sm:$0xff] }
 0xaff   : > { %2322 = vrot.lane.b32.xlu0 %v1900_v47, %s3229_s5 }
 0xb6a   : > { %v2152_v7 = vpop.xlane.xlu0 %2151 }
 0xb6b   : > { %3195 = vrcp.f32 %v2152_v7 }
 0xb6e   : > { %v2155_v8 = vpop.xlane.xlu0 %2154 }
 0xb6f   : > { %3197 = vrcp.f32 %v2155_v8 }
 0xb72   : > { %v2161_v9 = vpop.permute.xlu0 %2160 }
 0xb73   : > { %3073 = vmatpush3.msra.mxu0 %v2161_v9  ;;  %v850_v9 = vld [vmem:[%s3383_s0 + $0x78] sm:$0xff] }
 0xb74   : > { %3104 = vmatprep.subr.mxu0 %v850_v9 }
 0xb76   : > { %v2323_v23 = vpop.permute.xlu0 %2322 }
 0xb77   : > { %v2339_v28 = vsel %vm2338_vm5, %v2336_v24, %v2323_v23  ;;  %v835_v23 = vld [vmem:[%s3383_s0] sm:$0xff] }
 0xb78   : > { %v3196_v10 = vpop.eup %3195  ;;  %v2859_v24 = vld [vmem:[%s697_s9] ss:$0 sm:$0xff] }
 0xb79   : > { %v2158_v11 = vmul.f32 %v3196_v10, %v3192_v4  ;;  %v849_v10 = vld [vmem:[%s3383_s0 + $0x70] sm:$0xff] }
 0xb7b   : > { %3075 = vmatmul.mubr.msk.f32.vlgmr.msra.gmra.mxu0 %vm988_vm3, %v2158_v11  ;;  %v848_v11 = vld [vmem:[%s3383_s0 + $0x68] sm:$0xff] }
 0xb7c   : > { %v3198_v12 = vpop.eup %3197  ;;  %3105 = vmatpush3.msra.mxu0 %v850_v9 }
 0xb7d   : > { %v2159_v13 = vmul.f32 %v3198_v12, %v3194_v5  ;;  %3106 = vmatprep.subr.mxu0 %v849_v10  ;;  %v847_v12 = vld [vmem:[%s3383_s0 + $0x60] sm:$0xff] }
 0xb7e   : > { %3107 = vmatpush3.msra.mxu0 %v849_v10 }
 0xb7f   : > { %3080 = vmatmul.mubr.msk.f32.vlgmr.msra.gmra.mxu1 %vm988_vm3, %v2159_v13  ;;  %3108 = vmatprep.subr.mxu0 %v848_v11  ;;  %v846_v13 = vld [vmem:[%s3383_s0 + $0x58] sm:$0xff] }
 0xb80   : > { %3083 = vmatpush3.msra.mxu1 %v826_v14  ;;  %3109 = vmatpush3.msra.mxu0 %v848_v11  ;;  %v845_v14 = vld [vmem:[%s3383_s0 + $0x50] sm:$0xff] }
 0xb81   : > { %3084 = vmatprep.subr.mxu1 %v825_v1  ;;  %3110 = vmatprep.subr.mxu0 %v847_v12 }
 0xb82   : > { %3085 = vmatpush3.msra.mxu1 %v825_v1  ;;  %3111 = vmatpush3.msra.mxu0 %v847_v12  ;;  %v844_v1 = vld [vmem:[%s3383_s0 + $0x48] sm:$0xff] }
 0xb83   : > { %3086 = vmatprep.subr.mxu1 %v824_v15  ;;  %3112 = vmatprep.subr.mxu0 %v846_v13 }
 0xb84   : > { %3087 = vmatpush3.msra.mxu1 %v824_v15  ;;  %3113 = vmatpush3.msra.mxu0 %v846_v13  ;;  %v843_v15 = vld [vmem:[%s3383_s0 + $0x40] sm:$0xff] }
 0xb85   : > { %3088 = vmatprep.subr.mxu1 %v823_v16  ;;  %3114 = vmatprep.subr.mxu0 %v845_v14 }
 0xb86   : > { %3089 = vmatpush3.msra.mxu1 %v823_v16  ;;  %3115 = vmatpush3.msra.mxu0 %v845_v14  ;;  %v842_v16 = vld [vmem:[%s3383_s0 + $0x38] sm:$0xff] }
 0xb87   : > { %3093 = vmatprep.subr.mxu1 %v833_v52  ;;  %3116 = vmatprep.subr.mxu0 %v844_v1 }
 0xb88   : > { %3117 = vmatpush3.msra.mxu0 %v844_v1 }
 0xb89   : > { %3118 = vmatprep.subr.mxu0 %v843_v15 }
 0xb8a   : > { %3119 = vmatpush3.msra.mxu0 %v843_v15 }
 0xb8b   : > { %3120 = vmatprep.subr.mxu0 %v842_v16 }
 0xb8c   : > { %3121 = vmatpush3.msra.mxu0 %v842_v16 }
 0xc3b   : > { %v2232_v17 = vpop.f32.mrf.mxu0 }
 0xc3c   : > { %2330 = vrot.lane.b32.xlu0 %v2232_v17, %s3230_s18  ;;  %v841_v17 = vld [vmem:[%s3383_s0 + $0x30] sm:$0xff] }
 0xc3d   : > { %v3076_v18 = vpop.f32.mrf.mxu0  ;;  %3122 = vmatprep.subr.mxu0 %v841_v17 }
 0xc3e   : > { %v840_v18 = vld [vmem:[%s3383_s0 + $0x28] sm:$0xff]  ;;  %3123 = vmatpush3.msra.mxu0 %v841_v17 }
 0xc3f   : > { %v2308_v19 = vpop.f32.mrf.mxu1  ;;  %3124 = vmatprep.subr.mxu0 %v840_v18 }
 0xc40   : > { %2332 = vrot.lane.b32.xlu1 %v2308_v19, %s3230_s18  ;;  %v839_v19 = vld [vmem:[%s3383_s0 + $0x20] sm:$0xff]  ;;  %3125 = vmatpush3.msra.mxu0 %v840_v18 }
 0xc41   : > { %v3081_v20 = vpop.f32.mrf.mxu1  ;;  %3126 = vmatprep.subr.mxu0 %v839_v19 }
 0xc42   : > { %v838_v20 = vld [vmem:[%s3383_s0 + $0x18] sm:$0xff]  ;;  %3127 = vmatpush3.msra.mxu0 %v839_v19 }
 0xc43   : > { %3128 = vmatprep.subr.mxu0 %v838_v20 }
 0xc44   : > { %3129 = vmatpush3.msra.mxu0 %v838_v20 }
 0xc45   : > { %3130 = vmatprep.subr.mxu0 %v837_v21 }
 0xc46   : > { %3131 = vmatpush3.msra.mxu0 %v837_v21 }
 0xc47   : > { %3132 = vmatprep.subr.mxu0 %v836_v22 }
 0xc48   : > { %3133 = vmatpush3.msra.mxu0 %v836_v22 }
 0xc49   : > { %3134 = vmatprep.subr.mxu0 %v835_v23 }
 0xc4a   : > { %3135 = vmatpush3.msra.mxu0 %v835_v23 }
 0xcae   : > { %v2331_v29 = vpop.permute.xlu0 %2330 }
 0xcaf   : > { %v2342_v30 = vsel %vm2341_vm4, %v2339_v28, %v2331_v29 }
 0xcb0   : > { %3090 = vmatprep.mubr.msk.f32.mxu1 %vm854_vm1, %v2342_v30 }
 0xcb2   : > { %v2333_v33 = vpop.permute.xlu1 %2332 }
 0xcb3   : > { %v2343_v34 = vsel %vm2341_vm4, %v2340_v32, %v2333_v33 }
 0xcb4   : > { %3091 = vmatmul.mubr.msk.f32.vlgmr.msra.gmra.mxu1 %vm854_vm1, %v2343_v34 }
 0xcb5   : > { %3094 = vmatpush3.msra.mxu1 %v833_v52 }
 0xcb6   : > { %3095 = vmatprep.subr.mxu1 %v832_v53 }
 0xcb7   : > { %3096 = vmatpush3.msra.mxu1 %v832_v53 }
 0xcb8   : > { %3097 = vmatprep.subr.mxu1 %v831_v54 }
 0xcb9   : > { %3098 = vmatpush3.msra.mxu1 %v831_v54 }
 0xcba   : > { %3099 = vmatprep.subr.mxu1 %v830_v55 }
 0xcbb   : > { %3100 = vmatpush3.msra.mxu1 %v830_v55 }
 0xd74   : > { %v3092_v35 = vpop.f32.mrf.mxu1 }
 0xd75   : > { %v2428_v37 = vadd.f32 %v3092_v35, %v2854_v36 }
 0xd76   : > { %v2422_v39 = vpop.f32.mrf.mxu1 }
 0xd77   : > { %v3637_v40 = vadd.f32 %v2428_v37, %v3464_v27  ;;  %v2423_v41 = vadd.f32 %v2854_v36, %v2422_v39 }
 0xd79   : > { %v3640_v42 = vadd.f32 %v2423_v41, %v3459_v26  ;;  %v2436_v38 = vsel %vm854_vm1, %v3637_v40, 0.0 }
 0xd7a   : > { %2437 = vadd.xlane.f32.xlu1 %v2436_v38 }
 0xd7b   : > { %v2433_v43 = vsel %vm854_vm1, %v3640_v42, 0.0 }
 0xd7c   : > { %2434 = vadd.xlane.f32.xlu0 %v2433_v43 }
 0xe03   : > { %v2438_v44 = vpop.xlane.xlu1 %2437 }
 0xe04   : > { %v2440_v45 = vmul.f32 0.03125, %v2438_v44 }
 0xe05   : > { %v2435_v46 = vpop.xlane.xlu0 %2434 }
 0xe06   : > { %v2439_v27 = vmul.f32 0.03125, %v2435_v46  ;;  %v2442_v47 = vsub.f32 %v3637_v40, %v2440_v45 }
 0xe08   : > { %v2441_v26 = vsub.f32 %v3640_v42, %v2439_v27  ;;  %v2444_v50 = vmul.f32 %v2442_v47, %v2442_v47 }
 0xe0a   : > { %v2443_v48 = vmul.f32 %v2441_v26, %v2441_v26  ;;  %v2448_v51 = vsel %vm854_vm1, %v2444_v50, 0.0 }
 0xe0c   : > { %v2445_v49 = vsel %vm854_vm1, %v2443_v48, 0.0 }
 0xe0d   : > { %2446 = vadd.xlane.f32.xlu0 %v2445_v49  ;;  %v2862_v49 = vld [vmem:[%s705_s1] ss:$0 sm:$0xff] }
 0xe11   : > { %2449 = vadd.xlane.f32.xlu0 %v2448_v51 }
 0xe96   : > { %v2447_v56 = vpop.xlane.xlu0 %2446 }
 0xe97   : > { %v2451_v57 = vmul.f32 0.03125, %v2447_v56 }
 0xe99   : > { %v2453_v58 = vadd.f32 1e-05, %v2451_v57 }
 0xe9a   : > { %v2450_v60 = vpop.xlane.xlu0 %2449 }
 0xe9b   : > { %3199 = vrsqrt.f32 %v2453_v58  ;;  %v2452_v59 = vmul.f32 0.03125, %v2450_v60 }
 0xe9d   : > { %v2454_v61 = vadd.f32 1e-05, %v2452_v59 }
 0xe9f   : > { %3201 = vrsqrt.f32 %v2454_v61 }
 0xea8   : > { %v3200_v62 = vpop.eup %3199 }
 0xea9   : > { %v2457_v2 = vmul.f32 %v3200_v62, %v2441_v26 }
 0xeab   : > { %v2465_v4 = vmul.f32 %v2857_v0, %v2457_v2 }
 0xeac   : > { %v3202_v63 = vpop.eup %3201 }
 0xead   : > { %v2458_v5 = vmul.f32 %v3202_v63, %v2442_v47  ;;  %v2473_v6 = vadd.f32 %v2858_v3, %v2465_v4 }
 0xeaf   : > { %v2466_v7 = vmul.f32 %v2857_v0, %v2458_v5  ;;  %3101 = vmatprep.mubr.msk.f32.mxu1 %vm854_vm1, %v2473_v6 }
 0xeb1   : > { %v2474_v8 = vadd.f32 %v2858_v3, %v2466_v7 }
 0xeb3   : > { %3102 = vmatmul.mubr.msk.f32.vlgmr.msra.gmra.mxu1 %vm854_vm1, %v2474_v8 }
 0xf73   : > { %v3103_v25 = vpop.f32.mrf.mxu1 }
 0xf74   : > { %v2559_v28 = vadd.f32 %v3103_v25, %v2859_v24 }
 0xf75   : > { %v2553_v29 = vpop.f32.mrf.mxu1 }
 0xf76   : > { %v2563_v30 = vmul.f32 %v2559_v28, %v2559_v28  ;;  %v2554_v31 = vadd.f32 %v2859_v24, %v2553_v29 }
 0xf78   : > { %v2565_v32 = vmul.f32 %v2563_v30, %v2559_v28  ;;  %v2562_v33 = vmul.f32 %v2554_v31, %v2554_v31 }
 0xf7a   : > { %v2567_v34 = vmul.f32 0.044715, %v2565_v32  ;;  %v2564_v36 = vmul.f32 %v2562_v33, %v2554_v31 }
 0xf7c   : > { %v2569_v35 = vadd.f32 %v2567_v34, %v2559_v28  ;;  %v2566_v37 = vmul.f32 0.044715, %v2564_v36 }
 0xf7e   : > { %v2571_v39 = vmul.f32 0.7978846, %v2569_v35  ;;  %v2568_v41 = vadd.f32 %v2566_v37, %v2554_v31 }
 0xf80   : > { %3203 = vtanh.f32 %v2571_v39  ;;  %v2570_v38 = vmul.f32 0.7978846, %v2568_v41 }
 0xf82   : > { %3205 = vtanh.f32 %v2570_v38 }
 0xf8d   : > { %v3204_v43 = vpop.eup %3203 }
 0xf8e   : > { %v2575_v44 = vadd.f32 1.0, %v3204_v43 }
 0xf8f   : > { %v3206_v45 = vpop.eup %3205 }
 0xf90   : > { %v2574_v46 = vadd.f32 1.0, %v3206_v45  ;;  %v2577_v27 = vmul.f32 0.5, %v2575_v44 }
 0xf92   : > { %v2576_v47 = vmul.f32 0.5, %v2574_v46  ;;  %v2579_v48 = vmul.f32 %v2577_v27, %v2559_v28 }
 0xf94   : > { %v2578_v26 = vmul.f32 %v2576_v47, %v2554_v31 }
 0xf96   : > { %3136 = vmatprep.mubr.f32.mxu0 %v2578_v26 }
 0xf97   : > { %3137 = vmatmul.mubr.f32.vlgmr.msra.gmra.mxu0 %v2579_v48 }
0x1057   : > { %v3138_v50 = vpop.f32.mrf.mxu0 }
0x1058   : > { %v2658_v51 = vadd.f32 %v3138_v50, %v2862_v49 }
0x1059   : > { %v2652_v52 = vpop.f32.mrf.mxu0 }
0x105a   : > { %v2662_v53 = vadd.f32 %v2658_v51, %v3637_v40  ;;  %v2653_v54 = vadd.f32 %v2862_v49, %v2652_v52  ;;  %2668 = sbr.rel (%p2863_p5) target bundleno = 4195 (0x1063), region = 96 }
0x105c   : > { %2664 = vst.msk [vmem:[%s3737_s17 + $0x8] sm:$0xff] %vm854_vm1, %v2662_v53  ;;  %v2661_v55 = vadd.f32 %v2653_v54, %v3640_v42 }
0x105e   : > { %2663 = vst.msk [vmem:[%s3737_s17] sm:$0xff] %vm854_vm1, %v2661_v55 }
0x105f   : > { %v2669_v40 = vld [vmem:[%s3765_s27] sm:$0xff]  ;;  %v2670_v56 = vld [vmem:[%s3765_s27 + $0x8] sm:$0xff] }
0x1060   : > { %v2671_v57 = vadd.f32 %v2669_v40, %v2661_v55  ;;  %v2672_v58 = vadd.f32 %v2670_v56, %v2662_v53 }
0x1062   : > { %2673 = vst.msk [vmem:[%s3737_s17] sm:$0xff] %vm854_vm1, %v2671_v57  ;;  %2674 = vst.msk [vmem:[%s3737_s17 + $0x8] sm:$0xff] %vm854_vm1, %v2672_v58 }
0x1063 PF: > { %s3766_s25 = sld [smem:[#allocation2_spill]] }
0x1069   : > { %s27_s24 = sadd.s32 1, %s3766_s25  }
0x106a   : > { %p24_p6 = scmp.ge.s32.totalorder %s27_s24, 4  }
0x106c   :  { %26 = sbr.rel (!%p24_p6) target bundleno = 8 (0x8), region = 155 }

// kernel: _lambda_.8
= control target key start
LH: loop header
LB: loop body
LE: loop exit
PB: predicated region body
PF: predicated region fallthrough
CT: control target
= control target key end

     0   :  { %s4341_s0 = inlined_call_operand.vmem [shape: f32[3,3], index: 0, kind: input, shape index: {}]   ;;  %s4342_s1 = inlined_call_operand.vmem [shape: f32[2,8,32], index: 1, kind: input, shape index: {}]   ;;  %s4343_s2 = inlined_call_operand.vmem [shape: f32[3,1,32], index: 2, kind: input, shape index: {}]   ;;  %s4344_s3 = inlined_call_operand.vmem [shape: f32[3,2,8,32], index: 3, kind: input, shape index: {}]   ;;  %s4345_s4 = inlined_call_operand.vmem [shape: f32[2,2,8,32], index: 4, kind: input, shape index: {}]   ;;  %s4346_s5 = inlined_call_operand.vmem [shape: f32[2,2,8,32], index: 5, kind: input, shape index: {}]   ;;  %s4347_s6 = inlined_call_operand.vmem [shape: f32[32,32], index: 6, kind: input, shape index: {}]   ;;  %s4348_s7 = inlined_call_operand.vmem [shape: f32[1,32], index: 7, kind: input, shape index: {}]   ;;  %s4349_s8 = inlined_call_operand.vmem [shape: f32[32,64], index: 8, kind: input, shape index: {}]   ;;  %s4350_s9 = inlined_call_operand.vmem [shape: f32[1,64], index: 9, kind: input, shape index: {}]   ;;  %s4351_s10 = inlined_call_operand.vmem [shape: f32[2,1,32], index: 10, kind: input, shape index: {}]   ;;  %s4352_s11 = inlined_call_operand.vmem [shape: f32[2,1,32], index: 11, kind: input, shape index: {}]   ;;  %s4353_s12 = inlined_call_operand.vmem [shape: f32[2,32,32], index: 12, kind: input, shape index: {}]   ;;  %s4354_s13 = inlined_call_operand.vmem [shape: f32[2,1,32], index: 13, kind: input, shape index: {}]   ;;  %s4355_s14 = inlined_call_operand.vmem [shape: f32[2,32,32], index: 14, kind: input, shape index: {}]   ;;  %s4356_s15 = inlined_call_operand.vmem [shape: f32[2,1,32], index: 15, kind: input, shape index: {}]   ;;  %s4357_s16 = inlined_call_operand.vmem [shape: f32[2,1,32], index: 16, kind: input, shape index: {}]   ;;  %s4358_s17 = inlined_call_operand.vmem [shape: f32[2,1,32], index: 17, kind: input, shape index: {}]   ;;  %s4359_s18 = inlined_call_operand.vmem [shape: f32[2,32,128], index: 18, kind: input, shape index: {}]   ;;  %s4360_s19 = inlined_call_operand.vmem [shape: f32[2,1,128], index: 19, kind: input, shape index: {}]   ;;  %s4361_s20 = inlined_call_operand.vmem [shape: f32[2,128,32], index: 20, kind: input, shape index: {}]   ;;  %s4362_s21 = inlined_call_operand.vmem [shape: f32[2,1,32], index: 21, kind: input, shape index: {}]   ;;  %s4363_s22 = inlined_call_operand.vmem [shape: f32[2,8,32], index: 22, kind: output, shape index: {}]  }
   0x1   :  { %4377 = sst [smem:[#allocation15_spill]] %s4341_s0 }
   0x2   :  { %4378 = sst [smem:[#allocation16_spill]] %s4342_s1 }
   0x3   :  { %4379 = sst [smem:[#allocation17_spill]] %s4343_s2 }
   0x4   :  { %4380 = sst [smem:[#allocation18_spill]] %s4344_s3 }
   0x5   :  { %4381 = sst [smem:[#allocation19_spill]] %s4345_s4 }
   0x6   :  { %4382 = sst [smem:[#allocation20_spill]] %s4346_s5 }
   0x7   :  { %4383 = sst [smem:[#allocation21_spill]] %s4347_s6 }
   0x8   :  { %4384 = sst [smem:[#allocation22_spill]] %s4348_s7 }
   0x9   :  { %4385 = sst [smem:[#allocation23_spill]] %s4349_s8 }
   0xa   :  { %4386 = sst [smem:[#allocation24_spill]] %s4350_s9 }
   0xb   :  { %4387 = sst [smem:[#allocation25_spill]] %s4353_s12 }
   0xc   :  { %4388 = sst [smem:[#allocation26_spill]] %s4355_s14 }
   0xd   :  { %4389 = sst [smem:[#allocation27_spill]] %s4362_s21 }
   0xe   :  { %4390 = sst [smem:[#allocation28_spill]] %s4363_s22 }
   0xf   :  { %27 = vsyncpa [#allocation4], 0  ;;  %s3841_s3 = smov 0   ;;  %s3843_s28 = smov 0  }
  0x10   :  { %s3845_s29 = smov 0   ;;  %s3847_s30 = smov 0  }
  0x11   :  { %s3849_s4 = smov 0  }
  0x12 LB: > { %4391 = sst [smem:[#allocation6_spill]] %s3704_s29  ;;  %s3224_s0 = sadd.s32 4294967295, %s3712_s4   ;;  %s3712_s4 = sphi %s3849_s4, %s33_s4   ;;  %s3708_s30 = sphi %s3847_s30, %s4436_s30   ;;  %s3704_s29 = sphi %s3845_s29, %s4435_s29   ;;  %s3700_s28 = sphi %s3843_s28, %s4434_s28   ;;  %s3696_s3 = sphi %s3841_s3, %s4433_s3  }
  0x13   : > { %4392 = sst [smem:[#allocation7_spill]] %s3708_s30  ;;  %s42_s23 = sadd.s32 1, %s3704_s29 }
  0x14   : > { %4393 = sst [smem:[#allocation8_spill]] %s3712_s4  ;;  %p43_p0 = scmp.ge.s32.totalorder %s42_s23, 2 }
  0x15   : > { %s45_s1 = sadd.s32 1, %s3708_s30  ;;  %p3225_p1 = scmp.ge.s32.totalorder %s3712_s4, 1 }
  0x16   : > { %p613_p2 = scmp.lt.s32.totalorder %s3712_s4, 7  ;;  %s4438_s23 = smov (%p43_p0, %s42_s23), 0 }
  0x17   : > { %4394 = sst [smem:[#allocation9_spill]] %s4438_s23  ;;  %s4440_s1 = smov (!%p43_p0, %s45_s1), %s3708_s30 }
  0x18   : > { %p3874_p3 = pnand %p3225_p1, %p613_p2  ;;  %p47_p4 = scmp.ge.s32.totalorder %s4440_s1, 3 }
  0x19   : > { %p3878_p5 = scmp.eq.s32.totalorder %s3224_s0, 0  ;;  %s4397_s26 = sld [smem:[#allocation15_spill]] }
  0x1a   : > { %p3549_p6 = pneg %p3874_p3  ;;  %s4442_s1 = smov (%p47_p4, %s4440_s1), 0 }
  0x1b   : > { %4398 = sst [smem:[#allocation10_spill]] %s4442_s1 }
  0x1c   : > { %p3550_p7 = pnand %p3878_p5, %p3549_p6 }
  0x1e   : > { %p3657_p9 = pneg %p3550_p7 }
  0x1f   : > { %s626_s2 = sshll.u32 %s4397_s26, 4  ;;  %s627_s2 = int_to_ptr.vmem [resolvable:$true] %s626_s2 }
  0x20   : > { %s3655_s27 = scalar_lea.vmem %s627_s2, 64  ;;  %p3663_p12 = scmp.lt.s32.totalorder %s627_s2, %s627_s2 }
  0x21   : > { %p3656_p8 = scmp.ne.s32.totalorder %s627_s2, %s3655_s27  ;;  %p3664_p13 = scmp.lt.s32.totalorder %s3655_s27, %s3655_s27 }
  0x23   : > { %p3658_p10 = pnand %p3657_p9, %p3656_p8  ;;  %p3665_p0 = por %p3664_p13, %p3663_p12 }
  0x25   : > { %p3659_p11 = pneg %p3658_p10 }
  0x27   : > { %p3666_p1 = pnand %p3665_p0, %p3659_p11 }
  0x29   : > { %3669 = shalt.err (!%p3666_p1)
}
  0x2a   : > { %s3714_s0 = smov [#allocation3]   ;;  %764 = sbr.rel (%p3874_p3) target bundleno = 4459 (0x116b), region = 108 }
  0x2b   : > { %3552 = dma.vmem_to_smem (!%p3550_p7), %s627_s2, 64, %s3714_s0, [#allocation4]  }
  0x2f   : > { %3691 = dma.done.wait (%p3878_p5), [#allocation4], 64  }
  0x30   : > { %3693 = vsyncadd (%p3878_p5), [#allocation4], 4294967232 }
  0x31   : > { %770 = sfence }
  0x32   : > { %p879_p2 = scmp.lt.s32.totalorder %s3700_s28, 2  ;;  %p887_p4 = scmp.lt.s32.totalorder %s3696_s3, 1 }
  0x33   : > { %p941_p6 = scmp.eq.s32.totalorder %s3700_s28, 0  ;;  %p942_p7 = scmp.eq.s32.totalorder %s3696_s3, 0 }
  0x34   : > { %s3902_s6 = scalar_select %p879_p2, %s3700_s28, 2 }
  0x35   : > { %s3905_s5 = scalar_select %p887_p4, %s3696_s3, 1 }
  0x36   : > { %4399 = sst [smem:[#allocation11_spill]] %s3902_s6  ;;  %s3290_s27 = sshll.u32 %s3902_s6, 4 }
  0x37   : > { %s4401_s23 = sld [smem:[#allocation18_spill]]  ;;  %s3291_s29 = sshll.u32 %s3905_s5, 4 }
  0x38   : > { %s4403_s24 = sld [smem:[#allocation19_spill]]  ;;  %p943_p3 = pnand %p942_p7, %p941_p6 }
  0x39   : > { %s4405_s22 = sld [smem:[#allocation20_spill]] }
  0x3a   : > { %s4406_s12 = sld [smem:[#allocation25_spill]] }
  0x3b   : > { %s4407_s14 = sld [smem:[#allocation26_spill]] }
  0x3c   : > { %s4411_s6 = sld [smem:[#allocation28_spill]] (!%p943_p3) }
  0x3d   : > { %s3915_s30 = scalar_lea.vmem %s4401_s23, %s3290_s27 }
  0x3e   : > { %4402 = sst [smem:[#allocation12_spill]] %s3915_s30  ;;  %s3921_s9 = scalar_lea.vmem %s4403_s24, %s3291_s29 }
  0x3f   : > { %4404 = sst [smem:[#allocation13_spill]] %s3921_s9  ;;  %s3926_s26 = scalar_lea.vmem %s4405_s22, %s3291_s29 }
  0x40   : > { %s3293_s30 = sshll.u32 %s3905_s5, 5  ;;  %s924_s24 = scalar_lea.vmem %s4358_s17, %s3905_s5 }
  0x41   : > { %s3944_s7 = scalar_lea.vmem %s4406_s12, %s3293_s30  ;;  %s3949_s29 = scalar_lea.vmem %s4407_s14, %s3293_s30 }
  0x42   : > { %4408 = sst [smem:[#allocation14_spill]] %s3949_s29  ;;  %s3966_s12 = scalar_lea.vmem %s4359_s18, %s3293_s30 }
  0x43   : > { %s932_s14 = scalar_lea.vmem %s4360_s19, %s3905_s5  ;;  %s3296_s29 = sshll.u32 %s3905_s5, 7 }
  0x44   : > { %s3976_s23 = scalar_lea.vmem %s4361_s20, %s3296_s29  ;;  %946 = sbr.rel (%p943_p3) target bundleno = 77 (0x4d), region = 116 }
  0x45   : > { %s4410_s9 = sld [smem:[#allocation16_spill]] (!%p943_p3) }
  0x49   : > { %vm949_vm0 = vcmask 261120  }
  0x4b   : > { %v947_v0 = vld [vmem:[%s4410_s9] sm:$0xff]  ;;  %v948_v1 = vld [vmem:[%s4410_s9 + $0x8] sm:$0xff] }
  0x4c   : > { %950 = vst.msk [vmem:[%s4411_s6] sm:$0xff] %vm949_vm0, %v947_v0  ;;  %951 = vst.msk [vmem:[%s4411_s6 + $0x8] sm:$0xff] %vm949_vm0, %v948_v1 }
  0x4d PF: > { %p3244_p5 = scmp.ne.s32.totalorder %s3696_s3, 0 }
  0x4e   : > { %s4412_s30 = sld [smem:[#allocation21_spill]] (!%p3244_p5)  ;;  %s3717_s2 = smov (!%p3244_p5), 96  }
  0x4f   : > { %954 = sbr.rel (%p3244_p5) target bundleno = 637 (0x27d), region = 120  ;;  %s4414_s4 = sld [smem:[#allocation11_spill]] (!%p3244_p5) }
  0x50   : > { %s4415_s27 = sld [smem:[#allocation17_spill]] (!%p3244_p5) }
  0x51   : > { %s4417_s22 = sld [smem:[#allocation23_spill]] (!%p3244_p5) }
  0x52   : > { %s4418_s21 = sld [smem:[#allocation22_spill]] (!%p3244_p5) }
  0x53   : > { %s4419_s6 = sld [smem:[#allocation24_spill]] (!%p3244_p5) }
  0x54   : > { %s4413_s25 = smov %s4412_s30  ;;  %v959_v2 = vld [vmem:[%s4412_s30 + $0x18] sm:$0xff]  ;;  %v3715_v3 = vmov 0.0   ;;  %vm3716_vm1 = vmmov 0   ;;  %vm961_vm2 = vcmask 261120   ;;  %v1123_v21 = vlaneseq  ;;  %s4420_s1 = sld [smem:[#allocation28_spill]] }
  0x55   : > { %3375 = vmatprep.subr.mxu0 %v3715_v3  ;;  %v958_v4 = vld [vmem:[%s4413_s25 + $0x10] sm:$0xff]  ;;  %3383 = vmatprep.mubr.msk.f32.mxu0 %vm3716_vm1, %v3715_v3  ;;  %v957_v5 = vld [vmem:[%s4413_s25 + $0x8] sm:$0xff]  ;;  %v956_v6 = vld [vmem:[%s4413_s25] sm:$0xff] }
  0x56   : > { %3376 = vmatpush3.msra.mxu0 %v959_v2  ;;  %3386 = vmatprep.subr.mxu1 %v3715_v3  ;;  %s4416_s30 = scalar_lea.vmem %s4415_s27, %s4414_s4  ;;  %v1124_v22 = vshrl.u32 %v1123_v21, 7 }
  0x57   : > { %3377 = vmatprep.subr.mxu0 %v3715_v3  ;;  %3394 = vmatprep.mubr.msk.f32.mxu1 %vm3716_vm1, %v3715_v3  ;;  %v955_v7 = vld [vmem:[%s4416_s30] sm:$0x1]  ;;  %v1045_v8 = vld [vmem:[%s4417_s22 + $0x18] sm:$0xff]  ;;  %v1044_v9 = vld [vmem:[%s4417_s22 + $0x10] sm:$0xff] }
  0x58   : > { %3378 = vmatpush3.msra.mxu0 %v958_v4  ;;  %3387 = vmatpush3.msra.mxu1 %v1045_v8  ;;  %v1043_v10 = vld [vmem:[%s4417_s22 + $0x8] sm:$0xff]  ;;  %v1042_v11 = vld [vmem:[%s4417_s22] sm:$0xff]  ;;  %v1125_v24 = vsub.s32 0, %v1124_v22 }
  0x59   : > { %3379 = vmatprep.subr.mxu0 %v3715_v3  ;;  %3388 = vmatprep.subr.mxu1 %v3715_v3  ;;  %v960_v12 = vld [vmem:[%s4418_s21] sm:$0x1] }
  0x5a   : > { %3380 = vmatpush3.msra.mxu0 %v957_v5  ;;  %3389 = vmatpush3.msra.mxu1 %v1044_v9  ;;  %v1046_v23 = vld [vmem:[%s4419_s6] sm:$0x1]  ;;  %v1121_v32 = vld [vmem:[%s4420_s1 + $0x8] sm:$0xff] }
  0x5b   : > { %3381 = vmatprep.subr.mxu0 %v3715_v3  ;;  %3390 = vmatprep.subr.mxu1 %v3715_v3  ;;  %v1120_v31 = vld [vmem:[%s4420_s1] sm:$0xff] }
  0x5c   : > { %3382 = vmatpush3.msra.mxu0 %v956_v6  ;;  %3391 = vmatpush3.msra.mxu1 %v1043_v10 }
  0x5d   : > { %3384 = vmatmul.mubr.msk.f32.vlgmr.msra.gmra.mxu0 %vm961_vm2, %v955_v7  ;;  %3392 = vmatprep.subr.mxu1 %v3715_v3 }
  0x5e   : > { %3393 = vmatpush3.msra.mxu1 %v1042_v11 }
 0x11d   : > { %v1031_v13 = vpop.f32.mrf.mxu0 }
 0x11e   : > { %v1032_v14 = vadd.f32 %v1031_v13, %v960_v12 }
 0x11f   : > { %v3385_v15 = vpop.f32.mrf.mxu0 }
 0x120   : > { %v3246_v16 = vmul.f32 -1.442695, %v1032_v14 }
 0x122   : > { %3607 = vpow2.f32 %v3246_v16 }
 0x12f   : > { %v3608_v17 = vpop.eup %3607 }
 0x130   : > { %v1038_v18 = vadd.f32 1.0, %v3608_v17 }
 0x132   : > { %3609 = vrcp.f32 %v1038_v18 }
 0x13f   : > { %v3610_v19 = vpop.eup %3609 }
 0x140   : > { %v1041_v20 = vmul.f32 %v3610_v19, %v1032_v14 }
 0x142   : > { %3395 = vmatmul.mubr.msk.f32.vlgmr.msra.gmra.mxu1 %vm961_vm2, %v1041_v20 }
 0x202   : > { %v1116_v25 = vpop.f32.mrf.mxu1 }
 0x203   : > { %v1117_v26 = vadd.f32 %v1116_v25, %v1046_v23 }
 0x204   : > { %v3396_v27 = vpop.f32.mrf.mxu1 }
 0x205   : > { %v1122_v28 = vadd.f32 1.0, %v1117_v26  ;;  %v1132_v29 = vrot.slane %v1117_v26, %v1125_v24 }
 0x207   : > { %1134 = vrot.lane.b32.xlu0 %v1132_v29, %s3717_s2  ;;  %v1126_v30 = vrot.slane %v1122_v28, %v1125_v24 }
 0x209   : > { %v1127_v33 = vmul.f32 %v1126_v30, %v1120_v31  ;;  %v1128_v34 = vmul.f32 %v1126_v30, %v1121_v32 }
 0x279   : > { %v1135_v35 = vpop.permute.xlu0 %1134 }
 0x27a   : > { %v1137_v36 = vadd.f32 %v1135_v35, %v1127_v33  ;;  %v1138_v37 = vadd.f32 %v1135_v35, %v1128_v34 }
 0x27c   : > { %1139 = vst.msk [vmem:[#allocation2] sm:$0xff] %vm961_vm2, %v1137_v36  ;;  %1140 = vst.msk [vmem:[#allocation2 + $0x8] sm:$0xff] %vm961_vm2, %v1138_v37 }
 0x27d PF: > { %vm1183_vm3 = vcmask 261120   ;;  %v1146_v52 = vld [vmem:[%s3944_s7 + $0x18] sm:$0xff]  ;;  %v1145_v53 = vld [vmem:[%s3944_s7 + $0x10] sm:$0xff]  ;;  %v1144_v54 = vld [vmem:[%s3944_s7 + $0x8] sm:$0xff]  ;;  %s4421_s21 = sld [smem:[#allocation13_spill]]  ;;  %s4422_s6 = scalar_lea.vmem %s4351_s10, %s3905_s5  ;;  %v3718_v8 = vmov 0.0  }
 0x27e   : > { %3397 = vmatprep.subr.mxu1 %v1146_v52  ;;  %v1143_v55 = vld [vmem:[%s3944_s7] sm:$0xff]  ;;  %s4423_s4 = scalar_lea.vmem %s4352_s11, %s3905_s5  ;;  %vm1314_vm4 = vcmask 64512   ;;  %3418 = vmatprep.subr.mxu0 %v3718_v8  ;;  %vm3719_vm5 = vmmov 0   ;;  %s4424_s27 = scalar_lea.vmem %s4354_s13, %s3905_s5  ;;  %v4125_v35 = vld [vmem:[%s3926_s26 + $0x8] sm:$0xff]  ;;  %vm2664_vm6 = vcmask 195584   ;;  %vm2661_vm7 = vcmask 130048  }
 0x27f   : > { %3398 = vmatpush3.msra.mxu1 %v1146_v52  ;;  %v3248_v63 = vld [vmem:[%s4422_s6] ss:$0 sm:$0xff]  ;;  %3420 = vmatprep.mubr.msk.f32.mxu0 %vm3719_vm5, %v3718_v8  ;;  %s3720_s30 = smov 120   ;;  %s3723_s8 = smov 8  }
 0x280   : > { %3399 = vmatprep.subr.mxu1 %v1145_v53  ;;  %v3249_v1 = vld [vmem:[%s4423_s4] ss:$0 sm:$0xff]  ;;  %s3724_s29 = smov 16   ;;  %s4425_s6 = sld [smem:[#allocation14_spill]] }
 0x281   : > { %3400 = vmatpush3.msra.mxu1 %v1145_v53  ;;  %v3250_v11 = vld [vmem:[%s4424_s27] ss:$0 sm:$0xff]  ;;  %s3725_s2 = smov 24   ;;  %s4426_s0 = scalar_lea.vmem %s4356_s15, %s3905_s5 }
 0x282   : > { %3401 = vmatprep.subr.mxu1 %v1144_v54  ;;  %v4116_v34 = vld [vmem:[%s3926_s26] sm:$0xff]  ;;  %s3721_s26 = smov 112   ;;  %p3286_p8 = scmp.ne.s32.totalorder %s3696_s3, 1 }
 0x283   : > { %v4044_v38 = vld [vmem:[#allocation2] sm:$0xff]  ;;  %v4046_v39 = vld [vmem:[#allocation2 + $0x8] sm:$0xff]  ;;  %3402 = vmatpush3.msra.mxu1 %v1144_v54  ;;  %3419 = vmatpush3.msra.mxu0 %v4116_v34 }
 0x284   : > { %v1184_v40 = vsel %vm1183_vm3, %v4044_v38, 0.0  ;;  %v1187_v41 = vsel %vm1183_vm3, %v4046_v39, 0.0  ;;  %3403 = vmatprep.subr.mxu1 %v1143_v55  ;;  %v4074_v9 = vld [vmem:[%s4421_s21] sm:$0xff]  ;;  %v4092_v14 = vld [vmem:[%s4421_s21 + $0x8] sm:$0xff]  ;;  %3428 = vmatprep.subr.mxu0 %v3718_v8  ;;  %s3722_s21 = smov 104  }
 0x285   : > { %1185 = vadd.xlane.f32.xlu0 %v1184_v40  ;;  %3404 = vmatpush3.msra.mxu1 %v1143_v55 }
 0x286   : > { %3408 = vmatprep.subr.mxu1 %v3718_v8 }
 0x289   : > { %1188 = vadd.xlane.f32.xlu0 %v1187_v41 }
 0x30e   : > { %v1186_v42 = vpop.xlane.xlu0 %1185 }
 0x30f   : > { %v1191_v43 = vmul.f32 0.03125, %v1186_v42 }
 0x311   : > { %v1193_v44 = vsub.f32 %v4044_v38, %v1191_v43 }
 0x312   : > { %v1189_v45 = vpop.xlane.xlu0 %1188 }
 0x313   : > { %v1192_v46 = vmul.f32 0.03125, %v1189_v45  ;;  %v1195_v47 = vmul.f32 %v1193_v44, %v1193_v44 }
 0x315   : > { %v1194_v48 = vsub.f32 %v4046_v39, %v1192_v46  ;;  %v1197_v49 = vsel %vm1183_vm3, %v1195_v47, 0.0 }
 0x316   : > { %1198 = vadd.xlane.f32.xlu1 %v1197_v49 }
 0x317   : > { %v1196_v50 = vmul.f32 %v1194_v48, %v1194_v48 }
 0x319   : > { %v1200_v51 = vsel %vm1183_vm3, %v1196_v50, 0.0 }
 0x31a   : > { %1201 = vadd.xlane.f32.xlu1 %v1200_v51 }
 0x39f   : > { %v1199_v56 = vpop.xlane.xlu1 %1198 }
 0x3a0   : > { %v1203_v57 = vmul.f32 0.03125, %v1199_v56 }
 0x3a2   : > { %v1205_v58 = vadd.f32 1e-05, %v1203_v57 }
 0x3a3   : > { %v1202_v59 = vpop.xlane.xlu1 %1201 }
 0x3a4   : > { %3611 = vrsqrt.f32 %v1205_v58  ;;  %v1204_v60 = vmul.f32 0.03125, %v1202_v59 }
 0x3a6   : > { %v1206_v61 = vadd.f32 1e-05, %v1204_v60 }
 0x3a8   : > { %3613 = vrsqrt.f32 %v1206_v61 }
 0x3b1   : > { %v3612_v62 = vpop.eup %3611 }
 0x3b2   : > { %v1209_v0 = vmul.f32 %v3612_v62, %v1193_v44 }
 0x3b4   : > { %v1217_v2 = vmul.f32 %v3248_v63, %v1209_v0 }
 0x3b5   : > { %v3614_v3 = vpop.eup %3613 }
 0x3b6   : > { %v1210_v4 = vmul.f32 %v3614_v3, %v1194_v48  ;;  %v1225_v5 = vadd.f32 %v3249_v1, %v1217_v2 }
 0x3b8   : > { %v1218_v6 = vmul.f32 %v3248_v63, %v1210_v4  ;;  %3405 = vmatprep.mubr.msk.f32.mxu1 %vm1183_vm3, %v1225_v5 }
 0x3ba   : > { %v1226_v7 = vadd.f32 %v3249_v1, %v1218_v6 }
 0x3bc   : > { %3406 = vmatmul.mubr.msk.f32.vlgmr.msra.gmra.mxu1 %vm1183_vm3, %v1226_v7 }
 0x3bd   : > { %3409 = vmatpush3.xpose.msk.msra.mxu1 %vm1314_vm4, %v4074_v9  ;;  %3410 = vmatprep.mubr.msk.f32.mxu1 %vm3719_vm5, %v3718_v8 }
 0x3be   : > { %3413 = vmatprep.subr.mxu1 %v3718_v8 }
 0x47c   : > { %v3407_v10 = vpop.f32.mrf.mxu1 }
 0x47d   : > { %v4100_v15 = vadd.f32 %v3407_v10, %v3250_v11 }
 0x47e   : > { %v1305_v12 = vpop.f32.mrf.mxu1 }
 0x47f   : > { %v4089_v13 = vadd.f32 %v3250_v11, %v1305_v12 }
 0x481   : > { %3411 = vmatmul.mubr.msk.f32.vlgmr.msra.gmra.mxu1 %vm1314_vm4, %v4089_v13 }
 0x482   : > { %3414 = vmatpush3.xpose.msk.msra.mxu1 %vm1314_vm4, %v4092_v14  ;;  %3415 = vmatprep.mubr.msk.f32.mxu1 %vm3719_vm5, %v3718_v8 }
 0x483   : > { %3423 = vmatprep.subr.mxu1 %v3718_v8 }
 0x485   : > { %3416 = vmatmul.mubr.msk.f32.vlgmr.msra.gmra.mxu1 %vm1314_vm4, %v4100_v15 }
 0x486   : > { %3425 = vmatprep.mubr.msk.f32.mxu1 %vm3719_vm5, %v3718_v8  ;;  %3424 = vmatpush3.msra.mxu1 %v4125_v35 }
 0x487   : > { %3433 = vmatprep.subr.mxu1 %v3718_v8 }
 0x541   : > { %v1387_v16 = vpop.f32.mrf.mxu1 }
 0x542   : > { %v1467_v17 = vmul.f32 0.35355338, %v1387_v16 }
 0x543   : > { %v3412_v18 = vpop.f32.mrf.mxu1 }
 0x544   : > { %v1469_v19 = vsel %vm1314_vm4, %v1467_v17, -inf }
 0x545   : > { %1470 = vmax.xlane.f32.xlu0 %v1469_v19  ;;  %v1463_v20 = vpop.f32.mrf.mxu1 }
 0x546   : > { %v1468_v21 = vmul.f32 0.35355338, %v1463_v20 }
 0x547   : > { %v3417_v22 = vpop.f32.mrf.mxu1 }
 0x548   : > { %v1472_v23 = vsel %vm1314_vm4, %v1468_v21, -inf }
 0x549   : > { %1473 = vmax.xlane.f32.xlu1 %v1472_v23 }
 0x55a   : > { %1717 = vrot.lane.b32.xlu1 %v4092_v14, %s3720_s30 }
 0x55e   : > { %1637 = vrot.lane.b32.xlu1 %v4089_v13, %s3720_s30 }
 0x5ce   : > { %v1471_v24 = vpop.xlane.xlu0 %1470 }
 0x5cf   : > { %v1475_v25 = vsub.f32 %v1467_v17, %v1471_v24 }
 0x5d1   : > { %v1477_v26 = vmul.f32 1.442695, %v1475_v25 }
 0x5d2   : > { %v1474_v27 = vpop.xlane.xlu1 %1473 }
 0x5d3   : > { %3615 = vpow2.f32 %v1477_v26  ;;  %v1476_v28 = vsub.f32 %v1468_v21, %v1474_v27 }
 0x5d5   : > { %v1479_v29 = vmul.f32 1.442695, %v1476_v28 }
 0x5d6   : > { %v1718_v36 = vpop.permute.xlu1 %1717 }
 0x5d7   : > { %3617 = vpow2.f32 %v1479_v29 }
 0x5da   : > { %v1638_v37 = vpop.permute.xlu1 %1637 }
 0x5e0   : > { %v3616_v30 = vpop.eup %3615 }
 0x5e1   : > { %v1481_v31 = vsel %vm1314_vm4, %v3616_v30, 0.0 }
 0x5e2   : > { %1482 = vadd.xlane.f32.xlu0 %v1481_v31 }
 0x5e4   : > { %v3618_v32 = vpop.eup %3617 }
 0x5e5   : > { %v1484_v33 = vsel %vm1314_vm4, %v3618_v32, 0.0 }
 0x5e6   : > { %1485 = vadd.xlane.f32.xlu1 %v1484_v33 }
 0x5f7   : > { %1715 = vrot.lane.b32.xlu1 %v4100_v15, %s3720_s30 }
 0x5f8   : > { %1639 = vrot.lane.b32.xlu0 %v4074_v9, %s3720_s30 }
 0x66b   : > { %v1483_v40 = vpop.xlane.xlu0 %1482 }
 0x66c   : > { %3619 = vrcp.f32 %v1483_v40 }
 0x66f   : > { %v1486_v41 = vpop.xlane.xlu1 %1485  ;;  %v1640_v43 = vpop.permute.xlu0 %1639 }
 0x670   : > { %3621 = vrcp.f32 %v1486_v41 }
 0x673   : > { %v1716_v47 = vpop.permute.xlu1 %1715 }
 0x679   : > { %v3620_v42 = vpop.eup %3619 }
 0x67a   : > { %v1489_v44 = vmul.f32 %v3620_v42, %v3616_v30 }
 0x67c   : > { %3421 = vmatmul.mubr.msk.f32.vlgmr.msra.gmra.mxu0 %vm1314_vm4, %v1489_v44 }
 0x67d   : > { %v3622_v45 = vpop.eup %3621  ;;  %3429 = vmatpush3.xpose.msk.msra.mxu0 %vm1314_vm4, %v1640_v43  ;;  %3430 = vmatprep.mubr.msk.f32.mxu0 %vm3719_vm5, %v3718_v8 }
 0x67e   : > { %v1490_v46 = vmul.f32 %v3622_v45, %v3618_v32  ;;  %3438 = vmatprep.subr.mxu0 %v3718_v8 }
 0x680   : > { %3426 = vmatmul.mubr.msk.f32.vlgmr.msra.gmra.mxu1 %vm1314_vm4, %v1490_v46  ;;  %3431 = vmatmul.mubr.msk.f32.vlgmr.msra.gmra.mxu0 %vm1314_vm4, %v1638_v37 }
 0x681   : > { %3434 = vmatpush3.xpose.msk.msra.mxu1 %vm1314_vm4, %v1718_v36  ;;  %3435 = vmatprep.mubr.msk.f32.mxu1 %vm3719_vm5, %v3718_v8 }
 0x682   : > { %3443 = vmatprep.subr.mxu1 %v3718_v8  ;;  %3440 = vmatprep.mubr.msk.f32.mxu0 %vm3719_vm5, %v3718_v8 }
 0x684   : > { %3436 = vmatmul.mubr.msk.f32.vlgmr.msra.gmra.mxu1 %vm1314_vm4, %v1716_v47 }
 0x685   : > { %3445 = vmatprep.mubr.msk.f32.mxu1 %vm3719_vm5, %v3718_v8 }
 0x73c   : > { %v4145_v48 = vpop.f32.mrf.mxu0 }
 0x73e   : > { %v3422_v49 = vpop.f32.mrf.mxu0 }
 0x740   : > { %v4147_v50 = vpop.f32.mrf.mxu1  ;;  %v1711_v51 = vpop.f32.mrf.mxu0 }
 0x741   : > { %v1793_v52 = vmul.f32 0.35355338, %v1711_v51 }
 0x742   : > { %v3427_v53 = vpop.f32.mrf.mxu1  ;;  %v3432_v54 = vpop.f32.mrf.mxu0 }
 0x743   : > { %v1795_v55 = vsel %vm1314_vm4, %v1793_v52, -inf }
 0x744   : > { %1796 = vmax.xlane.f32.xlu0 %v1795_v55  ;;  %v1789_v56 = vpop.f32.mrf.mxu1 }
 0x745   : > { %v1794_v57 = vmul.f32 0.35355338, %v1789_v56 }
 0x746   : > { %v3437_v58 = vpop.f32.mrf.mxu1 }
 0x747   : > { %v1798_v59 = vsel %vm1314_vm4, %v1794_v57, -inf }
 0x748   : > { %1799 = vmax.xlane.f32.xlu1 %v1798_v59 }
 0x759   : > { %1895 = vrot.lane.b32.xlu1 %v4125_v35, %s3720_s30 }
 0x75a   : > { %1818 = vrot.lane.b32.xlu0 %v4116_v34, %s3720_s30  ;;  %s4427_s30 = scalar_lea.vmem %s4357_s16, %s3905_s5 }
 0x75d   : > { %1973 = vrot.lane.b32.xlu1 %v4074_v9, %s3721_s26 }
 0x761   : > { %2051 = vrot.lane.b32.xlu1 %v4092_v14, %s3721_s26 }
 0x765   : > { %2049 = vrot.lane.b32.xlu1 %v4100_v15, %s3721_s26 }
 0x7cd   : > { %v1797_v60 = vpop.xlane.xlu0 %1796 }
 0x7ce   : > { %v1801_v61 = vsub.f32 %v1793_v52, %v1797_v60 }
 0x7d0   : > { %v1803_v62 = vmul.f32 1.442695, %v1801_v61 }
 0x7d1   : > { %v1800_v63 = vpop.xlane.xlu1 %1799  ;;  %v1819_v0 = vpop.permute.xlu0 %1818 }
 0x7d2   : > { %3623 = vpow2.f32 %v1803_v62  ;;  %v1802_v1 = vsub.f32 %v1794_v57, %v1800_v63  ;;  %3439 = vmatpush3.msra.mxu0 %v1819_v0 }
 0x7d3   : > { %3448 = vmatprep.subr.mxu0 %v3718_v8 }
 0x7d4   : > { %v1805_v2 = vmul.f32 1.442695, %v1802_v1 }
 0x7d5   : > { %v1896_v3 = vpop.permute.xlu1 %1895 }
 0x7d6   : > { %3625 = vpow2.f32 %v1805_v2  ;;  %3444 = vmatpush3.msra.mxu1 %v1896_v3 }
 0x7d7   : > { %3453 = vmatprep.subr.mxu1 %v3718_v8 }
 0x7d9   : > { %v1974_v12 = vpop.permute.xlu1 %1973 }
 0x7dd   : > { %v2052_v19 = vpop.permute.xlu1 %2051 }
 0x7df   : > { %v3624_v4 = vpop.eup %3623 }
 0x7e0   : > { %v1807_v5 = vsel %vm1314_vm4, %v3624_v4, 0.0 }
 0x7e1   : > { %1808 = vadd.xlane.f32.xlu0 %v1807_v5  ;;  %v2050_v22 = vpop.permute.xlu1 %2049 }
 0x7e3   : > { %v3626_v6 = vpop.eup %3625 }
 0x7e4   : > { %v1810_v7 = vsel %vm1314_vm4, %v3626_v6, 0.0 }
 0x7e5   : > { %1811 = vadd.xlane.f32.xlu0 %v1810_v7 }
 0x7fb   : > { %1971 = vrot.lane.b32.xlu0 %v4089_v13, %s3721_s26 }
 0x86a   : > { %v1809_v10 = vpop.xlane.xlu0 %1808 }
 0x86b   : > { %3627 = vrcp.f32 %v1809_v10 }
 0x86e   : > { %v1812_v11 = vpop.xlane.xlu0 %1811 }
 0x86f   : > { %3629 = vrcp.f32 %v1812_v11 }
 0x872   : > { %v1972_v21 = vpop.permute.xlu0 %1971 }
 0x878   : > { %v3628_v16 = vpop.eup %3627 }
 0x879   : > { %v1815_v17 = vmul.f32 %v3628_v16, %v3624_v4 }
 0x87b   : > { %3441 = vmatmul.mubr.msk.f32.vlgmr.msra.gmra.mxu0 %vm1314_vm4, %v1815_v17 }
 0x87c   : > { %v3630_v18 = vpop.eup %3629  ;;  %3449 = vmatpush3.xpose.msk.msra.mxu0 %vm1314_vm4, %v1974_v12  ;;  %3450 = vmatprep.mubr.msk.f32.mxu0 %vm3719_vm5, %v3718_v8 }
 0x87d   : > { %v1816_v20 = vmul.f32 %v3630_v18, %v3626_v6  ;;  %3458 = vmatprep.subr.mxu0 %v3718_v8 }
 0x87f   : > { %3446 = vmatmul.mubr.msk.f32.vlgmr.msra.gmra.mxu1 %vm1314_vm4, %v1816_v20  ;;  %3451 = vmatmul.mubr.msk.f32.vlgmr.msra.gmra.mxu0 %vm1314_vm4, %v1972_v21 }
 0x880   : > { %3454 = vmatpush3.xpose.msk.msra.mxu1 %vm1314_vm4, %v2052_v19  ;;  %3455 = vmatprep.mubr.msk.f32.mxu1 %vm3719_vm5, %v3718_v8 }
 0x881   : > { %3463 = vmatprep.subr.mxu1 %v3718_v8  ;;  %3460 = vmatprep.mubr.msk.f32.mxu0 %vm3719_vm5, %v3718_v8 }
 0x883   : > { %3456 = vmatmul.mubr.msk.f32.vlgmr.msra.gmra.mxu1 %vm1314_vm4, %v2050_v22 }
 0x884   : > { %3465 = vmatprep.mubr.msk.f32.mxu1 %vm3719_vm5, %v3718_v8 }
 0x93b   : > { %v4183_v23 = vpop.f32.mrf.mxu0 }
 0x93d   : > { %v3442_v24 = vpop.f32.mrf.mxu0 }
 0x93f   : > { %v4185_v25 = vpop.f32.mrf.mxu1  ;;  %v2045_v26 = vpop.f32.mrf.mxu0 }
 0x940   : > { %v2127_v27 = vmul.f32 0.35355338, %v2045_v26 }
 0x941   : > { %v3447_v28 = vpop.f32.mrf.mxu1  ;;  %v3452_v29 = vpop.f32.mrf.mxu0 }
 0x942   : > { %v2129_v30 = vsel %vm1314_vm4, %v2127_v27, -inf  ;;  %v1151_v28 = vld [vmem:[%s4425_s6 + $0x18] sm:$0xff]  ;;  %v1149_v29 = vld [vmem:[%s4425_s6 + $0x8] sm:$0xff] }
 0x943   : > { %2130 = vmax.xlane.f32.xlu0 %v2129_v30  ;;  %v2123_v31 = vpop.f32.mrf.mxu1  ;;  %v1148_v30 = vld [vmem:[%s4425_s6] sm:$0xff] }
 0x944   : > { %v2128_v32 = vmul.f32 0.35355338, %v2123_v31 }
 0x945   : > { %v3457_v33 = vpop.f32.mrf.mxu1 }
 0x946   : > { %v2132_v36 = vsel %vm1314_vm4, %v2128_v32, -inf }
 0x947   : > { %2133 = vmax.xlane.f32.xlu1 %v2132_v36 }
 0x958   : > { %2227 = vrot.lane.b32.xlu1 %v4125_v35, %s3721_s26 }
 0x959   : > { %2151 = vrot.lane.b32.xlu0 %v4116_v34, %s3721_s26 }
 0x95c   : > { %2305 = vrot.lane.b32.xlu1 %v4074_v9, %s3722_s21 }
 0x960   : > { %2383 = vrot.lane.b32.xlu1 %v4092_v14, %s3722_s21 }
 0x964   : > { %2381 = vrot.lane.b32.xlu1 %v4100_v15, %s3722_s21 }
 0x9cc   : > { %v2131_v37 = vpop.xlane.xlu0 %2130 }
 0x9cd   : > { %v2135_v40 = vsub.f32 %v2127_v27, %v2131_v37 }
 0x9cf   : > { %v2137_v41 = vmul.f32 1.442695, %v2135_v40 }
 0x9d0   : > { %v2134_v42 = vpop.xlane.xlu1 %2133  ;;  %v2152_v43 = vpop.permute.xlu0 %2151 }
 0x9d1   : > { %3631 = vpow2.f32 %v2137_v41  ;;  %v2136_v44 = vsub.f32 %v2128_v32, %v2134_v42  ;;  %3459 = vmatpush3.msra.mxu0 %v2152_v43 }
 0x9d2   : > { %3468 = vmatprep.subr.mxu0 %v3718_v8 }
 0x9d3   : > { %v2139_v45 = vmul.f32 1.442695, %v2136_v44 }
 0x9d4   : > { %v2228_v46 = vpop.permute.xlu1 %2227 }
 0x9d5   : > { %3633 = vpow2.f32 %v2139_v45  ;;  %3464 = vmatpush3.msra.mxu1 %v2228_v46 }
 0x9d6   : > { %3473 = vmatprep.subr.mxu1 %v3718_v8 }
 0x9d8   : > { %v2306_v52 = vpop.permute.xlu1 %2305 }
 0x9dc   : > { %v2384_v56 = vpop.permute.xlu1 %2383 }
 0x9de   : > { %v3632_v9 = vpop.eup %3631 }
 0x9df   : > { %v2141_v14 = vsel %vm1314_vm4, %v3632_v9, 0.0 }
 0x9e0   : > { %2142 = vadd.xlane.f32.xlu0 %v2141_v14  ;;  %v2382_v58 = vpop.permute.xlu1 %2381 }
 0x9e2   : > { %v3634_v15 = vpop.eup %3633 }
 0x9e3   : > { %v2144_v47 = vsel %vm1314_vm4, %v3634_v15, 0.0 }
 0x9e4   : > { %2145 = vadd.xlane.f32.xlu0 %v2144_v47 }
 0x9fa   : > { %2303 = vrot.lane.b32.xlu0 %v4089_v13, %s3722_s21 }
 0xa69   : > { %v2143_v49 = vpop.xlane.xlu0 %2142 }
 0xa6a   : > { %3635 = vrcp.f32 %v2143_v49 }
 0xa6d   : > { %v2146_v51 = vpop.xlane.xlu0 %2145 }
 0xa6e   : > { %3637 = vrcp.f32 %v2146_v51 }
 0xa71   : > { %v2304_v13 = vpop.permute.xlu0 %2303 }
 0xa77   : > { %v3636_v53 = vpop.eup %3635 }
 0xa78   : > { %v2149_v54 = vmul.f32 %v3636_v53, %v3632_v9 }
 0xa7a   : > { %3461 = vmatmul.mubr.msk.f32.vlgmr.msra.gmra.mxu0 %vm1314_vm4, %v2149_v54 }
 0xa7b   : > { %v3638_v55 = vpop.eup %3637  ;;  %3469 = vmatpush3.xpose.msk.msra.mxu0 %vm1314_vm4, %v2306_v52  ;;  %3470 = vmatprep.mubr.msk.f32.mxu0 %vm3719_vm5, %v3718_v8 }
 0xa7c   : > { %v2150_v57 = vmul.f32 %v3638_v55, %v3634_v15  ;;  %3478 = vmatprep.subr.mxu0 %v3718_v8 }
 0xa7e   : > { %3466 = vmatmul.mubr.msk.f32.vlgmr.msra.gmra.mxu1 %vm1314_vm4, %v2150_v57  ;;  %3471 = vmatmul.mubr.msk.f32.vlgmr.msra.gmra.mxu0 %vm1314_vm4, %v2304_v13 }
 0xa7f   : > { %3474 = vmatpush3.xpose.msk.msra.mxu1 %vm1314_vm4, %v2384_v56  ;;  %3475 = vmatprep.mubr.msk.f32.mxu1 %vm3719_vm5, %v3718_v8 }
 0xa80   : > { %3480 = vmatprep.mubr.msk.f32.mxu0 %vm3719_vm5, %v3718_v8  ;;  %3483 = vmatprep.subr.mxu1 %v3718_v8 }
 0xa82   : > { %3476 = vmatmul.mubr.msk.f32.vlgmr.msra.gmra.mxu1 %vm1314_vm4, %v2382_v58 }
 0xa83   : > { %3485 = vmatprep.mubr.msk.f32.mxu1 %vm3719_vm5, %v3718_v8 }
 0xb3a   : > { %v2223_v59 = vpop.f32.mrf.mxu0 }
 0xb3c   : > { %v3462_v60 = vpop.f32.mrf.mxu0 }
 0xb3e   : > { %v2299_v61 = vpop.f32.mrf.mxu1  ;;  %v2377_v62 = vpop.f32.mrf.mxu0 }
 0xb3f   : > { %v2459_v63 = vmul.f32 0.35355338, %v2377_v62 }
 0xb40   : > { %v3467_v0 = vpop.f32.mrf.mxu1  ;;  %v3472_v1 = vpop.f32.mrf.mxu0 }
 0xb41   : > { %v2461_v2 = vsel %vm1314_vm4, %v2459_v63, -inf  ;;  %v1158_v0 = vld [vmem:[%s3966_s12 + $0x18] sm:$0xff]  ;;  %v1157_v1 = vld [vmem:[%s3966_s12 + $0x10] sm:$0xff] }
 0xb42   : > { %2462 = vmax.xlane.f32.xlu0 %v2461_v2  ;;  %v2455_v3 = vpop.f32.mrf.mxu1  ;;  %v1156_v2 = vld [vmem:[%s3966_s12 + $0x8] sm:$0xff] }
 0xb43   : > { %v2460_v4 = vmul.f32 0.35355338, %v2455_v3  ;;  %v1155_v3 = vld [vmem:[%s3966_s12] sm:$0xff]  ;;  %s4431_s12 = sld [smem:[#allocation28_spill]] (!%p3286_p8) }
 0xb44   : > { %v3477_v5 = vpop.f32.mrf.mxu1 }
 0xb45   : > { %v2464_v6 = vsel %vm1314_vm4, %v2460_v4, -inf }
 0xb46   : > { %2465 = vmax.xlane.f32.xlu1 %v2464_v6 }
 0xb57   : > { %2559 = vrot.lane.b32.xlu1 %v4125_v35, %s3722_s21 }
 0xb5b   : > { %2637 = vrot.lane.b32.xlu1 %v4183_v23, %s3723_s8 }
 0xb5f   : > { %2639 = vrot.lane.b32.xlu1 %v4185_v25, %s3723_s8  ;;  %s4428_s8 = sld [smem:[#allocation27_spill]] }
 0xb63   : > { %2647 = vrot.lane.b32.xlu1 %v2299_v61, %s3724_s29 }
 0xbcb   : > { %v2463_v8 = vpop.xlane.xlu0 %2462 }
 0xbcc   : > { %v2467_v7 = vsub.f32 %v2459_v63, %v2463_v8 }
 0xbce   : > { %v2469_v10 = vmul.f32 1.442695, %v2467_v7 }
 0xbcf   : > { %v2466_v11 = vpop.xlane.xlu1 %2465 }
 0xbd0   : > { %3639 = vpow2.f32 %v2469_v10  ;;  %v2468_v12 = vsub.f32 %v2460_v4, %v2466_v11 }
 0xbd2   : > { %v2471_v16 = vmul.f32 1.442695, %v2468_v12  ;;  %v3280_v12 = vld [vmem:[%s4427_s30] ss:$0 sm:$0xff] }
 0xbd3   : > { %v2560_v17 = vpop.permute.xlu1 %2559 }
 0xbd4   : > { %3641 = vpow2.f32 %v2471_v16  ;;  %3484 = vmatpush3.msra.mxu1 %v2560_v17  ;;  %v3281_v17 = vld [vmem:[%s924_s24] ss:$0 sm:$0xff] }
 0xbd5   : > { %3488 = vmatprep.subr.mxu1 %v1151_v28 }
 0xbd7   : > { %v2638_v37 = vpop.permute.xlu1 %2637 }
 0xbd8   : > { %v2659_v42 = vsel %vm1314_vm4, %v4145_v48, %v2638_v37  ;;  %v3277_v48 = vld [vmem:[%s4426_s0] ss:$0 sm:$0xff]  ;;  %v1162_v37 = vld [vmem:[%s3976_s23 + $0x10] sm:$0xff] }
 0xbdb   : > { %v2640_v40 = vpop.permute.xlu1 %2639 }
 0xbdc   : > { %v2660_v9 = vsel %vm1314_vm4, %v4147_v50, %v2640_v40  ;;  %v1161_v40 = vld [vmem:[%s3976_s23 + $0x8] sm:$0xff] }
 0xbdd   : > { %v3640_v18 = vpop.eup %3639 }
 0xbde   : > { %v2473_v35 = vsel %vm1314_vm4, %v3640_v18, 0.0 }
 0xbdf   : > { %2474 = vadd.xlane.f32.xlu0 %v2473_v35  ;;  %v2648_v43 = vpop.permute.xlu1 %2647 }
 0xbe0   : > { %v2663_v14 = vsel %vm2661_vm7, %v2660_v9, %v2648_v43 }
 0xbe1   : > { %v3642_v19 = vpop.eup %3641 }
 0xbe2   : > { %v2476_v20 = vsel %vm1314_vm4, %v3642_v19, 0.0 }
 0xbe3   : > { %2477 = vadd.xlane.f32.xlu0 %v2476_v20 }
 0xbf9   : > { %2483 = vrot.lane.b32.xlu0 %v4116_v34, %s3722_s21  ;;  %v1150_v34 = vld [vmem:[%s4425_s6 + $0x10] sm:$0xff]  ;;  %s4430_s6 = sld [smem:[#allocation12_spill]] (!%p3286_p8) }
 0xbfd   : > { %2645 = vrot.lane.b32.xlu0 %v2223_v59, %s3724_s29  ;;  %s4429_s29 = scalar_lea.vmem %s4428_s8, %s3905_s5  ;;  %s3287_s5 = sshll.u32 (!%p3286_p8), %s3700_s28, 7 }
 0xbfe   : > { %s2994_s7 = sadd.s32 (!%p3286_p8), 1, %s3287_s5  ;;  %s2996_s0 = sadd.s32 (!%p3286_p8), 2, %s3287_s5 }
 0xbff   : > { %s2995_s4 = sld [smem:[#allocation3 + %s2994_s7]] (!%p3286_p8) }
 0xc00   : > { %s2997_s1 = sld [smem:[#allocation3 + %s2996_s0]] (!%p3286_p8) }
 0xc68   : > { %v2475_v21 = vpop.xlane.xlu0 %2474 }
 0xc69   : > { %3643 = vrcp.f32 %v2475_v21 }
 0xc6c   : > { %v2478_v22 = vpop.xlane.xlu0 %2477 }
 0xc6d   : > { %3645 = vrcp.f32 %v2478_v22 }
 0xc70   : > { %v2484_v23 = vpop.permute.xlu0 %2483 }
 0xc71   : > { %3479 = vmatpush3.msra.mxu0 %v2484_v23  ;;  %v1175_v23 = vld [vmem:[%s3976_s23 + $0x78] sm:$0xff] }
 0xc72   : > { %3510 = vmatprep.subr.mxu0 %v1175_v23 }
 0xc74   : > { %v2646_v41 = vpop.permute.xlu0 %2645 }
 0xc75   : > { %v2662_v44 = vsel %vm2661_vm7, %v2659_v42, %v2646_v41  ;;  %v1160_v41 = vld [vmem:[%s3976_s23] sm:$0xff] }
 0xc76   : > { %v3644_v24 = vpop.eup %3643  ;;  %v3282_v42 = vld [vmem:[%s932_s14] ss:$0 sm:$0xff] }
 0xc77   : > { %v2481_v25 = vmul.f32 %v3644_v24, %v3640_v18  ;;  %v1174_v24 = vld [vmem:[%s3976_s23 + $0x70] sm:$0xff] }
 0xc79   : > { %3481 = vmatmul.mubr.msk.f32.vlgmr.msra.gmra.mxu0 %vm1314_vm4, %v2481_v25  ;;  %v1173_v25 = vld [vmem:[%s3976_s23 + $0x68] sm:$0xff] }
 0xc7a   : > { %v3646_v26 = vpop.eup %3645  ;;  %3511 = vmatpush3.msra.mxu0 %v1175_v23 }
 0xc7b   : > { %v2482_v27 = vmul.f32 %v3646_v26, %v3642_v19  ;;  %3512 = vmatprep.subr.mxu0 %v1174_v24  ;;  %v1172_v26 = vld [vmem:[%s3976_s23 + $0x60] sm:$0xff] }
 0xc7c   : > { %3513 = vmatpush3.msra.mxu0 %v1174_v24 }
 0xc7d   : > { %3486 = vmatmul.mubr.msk.f32.vlgmr.msra.gmra.mxu1 %vm1314_vm4, %v2482_v27  ;;  %3514 = vmatprep.subr.mxu0 %v1173_v25  ;;  %v1171_v27 = vld [vmem:[%s3976_s23 + $0x58] sm:$0xff] }
 0xc7e   : > { %3489 = vmatpush3.msra.mxu1 %v1151_v28  ;;  %3515 = vmatpush3.msra.mxu0 %v1173_v25  ;;  %v1170_v28 = vld [vmem:[%s3976_s23 + $0x50] sm:$0xff] }
 0xc7f   : > { %3490 = vmatprep.subr.mxu1 %v1150_v34  ;;  %3516 = vmatprep.subr.mxu0 %v1172_v26 }
 0xc80   : > { %3491 = vmatpush3.msra.mxu1 %v1150_v34  ;;  %3517 = vmatpush3.msra.mxu0 %v1172_v26  ;;  %v1169_v34 = vld [vmem:[%s3976_s23 + $0x48] sm:$0xff] }
 0xc81   : > { %3492 = vmatprep.subr.mxu1 %v1149_v29  ;;  %3518 = vmatprep.subr.mxu0 %v1171_v27 }
 0xc82   : > { %3493 = vmatpush3.msra.mxu1 %v1149_v29  ;;  %3519 = vmatpush3.msra.mxu0 %v1171_v27  ;;  %v1168_v29 = vld [vmem:[%s3976_s23 + $0x40] sm:$0xff] }
 0xc83   : > { %3494 = vmatprep.subr.mxu1 %v1148_v30  ;;  %3520 = vmatprep.subr.mxu0 %v1170_v28 }
 0xc84   : > { %3495 = vmatpush3.msra.mxu1 %v1148_v30  ;;  %3521 = vmatpush3.msra.mxu0 %v1170_v28  ;;  %v1167_v30 = vld [vmem:[%s3976_s23 + $0x38] sm:$0xff] }
 0xc85   : > { %3499 = vmatprep.subr.mxu1 %v1158_v0  ;;  %3522 = vmatprep.subr.mxu0 %v1169_v34 }
 0xc86   : > { %3523 = vmatpush3.msra.mxu0 %v1169_v34 }
 0xc87   : > { %3524 = vmatprep.subr.mxu0 %v1168_v29 }
 0xc88   : > { %3525 = vmatpush3.msra.mxu0 %v1168_v29 }
 0xc89   : > { %3526 = vmatprep.subr.mxu0 %v1167_v30 }
 0xc8a   : > { %3527 = vmatpush3.msra.mxu0 %v1167_v30 }
 0xd39   : > { %v2555_v31 = vpop.f32.mrf.mxu0 }
 0xd3a   : > { %2653 = vrot.lane.b32.xlu0 %v2555_v31, %s3725_s2  ;;  %v1166_v31 = vld [vmem:[%s3976_s23 + $0x30] sm:$0xff] }
 0xd3b   : > { %v3482_v32 = vpop.f32.mrf.mxu0  ;;  %3528 = vmatprep.subr.mxu0 %v1166_v31 }
 0xd3c   : > { %v1165_v32 = vld [vmem:[%s3976_s23 + $0x28] sm:$0xff]  ;;  %3529 = vmatpush3.msra.mxu0 %v1166_v31 }
 0xd3d   : > { %v2631_v33 = vpop.f32.mrf.mxu1  ;;  %3530 = vmatprep.subr.mxu0 %v1165_v32 }
 0xd3e   : > { %2655 = vrot.lane.b32.xlu1 %v2631_v33, %s3725_s2  ;;  %v1164_v33 = vld [vmem:[%s3976_s23 + $0x20] sm:$0xff]  ;;  %3531 = vmatpush3.msra.mxu0 %v1165_v32  ;;  %s2993_s2 = sld [smem:[#allocation3 + %s3287_s5]] (!%p3286_p8) }
 0xd3f   : > { %v3487_v36 = vpop.f32.mrf.mxu1  ;;  %3532 = vmatprep.subr.mxu0 %v1164_v33 }
 0xd40   : > { %v1163_v36 = vld [vmem:[%s3976_s23 + $0x18] sm:$0xff]  ;;  %3533 = vmatpush3.msra.mxu0 %v1164_v33 }
 0xd41   : > { %3534 = vmatprep.subr.mxu0 %v1163_v36 }
 0xd42   : > { %3535 = vmatpush3.msra.mxu0 %v1163_v36 }
 0xd43   : > { %3536 = vmatprep.subr.mxu0 %v1162_v37 }
 0xd44   : > { %3537 = vmatpush3.msra.mxu0 %v1162_v37 }
 0xd45   : > { %3538 = vmatprep.subr.mxu0 %v1161_v40 }
 0xd46   : > { %3539 = vmatpush3.msra.mxu0 %v1161_v40 }
 0xd47   : > { %3540 = vmatprep.subr.mxu0 %v1160_v41 }
 0xd48   : > { %3541 = vmatpush3.msra.mxu0 %v1160_v41 }
 0xdac   : > { %v2654_v45 = vpop.permute.xlu0 %2653 }
 0xdad   : > { %v2665_v46 = vsel %vm2664_vm6, %v2662_v44, %v2654_v45 }
 0xdae   : > { %3496 = vmatprep.mubr.msk.f32.mxu1 %vm1183_vm3, %v2665_v46 }
 0xdb0   : > { %v2656_v15 = vpop.permute.xlu1 %2655 }
 0xdb1   : > { %v2666_v47 = vsel %vm2664_vm6, %v2663_v14, %v2656_v15 }
 0xdb2   : > { %3497 = vmatmul.mubr.msk.f32.vlgmr.msra.gmra.mxu1 %vm1183_vm3, %v2666_v47 }
 0xdb3   : > { %3500 = vmatpush3.msra.mxu1 %v1158_v0 }
 0xdb4   : > { %3501 = vmatprep.subr.mxu1 %v1157_v1 }
 0xdb5   : > { %3502 = vmatpush3.msra.mxu1 %v1157_v1 }
 0xdb6   : > { %3503 = vmatprep.subr.mxu1 %v1156_v2 }
 0xdb7   : > { %3504 = vmatpush3.msra.mxu1 %v1156_v2 }
 0xdb8   : > { %3505 = vmatprep.subr.mxu1 %v1155_v3 }
 0xdb9   : > { %3506 = vmatpush3.msra.mxu1 %v1155_v3 }
 0xe72   : > { %v3498_v49 = vpop.f32.mrf.mxu1 }
 0xe73   : > { %v2751_v51 = vadd.f32 %v3498_v49, %v3277_v48 }
 0xe74   : > { %v2745_v52 = vpop.f32.mrf.mxu1 }
 0xe75   : > { %v4249_v53 = vadd.f32 %v2751_v51, %v4046_v39  ;;  %v2746_v54 = vadd.f32 %v3277_v48, %v2745_v52 }
 0xe77   : > { %v4252_v55 = vadd.f32 %v2746_v54, %v4044_v38  ;;  %v2759_v50 = vsel %vm1183_vm3, %v4249_v53, 0.0 }
 0xe78   : > { %2760 = vadd.xlane.f32.xlu1 %v2759_v50 }
 0xe79   : > { %v2756_v56 = vsel %vm1183_vm3, %v4252_v55, 0.0 }
 0xe7a   : > { %2757 = vadd.xlane.f32.xlu0 %v2756_v56 }
 0xf01   : > { %v2761_v57 = vpop.xlane.xlu1 %2760 }
 0xf02   : > { %v2763_v13 = vmul.f32 0.03125, %v2761_v57 }
 0xf03   : > { %v2758_v58 = vpop.xlane.xlu0 %2757 }
 0xf04   : > { %v2762_v39 = vmul.f32 0.03125, %v2758_v58  ;;  %v2765_v59 = vsub.f32 %v4249_v53, %v2763_v13 }
 0xf06   : > { %v2764_v38 = vsub.f32 %v4252_v55, %v2762_v39  ;;  %v2767_v62 = vmul.f32 %v2765_v59, %v2765_v59 }
 0xf08   : > { %v2766_v60 = vmul.f32 %v2764_v38, %v2764_v38  ;;  %v2771_v63 = vsel %vm1183_vm3, %v2767_v62, 0.0 }
 0xf0a   : > { %v2768_v61 = vsel %vm1183_vm3, %v2766_v60, 0.0 }
 0xf0b   : > { %2769 = vadd.xlane.f32.xlu0 %v2768_v61  ;;  %v3285_v61 = vld [vmem:[%s4429_s29] ss:$0 sm:$0xff] }
 0xf0f   : > { %2772 = vadd.xlane.f32.xlu0 %v2771_v63 }
 0xf94   : > { %v2770_v4 = vpop.xlane.xlu0 %2769 }
 0xf95   : > { %v2774_v5 = vmul.f32 0.03125, %v2770_v4 }
 0xf97   : > { %v2776_v6 = vadd.f32 1e-05, %v2774_v5 }
 0xf98   : > { %v2773_v8 = vpop.xlane.xlu0 %2772 }
 0xf99   : > { %3647 = vrsqrt.f32 %v2776_v6  ;;  %v2775_v7 = vmul.f32 0.03125, %v2773_v8 }
 0xf9b   : > { %v2777_v10 = vadd.f32 1e-05, %v2775_v7 }
 0xf9d   : > { %3649 = vrsqrt.f32 %v2777_v10 }
 0xfa6   : > { %v3648_v11 = vpop.eup %3647 }
 0xfa7   : > { %v2780_v16 = vmul.f32 %v3648_v11, %v2764_v38 }
 0xfa9   : > { %v2788_v18 = vmul.f32 %v3280_v12, %v2780_v16 }
 0xfaa   : > { %v3650_v35 = vpop.eup %3649 }
 0xfab   : > { %v2781_v19 = vmul.f32 %v3650_v35, %v2765_v59  ;;  %v2796_v20 = vadd.f32 %v3281_v17, %v2788_v18 }
 0xfad   : > { %v2789_v21 = vmul.f32 %v3280_v12, %v2781_v19  ;;  %3507 = vmatprep.mubr.msk.f32.mxu1 %vm1183_vm3, %v2796_v20 }
 0xfaf   : > { %v2797_v22 = vadd.f32 %v3281_v17, %v2789_v21 }
 0xfb1   : > { %3508 = vmatmul.mubr.msk.f32.vlgmr.msra.gmra.mxu1 %vm1183_vm3, %v2797_v22 }
0x1071   : > { %v3509_v43 = vpop.f32.mrf.mxu1 }
0x1072   : > { %v2882_v44 = vadd.f32 %v3509_v43, %v3282_v42 }
0x1073   : > { %v2876_v45 = vpop.f32.mrf.mxu1 }
0x1074   : > { %v2886_v46 = vmul.f32 %v2882_v44, %v2882_v44  ;;  %v2877_v9 = vadd.f32 %v3282_v42, %v2876_v45 }
0x1076   : > { %v2888_v14 = vmul.f32 %v2886_v46, %v2882_v44  ;;  %v2885_v15 = vmul.f32 %v2877_v9, %v2877_v9 }
0x1078   : > { %v2890_v47 = vmul.f32 0.044715, %v2888_v14  ;;  %v2887_v48 = vmul.f32 %v2885_v15, %v2877_v9 }
0x107a   : > { %v2892_v49 = vadd.f32 %v2890_v47, %v2882_v44  ;;  %v2889_v51 = vmul.f32 0.044715, %v2887_v48 }
0x107c   : > { %v2894_v52 = vmul.f32 0.7978846, %v2892_v49  ;;  %v2891_v54 = vadd.f32 %v2889_v51, %v2877_v9 }
0x107e   : > { %3651 = vtanh.f32 %v2894_v52  ;;  %v2893_v50 = vmul.f32 0.7978846, %v2891_v54 }
0x1080   : > { %3653 = vtanh.f32 %v2893_v50 }
0x108b   : > { %v3652_v56 = vpop.eup %3651 }
0x108c   : > { %v2898_v57 = vadd.f32 1.0, %v3652_v56 }
0x108d   : > { %v3654_v13 = vpop.eup %3653 }
0x108e   : > { %v2897_v58 = vadd.f32 1.0, %v3654_v13  ;;  %v2900_v39 = vmul.f32 0.5, %v2898_v57 }
0x1090   : > { %v2899_v59 = vmul.f32 0.5, %v2897_v58  ;;  %v2902_v60 = vmul.f32 %v2900_v39, %v2882_v44 }
0x1092   : > { %v2901_v38 = vmul.f32 %v2899_v59, %v2877_v9 }
0x1094   : > { %3542 = vmatprep.mubr.f32.mxu0 %v2901_v38 }
0x1095   : > { %3543 = vmatmul.mubr.f32.vlgmr.msra.gmra.mxu0 %v2902_v60 }
0x1155   : > { %v3544_v62 = vpop.f32.mrf.mxu0 }
0x1156   : > { %v2981_v63 = vadd.f32 %v3544_v62, %v3285_v61 }
0x1157   : > { %v2975_v0 = vpop.f32.mrf.mxu0 }
0x1158   : > { %v2985_v1 = vadd.f32 %v2981_v63, %v4249_v53  ;;  %v2976_v2 = vadd.f32 %v3285_v61, %v2975_v0  ;;  %2991 = sbr.rel (%p3286_p8) target bundleno = 4459 (0x116b), region = 124 }
0x115a   : > { %2987 = vst.msk [vmem:[#allocation2 + $0x8] sm:$0xff] %vm1183_vm3, %v2985_v1  ;;  %v2984_v3 = vadd.f32 %v2976_v2, %v4252_v55 }
0x115c   : > { %2986 = vst.msk [vmem:[#allocation2] sm:$0xff] %vm1183_vm3, %v2984_v3 }
0x115d   : > { %v2998_v53 = vld [vmem:[%s4431_s12] sm:$0xff]  ;;  %v2999_v55 = vld [vmem:[%s4431_s12 + $0x8] sm:$0xff]  ;;  %v3000_v6 = vstv %s2993_s2  ;;  %v3005_v11 = vstv %s2995_s4 }
0x115e   : > { %v3010_v8 = vld [vmem:[%s4430_s6] sm:$0xff]  ;;  %v3011_v7 = vld [vmem:[%s4430_s6 + $0x8] sm:$0xff]  ;;  %v3001_v10 = vmul.f32 %v3000_v6, %v2998_v53  ;;  %v3002_v12 = vmul.f32 %v3000_v6, %v2999_v55  ;;  %v3012_v17 = vstv %s2997_s1 }
0x115f   : > { %v3013_v35 = vmul.f32 %v3012_v17, %v3010_v8  ;;  %v3014_v19 = vmul.f32 %v3012_v17, %v3011_v7 }
0x1161   : > { %v3004_v5 = vld [vmem:[#allocation2 + $0x8] sm:$0xff] }
0x1162   : > { %v3007_v18 = vmul.f32 %v3005_v11, %v3004_v5 }
0x1163   : > { %v3003_v4 = vld [vmem:[#allocation2] sm:$0xff] }
0x1164   : > { %v3006_v16 = vmul.f32 %v3005_v11, %v3003_v4  ;;  %v3009_v21 = vadd.f32 %v3007_v18, %v3002_v12 }
0x1166   : > { %v3008_v20 = vadd.f32 %v3006_v16, %v3001_v10  ;;  %v3016_v23 = vadd.f32 %v3014_v19, %v3009_v21 }
0x1168   : > { %v3015_v22 = vadd.f32 %v3013_v35, %v3008_v20  ;;  %3018 = vst.msk [vmem:[%s4431_s12 + $0x8] sm:$0xff] %vm1183_vm3, %v3016_v23 }
0x116a   : > { %3017 = vst.msk [vmem:[%s4431_s12] sm:$0xff] %vm1183_vm3, %v3015_v22 }
0x116b PF: > { %s4432_s23 = sld [smem:[#allocation8_spill]] }
0x116c   : > { %s4433_s3 = sld [smem:[#allocation6_spill]] }
0x116d   : > { %s4434_s28 = sld [smem:[#allocation7_spill]] }
0x116e   : > { %s4435_s29 = sld [smem:[#allocation9_spill]] }
0x116f   : > { %s4436_s30 = sld [smem:[#allocation10_spill]] }
0x1171   : > { %s33_s4 = sadd.s32 1, %s4432_s23  }
0x1172   : > { %p30_p9 = scmp.ge.s32.totalorder %s33_s4, 8  }
0x1174   :  { %32 = sbr.rel (!%p30_p9) target bundleno = 18 (0x12), region = 196 }
0x1179   :  { %3030 = vsyncpa [#allocation4], 1 }
0x117a   :  { %3032 = vsyncpa [#allocation4 + $0x1], 1 }

// kernel: _lambda_.9
= control target key start
LH: loop header
LB: loop body
LE: loop exit
PB: predicated region body
PF: predicated region fallthrough
CT: control target
= control target key end

     0   :  { %s3324_s24 = smov 0   ;;  %s3670_s0 = inlined_call_operand.vmem [shape: f32[2,8,32], index: 0, kind: input, shape index: {}]   ;;  %s3671_s1 = inlined_call_operand.vmem [shape: f32[1,32], index: 1, kind: input, shape index: {}]   ;;  %s3672_s2 = inlined_call_operand.vmem [shape: f32[1,32], index: 2, kind: input, shape index: {}]   ;;  %s3673_s3 = inlined_call_operand.vmem [shape: f32[32,128], index: 3, kind: input, shape index: {}]   ;;  %s3674_s4 = inlined_call_operand.vmem [shape: f32[1,128], index: 4, kind: input, shape index: {}]   ;;  %s3675_s5 = inlined_call_operand.vmem [shape: f32[2,1,32], index: 5, kind: input, shape index: {}]   ;;  %s3676_s6 = inlined_call_operand.vmem [shape: f32[2,1,32], index: 6, kind: input, shape index: {}]   ;;  %s3677_s7 = inlined_call_operand.vmem [shape: f32[2,32,96], index: 7, kind: input, shape index: {}]   ;;  %s3678_s8 = inlined_call_operand.vmem [shape: f32[2,1,96], index: 8, kind: input, shape index: {}]   ;;  %s3679_s9 = inlined_call_operand.vmem [shape: f32[2,32,32], index: 9, kind: input, shape index: {}]   ;;  %s3680_s10 = inlined_call_operand.vmem [shape: f32[2,1,32], index: 10, kind: input, shape index: {}]   ;;  %s3681_s11 = inlined_call_operand.vmem [shape: f32[2,1,32], index: 11, kind: input, shape index: {}]   ;;  %s3682_s12 = inlined_call_operand.vmem [shape: f32[2,1,32], index: 12, kind: input, shape index: {}]   ;;  %s3683_s13 = inlined_call_operand.vmem [shape: f32[2,32,128], index: 13, kind: input, shape index: {}]   ;;  %s3684_s14 = inlined_call_operand.vmem [shape: f32[2,1,128], index: 14, kind: input, shape index: {}]   ;;  %s3685_s15 = inlined_call_operand.vmem [shape: f32[2,128,32], index: 15, kind: input, shape index: {}]   ;;  %s3686_s16 = inlined_call_operand.vmem [shape: f32[2,1,32], index: 16, kind: input, shape index: {}]   ;;  %s3687_s17 = inlined_call_operand.vmem [shape: f32[2,8,128], index: 17, kind: output, shape index: {}]  }
   0x1   :  { %3692 = sst [smem:[#allocation4_spill]] %s3670_s0 }
   0x2   :  { %3693 = sst [smem:[#allocation5_spill]] %s3671_s1 }
   0x3   :  { %3694 = sst [smem:[#allocation6_spill]] %s3672_s2 }
   0x4   :  { %3695 = sst [smem:[#allocation7_spill]] %s3673_s3 }
   0x5   :  { %3696 = sst [smem:[#allocation8_spill]] %s3674_s4 }
   0x6   :  { %3697 = sst [smem:[#allocation9_spill]] %s3677_s7 }
   0x7   :  { %3698 = sst [smem:[#allocation10_spill]] %s3679_s9 }
   0x8   :  { %3699 = sst [smem:[#allocation11_spill]] %s3687_s17 }
   0x9 LB: > { %3700 = sst [smem:[#allocation3_spill]] %s3216_s24  ;;  %s3330_s25 = sadd.s32 4294967295, %s3216_s24   ;;  %s3216_s24 = sphi %s3324_s24, %s27_s24  }
   0xa   : > { %p2845_p0 = scmp.ge.s32.totalorder %s3216_s24, 1  ;;  %p576_p1 = scmp.lt.s32.totalorder %s3216_s24, 3 }
   0xc   : > { %p577_p2 = pnand %p2845_p0, %p576_p1 }
   0xd   : > { %p662_p3 = scmp.lt.s32.totalorder (!%p577_p2), %s3330_s25, 1  ;;  %s3701_s7 = sld [smem:[#allocation9_spill]] (!%p577_p2) }
   0xe   : > { %580 = sbr.rel (%p577_p2) target bundleno = 4469 (0x1175), region = 88  ;;  %s3702_s9 = sld [smem:[#allocation10_spill]] (!%p577_p2) }
   0xf   : > { %p2854_p4 = scmp.ne.s32.totalorder (!%p577_p2), %s3330_s25, 0 }
  0x13   : > { %s3336_s26 = scalar_select %p662_p3, %s3330_s25, 1 }
  0x14   : > { %s3703_s22 = sld [smem:[#allocation4_spill]] (!%p2854_p4) }
  0x15   : > { %s2901_s19 = sshll.u32 %s3336_s26, 5  ;;  %s686_s2 = scalar_lea.vmem %s3681_s11, %s3336_s26 }
  0x16   : > { %s3354_s27 = scalar_lea.vmem %s3701_s7, %s2901_s19  ;;  %s3359_s17 = scalar_lea.vmem %s3702_s9, %s2901_s19 }
  0x17   : > { %s689_s21 = scalar_lea.vmem %s3682_s12, %s3336_s26  ;;  %s3376_s7 = scalar_lea.vmem %s3683_s13, %s2901_s19 }
  0x18   : > { %s697_s9 = scalar_lea.vmem %s3684_s14, %s3336_s26  ;;  %s2904_s3 = sshll.u32 %s3336_s26, 7 }
  0x19   : > { %s3386_s0 = scalar_lea.vmem %s3685_s15, %s2904_s3  ;;  %s705_s1 = scalar_lea.vmem %s3686_s16, %s3336_s26 }
  0x1a   : > { %709 = sbr.rel (%p2854_p4) target bundleno = 33 (0x21), region = 92 }
  0x1f   : > { %v710_v0 = vld [vmem:[%s3703_s22] sm:$0xff]  ;;  %vm712_vm0 = vcmask 261120   ;;  %v711_v1 = vld [vmem:[%s3703_s22 + $0x8] sm:$0xff] }
  0x20   : > { %713 = vst.msk [vmem:[#allocation2] sm:$0xff] %vm712_vm0, %v710_v0  ;;  %714 = vst.msk [vmem:[#allocation2 + $0x8] sm:$0xff] %vm712_vm0, %v711_v1 }
  0x21 PF: > { %vm753_vm1 = vcmask 261120   ;;  %v720_v16 = vld [vmem:[%s3354_s27 + $0x18] sm:$0xff]  ;;  %v719_v17 = vld [vmem:[%s3354_s27 + $0x10] sm:$0xff]  ;;  %v718_v18 = vld [vmem:[%s3354_s27 + $0x8] sm:$0xff]  ;;  %s3704_s4 = scalar_lea.vmem %s3675_s5, %s3336_s26  ;;  %v3218_v36 = vmov 0.0   ;;  %vm3219_vm2 = vmmov 0   ;;  %s3706_s19 = scalar_lea.vmem %s3678_s8, %s3336_s26 }
  0x22   : > { %2979 = vmatprep.subr.mxu1 %v720_v16  ;;  %v717_v19 = vld [vmem:[%s3354_s27] sm:$0xff]  ;;  %s3705_s27 = scalar_lea.vmem %s3676_s6, %s3336_s26  ;;  %3000 = vmatprep.subr.mxu0 %v3218_v36  ;;  %s3220_s23 = smov 96   ;;  %vm887_vm3 = vcmask 64512   ;;  %vm2240_vm4 = vcmask 195584   ;;  %vm2237_vm5 = vcmask 130048  }
  0x23   : > { %2980 = vmatpush3.msra.mxu1 %v720_v16  ;;  %v2855_v27 = vld [vmem:[%s3704_s4] ss:$0 sm:$0xff]  ;;  %3002 = vmatprep.mubr.msk.f32.mxu0 %vm3219_vm2, %v3218_v36  ;;  %s3221_s24 = smov 64   ;;  %s3222_s3 = smov 88  }
  0x24   : > { %2981 = vmatprep.subr.mxu1 %v719_v17  ;;  %v2856_v29 = vld [vmem:[%s3705_s27] ss:$0 sm:$0xff]  ;;  %s3223_s28 = smov 120   ;;  %s3224_s4 = smov 56  }
  0x25   : > { %2982 = vmatpush3.msra.mxu1 %v719_v17  ;;  %v2857_v37 = vld [vmem:[%s3706_s19] ss:$0 sm:$0xff]  ;;  %s3225_s29 = smov 80   ;;  %s3226_s18 = smov 112  }
  0x26   : > { %2983 = vmatprep.subr.mxu1 %v718_v18  ;;  %s3227_s27 = smov 48   ;;  %s3228_s30 = smov 72  }
  0x27   : > { %v3399_v2 = vld [vmem:[#allocation2] sm:$0xff]  ;;  %v3401_v3 = vld [vmem:[#allocation2 + $0x8] sm:$0xff]  ;;  %2984 = vmatpush3.msra.mxu1 %v718_v18  ;;  %s3229_s20 = smov 104   ;;  %s3230_s19 = smov 40  }
  0x28   : > { %v754_v4 = vsel %vm753_vm1, %v3399_v2, 0.0  ;;  %v757_v5 = vsel %vm753_vm1, %v3401_v3, 0.0  ;;  %2985 = vmatprep.subr.mxu1 %v717_v19  ;;  %p2893_p5 = scmp.ne.s32.totalorder %s3330_s25, 1 }
  0x29   : > { %755 = vadd.xlane.f32.xlu0 %v754_v4  ;;  %2986 = vmatpush3.msra.mxu1 %v717_v19  ;;  %s3712_s25 = sld [smem:[#allocation11_spill]] (!%p2893_p5) }
  0x2a   : > { %2990 = vmatprep.subr.mxu1 %v3218_v36 }
  0x2d   : > { %758 = vadd.xlane.f32.xlu0 %v757_v5 }
  0xb2   : > { %v756_v6 = vpop.xlane.xlu0 %755 }
  0xb3   : > { %v761_v7 = vmul.f32 0.03125, %v756_v6 }
  0xb5   : > { %v763_v8 = vsub.f32 %v3399_v2, %v761_v7 }
  0xb6   : > { %v759_v9 = vpop.xlane.xlu0 %758 }
  0xb7   : > { %v762_v10 = vmul.f32 0.03125, %v759_v9  ;;  %v765_v11 = vmul.f32 %v763_v8, %v763_v8 }
  0xb9   : > { %v764_v12 = vsub.f32 %v3401_v3, %v762_v10  ;;  %v767_v13 = vsel %vm753_vm1, %v765_v11, 0.0 }
  0xba   : > { %768 = vadd.xlane.f32.xlu1 %v767_v13 }
  0xbb   : > { %v766_v14 = vmul.f32 %v764_v12, %v764_v12 }
  0xbd   : > { %v770_v15 = vsel %vm753_vm1, %v766_v14, 0.0 }
  0xbe   : > { %771 = vadd.xlane.f32.xlu1 %v770_v15 }
 0x143   : > { %v769_v20 = vpop.xlane.xlu1 %768 }
 0x144   : > { %v773_v21 = vmul.f32 0.03125, %v769_v20 }
 0x146   : > { %v775_v22 = vadd.f32 1e-05, %v773_v21 }
 0x147   : > { %v772_v23 = vpop.xlane.xlu1 %771 }
 0x148   : > { %3162 = vrsqrt.f32 %v775_v22  ;;  %v774_v24 = vmul.f32 0.03125, %v772_v23 }
 0x14a   : > { %v776_v25 = vadd.f32 1e-05, %v774_v24 }
 0x14c   : > { %3164 = vrsqrt.f32 %v776_v25 }
 0x155   : > { %v3163_v26 = vpop.eup %3162 }
 0x156   : > { %v779_v28 = vmul.f32 %v3163_v26, %v763_v8 }
 0x158   : > { %v787_v30 = vmul.f32 %v2855_v27, %v779_v28 }
 0x159   : > { %v3165_v31 = vpop.eup %3164 }
 0x15a   : > { %v780_v32 = vmul.f32 %v3165_v31, %v764_v12  ;;  %v795_v33 = vadd.f32 %v2856_v29, %v787_v30 }
 0x15c   : > { %v788_v34 = vmul.f32 %v2855_v27, %v780_v32  ;;  %2987 = vmatprep.mubr.msk.f32.mxu1 %vm753_vm1, %v795_v33 }
 0x15e   : > { %v796_v35 = vadd.f32 %v2856_v29, %v788_v34 }
 0x160   : > { %2988 = vmatmul.mubr.msk.f32.vlgmr.msra.gmra.mxu1 %vm753_vm1, %v796_v35 }
 0x161   : > { %2992 = vmatprep.mubr.msk.f32.mxu1 %vm3219_vm2, %v3218_v36 }
 0x220   : > { %v2989_v38 = vpop.f32.mrf.mxu1 }
 0x221   : > { %v3438_v39 = vadd.f32 %v2989_v38, %v2857_v37 }
 0x222   : > { %v875_v40 = vpop.f32.mrf.mxu1 }
 0x223   : > { %v3440_v41 = vadd.f32 %v2857_v37, %v875_v40  ;;  %963 = vrot.lane.b32.xlu1 %v3438_v39, %s3220_s23 }
 0x225   : > { %885 = vrot.lane.b32.xlu0 %v3440_v41, %s3220_s23  ;;  %s3231_s23 = smov 8  }
 0x295   : > { %v964_v43 = vpop.permute.xlu1 %963 }
 0x297   : > { %v886_v42 = vpop.permute.xlu0 %885 }
 0x298   : > { %2991 = vmatpush3.xpose.msk.msra.mxu1 %vm887_vm3, %v886_v42 }
 0x299   : > { %2995 = vmatprep.subr.mxu1 %v3218_v36 }
 0x29b   : > { %2993 = vmatmul.mubr.msk.f32.vlgmr.msra.gmra.mxu1 %vm887_vm3, %v3440_v41 }
 0x29c   : > { %2996 = vmatpush3.xpose.msk.msra.mxu1 %vm887_vm3, %v964_v43  ;;  %2997 = vmatprep.mubr.msk.f32.mxu1 %vm3219_vm2, %v3218_v36 }
 0x29d   : > { %3005 = vmatprep.subr.mxu1 %v3218_v36 }
 0x29f   : > { %2998 = vmatmul.mubr.msk.f32.vlgmr.msra.gmra.mxu1 %vm887_vm3, %v3438_v39 }
 0x2a0   : > { %3007 = vmatprep.mubr.msk.f32.mxu1 %vm3219_vm2, %v3218_v36 }
 0x35b   : > { %v958_v44 = vpop.f32.mrf.mxu1 }
 0x35c   : > { %v1039_v45 = vmul.f32 0.35355338, %v958_v44 }
 0x35d   : > { %v2994_v46 = vpop.f32.mrf.mxu1 }
 0x35e   : > { %v1041_v47 = vsel %vm887_vm3, %v1039_v45, -inf }
 0x35f   : > { %1042 = vmax.xlane.f32.xlu1 %v1041_v47  ;;  %v1035_v48 = vpop.f32.mrf.mxu1 }
 0x360   : > { %v1040_v49 = vmul.f32 0.35355338, %v1035_v48 }
 0x361   : > { %v2999_v50 = vpop.f32.mrf.mxu1 }
 0x362   : > { %v1044_v51 = vsel %vm887_vm3, %v1040_v49, -inf }
 0x363   : > { %1045 = vmax.xlane.f32.xlu0 %v1044_v51 }
 0x370   : > { %1139 = vrot.lane.b32.xlu1 %v3438_v39, %s3221_s24 }
 0x374   : > { %1217 = vrot.lane.b32.xlu1 %v3440_v41, %s3222_s3 }
 0x378   : > { %1295 = vrot.lane.b32.xlu1 %v3438_v39, %s3222_s3  ;;  %s3233_s3 = smov 24  }
 0x3e8   : > { %v1043_v52 = vpop.xlane.xlu1 %1042 }
 0x3e9   : > { %v1047_v53 = vsub.f32 %v1039_v45, %v1043_v52 }
 0x3eb   : > { %v1049_v54 = vmul.f32 1.442695, %v1047_v53 }
 0x3ec   : > { %v1140_v55 = vpop.permute.xlu1 %1139  ;;  %v1046_v56 = vpop.xlane.xlu0 %1045 }
 0x3ed   : > { %3166 = vpow2.f32 %v1049_v54  ;;  %v1048_v57 = vsub.f32 %v1040_v49, %v1046_v56  ;;  %3006 = vmatpush3.msra.mxu1 %v1140_v55 }
 0x3ee   : > { %3015 = vmatprep.subr.mxu1 %v3218_v36 }
 0x3ef   : > { %v1051_v58 = vmul.f32 1.442695, %v1048_v57 }
 0x3f0   : > { %v1218_v63 = vpop.permute.xlu1 %1217 }
 0x3f1   : > { %3168 = vpow2.f32 %v1051_v58 }
 0x3f4   : > { %v1296_v0 = vpop.permute.xlu1 %1295 }
 0x3fa   : > { %v3167_v59 = vpop.eup %3166 }
 0x3fb   : > { %v1053_v60 = vsel %vm887_vm3, %v3167_v59, 0.0 }
 0x3fc   : > { %1054 = vadd.xlane.f32.xlu0 %v1053_v60 }
 0x3fe   : > { %v3169_v61 = vpop.eup %3168 }
 0x3ff   : > { %v1056_v62 = vsel %vm887_vm3, %v3169_v61, 0.0 }
 0x400   : > { %1057 = vadd.xlane.f32.xlu1 %v1056_v62 }
 0x411   : > { %1293 = vrot.lane.b32.xlu1 %v3438_v39, %s3223_s28 }
 0x412   : > { %1063 = vrot.lane.b32.xlu0 %v3440_v41, %s3221_s24  ;;  %s3232_s24 = smov 16  }
 0x416   : > { %1215 = vrot.lane.b32.xlu0 %v3440_v41, %s3223_s28 }
 0x485   : > { %v1055_v1 = vpop.xlane.xlu0 %1054 }
 0x486   : > { %3170 = vrcp.f32 %v1055_v1 }
 0x489   : > { %v1058_v4 = vpop.xlane.xlu1 %1057  ;;  %v1064_v5 = vpop.permute.xlu0 %1063 }
 0x48a   : > { %3172 = vrcp.f32 %v1058_v4  ;;  %3001 = vmatpush3.msra.mxu0 %v1064_v5 }
 0x48b   : > { %3010 = vmatprep.subr.mxu0 %v3218_v36 }
 0x48d   : > { %v1216_v10 = vpop.permute.xlu0 %1215  ;;  %v1294_v11 = vpop.permute.xlu1 %1293 }
 0x493   : > { %v3171_v6 = vpop.eup %3170 }
 0x494   : > { %v1061_v7 = vmul.f32 %v3171_v6, %v3167_v59 }
 0x496   : > { %3003 = vmatmul.mubr.msk.f32.vlgmr.msra.gmra.mxu0 %vm887_vm3, %v1061_v7 }
 0x497   : > { %v3173_v8 = vpop.eup %3172  ;;  %3011 = vmatpush3.xpose.msk.msra.mxu0 %vm887_vm3, %v1218_v63  ;;  %3012 = vmatprep.mubr.msk.f32.mxu0 %vm3219_vm2, %v3218_v36 }
 0x498   : > { %v1062_v9 = vmul.f32 %v3173_v8, %v3169_v61  ;;  %3020 = vmatprep.subr.mxu0 %v3218_v36 }
 0x49a   : > { %3008 = vmatmul.mubr.msk.f32.vlgmr.msra.gmra.mxu1 %vm887_vm3, %v1062_v9  ;;  %3013 = vmatmul.mubr.msk.f32.vlgmr.msra.gmra.mxu0 %vm887_vm3, %v1216_v10 }
 0x49b   : > { %3016 = vmatpush3.xpose.msk.msra.mxu1 %vm887_vm3, %v1296_v0  ;;  %3017 = vmatprep.mubr.msk.f32.mxu1 %vm3219_vm2, %v3218_v36 }
 0x49c   : > { %3025 = vmatprep.subr.mxu1 %v3218_v36  ;;  %3022 = vmatprep.mubr.msk.f32.mxu0 %vm3219_vm2, %v3218_v36 }
 0x49e   : > { %3018 = vmatmul.mubr.msk.f32.vlgmr.msra.gmra.mxu1 %vm887_vm3, %v1294_v11 }
 0x49f   : > { %3027 = vmatprep.mubr.msk.f32.mxu1 %vm3219_vm2, %v3218_v36 }
 0x556   : > { %v3484_v12 = vpop.f32.mrf.mxu0 }
 0x558   : > { %v3004_v13 = vpop.f32.mrf.mxu0 }
 0x55a   : > { %v3486_v14 = vpop.f32.mrf.mxu1  ;;  %v1289_v15 = vpop.f32.mrf.mxu0 }
 0x55b   : > { %v1371_v16 = vmul.f32 0.35355338, %v1289_v15 }
 0x55c   : > { %v3009_v17 = vpop.f32.mrf.mxu1  ;;  %v3014_v18 = vpop.f32.mrf.mxu0 }
 0x55d   : > { %v1373_v19 = vsel %vm887_vm3, %v1371_v16, -inf }
 0x55e   : > { %1374 = vmax.xlane.f32.xlu0 %v1373_v19  ;;  %v1367_v20 = vpop.f32.mrf.mxu1 }
 0x55f   : > { %v1372_v21 = vmul.f32 0.35355338, %v1367_v20 }
 0x560   : > { %v3019_v22 = vpop.f32.mrf.mxu1 }
 0x561   : > { %v1376_v23 = vsel %vm887_vm3, %v1372_v21, -inf }
 0x562   : > { %1377 = vmax.xlane.f32.xlu1 %v1376_v23 }
 0x573   : > { %1471 = vrot.lane.b32.xlu1 %v3438_v39, %s3224_s4 }
 0x574   : > { %1395 = vrot.lane.b32.xlu0 %v3440_v41, %s3224_s4  ;;  %s3707_s4 = scalar_lea.vmem %s3680_s10, %s3336_s26 }
 0x577   : > { %1549 = vrot.lane.b32.xlu1 %v3440_v41, %s3225_s29 }
 0x57b   : > { %1627 = vrot.lane.b32.xlu1 %v3438_v39, %s3225_s29 }
 0x57f   : > { %1625 = vrot.lane.b32.xlu1 %v3438_v39, %s3226_s18 }
 0x5e7   : > { %v1375_v24 = vpop.xlane.xlu0 %1374 }
 0x5e8   : > { %v1379_v25 = vsub.f32 %v1371_v16, %v1375_v24 }
 0x5ea   : > { %v1381_v26 = vmul.f32 1.442695, %v1379_v25 }
 0x5eb   : > { %v1396_v27 = vpop.permute.xlu0 %1395  ;;  %v1378_v28 = vpop.xlane.xlu1 %1377 }
 0x5ec   : > { %3174 = vpow2.f32 %v1381_v26  ;;  %v1380_v29 = vsub.f32 %v1372_v21, %v1378_v28  ;;  %3021 = vmatpush3.msra.mxu0 %v1396_v27 }
 0x5ed   : > { %3030 = vmatprep.subr.mxu0 %v3218_v36 }
 0x5ee   : > { %v1383_v30 = vmul.f32 1.442695, %v1380_v29 }
 0x5ef   : > { %v1472_v31 = vpop.permute.xlu1 %1471 }
 0x5f0   : > { %3176 = vpow2.f32 %v1383_v30  ;;  %3026 = vmatpush3.msra.mxu1 %v1472_v31 }
 0x5f1   : > { %3035 = vmatprep.subr.mxu1 %v3218_v36 }
 0x5f3   : > { %v1550_v40 = vpop.permute.xlu1 %1549 }
 0x5f7   : > { %v1628_v45 = vpop.permute.xlu1 %1627 }
 0x5f9   : > { %v3175_v32 = vpop.eup %3174 }
 0x5fa   : > { %v1385_v33 = vsel %vm887_vm3, %v3175_v32, 0.0 }
 0x5fb   : > { %1386 = vadd.xlane.f32.xlu0 %v1385_v33  ;;  %v1626_v48 = vpop.permute.xlu1 %1625 }
 0x5fd   : > { %v3177_v34 = vpop.eup %3176 }
 0x5fe   : > { %v1388_v35 = vsel %vm887_vm3, %v3177_v34, 0.0 }
 0x5ff   : > { %1389 = vadd.xlane.f32.xlu0 %v1388_v35 }
 0x615   : > { %1547 = vrot.lane.b32.xlu0 %v3440_v41, %s3226_s18 }
 0x684   : > { %v1387_v37 = vpop.xlane.xlu0 %1386 }
 0x685   : > { %3178 = vrcp.f32 %v1387_v37 }
 0x688   : > { %v1390_v38 = vpop.xlane.xlu0 %1389 }
 0x689   : > { %3180 = vrcp.f32 %v1390_v38 }
 0x68c   : > { %v1548_v47 = vpop.permute.xlu0 %1547 }
 0x692   : > { %v3179_v42 = vpop.eup %3178 }
 0x693   : > { %v1393_v43 = vmul.f32 %v3179_v42, %v3175_v32 }
 0x695   : > { %3023 = vmatmul.mubr.msk.f32.vlgmr.msra.gmra.mxu0 %vm887_vm3, %v1393_v43 }
 0x696   : > { %v3181_v44 = vpop.eup %3180  ;;  %3031 = vmatpush3.xpose.msk.msra.mxu0 %vm887_vm3, %v1550_v40  ;;  %3032 = vmatprep.mubr.msk.f32.mxu0 %vm3219_vm2, %v3218_v36 }
 0x697   : > { %v1394_v46 = vmul.f32 %v3181_v44, %v3177_v34  ;;  %3040 = vmatprep.subr.mxu0 %v3218_v36 }
 0x699   : > { %3028 = vmatmul.mubr.msk.f32.vlgmr.msra.gmra.mxu1 %vm887_vm3, %v1394_v46  ;;  %3033 = vmatmul.mubr.msk.f32.vlgmr.msra.gmra.mxu0 %vm887_vm3, %v1548_v47 }
 0x69a   : > { %3036 = vmatpush3.xpose.msk.msra.mxu1 %vm887_vm3, %v1628_v45  ;;  %3037 = vmatprep.mubr.msk.f32.mxu1 %vm3219_vm2, %v3218_v36 }
 0x69b   : > { %3045 = vmatprep.subr.mxu1 %v3218_v36  ;;  %3042 = vmatprep.mubr.msk.f32.mxu0 %vm3219_vm2, %v3218_v36 }
 0x69d   : > { %3038 = vmatmul.mubr.msk.f32.vlgmr.msra.gmra.mxu1 %vm887_vm3, %v1626_v48 }
 0x69e   : > { %3047 = vmatprep.mubr.msk.f32.mxu1 %vm3219_vm2, %v3218_v36 }
 0x755   : > { %v3516_v49 = vpop.f32.mrf.mxu0 }
 0x757   : > { %v3024_v50 = vpop.f32.mrf.mxu0 }
 0x759   : > { %v3518_v51 = vpop.f32.mrf.mxu1  ;;  %v1621_v52 = vpop.f32.mrf.mxu0 }
 0x75a   : > { %v1703_v53 = vmul.f32 0.35355338, %v1621_v52 }
 0x75b   : > { %v3029_v54 = vpop.f32.mrf.mxu1  ;;  %v3034_v55 = vpop.f32.mrf.mxu0 }
 0x75c   : > { %v1705_v56 = vsel %vm887_vm3, %v1703_v53, -inf  ;;  %v725_v54 = vld [vmem:[%s3359_s17 + $0x18] sm:$0xff]  ;;  %v723_v55 = vld [vmem:[%s3359_s17 + $0x8] sm:$0xff] }
 0x75d   : > { %1706 = vmax.xlane.f32.xlu0 %v1705_v56  ;;  %v1699_v57 = vpop.f32.mrf.mxu1  ;;  %v722_v56 = vld [vmem:[%s3359_s17] sm:$0xff] }
 0x75e   : > { %v1704_v58 = vmul.f32 0.35355338, %v1699_v57 }
 0x75f   : > { %v3039_v59 = vpop.f32.mrf.mxu1 }
 0x760   : > { %v1708_v60 = vsel %vm887_vm3, %v1704_v58, -inf }
 0x761   : > { %1709 = vmax.xlane.f32.xlu1 %v1708_v60 }
 0x772   : > { %1803 = vrot.lane.b32.xlu1 %v3438_v39, %s3227_s27 }
 0x773   : > { %1727 = vrot.lane.b32.xlu0 %v3440_v41, %s3227_s27 }
 0x776   : > { %1881 = vrot.lane.b32.xlu1 %v3440_v41, %s3228_s30 }
 0x77a   : > { %1959 = vrot.lane.b32.xlu1 %v3438_v39, %s3228_s30 }
 0x77e   : > { %1957 = vrot.lane.b32.xlu1 %v3438_v39, %s3229_s20 }
 0x7e6   : > { %v1707_v61 = vpop.xlane.xlu0 %1706 }
 0x7e7   : > { %v1711_v62 = vsub.f32 %v1703_v53, %v1707_v61 }
 0x7e9   : > { %v1713_v63 = vmul.f32 1.442695, %v1711_v62 }
 0x7ea   : > { %v1728_v0 = vpop.permute.xlu0 %1727  ;;  %v1710_v1 = vpop.xlane.xlu1 %1709 }
 0x7eb   : > { %3182 = vpow2.f32 %v1713_v63  ;;  %v1712_v4 = vsub.f32 %v1704_v58, %v1710_v1  ;;  %3041 = vmatpush3.msra.mxu0 %v1728_v0 }
 0x7ec   : > { %3050 = vmatprep.subr.mxu0 %v3218_v36 }
 0x7ed   : > { %v1715_v5 = vmul.f32 1.442695, %v1712_v4 }
 0x7ee   : > { %v1804_v6 = vpop.permute.xlu1 %1803 }
 0x7ef   : > { %3184 = vpow2.f32 %v1715_v5  ;;  %3046 = vmatpush3.msra.mxu1 %v1804_v6 }
 0x7f0   : > { %3055 = vmatprep.subr.mxu1 %v3218_v36 }
 0x7f2   : > { %v1882_v15 = vpop.permute.xlu1 %1881 }
 0x7f6   : > { %v1960_v19 = vpop.permute.xlu1 %1959 }
 0x7f8   : > { %v3183_v7 = vpop.eup %3182 }
 0x7f9   : > { %v1717_v8 = vsel %vm887_vm3, %v3183_v7, 0.0 }
 0x7fa   : > { %1718 = vadd.xlane.f32.xlu0 %v1717_v8  ;;  %v1958_v22 = vpop.permute.xlu1 %1957 }
 0x7fc   : > { %v3185_v9 = vpop.eup %3184 }
 0x7fd   : > { %v1720_v10 = vsel %vm887_vm3, %v3185_v9, 0.0 }
 0x7fe   : > { %1721 = vadd.xlane.f32.xlu0 %v1720_v10 }
 0x814   : > { %1879 = vrot.lane.b32.xlu0 %v3440_v41, %s3229_s20 }
 0x883   : > { %v1719_v11 = vpop.xlane.xlu0 %1718 }
 0x884   : > { %3186 = vrcp.f32 %v1719_v11 }
 0x887   : > { %v1722_v13 = vpop.xlane.xlu0 %1721 }
 0x888   : > { %3188 = vrcp.f32 %v1722_v13 }
 0x88b   : > { %v1880_v21 = vpop.permute.xlu0 %1879 }
 0x891   : > { %v3187_v16 = vpop.eup %3186 }
 0x892   : > { %v1725_v17 = vmul.f32 %v3187_v16, %v3183_v7 }
 0x894   : > { %3043 = vmatmul.mubr.msk.f32.vlgmr.msra.gmra.mxu0 %vm887_vm3, %v1725_v17 }
 0x895   : > { %v3189_v18 = vpop.eup %3188  ;;  %3051 = vmatpush3.xpose.msk.msra.mxu0 %vm887_vm3, %v1882_v15  ;;  %3052 = vmatprep.mubr.msk.f32.mxu0 %vm3219_vm2, %v3218_v36 }
 0x896   : > { %v1726_v20 = vmul.f32 %v3189_v18, %v3185_v9  ;;  %3060 = vmatprep.subr.mxu0 %v3218_v36 }
 0x898   : > { %3048 = vmatmul.mubr.msk.f32.vlgmr.msra.gmra.mxu1 %vm887_vm3, %v1726_v20  ;;  %3053 = vmatmul.mubr.msk.f32.vlgmr.msra.gmra.mxu0 %vm887_vm3, %v1880_v21 }
 0x899   : > { %3056 = vmatpush3.xpose.msk.msra.mxu1 %vm887_vm3, %v1960_v19  ;;  %3057 = vmatprep.mubr.msk.f32.mxu1 %vm3219_vm2, %v3218_v36 }
 0x89a   : > { %3065 = vmatprep.subr.mxu1 %v3218_v36  ;;  %3062 = vmatprep.mubr.msk.f32.mxu0 %vm3219_vm2, %v3218_v36 }
 0x89c   : > { %3058 = vmatmul.mubr.msk.f32.vlgmr.msra.gmra.mxu1 %vm887_vm3, %v1958_v22 }
 0x89d   : > { %3067 = vmatprep.mubr.msk.f32.mxu1 %vm3219_vm2, %v3218_v36 }
 0x954   : > { %v1799_v23 = vpop.f32.mrf.mxu0 }
 0x956   : > { %v3044_v24 = vpop.f32.mrf.mxu0 }
 0x958   : > { %v1875_v25 = vpop.f32.mrf.mxu1  ;;  %v1953_v26 = vpop.f32.mrf.mxu0 }
 0x959   : > { %v2035_v27 = vmul.f32 0.35355338, %v1953_v26 }
 0x95a   : > { %v3049_v28 = vpop.f32.mrf.mxu1  ;;  %v3054_v29 = vpop.f32.mrf.mxu0 }
 0x95b   : > { %v2037_v30 = vsel %vm887_vm3, %v2035_v27, -inf  ;;  %v732_v28 = vld [vmem:[%s3376_s7 + $0x18] sm:$0xff]  ;;  %v731_v29 = vld [vmem:[%s3376_s7 + $0x10] sm:$0xff] }
 0x95c   : > { %2038 = vmax.xlane.f32.xlu0 %v2037_v30  ;;  %v2031_v31 = vpop.f32.mrf.mxu1  ;;  %v730_v30 = vld [vmem:[%s3376_s7 + $0x8] sm:$0xff] }
 0x95d   : > { %v2036_v32 = vmul.f32 0.35355338, %v2031_v31  ;;  %v729_v31 = vld [vmem:[%s3376_s7] sm:$0xff]  ;;  %s3710_s7 = sld [smem:[#allocation6_spill]] (!%p2893_p5) }
 0x95e   : > { %v3059_v33 = vpop.f32.mrf.mxu1 }
 0x95f   : > { %v2040_v34 = vsel %vm887_vm3, %v2036_v32, -inf }
 0x960   : > { %2041 = vmax.xlane.f32.xlu1 %v2040_v34 }
 0x971   : > { %2135 = vrot.lane.b32.xlu1 %v3438_v39, %s3230_s19 }
 0x975   : > { %2213 = vrot.lane.b32.xlu1 %v3516_v49, %s3231_s23 }
 0x979   : > { %2215 = vrot.lane.b32.xlu1 %v3518_v51, %s3231_s23 }
 0x97d   : > { %2223 = vrot.lane.b32.xlu1 %v1875_v25, %s3232_s24 }
 0x9e5   : > { %v2039_v36 = vpop.xlane.xlu0 %2038 }
 0x9e6   : > { %v2043_v35 = vsub.f32 %v2035_v27, %v2039_v36 }
 0x9e8   : > { %v2045_v37 = vmul.f32 1.442695, %v2043_v35 }
 0x9e9   : > { %v2042_v38 = vpop.xlane.xlu1 %2041 }
 0x9ea   : > { %3190 = vpow2.f32 %v2045_v37  ;;  %v2044_v40 = vsub.f32 %v2036_v32, %v2042_v38 }
 0x9ec   : > { %v2047_v42 = vmul.f32 1.442695, %v2044_v40  ;;  %v2887_v40 = vld [vmem:[%s686_s2] ss:$0 sm:$0xff] }
 0x9ed   : > { %v2136_v43 = vpop.permute.xlu1 %2135 }
 0x9ee   : > { %3192 = vpow2.f32 %v2047_v42  ;;  %3066 = vmatpush3.msra.mxu1 %v2136_v43  ;;  %v2888_v43 = vld [vmem:[%s689_s21] ss:$0 sm:$0xff]  ;;  %s3711_s21 = sld [smem:[#allocation8_spill]] (!%p2893_p5) }
 0x9ef   : > { %3070 = vmatprep.subr.mxu1 %v725_v54 }
 0x9f1   : > { %v2214_v61 = vpop.permute.xlu1 %2213 }
 0x9f2   : > { %v2235_v0 = vsel %vm887_vm3, %v3484_v12, %v2214_v61  ;;  %v2884_v12 = vld [vmem:[%s3707_s4] ss:$0 sm:$0xff]  ;;  %v736_v61 = vld [vmem:[%s3386_s0 + $0x10] sm:$0xff]  ;;  %s3709_s4 = sld [smem:[#allocation5_spill]] (!%p2893_p5) }
 0x9f5   : > { %v2216_v62 = vpop.permute.xlu1 %2215 }
 0x9f6   : > { %v2236_v7 = vsel %vm887_vm3, %v3486_v14, %v2216_v62  ;;  %v735_v62 = vld [vmem:[%s3386_s0 + $0x8] sm:$0xff] }
 0x9f7   : > { %v3191_v44 = vpop.eup %3190 }
 0x9f8   : > { %v2049_v39 = vsel %vm887_vm3, %v3191_v44, 0.0 }
 0x9f9   : > { %2050 = vadd.xlane.f32.xlu0 %v2049_v39  ;;  %v2224_v1 = vpop.permute.xlu1 %2223 }
 0x9fa   : > { %v2239_v8 = vsel %vm2237_vm5, %v2236_v7, %v2224_v1 }
 0x9fb   : > { %v3193_v45 = vpop.eup %3192 }
 0x9fc   : > { %v2052_v46 = vsel %vm887_vm3, %v3193_v45, 0.0 }
 0x9fd   : > { %2053 = vadd.xlane.f32.xlu0 %v2052_v46 }
 0xa13   : > { %2059 = vrot.lane.b32.xlu0 %v3440_v41, %s3230_s19  ;;  %v724_v41 = vld [vmem:[%s3359_s17 + $0x10] sm:$0xff] }
 0xa17   : > { %2221 = vrot.lane.b32.xlu0 %v1799_v23, %s3232_s24 }
 0xa82   : > { %v2051_v47 = vpop.xlane.xlu0 %2050 }
 0xa83   : > { %3194 = vrcp.f32 %v2051_v47 }
 0xa86   : > { %v2054_v48 = vpop.xlane.xlu0 %2053 }
 0xa87   : > { %3196 = vrcp.f32 %v2054_v48 }
 0xa8a   : > { %v2060_v49 = vpop.permute.xlu0 %2059 }
 0xa8b   : > { %3061 = vmatpush3.msra.mxu0 %v2060_v49  ;;  %v749_v49 = vld [vmem:[%s3386_s0 + $0x78] sm:$0xff] }
 0xa8c   : > { %3092 = vmatprep.subr.mxu0 %v749_v49 }
 0xa8e   : > { %v2222_v63 = vpop.permute.xlu0 %2221 }
 0xa8f   : > { %v2238_v4 = vsel %vm2237_vm5, %v2235_v0, %v2222_v63  ;;  %v734_v63 = vld [vmem:[%s3386_s0] sm:$0xff] }
 0xa90   : > { %v3195_v50 = vpop.eup %3194  ;;  %v2889_v0 = vld [vmem:[%s697_s9] ss:$0 sm:$0xff] }
 0xa91   : > { %v2057_v51 = vmul.f32 %v3195_v50, %v3191_v44  ;;  %v748_v50 = vld [vmem:[%s3386_s0 + $0x70] sm:$0xff] }
 0xa93   : > { %3063 = vmatmul.mubr.msk.f32.vlgmr.msra.gmra.mxu0 %vm887_vm3, %v2057_v51  ;;  %v747_v51 = vld [vmem:[%s3386_s0 + $0x68] sm:$0xff] }
 0xa94   : > { %v3197_v52 = vpop.eup %3196  ;;  %3093 = vmatpush3.msra.mxu0 %v749_v49 }
 0xa95   : > { %v2058_v53 = vmul.f32 %v3197_v52, %v3193_v45  ;;  %3094 = vmatprep.subr.mxu0 %v748_v50  ;;  %v746_v52 = vld [vmem:[%s3386_s0 + $0x60] sm:$0xff] }
 0xa96   : > { %3095 = vmatpush3.msra.mxu0 %v748_v50 }
 0xa97   : > { %3068 = vmatmul.mubr.msk.f32.vlgmr.msra.gmra.mxu1 %vm887_vm3, %v2058_v53  ;;  %3096 = vmatprep.subr.mxu0 %v747_v51  ;;  %v745_v53 = vld [vmem:[%s3386_s0 + $0x58] sm:$0xff] }
 0xa98   : > { %3071 = vmatpush3.msra.mxu1 %v725_v54  ;;  %3097 = vmatpush3.msra.mxu0 %v747_v51  ;;  %v744_v54 = vld [vmem:[%s3386_s0 + $0x50] sm:$0xff] }
 0xa99   : > { %3072 = vmatprep.subr.mxu1 %v724_v41  ;;  %3098 = vmatprep.subr.mxu0 %v746_v52 }
 0xa9a   : > { %3073 = vmatpush3.msra.mxu1 %v724_v41  ;;  %3099 = vmatpush3.msra.mxu0 %v746_v52  ;;  %v743_v41 = vld [vmem:[%s3386_s0 + $0x48] sm:$0xff] }
 0xa9b   : > { %3074 = vmatprep.subr.mxu1 %v723_v55  ;;  %3100 = vmatprep.subr.mxu0 %v745_v53 }
 0xa9c   : > { %3075 = vmatpush3.msra.mxu1 %v723_v55  ;;  %3101 = vmatpush3.msra.mxu0 %v745_v53  ;;  %v742_v55 = vld [vmem:[%s3386_s0 + $0x40] sm:$0xff] }
 0xa9d   : > { %3076 = vmatprep.subr.mxu1 %v722_v56  ;;  %3102 = vmatprep.subr.mxu0 %v744_v54 }
 0xa9e   : > { %3077 = vmatpush3.msra.mxu1 %v722_v56  ;;  %3103 = vmatpush3.msra.mxu0 %v744_v54  ;;  %v741_v56 = vld [vmem:[%s3386_s0 + $0x38] sm:$0xff] }
 0xa9f   : > { %3081 = vmatprep.subr.mxu1 %v732_v28  ;;  %3104 = vmatprep.subr.mxu0 %v743_v41 }
 0xaa0   : > { %3105 = vmatpush3.msra.mxu0 %v743_v41 }
 0xaa1   : > { %3106 = vmatprep.subr.mxu0 %v742_v55 }
 0xaa2   : > { %3107 = vmatpush3.msra.mxu0 %v742_v55 }
 0xaa3   : > { %3108 = vmatprep.subr.mxu0 %v741_v56 }
 0xaa4   : > { %3109 = vmatpush3.msra.mxu0 %v741_v56 }
 0xb53   : > { %v2131_v57 = vpop.f32.mrf.mxu0 }
 0xb54   : > { %2229 = vrot.lane.b32.xlu0 %v2131_v57, %s3233_s3  ;;  %v740_v57 = vld [vmem:[%s3386_s0 + $0x30] sm:$0xff] }
 0xb55   : > { %v3064_v58 = vpop.f32.mrf.mxu0  ;;  %3110 = vmatprep.subr.mxu0 %v740_v57 }
 0xb56   : > { %v739_v58 = vld [vmem:[%s3386_s0 + $0x28] sm:$0xff]  ;;  %3111 = vmatpush3.msra.mxu0 %v740_v57 }
 0xb57   : > { %v2207_v59 = vpop.f32.mrf.mxu1  ;;  %3112 = vmatprep.subr.mxu0 %v739_v58 }
 0xb58   : > { %2231 = vrot.lane.b32.xlu1 %v2207_v59, %s3233_s3  ;;  %v738_v59 = vld [vmem:[%s3386_s0 + $0x20] sm:$0xff]  ;;  %3113 = vmatpush3.msra.mxu0 %v739_v58 }
 0xb59   : > { %v3069_v60 = vpop.f32.mrf.mxu1  ;;  %3114 = vmatprep.subr.mxu0 %v738_v59 }
 0xb5a   : > { %v737_v60 = vld [vmem:[%s3386_s0 + $0x18] sm:$0xff]  ;;  %3115 = vmatpush3.msra.mxu0 %v738_v59 }
 0xb5b   : > { %3116 = vmatprep.subr.mxu0 %v737_v60 }
 0xb5c   : > { %3117 = vmatpush3.msra.mxu0 %v737_v60 }
 0xb5d   : > { %3118 = vmatprep.subr.mxu0 %v736_v61 }
 0xb5e   : > { %3119 = vmatpush3.msra.mxu0 %v736_v61 }
 0xb5f   : > { %3120 = vmatprep.subr.mxu0 %v735_v62 }
 0xb60   : > { %3121 = vmatpush3.msra.mxu0 %v735_v62 }
 0xb61   : > { %3122 = vmatprep.subr.mxu0 %v734_v63 }
 0xb62   : > { %3123 = vmatpush3.msra.mxu0 %v734_v63 }
 0xbc6   : > { %v2230_v5 = vpop.permute.xlu0 %2229 }
 0xbc7   : > { %v2241_v6 = vsel %vm2240_vm4, %v2238_v4, %v2230_v5 }
 0xbc8   : > { %3078 = vmatprep.mubr.msk.f32.mxu1 %vm753_vm1, %v2241_v6 }
 0xbca   : > { %v2232_v9 = vpop.permute.xlu1 %2231 }
 0xbcb   : > { %v2242_v10 = vsel %vm2240_vm4, %v2239_v8, %v2232_v9 }
 0xbcc   : > { %3079 = vmatmul.mubr.msk.f32.vlgmr.msra.gmra.mxu1 %vm753_vm1, %v2242_v10 }
 0xbcd   : > { %3082 = vmatpush3.msra.mxu1 %v732_v28 }
 0xbce   : > { %3083 = vmatprep.subr.mxu1 %v731_v29 }
 0xbcf   : > { %3084 = vmatpush3.msra.mxu1 %v731_v29 }
 0xbd0   : > { %3085 = vmatprep.subr.mxu1 %v730_v30 }
 0xbd1   : > { %3086 = vmatpush3.msra.mxu1 %v730_v30 }
 0xbd2   : > { %3087 = vmatprep.subr.mxu1 %v729_v31 }
 0xbd3   : > { %3088 = vmatpush3.msra.mxu1 %v729_v31 }
 0xc8c   : > { %v3080_v11 = vpop.f32.mrf.mxu1 }
 0xc8d   : > { %v2327_v13 = vadd.f32 %v3080_v11, %v2884_v12 }
 0xc8e   : > { %v2321_v15 = vpop.f32.mrf.mxu1 }
 0xc8f   : > { %v3574_v16 = vadd.f32 %v2327_v13, %v3401_v3  ;;  %v2322_v17 = vadd.f32 %v2884_v12, %v2321_v15 }
 0xc91   : > { %v3577_v18 = vadd.f32 %v2322_v17, %v3399_v2  ;;  %v2335_v14 = vsel %vm753_vm1, %v3574_v16, 0.0 }
 0xc92   : > { %2336 = vadd.xlane.f32.xlu1 %v2335_v14 }
 0xc93   : > { %v2332_v19 = vsel %vm753_vm1, %v3577_v18, 0.0 }
 0xc94   : > { %2333 = vadd.xlane.f32.xlu0 %v2332_v19 }
 0xd1b   : > { %v2337_v20 = vpop.xlane.xlu1 %2336 }
 0xd1c   : > { %v2339_v21 = vmul.f32 0.03125, %v2337_v20 }
 0xd1d   : > { %v2334_v22 = vpop.xlane.xlu0 %2333 }
 0xd1e   : > { %v2338_v3 = vmul.f32 0.03125, %v2334_v22  ;;  %v2341_v23 = vsub.f32 %v3574_v16, %v2339_v21 }
 0xd20   : > { %v2340_v2 = vsub.f32 %v3577_v18, %v2338_v3  ;;  %v2343_v26 = vmul.f32 %v2341_v23, %v2341_v23 }
 0xd22   : > { %v2342_v24 = vmul.f32 %v2340_v2, %v2340_v2  ;;  %v2347_v27 = vsel %vm753_vm1, %v2343_v26, 0.0 }
 0xd24   : > { %v2344_v25 = vsel %vm753_vm1, %v2342_v24, 0.0 }
 0xd25   : > { %2345 = vadd.xlane.f32.xlu0 %v2344_v25  ;;  %v2892_v25 = vld [vmem:[%s705_s1] ss:$0 sm:$0xff]  ;;  %s3708_s1 = sld [smem:[#allocation7_spill]] (!%p2893_p5) }
 0xd29   : > { %2348 = vadd.xlane.f32.xlu0 %v2347_v27 }
 0xdae   : > { %v2346_v32 = vpop.xlane.xlu0 %2345 }
 0xdaf   : > { %v2350_v33 = vmul.f32 0.03125, %v2346_v32 }
 0xdb1   : > { %v2352_v34 = vadd.f32 1e-05, %v2350_v33 }
 0xdb2   : > { %v2349_v36 = vpop.xlane.xlu0 %2348 }
 0xdb3   : > { %3198 = vrsqrt.f32 %v2352_v34  ;;  %v2351_v35 = vmul.f32 0.03125, %v2349_v36 }
 0xdb5   : > { %v2353_v37 = vadd.f32 1e-05, %v2351_v35 }
 0xdb7   : > { %3200 = vrsqrt.f32 %v2353_v37 }
 0xdc0   : > { %v3199_v38 = vpop.eup %3198 }
 0xdc1   : > { %v2356_v42 = vmul.f32 %v3199_v38, %v2340_v2 }
 0xdc3   : > { %v2364_v44 = vmul.f32 %v2887_v40, %v2356_v42 }
 0xdc4   : > { %v3201_v39 = vpop.eup %3200 }
 0xdc5   : > { %v2357_v45 = vmul.f32 %v3201_v39, %v2341_v23  ;;  %v2372_v46 = vadd.f32 %v2888_v43, %v2364_v44 }
 0xdc7   : > { %v2365_v47 = vmul.f32 %v2887_v40, %v2357_v45  ;;  %3089 = vmatprep.mubr.msk.f32.mxu1 %vm753_vm1, %v2372_v46 }
 0xdc9   : > { %v2373_v48 = vadd.f32 %v2888_v43, %v2365_v47 }
 0xdcb   : > { %3090 = vmatmul.mubr.msk.f32.vlgmr.msra.gmra.mxu1 %vm753_vm1, %v2373_v48 }
 0xe8b   : > { %v3091_v1 = vpop.f32.mrf.mxu1 }
 0xe8c   : > { %v2458_v4 = vadd.f32 %v3091_v1, %v2889_v0 }
 0xe8d   : > { %v2452_v5 = vpop.f32.mrf.mxu1 }
 0xe8e   : > { %v2462_v6 = vmul.f32 %v2458_v4, %v2458_v4  ;;  %v2453_v7 = vadd.f32 %v2889_v0, %v2452_v5 }
 0xe90   : > { %v2464_v8 = vmul.f32 %v2462_v6, %v2458_v4  ;;  %v2461_v9 = vmul.f32 %v2453_v7, %v2453_v7 }
 0xe92   : > { %v2466_v10 = vmul.f32 0.044715, %v2464_v8  ;;  %v2463_v12 = vmul.f32 %v2461_v9, %v2453_v7 }
 0xe94   : > { %v2468_v11 = vadd.f32 %v2466_v10, %v2458_v4  ;;  %v2465_v13 = vmul.f32 0.044715, %v2463_v12 }
 0xe96   : > { %v2470_v15 = vmul.f32 0.7978846, %v2468_v11  ;;  %v2467_v17 = vadd.f32 %v2465_v13, %v2453_v7 }
 0xe98   : > { %3202 = vtanh.f32 %v2470_v15  ;;  %v2469_v14 = vmul.f32 0.7978846, %v2467_v17 }
 0xe9a   : > { %3204 = vtanh.f32 %v2469_v14 }
 0xea5   : > { %v3203_v19 = vpop.eup %3202 }
 0xea6   : > { %v2474_v20 = vadd.f32 1.0, %v3203_v19 }
 0xea7   : > { %v3205_v21 = vpop.eup %3204 }
 0xea8   : > { %v2473_v22 = vadd.f32 1.0, %v3205_v21  ;;  %v2476_v3 = vmul.f32 0.5, %v2474_v20 }
 0xeaa   : > { %v2475_v23 = vmul.f32 0.5, %v2473_v22  ;;  %v2478_v24 = vmul.f32 %v2476_v3, %v2458_v4 }
 0xeac   : > { %v2477_v2 = vmul.f32 %v2475_v23, %v2453_v7 }
 0xeae   : > { %3124 = vmatprep.mubr.f32.mxu0 %v2477_v2 }
 0xeaf   : > { %3125 = vmatmul.mubr.f32.vlgmr.msra.gmra.mxu0 %v2478_v24 }
 0xf6f   : > { %v3126_v26 = vpop.f32.mrf.mxu0 }
 0xf70   : > { %v2557_v27 = vadd.f32 %v3126_v26, %v2892_v25 }
 0xf71   : > { %v2551_v28 = vpop.f32.mrf.mxu0 }
 0xf72   : > { %v2561_v29 = vadd.f32 %v2557_v27, %v3574_v16  ;;  %v2552_v30 = vadd.f32 %v2892_v25, %v2551_v28  ;;  %2567 = sbr.rel (%p2893_p5) target bundleno = 4469 (0x1175), region = 96 }
 0xf74   : > { %2563 = vst.msk [vmem:[#allocation2 + $0x8] sm:$0xff] %vm753_vm1, %v2561_v29  ;;  %v2560_v31 = vadd.f32 %v2552_v30, %v3577_v18 }
 0xf76   : > { %2562 = vst.msk [vmem:[#allocation2] sm:$0xff] %vm753_vm1, %v2560_v31 }
 0xf77   : > { %v2570_v32 = vsel %vm753_vm1, %v2560_v31, 0.0  ;;  %v2573_v33 = vsel %vm753_vm1, %v2561_v29, 0.0  ;;  %v2615_v44 = vld [vmem:[%s3708_s1 + $0x18] sm:$0xff]  ;;  %v2614_v39 = vld [vmem:[%s3708_s1 + $0x10] sm:$0xff]  ;;  %v2613_v45 = vld [vmem:[%s3708_s1 + $0x8] sm:$0xff] }
 0xf78   : > { %2571 = vadd.xlane.f32.xlu0 %v2570_v32  ;;  %3127 = vmatprep.subr.mxu0 %v2615_v44  ;;  %v2612_v46 = vld [vmem:[%s3708_s1] sm:$0xff] }
 0xf79   : > { %3128 = vmatpush3.msra.mxu0 %v2615_v44  ;;  %v2894_v54 = vld [vmem:[%s3709_s4] ss:$0 sm:$0xff] }
 0xf7a   : > { %3129 = vmatprep.subr.mxu0 %v2614_v39  ;;  %v2895_v55 = vld [vmem:[%s3710_s7] ss:$0 sm:$0xff] }
 0xf7b   : > { %3130 = vmatpush3.msra.mxu0 %v2614_v39  ;;  %v2896_v62 = vld [vmem:[%s3711_s21] ss:$0 sm:$0xff] }
 0xf7c   : > { %2574 = vadd.xlane.f32.xlu0 %v2573_v33  ;;  %3131 = vmatprep.subr.mxu0 %v2613_v45 }
 0xf7d   : > { %3132 = vmatpush3.msra.mxu0 %v2613_v45 }
 0xf7e   : > { %3133 = vmatprep.subr.mxu0 %v2612_v46 }
 0xf7f   : > { %3134 = vmatpush3.msra.mxu0 %v2612_v46 }
0x1001   : > { %v2572_v34 = vpop.xlane.xlu0 %2571 }
0x1002   : > { %v2576_v36 = vmul.f32 0.03125, %v2572_v34 }
0x1004   : > { %v2578_v35 = vsub.f32 %v2560_v31, %v2576_v36 }
0x1005   : > { %v2575_v16 = vpop.xlane.xlu0 %2574 }
0x1006   : > { %v2577_v37 = vmul.f32 0.03125, %v2575_v16  ;;  %v2580_v38 = vmul.f32 %v2578_v35, %v2578_v35 }
0x1008   : > { %v2579_v40 = vsub.f32 %v2561_v29, %v2577_v37  ;;  %v2582_v18 = vsel %vm753_vm1, %v2580_v38, 0.0 }
0x1009   : > { %2583 = vadd.xlane.f32.xlu1 %v2582_v18 }
0x100a   : > { %v2581_v42 = vmul.f32 %v2579_v40, %v2579_v40 }
0x100c   : > { %v2585_v43 = vsel %vm753_vm1, %v2581_v42, 0.0 }
0x100d   : > { %2586 = vadd.xlane.f32.xlu1 %v2585_v43 }
0x1092   : > { %v2584_v47 = vpop.xlane.xlu1 %2583 }
0x1093   : > { %v2588_v48 = vmul.f32 0.03125, %v2584_v47 }
0x1095   : > { %v2590_v49 = vadd.f32 1e-05, %v2588_v48 }
0x1096   : > { %v2587_v50 = vpop.xlane.xlu1 %2586 }
0x1097   : > { %3206 = vrsqrt.f32 %v2590_v49  ;;  %v2589_v51 = vmul.f32 0.03125, %v2587_v50 }
0x1099   : > { %v2591_v52 = vadd.f32 1e-05, %v2589_v51 }
0x109b   : > { %3208 = vrsqrt.f32 %v2591_v52 }
0x10a4   : > { %v3207_v53 = vpop.eup %3206 }
0x10a5   : > { %v2594_v41 = vmul.f32 %v3207_v53, %v2578_v35 }
0x10a7   : > { %v2602_v56 = vmul.f32 %v2894_v54, %v2594_v41 }
0x10a8   : > { %v3209_v57 = vpop.eup %3208 }
0x10a9   : > { %v2595_v58 = vmul.f32 %v3209_v57, %v2579_v40  ;;  %v2610_v59 = vadd.f32 %v2895_v55, %v2602_v56 }
0x10ab   : > { %v2603_v60 = vmul.f32 %v2894_v54, %v2595_v58  ;;  %3135 = vmatprep.mubr.msk.f32.mxu0 %vm753_vm1, %v2610_v59 }
0x10ad   : > { %v2611_v61 = vadd.f32 %v2895_v55, %v2603_v60 }
0x10af   : > { %3136 = vmatmul.mubr.msk.f32.vlgmr.msra.gmra.mxu0 %vm753_vm1, %v2611_v61 }
0x116f   : > { %v3137_v63 = vpop.f32.mrf.mxu0 }
0x1170   : > { %v2701_v0 = vadd.f32 %v3137_v63, %v2896_v62 }
0x1171   : > { %v2695_v1 = vpop.f32.mrf.mxu0 }
0x1172   : > { %2705 = vst [vmem:[%s3712_s25 + $0x8] sm:$0xff] %v2701_v0  ;;  %v2696_v4 = vadd.f32 %v2896_v62, %v2695_v1 }
0x1174   : > { %2704 = vst [vmem:[%s3712_s25] sm:$0xff] %v2696_v4 }
0x1175 PF: > { %s3713_s20 = sld [smem:[#allocation3_spill]] }
0x117b   : > { %s27_s24 = sadd.s32 1, %s3713_s20  }
0x117c   : > { %p24_p6 = scmp.ge.s32.totalorder %s27_s24, 4  }
0x117e   :  { %26 = sbr.rel (!%p24_p6) target bundleno = 9 (0x9), region = 155 }

</bundles_post_ra>
